<compile_context>
chip_gen: v6e
topology: v6e:2x2x1
jax: 0.10.0
libtpu: 0.0.40
codegen_flags: <defaults>
</compile_context>

<pallas_src>
import numpy as np
import jax
import jax.numpy as jnp
from jax import lax
from jax.experimental import pallas as pl
from jax.experimental.pallas import tpu as pltpu


# ---------------- Pallas kernels ----------------

def _conv_pool_sig_kernel(x_ref, bnd_ref, bias_ref, se_ref, so_ref, o_ref):
    """Fused VALID conv (as banded matmuls) + bias + 2x2 maxpool + sigmoid.

    x_ref   : (Hin, Win)            one image / feature map, channels folded into Win
    bnd_ref : (5, Win, 2*Wout)      banded conv weights, one slab per kernel row
    bias_ref: (1, 2*Wout)           per-output-column bias
    se_ref  : (Hout, 2*Hout)        exact 0/1 even-row selector
    so_ref  : (Hout, 2*Hout)        exact 0/1 odd-row selector
    o_ref   : (Hout, Wout)
    """
    hout, wout = o_ref.shape
    hconv = 2 * hout

    x = x_ref[...]
    acc = jnp.dot(x[0:hconv, :], bnd_ref[0], preferred_element_type=jnp.float32)
    for di in range(1, bnd_ref.shape[0]):
        acc = acc + jnp.dot(x[di:di + hconv, :], bnd_ref[di],
                            preferred_element_type=jnp.float32)
    acc = acc + bias_ref[...]

    # 2x2 max pool: rows via exact 0/1 selection matmuls, columns via the
    # even/odd half-split baked into the banded weight column layout.
    z = jnp.maximum(
        jnp.dot(se_ref[...], acc, preferred_element_type=jnp.float32),
        jnp.dot(so_ref[...], acc, preferred_element_type=jnp.float32))
    p = jnp.maximum(z[:, :wout], z[:, wout:])

    # sigmoid(max(.)) == max(sigmoid(.)) (monotone) -> do it once, after pooling.
    o_ref[...] = jax.nn.sigmoid(p)


def _fc3_kernel(x_ref, w1_ref, b1_ref, w2_ref, b2_ref, w3_ref, b3_ref, o_ref):
    """Fused fc1+sigmoid -> fc2+sigmoid -> fc3, all weights resident in VMEM."""
    h = jax.nn.sigmoid(jnp.dot(x_ref[...], w1_ref[...],
                               preferred_element_type=jnp.float32) + b1_ref[...])
    h = jax.nn.sigmoid(jnp.dot(h, w2_ref[...],
                               preferred_element_type=jnp.float32) + b2_ref[...])
    o_ref[...] = jnp.dot(h, w3_ref[...],
                         preferred_element_type=jnp.float32) + b3_ref[...]


# ---------------- pallas_call wrappers ----------------

def conv_pool_sigmoid(x, banded_w, bias_row, sel_even, sel_odd):
    """x: (B, Hin, Win) -> (B, Hout, Wout) with the fused conv/pool/sigmoid kernel."""
    B, Hin, Win = x.shape
    KT, Win2, C2 = banded_w.shape
    assert Win2 == Win
    hout, hconv = sel_even.shape
    wout = C2 // 2
    return pl.pallas_call(
        _conv_pool_sig_kernel,
        out_shape=jax.ShapeDtypeStruct((B, hout, wout), jnp.float32),
        grid=(B,),
        in_specs=[
            pl.BlockSpec((None, Hin, Win), lambda b: (b, 0, 0)),   # per-image tile
            pl.BlockSpec((KT, Win, C2), lambda b: (0, 0, 0)),      # weights: resident
            pl.BlockSpec((1, C2), lambda b: (0, 0)),               # bias: resident
            pl.BlockSpec((hout, hconv), lambda b: (0, 0)),         # row selectors
            pl.BlockSpec((hout, hconv), lambda b: (0, 0)),
        ],
        out_specs=pl.BlockSpec((None, hout, wout), lambda b: (b, 0, 0)),
        compiler_params=pltpu.CompilerParams(
            dimension_semantics=("parallel",),         # >=2 steps -> both TCs on v7x
            vmem_limit_bytes=32 * 1024 * 1024,
        ),
    )(x, banded_w, bias_row, sel_even, sel_odd)


def fc_chain(flat, w1, b1, w2, b2, w3, b3):
    B = flat.shape[0]
    N = w3.shape[1]
    return pl.pallas_call(
        _fc3_kernel,
        out_shape=jax.ShapeDtypeStruct((B, N), jnp.float32),
        compiler_params=pltpu.CompilerParams(vmem_limit_bytes=32 * 1024 * 1024),
    )(flat, w1, b1, w2, b2, w3, b3)


# ---------------- init-time parameter preparation (all done once, on host) ---

def init_params(key):
    """PyTorch-layout parameters (same init scheme as nn.Conv2d / nn.Linear)."""
    ks = jax.random.split(key, 10)

    def u(k, shape, fan_in):
        bound = 1.0 / np.sqrt(fan_in)
        return jax.random.uniform(k, shape, jnp.float32, -bound, bound)

    w1 = u(ks[0], (12, 1, 5, 5), 25);    b1 = u(ks[1], (12,), 25)
    w2 = u(ks[2], (16, 12, 5, 5), 300);  b2 = u(ks[3], (16,), 300)
    fw1 = u(ks[4], (120, 2704), 2704);   fb1 = u(ks[5], (120,), 2704)
    fw2 = u(ks[6], (120, 120), 120);     fb2 = u(ks[7], (120,), 120)
    fw3 = u(ks[8], (16, 120), 120);      fb3 = u(ks[9], (16,), 120)
    return (w1, b1, w2, b2, fw1, fb1, fw2, fb2, fw3, fb3)


def _row_selectors(hout):
    hconv = 2 * hout
    r = np.arange(hout)[:, None]
    c = np.arange(hconv)[None, :]
    return ((c == 2 * r).astype(np.float32),
            (c == 2 * r + 1).astype(np.float32))


def _banded_conv1(w1):
    """(12,1,5,5) -> (5, 64, 720); output col = (j//2)*12 + co + 360*(j%2)."""
    B1 = np.zeros((5, 64, 720), np.float32)
    dj, co, j = np.meshgrid(np.arange(5), np.arange(12), np.arange(60), indexing="ij")
    q = j + dj
    col = (j // 2) * 12 + co + 360 * (j % 2)
    for di in range(5):
        B1[di, q, col] = w1[co, 0, di, dj]
    return B1


def _banded_conv2(w2):
    """(16,12,5,5) -> (5, 360, 416); input col = w*12 + ci,
    output col = (j//2)*16 + co + 208*(j%2)."""
    B2 = np.zeros((5, 360, 416), np.float32)
    dj, ci, co, j = np.meshgrid(np.arange(5), np.arange(12), np.arange(16),
                                np.arange(26), indexing="ij")
    q = (j + dj) * 12 + ci
    col = (j // 2) * 16 + co + 208 * (j % 2)
    for di in range(5):
        B2[di, q, col] = w2[co, ci, di, dj]
    return B2


def _fc1_permuted(fw1):
    """Fold the (h, w, c)-flatten (our layout) -> NCHW-flatten (torch .view) into fc1."""
    h, w, c = np.meshgrid(np.arange(13), np.arange(13), np.arange(16), indexing="ij")
    m = (h * 208 + w * 16 + c).ravel()          # our flat index
    k = (c * 169 + h * 13 + w).ravel()          # torch NCHW flat index
    kmap = np.empty(2704, np.int64)
    kmap[m] = k
    return fw1.T[kmap, :]                       # (2704, 120)


def prepare_params(params):
    (w1, b1, w2, b2, fw1, fb1, fw2, fb2, fw3, fb3) = [
        np.asarray(p, np.float32) for p in params]

    prep = dict(
        B1=_banded_conv1(w1),
        b1row=np.tile(b1, 60).reshape(1, 720),
        B2=_banded_conv2(w2),
        b2row=np.tile(b2, 26).reshape(1, 416),
        W1=_fc1_permuted(fw1), bb1=fb1.reshape(1, 120),
        W2=fw2.T.copy(),       bb2=fb2.reshape(1, 120),
        W3=fw3.T.copy(),       bb3=fb3.reshape(1, 16),
    )
    S1e, S1o = _row_selectors(30)
    S2e, S2o = _row_selectors(13)
    prep.update(S1e=S1e, S1o=S1o, S2e=S2e, S2o=S2o)
    return {k: jnp.asarray(v) for k, v in prep.items()}


# ---------------- forward passes ----------------

@jax.jit
def model_sigmoid_forward(x, prep):
    """Pallas forward pass.  x: (B, 1, 64, 64) NCHW float32 -> (B, 16)."""
    B = x.shape[0]
    x2 = x.reshape(B, 64, 64)                                  # C=1, free reshape

    p1 = conv_pool_sigmoid(x2, prep["B1"], prep["b1row"],
                           prep["S1e"], prep["S1o"])           # (B, 30, 360)
    # TODO(synk): dropout1 (p=0.5) is identity at inference; not modeled.
    p2 = conv_pool_sigmoid(p1, prep["B2"], prep["b2row"],
                           prep["S2e"], prep["S2o"])           # (B, 13, 208)
    # TODO(synk): dropout2 (p=0.5) is identity at inference; not modeled.

    flat = p2.reshape(B, 13 * 208)                             # (h,w,c)-flat, free
    return fc_chain(flat, prep["W1"], prep["bb1"], prep["W2"], prep["bb2"],
                    prep["W3"], prep["bb3"])                   # (B, 16)


def reference_forward(x, params):
    """Pure-JAX reference mirroring the PyTorch forward (eval mode)."""
    (w1, b1, w2, b2, fw1, fb1, fw2, fb2, fw3, fb3) = params
    dn = ('NCHW', 'OIHW', 'NCHW')
    y = lax.conv_general_dilated(x, w1, (1, 1), 'VALID', dimension_numbers=dn)
    y = jax.nn.sigmoid(y + b1[None, :, None, None])
    y = lax.reduce_window(y, -jnp.inf, lax.max, (1, 1, 2, 2), (1, 1, 2, 2), 'VALID')
    y = lax.conv_general_dilated(y, w2, (1, 1), 'VALID', dimension_numbers=dn)
    y = jax.nn.sigmoid(y + b2[None, :, None, None])
    y = lax.reduce_window(y, -jnp.inf, lax.max, (1, 1, 2, 2), (1, 1, 2, 2), 'VALID')
    y = y.reshape(y.shape[0], -1)
    y = jax.nn.sigmoid(y @ fw1.T + fb1)
    y = jax.nn.sigmoid(y @ fw2.T + fb2)
    return y @ fw3.T + fb3


if __name__ == "__main__":
    key = jax.random.PRNGKey(0)
    kx, kp = jax.random.split(key)
    x = jax.random.normal(kx, (2, 1, 64, 64), jnp.float32)
    params = init_params(kp)
    prep = prepare_params(params)

    out = jax.block_until_ready(model_sigmoid_forward(x, prep))
    ref = jax.block_until_ready(reference_forward(x, params))

    assert out.shape == (2, 16), out.shape
    err = float(np.max(np.abs(np.asarray(out) - np.asarray(ref))))
    assert np.allclose(np.asarray(out), np.asarray(ref), rtol=2e-3, atol=2e-3), (
        "max abs diff = %g" % err)
    print("KERNEL_OK")
</pallas_src>

<mosaic_0001>
module attributes {stable_mosaic.version = 11 : i64} {
  func.func @_conv_pool_sig_kernel(%arg0: i32, %arg1: memref<1x30x360xf32, #tpu.memory_space<vmem>>, %arg2: memref<5x360x416xf32, #tpu.memory_space<vmem>>, %arg3: memref<1x416xf32, #tpu.memory_space<vmem>>, %arg4: memref<13x26xf32, #tpu.memory_space<vmem>>, %arg5: memref<13x26xf32, #tpu.memory_space<vmem>>, %arg6: memref<1x13x208xf32, #tpu.memory_space<vmem>>) attributes {dimension_semantics = [#tpu.dimension_semantics<parallel>], iteration_bounds = array<i64: 2>, scalar_prefetch = 0 : i64, scratch_operands = 0 : i64, tpu.core_type = #tpu.core_type<tc>, window_params = [{transform_indices = @transform_0, window_bounds = array<i64: 1, 30, 360>}, {pipeline_mode = #tpu.pipeline_mode<synchronous>, transform_indices = @transform_1, window_bounds = array<i64: 5, 360, 416>}, {pipeline_mode = #tpu.pipeline_mode<synchronous>, transform_indices = @transform_2, window_bounds = array<i64: 1, 416>}, {pipeline_mode = #tpu.pipeline_mode<synchronous>, transform_indices = @transform_3, window_bounds = array<i64: 13, 26>}, {pipeline_mode = #tpu.pipeline_mode<synchronous>, transform_indices = @transform_4, window_bounds = array<i64: 13, 26>}, {transform_indices = @transform_5, window_bounds = array<i64: 1, 13, 208>}]} {
    %c0 = arith.constant 0 : index
    %c0_0 = arith.constant 0 : index
    %c0_1 = arith.constant 0 : index
    %0 = vector.load %arg1[%c0, %c0_0, %c0_1] : memref<1x30x360xf32, #tpu.memory_space<vmem>>, vector<1x30x360xf32>
    %1 = vector.shape_cast %0 : vector<1x30x360xf32> to vector<30x360xf32>
    %2 = vector.extract_strided_slice %1 {offsets = [0, 0], sizes = [26, 360], strides = [1, 1]} : vector<30x360xf32> to vector<26x360xf32>
    %c0_2 = arith.constant 0 : index
    %c0_3 = arith.constant 0 : index
    %c0_4 = arith.constant 0 : index
    %3 = vector.load %arg2[%c0_2, %c0_3, %c0_4] : memref<5x360x416xf32, #tpu.memory_space<vmem>>, vector<1x360x416xf32>
    %4 = vector.shape_cast %3 : vector<1x360x416xf32> to vector<360x416xf32>
    %cst = arith.constant dense<0.000000e+00> : vector<26x416xf32>
    %5 = tpu.matmul %2, %4, %cst {dimension_numbers = #tpu.dot_dimension_numbers<[1], [0], [0], [1], [0, 0, 1, 1], [], []>} : vector<26x360xf32>, vector<360x416xf32>, vector<26x416xf32> -> vector<26x416xf32>
    %6 = vector.extract_strided_slice %1 {offsets = [1, 0], sizes = [26, 360], strides = [1, 1]} : vector<30x360xf32> to vector<26x360xf32>
    %c1 = arith.constant 1 : index
    %c0_5 = arith.constant 0 : index
    %c0_6 = arith.constant 0 : index
    %7 = vector.load %arg2[%c1, %c0_5, %c0_6] : memref<5x360x416xf32, #tpu.memory_space<vmem>>, vector<1x360x416xf32>
    %8 = vector.shape_cast %7 : vector<1x360x416xf32> to vector<360x416xf32>
    %cst_7 = arith.constant dense<0.000000e+00> : vector<26x416xf32>
    %9 = tpu.matmul %6, %8, %cst_7 {dimension_numbers = #tpu.dot_dimension_numbers<[1], [0], [0], [1], [0, 0, 1, 1], [], []>} : vector<26x360xf32>, vector<360x416xf32>, vector<26x416xf32> -> vector<26x416xf32>
    %10 = arith.addf %5, %9 : vector<26x416xf32>
    %11 = vector.extract_strided_slice %1 {offsets = [2, 0], sizes = [26, 360], strides = [1, 1]} : vector<30x360xf32> to vector<26x360xf32>
    %c2 = arith.constant 2 : index
    %c0_8 = arith.constant 0 : index
    %c0_9 = arith.constant 0 : index
    %12 = vector.load %arg2[%c2, %c0_8, %c0_9] : memref<5x360x416xf32, #tpu.memory_space<vmem>>, vector<1x360x416xf32>
    %13 = vector.shape_cast %12 : vector<1x360x416xf32> to vector<360x416xf32>
    %cst_10 = arith.constant dense<0.000000e+00> : vector<26x416xf32>
    %14 = tpu.matmul %11, %13, %cst_10 {dimension_numbers = #tpu.dot_dimension_numbers<[1], [0], [0], [1], [0, 0, 1, 1], [], []>} : vector<26x360xf32>, vector<360x416xf32>, vector<26x416xf32> -> vector<26x416xf32>
    %15 = arith.addf %10, %14 : vector<26x416xf32>
    %16 = vector.extract_strided_slice %1 {offsets = [3, 0], sizes = [26, 360], strides = [1, 1]} : vector<30x360xf32> to vector<26x360xf32>
    %c3 = arith.constant 3 : index
    %c0_11 = arith.constant 0 : index
    %c0_12 = arith.constant 0 : index
    %17 = vector.load %arg2[%c3, %c0_11, %c0_12] : memref<5x360x416xf32, #tpu.memory_space<vmem>>, vector<1x360x416xf32>
    %18 = vector.shape_cast %17 : vector<1x360x416xf32> to vector<360x416xf32>
    %cst_13 = arith.constant dense<0.000000e+00> : vector<26x416xf32>
    %19 = tpu.matmul %16, %18, %cst_13 {dimension_numbers = #tpu.dot_dimension_numbers<[1], [0], [0], [1], [0, 0, 1, 1], [], []>} : vector<26x360xf32>, vector<360x416xf32>, vector<26x416xf32> -> vector<26x416xf32>
    %20 = arith.addf %15, %19 : vector<26x416xf32>
    %21 = vector.extract_strided_slice %1 {offsets = [4, 0], sizes = [26, 360], strides = [1, 1]} : vector<30x360xf32> to vector<26x360xf32>
    %c4 = arith.constant 4 : index
    %c0_14 = arith.constant 0 : index
    %c0_15 = arith.constant 0 : index
    %22 = vector.load %arg2[%c4, %c0_14, %c0_15] : memref<5x360x416xf32, #tpu.memory_space<vmem>>, vector<1x360x416xf32>
    %23 = vector.shape_cast %22 : vector<1x360x416xf32> to vector<360x416xf32>
    %cst_16 = arith.constant dense<0.000000e+00> : vector<26x416xf32>
    %24 = tpu.matmul %21, %23, %cst_16 {dimension_numbers = #tpu.dot_dimension_numbers<[1], [0], [0], [1], [0, 0, 1, 1], [], []>} : vector<26x360xf32>, vector<360x416xf32>, vector<26x416xf32> -> vector<26x416xf32>
    %25 = arith.addf %20, %24 : vector<26x416xf32>
    %c0_17 = arith.constant 0 : index
    %c0_18 = arith.constant 0 : index
    %26 = vector.load %arg3[%c0_17, %c0_18] : memref<1x416xf32, #tpu.memory_space<vmem>>, vector<1x416xf32>
    %27 = vector.broadcast %26 : vector<1x416xf32> to vector<26x416xf32>
    %28 = arith.addf %25, %27 : vector<26x416xf32>
    %c0_19 = arith.constant 0 : index
    %c0_20 = arith.constant 0 : index
    %29 = vector.load %arg4[%c0_19, %c0_20] : memref<13x26xf32, #tpu.memory_space<vmem>>, vector<13x26xf32>
    %cst_21 = arith.constant dense<0.000000e+00> : vector<13x416xf32>
    %30 = tpu.matmul %29, %28, %cst_21 {dimension_numbers = #tpu.dot_dimension_numbers<[1], [0], [0], [1], [0, 0, 1, 1], [], []>} : vector<13x26xf32>, vector<26x416xf32>, vector<13x416xf32> -> vector<13x416xf32>
    %c0_22 = arith.constant 0 : index
    %c0_23 = arith.constant 0 : index
    %31 = vector.load %arg5[%c0_22, %c0_23] : memref<13x26xf32, #tpu.memory_space<vmem>>, vector<13x26xf32>
    %cst_24 = arith.constant dense<0.000000e+00> : vector<13x416xf32>
    %32 = tpu.matmul %31, %28, %cst_24 {dimension_numbers = #tpu.dot_dimension_numbers<[1], [0], [0], [1], [0, 0, 1, 1], [], []>} : vector<13x26xf32>, vector<26x416xf32>, vector<13x416xf32> -> vector<13x416xf32>
    %33 = arith.maximumf %30, %32 : vector<13x416xf32>
    %34 = vector.extract_strided_slice %33 {offsets = [0, 0], sizes = [13, 208], strides = [1, 1]} : vector<13x416xf32> to vector<13x208xf32>
    %35 = vector.extract_strided_slice %33 {offsets = [0, 208], sizes = [13, 208], strides = [1, 1]} : vector<13x416xf32> to vector<13x208xf32>
    %36 = arith.maximumf %34, %35 : vector<13x208xf32>
    %37 = arith.negf %36 : vector<13x208xf32>
    %38 = math.exp %37 : vector<13x208xf32>
    %cst_25 = arith.constant 1.000000e+00 : f32
    %39 = vector.broadcast %cst_25 : f32 to vector<13x208xf32>
    %40 = arith.addf %39, %38 : vector<13x208xf32>
    %41 = arith.divf %39, %40 : vector<13x208xf32>
    %c0_26 = arith.constant 0 : index
    %c0_27 = arith.constant 0 : index
    %c0_28 = arith.constant 0 : index
    %42 = vector.load %arg6[%c0_26, %c0_27, %c0_28] : memref<1x13x208xf32, #tpu.memory_space<vmem>>, vector<1x13x208xf32>
    %43 = vector.shape_cast %42 : vector<1x13x208xf32> to vector<13x208xf32>
    %44 = vector.shape_cast %41 : vector<13x208xf32> to vector<1x13x208xf32>
    tpu.vector_store %arg6[%c0_26, %c0_27, %c0_28], %44 {strides = array<i32>} : memref<1x13x208xf32, #tpu.memory_space<vmem>>, vector<1x13x208xf32>,
    return
  }
  func.func @transform_0(%arg0: i32) -> (i32, i32, i32) {
    %c0_i32 = arith.constant 0 : i32
    %c0_i32_0 = arith.constant 0 : i32
    %c0_i32_1 = arith.constant 0 : i32
    return %arg0, %c0_i32, %c0_i32_0 : i32, i32, i32
  }
  func.func @transform_1(%arg0: i32) -> (i32, i32, i32) {
    %c0_i32 = arith.constant 0 : i32
    %c0_i32_0 = arith.constant 0 : i32
    %c0_i32_1 = arith.constant 0 : i32
    %c0_i32_2 = arith.constant 0 : i32
    return %c0_i32, %c0_i32_0, %c0_i32_1 : i32, i32, i32
  }
  func.func @transform_2(%arg0: i32) -> (i32, i32) {
    %c0_i32 = arith.constant 0 : i32
    %c0_i32_0 = arith.constant 0 : i32
    %c0_i32_1 = arith.constant 0 : i32
    return %c0_i32, %c0_i32_0 : i32, i32
  }
  func.func @transform_3(%arg0: i32) -> (i32, i32) {
    %c0_i32 = arith.constant 0 : i32
    %c0_i32_0 = arith.constant 0 : i32
    %c0_i32_1 = arith.constant 0 : i32
    return %c0_i32, %c0_i32_0 : i32, i32
  }
  func.func @transform_4(%arg0: i32) -> (i32, i32) {
    %c0_i32 = arith.constant 0 : i32
    %c0_i32_0 = arith.constant 0 : i32
    %c0_i32_1 = arith.constant 0 : i32
    return %c0_i32, %c0_i32_0 : i32, i32
  }
  func.func @transform_5(%arg0: i32) -> (i32, i32, i32) {
    %c0_i32 = arith.constant 0 : i32
    %c0_i32_0 = arith.constant 0 : i32
    %c0_i32_1 = arith.constant 0 : i32
    return %arg0, %c0_i32, %c0_i32_0 : i32, i32, i32
  }
}

module attributes {stable_mosaic.version = 11 : i64} {
  func.func @_conv_pool_sig_kernel(%arg0: i32, %arg1: memref<1x64x64xf32, #tpu.memory_space<vmem>>, %arg2: memref<5x64x720xf32, #tpu.memory_space<vmem>>, %arg3: memref<1x720xf32, #tpu.memory_space<vmem>>, %arg4: memref<30x60xf32, #tpu.memory_space<vmem>>, %arg5: memref<30x60xf32, #tpu.memory_space<vmem>>, %arg6: memref<1x30x360xf32, #tpu.memory_space<vmem>>) attributes {dimension_semantics = [#tpu.dimension_semantics<parallel>], iteration_bounds = array<i64: 2>, scalar_prefetch = 0 : i64, scratch_operands = 0 : i64, tpu.core_type = #tpu.core_type<tc>, window_params = [{transform_indices = @transform_0, window_bounds = array<i64: 1, 64, 64>}, {pipeline_mode = #tpu.pipeline_mode<synchronous>, transform_indices = @transform_1, window_bounds = array<i64: 5, 64, 720>}, {pipeline_mode = #tpu.pipeline_mode<synchronous>, transform_indices = @transform_2, window_bounds = array<i64: 1, 720>}, {pipeline_mode = #tpu.pipeline_mode<synchronous>, transform_indices = @transform_3, window_bounds = array<i64: 30, 60>}, {pipeline_mode = #tpu.pipeline_mode<synchronous>, transform_indices = @transform_4, window_bounds = array<i64: 30, 60>}, {transform_indices = @transform_5, window_bounds = array<i64: 1, 30, 360>}]} {
    %c0 = arith.constant 0 : index
    %c0_0 = arith.constant 0 : index
    %c0_1 = arith.constant 0 : index
    %0 = vector.load %arg1[%c0, %c0_0, %c0_1] : memref<1x64x64xf32, #tpu.memory_space<vmem>>, vector<1x64x64xf32>
    %1 = vector.shape_cast %0 : vector<1x64x64xf32> to vector<64x64xf32>
    %2 = vector.extract_strided_slice %1 {offsets = [0, 0], sizes = [60, 64], strides = [1, 1]} : vector<64x64xf32> to vector<60x64xf32>
    %c0_2 = arith.constant 0 : index
    %c0_3 = arith.constant 0 : index
    %c0_4 = arith.constant 0 : index
    %3 = vector.load %arg2[%c0_2, %c0_3, %c0_4] : memref<5x64x720xf32, #tpu.memory_space<vmem>>, vector<1x64x720xf32>
    %4 = vector.shape_cast %3 : vector<1x64x720xf32> to vector<64x720xf32>
    %cst = arith.constant dense<0.000000e+00> : vector<60x720xf32>
    %5 = tpu.matmul %2, %4, %cst {dimension_numbers = #tpu.dot_dimension_numbers<[1], [0], [0], [1], [0, 0, 1, 1], [], []>} : vector<60x64xf32>, vector<64x720xf32>, vector<60x720xf32> -> vector<60x720xf32>
    %6 = vector.extract_strided_slice %1 {offsets = [1, 0], sizes = [60, 64], strides = [1, 1]} : vector<64x64xf32> to vector<60x64xf32>
    %c1 = arith.constant 1 : index
    %c0_5 = arith.constant 0 : index
    %c0_6 = arith.constant 0 : index
    %7 = vector.load %arg2[%c1, %c0_5, %c0_6] : memref<5x64x720xf32, #tpu.memory_space<vmem>>, vector<1x64x720xf32>
    %8 = vector.shape_cast %7 : vector<1x64x720xf32> to vector<64x720xf32>
    %cst_7 = arith.constant dense<0.000000e+00> : vector<60x720xf32>
    %9 = tpu.matmul %6, %8, %cst_7 {dimension_numbers = #tpu.dot_dimension_numbers<[1], [0], [0], [1], [0, 0, 1, 1], [], []>} : vector<60x64xf32>, vector<64x720xf32>, vector<60x720xf32> -> vector<60x720xf32>
    %10 = arith.addf %5, %9 : vector<60x720xf32>
    %11 = vector.extract_strided_slice %1 {offsets = [2, 0], sizes = [60, 64], strides = [1, 1]} : vector<64x64xf32> to vector<60x64xf32>
    %c2 = arith.constant 2 : index
    %c0_8 = arith.constant 0 : index
    %c0_9 = arith.constant 0 : index
    %12 = vector.load %arg2[%c2, %c0_8, %c0_9] : memref<5x64x720xf32, #tpu.memory_space<vmem>>, vector<1x64x720xf32>
    %13 = vector.shape_cast %12 : vector<1x64x720xf32> to vector<64x720xf32>
    %cst_10 = arith.constant dense<0.000000e+00> : vector<60x720xf32>
    %14 = tpu.matmul %11, %13, %cst_10 {dimension_numbers = #tpu.dot_dimension_numbers<[1], [0], [0], [1], [0, 0, 1, 1], [], []>} : vector<60x64xf32>, vector<64x720xf32>, vector<60x720xf32> -> vector<60x720xf32>
    %15 = arith.addf %10, %14 : vector<60x720xf32>
    %16 = vector.extract_strided_slice %1 {offsets = [3, 0], sizes = [60, 64], strides = [1, 1]} : vector<64x64xf32> to vector<60x64xf32>
    %c3 = arith.constant 3 : index
    %c0_11 = arith.constant 0 : index
    %c0_12 = arith.constant 0 : index
    %17 = vector.load %arg2[%c3, %c0_11, %c0_12] : memref<5x64x720xf32, #tpu.memory_space<vmem>>, vector<1x64x720xf32>
    %18 = vector.shape_cast %17 : vector<1x64x720xf32> to vector<64x720xf32>
    %cst_13 = arith.constant dense<0.000000e+00> : vector<60x720xf32>
    %19 = tpu.matmul %16, %18, %cst_13 {dimension_numbers = #tpu.dot_dimension_numbers<[1], [0], [0], [1], [0, 0, 1, 1], [], []>} : vector<60x64xf32>, vector<64x720xf32>, vector<60x720xf32> -> vector<60x720xf32>
    %20 = arith.addf %15, %19 : vector<60x720xf32>
    %21 = vector.extract_strided_slice %1 {offsets = [4, 0], sizes = [60, 64], strides = [1, 1]} : vector<64x64xf32> to vector<60x64xf32>
    %c4 = arith.constant 4 : index
    %c0_14 = arith.constant 0 : index
    %c0_15 = arith.constant 0 : index
    %22 = vector.load %arg2[%c4, %c0_14, %c0_15] : memref<5x64x720xf32, #tpu.memory_space<vmem>>, vector<1x64x720xf32>
    %23 = vector.shape_cast %22 : vector<1x64x720xf32> to vector<64x720xf32>
    %cst_16 = arith.constant dense<0.000000e+00> : vector<60x720xf32>
    %24 = tpu.matmul %21, %23, %cst_16 {dimension_numbers = #tpu.dot_dimension_numbers<[1], [0], [0], [1], [0, 0, 1, 1], [], []>} : vector<60x64xf32>, vector<64x720xf32>, vector<60x720xf32> -> vector<60x720xf32>
    %25 = arith.addf %20, %24 : vector<60x720xf32>
    %c0_17 = arith.constant 0 : index
    %c0_18 = arith.constant 0 : index
    %26 = vector.load %arg3[%c0_17, %c0_18] : memref<1x720xf32, #tpu.memory_space<vmem>>, vector<1x720xf32>
    %27 = vector.broadcast %26 : vector<1x720xf32> to vector<60x720xf32>
    %28 = arith.addf %25, %27 : vector<60x720xf32>
    %c0_19 = arith.constant 0 : index
    %c0_20 = arith.constant 0 : index
    %29 = vector.load %arg4[%c0_19, %c0_20] : memref<30x60xf32, #tpu.memory_space<vmem>>, vector<30x60xf32>
    %cst_21 = arith.constant dense<0.000000e+00> : vector<30x720xf32>
    %30 = tpu.matmul %29, %28, %cst_21 {dimension_numbers = #tpu.dot_dimension_numbers<[1], [0], [0], [1], [0, 0, 1, 1], [], []>} : vector<30x60xf32>, vector<60x720xf32>, vector<30x720xf32> -> vector<30x720xf32>
    %c0_22 = arith.constant 0 : index
    %c0_23 = arith.constant 0 : index
    %31 = vector.load %arg5[%c0_22, %c0_23] : memref<30x60xf32, #tpu.memory_space<vmem>>, vector<30x60xf32>
    %cst_24 = arith.constant dense<0.000000e+00> : vector<30x720xf32>
    %32 = tpu.matmul %31, %28, %cst_24 {dimension_numbers = #tpu.dot_dimension_numbers<[1], [0], [0], [1], [0, 0, 1, 1], [], []>} : vector<30x60xf32>, vector<60x720xf32>, vector<30x720xf32> -> vector<30x720xf32>
    %33 = arith.maximumf %30, %32 : vector<30x720xf32>
    %34 = vector.extract_strided_slice %33 {offsets = [0, 0], sizes = [30, 360], strides = [1, 1]} : vector<30x720xf32> to vector<30x360xf32>
    %35 = vector.extract_strided_slice %33 {offsets = [0, 360], sizes = [30, 360], strides = [1, 1]} : vector<30x720xf32> to vector<30x360xf32>
    %36 = arith.maximumf %34, %35 : vector<30x360xf32>
    %37 = arith.negf %36 : vector<30x360xf32>
    %38 = math.exp %37 : vector<30x360xf32>
    %cst_25 = arith.constant 1.000000e+00 : f32
    %39 = vector.broadcast %cst_25 : f32 to vector<30x360xf32>
    %40 = arith.addf %39, %38 : vector<30x360xf32>
    %41 = arith.divf %39, %40 : vector<30x360xf32>
    %c0_26 = arith.constant 0 : index
    %c0_27 = arith.constant 0 : index
    %c0_28 = arith.constant 0 : index
    %42 = vector.load %arg6[%c0_26, %c0_27, %c0_28] : memref<1x30x360xf32, #tpu.memory_space<vmem>>, vector<1x30x360xf32>
    %43 = vector.shape_cast %42 : vector<1x30x360xf32> to vector<30x360xf32>
    %44 = vector.shape_cast %41 : vector<30x360xf32> to vector<1x30x360xf32>
    tpu.vector_store %arg6[%c0_26, %c0_27, %c0_28], %44 {strides = array<i32>} : memref<1x30x360xf32, #tpu.memory_space<vmem>>, vector<1x30x360xf32>,
    return
  }
  func.func @transform_0(%arg0: i32) -> (i32, i32, i32) {
    %c0_i32 = arith.constant 0 : i32
    %c0_i32_0 = arith.constant 0 : i32
    %c0_i32_1 = arith.constant 0 : i32
    return %arg0, %c0_i32, %c0_i32_0 : i32, i32, i32
  }
  func.func @transform_1(%arg0: i32) -> (i32, i32, i32) {
    %c0_i32 = arith.constant 0 : i32
    %c0_i32_0 = arith.constant 0 : i32
    %c0_i32_1 = arith.constant 0 : i32
    %c0_i32_2 = arith.constant 0 : i32
    return %c0_i32, %c0_i32_0, %c0_i32_1 : i32, i32, i32
  }
  func.func @transform_2(%arg0: i32) -> (i32, i32) {
    %c0_i32 = arith.constant 0 : i32
    %c0_i32_0 = arith.constant 0 : i32
    %c0_i32_1 = arith.constant 0 : i32
    return %c0_i32, %c0_i32_0 : i32, i32
  }
  func.func @transform_3(%arg0: i32) -> (i32, i32) {
    %c0_i32 = arith.constant 0 : i32
    %c0_i32_0 = arith.constant 0 : i32
    %c0_i32_1 = arith.constant 0 : i32
    return %c0_i32, %c0_i32_0 : i32, i32
  }
  func.func @transform_4(%arg0: i32) -> (i32, i32) {
    %c0_i32 = arith.constant 0 : i32
    %c0_i32_0 = arith.constant 0 : i32
    %c0_i32_1 = arith.constant 0 : i32
    return %c0_i32, %c0_i32_0 : i32, i32
  }
  func.func @transform_5(%arg0: i32) -> (i32, i32, i32) {
    %c0_i32 = arith.constant 0 : i32
    %c0_i32_0 = arith.constant 0 : i32
    %c0_i32_1 = arith.constant 0 : i32
    return %arg0, %c0_i32, %c0_i32_0 : i32, i32, i32
  }
}

module attributes {stable_mosaic.version = 11 : i64} {
  func.func @_fc3_kernel(%arg0: memref<2x2704xf32, #tpu.memory_space<vmem>>, %arg1: memref<2704x120xf32, #tpu.memory_space<vmem>>, %arg2: memref<1x120xf32, #tpu.memory_space<vmem>>, %arg3: memref<120x120xf32, #tpu.memory_space<vmem>>, %arg4: memref<1x120xf32, #tpu.memory_space<vmem>>, %arg5: memref<120x16xf32, #tpu.memory_space<vmem>>, %arg6: memref<1x16xf32, #tpu.memory_space<vmem>>, %arg7: memref<2x16xf32, #tpu.memory_space<vmem>>) attributes {dimension_semantics = [], scalar_prefetch = 0 : i64, scratch_operands = 0 : i64, tpu.core_type = #tpu.core_type<tc>} {
    %c0 = arith.constant 0 : index
    %c0_0 = arith.constant 0 : index
    %0 = vector.load %arg0[%c0, %c0_0] : memref<2x2704xf32, #tpu.memory_space<vmem>>, vector<2x2704xf32>
    %c0_1 = arith.constant 0 : index
    %c0_2 = arith.constant 0 : index
    %1 = vector.load %arg1[%c0_1, %c0_2] : memref<2704x120xf32, #tpu.memory_space<vmem>>, vector<2704x120xf32>
    %cst = arith.constant dense<0.000000e+00> : vector<2x120xf32>
    %2 = tpu.matmul %0, %1, %cst {dimension_numbers = #tpu.dot_dimension_numbers<[1], [0], [0], [1], [0, 0, 1, 1], [], []>} : vector<2x2704xf32>, vector<2704x120xf32>, vector<2x120xf32> -> vector<2x120xf32>
    %c0_3 = arith.constant 0 : index
    %c0_4 = arith.constant 0 : index
    %3 = vector.load %arg2[%c0_3, %c0_4] : memref<1x120xf32, #tpu.memory_space<vmem>>, vector<1x120xf32>
    %4 = vector.broadcast %3 : vector<1x120xf32> to vector<2x120xf32>
    %5 = arith.addf %2, %4 : vector<2x120xf32>
    %6 = arith.negf %5 : vector<2x120xf32>
    %7 = math.exp %6 : vector<2x120xf32>
    %cst_5 = arith.constant 1.000000e+00 : f32
    %8 = vector.broadcast %cst_5 : f32 to vector<2x120xf32>
    %9 = arith.addf %8, %7 : vector<2x120xf32>
    %10 = arith.divf %8, %9 : vector<2x120xf32>
    %c0_6 = arith.constant 0 : index
    %c0_7 = arith.constant 0 : index
    %11 = vector.load %arg3[%c0_6, %c0_7] : memref<120x120xf32, #tpu.memory_space<vmem>>, vector<120x120xf32>
    %cst_8 = arith.constant dense<0.000000e+00> : vector<2x120xf32>
    %12 = tpu.matmul %10, %11, %cst_8 {dimension_numbers = #tpu.dot_dimension_numbers<[1], [0], [0], [1], [0, 0, 1, 1], [], []>} : vector<2x120xf32>, vector<120x120xf32>, vector<2x120xf32> -> vector<2x120xf32>
    %c0_9 = arith.constant 0 : index
    %c0_10 = arith.constant 0 : index
    %13 = vector.load %arg4[%c0_9, %c0_10] : memref<1x120xf32, #tpu.memory_space<vmem>>, vector<1x120xf32>
    %14 = vector.broadcast %13 : vector<1x120xf32> to vector<2x120xf32>
    %15 = arith.addf %12, %14 : vector<2x120xf32>
    %16 = arith.negf %15 : vector<2x120xf32>
    %17 = math.exp %16 : vector<2x120xf32>
    %cst_11 = arith.constant 1.000000e+00 : f32
    %18 = vector.broadcast %cst_11 : f32 to vector<2x120xf32>
    %19 = arith.addf %18, %17 : vector<2x120xf32>
    %20 = arith.divf %18, %19 : vector<2x120xf32>
    %c0_12 = arith.constant 0 : index
    %c0_13 = arith.constant 0 : index
    %21 = vector.load %arg5[%c0_12, %c0_13] : memref<120x16xf32, #tpu.memory_space<vmem>>, vector<120x16xf32>
    %cst_14 = arith.constant dense<0.000000e+00> : vector<2x16xf32>
    %22 = tpu.matmul %20, %21, %cst_14 {dimension_numbers = #tpu.dot_dimension_numbers<[1], [0], [0], [1], [0, 0, 1, 1], [], []>} : vector<2x120xf32>, vector<120x16xf32>, vector<2x16xf32> -> vector<2x16xf32>
    %c0_15 = arith.constant 0 : index
    %c0_16 = arith.constant 0 : index
    %23 = vector.load %arg6[%c0_15, %c0_16] : memref<1x16xf32, #tpu.memory_space<vmem>>, vector<1x16xf32>
    %24 = vector.broadcast %23 : vector<1x16xf32> to vector<2x16xf32>
    %25 = arith.addf %22, %24 : vector<2x16xf32>
    %c0_17 = arith.constant 0 : index
    %c0_18 = arith.constant 0 : index
    %26 = vector.load %arg7[%c0_17, %c0_18] : memref<2x16xf32, #tpu.memory_space<vmem>>, vector<2x16xf32>
    tpu.vector_store %arg7[%c0_17, %c0_18], %25 {strides = array<i32>} : memref<2x16xf32, #tpu.memory_space<vmem>>, vector<2x16xf32>,
    return
  }
}

</mosaic_0001>

<bundles_post_ra>
// kernel: model_sigmoid_forward.5
= control target key start
LH: loop header
LB: loop body
LE: loop exit
PB: predicated region body
PF: predicated region fallthrough
CT: control target
= control target key end

     0   :  { %v1986_v27 = vmov 1983009808   ;;  %v388_v29 = vlaneseq  ;;  %s3235_s0 = inlined_call_operand.vmem [shape: f32[2,2704], index: 0, kind: input, shape index: {}]   ;;  %s3236_s1 = inlined_call_operand.vmem [shape: f32[2704,120], index: 1, kind: input, shape index: {}]   ;;  %s3237_s2 = inlined_call_operand.vmem [shape: f32[1,120], index: 2, kind: input, shape index: {}]   ;;  %s3238_s3 = inlined_call_operand.vmem [shape: f32[120,120], index: 3, kind: input, shape index: {}]   ;;  %s3239_s4 = inlined_call_operand.vmem [shape: f32[1,120], index: 4, kind: input, shape index: {}]   ;;  %s3240_s5 = inlined_call_operand.vmem [shape: f32[120,16], index: 5, kind: input, shape index: {}]   ;;  %s3241_s6 = inlined_call_operand.vmem [shape: f32[1,16], index: 6, kind: input, shape index: {}]   ;;  %s3242_s7 = inlined_call_operand.hbm [shape: f32[2,16], index: 7, kind: output, shape index: {}]  }
   0x1   :  { %v64_v0 = vld [vmem:[%s3236_s1 + $0xf8] sm:$0xff]  ;;  %v63_v2 = vld [vmem:[%s3236_s1 + $0xf0] sm:$0xff]  ;;  %v62_v6 = vld [vmem:[%s3236_s1 + $0xe8] sm:$0xff]  ;;  %v386_v28 = vunpack.c.l.s4 %v1986_v27 }
   0x2   :  { %v48_v1 = vld [vmem:[%s3236_s1 + $0x78] sm:$0xff]  ;;  %1499 = vmatprep.subr.mxu0 %v64_v0  ;;  %v47_v4 = vld [vmem:[%s3236_s1 + $0x70] sm:$0xff]  ;;  %v46_v8 = vld [vmem:[%s3236_s1 + $0x68] sm:$0xff]  ;;  %v389_v39 = vshrl.u32 %v388_v29, 7 }
   0x3   :  { %v96_v3 = vld [vmem:[%s3236_s1 + $0x1f8] sm:$0xff]  ;;  %1500 = vmatpush3.msra.mxu0 %v48_v1  ;;  %v95_v7 = vld [vmem:[%s3236_s1 + $0x1f0] sm:$0xff]  ;;  %v94_v10 = vld [vmem:[%s3236_s1 + $0x1e8] sm:$0xff]  ;;  %v387_v38 = vunpack.c.0.s8 %v386_v28 }
   0x4   :  { %v80_v5 = vld [vmem:[%s3236_s1 + $0x178] sm:$0xff]  ;;  %1534 = vmatprep.subr.mxu1 %v96_v3  ;;  %1501 = vmatprep.subr.mxu0 %v63_v2  ;;  %v79_v9 = vld [vmem:[%s3236_s1 + $0x170] sm:$0xff]  ;;  %v61_v11 = vld [vmem:[%s3236_s1 + $0xe0] sm:$0xff] }
   0x5   :  { %1535 = vmatpush3.msra.mxu1 %v80_v5  ;;  %1502 = vmatpush3.msra.mxu0 %v47_v4  ;;  %v78_v12 = vld [vmem:[%s3236_s1 + $0x168] sm:$0xff]  ;;  %v45_v13 = vld [vmem:[%s3236_s1 + $0x60] sm:$0xff]  ;;  %v60_v15 = vld [vmem:[%s3236_s1 + $0xd8] sm:$0xff]  ;;  %v2159_v48 = vsub.s32 %v387_v38, %v389_v39 }
   0x6   :  { %1536 = vmatprep.subr.mxu1 %v95_v7  ;;  %1503 = vmatprep.subr.mxu0 %v62_v6  ;;  %v93_v14 = vld [vmem:[%s3236_s1 + $0x1e0] sm:$0xff]  ;;  %v44_v17 = vld [vmem:[%s3236_s1 + $0x58] sm:$0xff]  ;;  %v59_v19 = vld [vmem:[%s3236_s1 + $0xd0] sm:$0xff] }
   0x7   :  { %1537 = vmatpush3.msra.mxu1 %v79_v9  ;;  %1504 = vmatpush3.msra.mxu0 %v46_v8  ;;  %v77_v16 = vld [vmem:[%s3236_s1 + $0x160] sm:$0xff]  ;;  %v92_v18 = vld [vmem:[%s3236_s1 + $0x1d8] sm:$0xff]  ;;  %v43_v21 = vld [vmem:[%s3236_s1 + $0x50] sm:$0xff] }
   0x8   :  { %1538 = vmatprep.subr.mxu1 %v94_v10  ;;  %1505 = vmatprep.subr.mxu0 %v61_v11  ;;  %v76_v20 = vld [vmem:[%s3236_s1 + $0x158] sm:$0xff]  ;;  %v91_v22 = vld [vmem:[%s3236_s1 + $0x1d0] sm:$0xff]  ;;  %v58_v23 = vld [vmem:[%s3236_s1 + $0xc8] sm:$0xff] }
   0x9   :  { %1539 = vmatpush3.msra.mxu1 %v78_v12  ;;  %1506 = vmatpush3.msra.mxu0 %v45_v13  ;;  %v75_v24 = vld [vmem:[%s3236_s1 + $0x150] sm:$0xff]  ;;  %v42_v25 = vld [vmem:[%s3236_s1 + $0x48] sm:$0xff]  ;;  %v57_v30 = vld [vmem:[%s3236_s1 + $0xc0] sm:$0xff] }
   0xa   :  { %1540 = vmatprep.subr.mxu1 %v93_v14  ;;  %1507 = vmatprep.subr.mxu0 %v60_v15  ;;  %v90_v26 = vld [vmem:[%s3236_s1 + $0x1c8] sm:$0xff]  ;;  %v41_v32 = vld [vmem:[%s3236_s1 + $0x40] sm:$0xff]  ;;  %v56_v34 = vld [vmem:[%s3236_s1 + $0xb8] sm:$0xff] }
   0xb   :  { %1541 = vmatpush3.msra.mxu1 %v77_v16  ;;  %1508 = vmatpush3.msra.mxu0 %v44_v17  ;;  %v74_v31 = vld [vmem:[%s3236_s1 + $0x148] sm:$0xff]  ;;  %v89_v33 = vld [vmem:[%s3236_s1 + $0x1c0] sm:$0xff]  ;;  %v40_v36 = vld [vmem:[%s3236_s1 + $0x38] sm:$0xff] }
   0xc   :  { %1542 = vmatprep.subr.mxu1 %v92_v18  ;;  %1509 = vmatprep.subr.mxu0 %v59_v19  ;;  %v73_v35 = vld [vmem:[%s3236_s1 + $0x140] sm:$0xff]  ;;  %v88_v37 = vld [vmem:[%s3236_s1 + $0x1b8] sm:$0xff]  ;;  %v55_v40 = vld [vmem:[%s3236_s1 + $0xb0] sm:$0xff] }
   0xd   :  { %1543 = vmatpush3.msra.mxu1 %v76_v20  ;;  %1510 = vmatpush3.msra.mxu0 %v43_v21  ;;  %v72_v41 = vld [vmem:[%s3236_s1 + $0x138] sm:$0xff]  ;;  %v39_v42 = vld [vmem:[%s3236_s1 + $0x30] sm:$0xff]  ;;  %v54_v44 = vld [vmem:[%s3236_s1 + $0xa8] sm:$0xff] }
   0xe   :  { %1544 = vmatprep.subr.mxu1 %v91_v22  ;;  %1511 = vmatprep.subr.mxu0 %v58_v23  ;;  %v87_v43 = vld [vmem:[%s3236_s1 + $0x1b0] sm:$0xff]  ;;  %v38_v46 = vld [vmem:[%s3236_s1 + $0x28] sm:$0xff]  ;;  %v53_v49 = vld [vmem:[%s3236_s1 + $0xa0] sm:$0xff] }
   0xf   :  { %1545 = vmatpush3.msra.mxu1 %v75_v24  ;;  %1512 = vmatpush3.msra.mxu0 %v42_v25  ;;  %v71_v45 = vld [vmem:[%s3236_s1 + $0x130] sm:$0xff]  ;;  %v86_v47 = vld [vmem:[%s3236_s1 + $0x1a8] sm:$0xff]  ;;  %v27_v51 = vld [vmem:[%s3235_s0] sm:$0xff] }
  0x10   :  { %1546 = vmatprep.subr.mxu1 %v90_v26  ;;  %1513 = vmatprep.subr.mxu0 %v57_v30  ;;  %v70_v50 = vld [vmem:[%s3236_s1 + $0x128] sm:$0xff]  ;;  %v37_v52 = vld [vmem:[%s3236_s1 + $0x20] sm:$0xff]  ;;  %v52_v54 = vld [vmem:[%s3236_s1 + $0x98] sm:$0xff]  ;;  %v391_v58 = vrot.slane %v27_v51, %v2159_v48  ;;  %v384_v59 = vcombine.high %v27_v51, %v27_v51 }
  0x11   :  { %1547 = vmatpush3.msra.mxu1 %v74_v31  ;;  %1514 = vmatpush3.msra.mxu0 %v41_v32  ;;  %v85_v53 = vld [vmem:[%s3236_s1 + $0x1a0] sm:$0xff]  ;;  %v36_v56 = vld [vmem:[%s3236_s1 + $0x18] sm:$0xff]  ;;  %v51_v60 = vld [vmem:[%s3236_s1 + $0x90] sm:$0xff] }
  0x12   :  { %1548 = vmatprep.subr.mxu1 %v89_v33  ;;  %1515 = vmatprep.subr.mxu0 %v56_v34  ;;  %v69_v55 = vld [vmem:[%s3236_s1 + $0x120] sm:$0xff]  ;;  %v84_v57 = vld [vmem:[%s3236_s1 + $0x198] sm:$0xff]  ;;  %v35_v62 = vld [vmem:[%s3236_s1 + $0x10] sm:$0xff]  ;;  %v399_v4 = vcombine.high %v391_v58, %v391_v58  ;;  %v398_v5 = vrot.slane %v384_v59, %v2159_v48 }
  0x13   :  { %1549 = vmatpush3.msra.mxu1 %v73_v35  ;;  %1516 = vmatpush3.msra.mxu0 %v40_v36  ;;  %v68_v61 = vld [vmem:[%s3236_s1 + $0x118] sm:$0xff]  ;;  %v83_v63 = vld [vmem:[%s3236_s1 + $0x190] sm:$0xff]  ;;  %v50_v0 = vld [vmem:[%s3236_s1 + $0x88] sm:$0xff] }
  0x14   :  { %1550 = vmatprep.subr.mxu1 %v88_v37  ;;  %1517 = vmatprep.subr.mxu0 %v55_v40  ;;  %v67_v1 = vld [vmem:[%s3236_s1 + $0x110] sm:$0xff]  ;;  %v34_v2 = vld [vmem:[%s3236_s1 + $0x8] sm:$0xff]  ;;  %v49_v6 = vld [vmem:[%s3236_s1 + $0x80] sm:$0xff]  ;;  %v400_v12 = vcombine.high %v398_v5, %v398_v5 }
  0x15   :  { %1551 = vmatpush3.msra.mxu1 %v72_v41  ;;  %1518 = vmatpush3.msra.mxu0 %v39_v42  ;;  %v82_v3 = vld [vmem:[%s3236_s1 + $0x188] sm:$0xff]  ;;  %v33_v7 = vld [vmem:[%s3236_s1] sm:$0xff]  ;;  %v128_v10 = vld [vmem:[%s3236_s1 + $0x2f8] sm:$0xff] }
  0x16   :  { %1552 = vmatprep.subr.mxu1 %v87_v43  ;;  %1519 = vmatprep.subr.mxu0 %v54_v44  ;;  %v66_v8 = vld [vmem:[%s3236_s1 + $0x108] sm:$0xff]  ;;  %v81_v9 = vld [vmem:[%s3236_s1 + $0x180] sm:$0xff]  ;;  %v112_v13 = vld [vmem:[%s3236_s1 + $0x278] sm:$0xff] }
  0x17   :  { %1553 = vmatpush3.msra.mxu1 %v71_v45  ;;  %1520 = vmatpush3.msra.mxu0 %v38_v46  ;;  %v65_v11 = vld [vmem:[%s3236_s1 + $0x100] sm:$0xff]  ;;  %v127_v14 = vld [vmem:[%s3236_s1 + $0x2f0] sm:$0xff]  ;;  %v160_v15 = vld [vmem:[%s3236_s1 + $0x3f8] sm:$0xff] }
  0x18   :  { %1554 = vmatprep.subr.mxu1 %v86_v47  ;;  %1521 = vmatprep.subr.mxu0 %v53_v49  ;;  %v111_v16 = vld [vmem:[%s3236_s1 + $0x270] sm:$0xff]  ;;  %v144_v17 = vld [vmem:[%s3236_s1 + $0x378] sm:$0xff]  ;;  %v126_v18 = vld [vmem:[%s3236_s1 + $0x2e8] sm:$0xff] }
  0x19   :  { %1555 = vmatpush3.msra.mxu1 %v70_v50  ;;  %1522 = vmatpush3.msra.mxu0 %v37_v52  ;;  %v159_v19 = vld [vmem:[%s3236_s1 + $0x3f0] sm:$0xff]  ;;  %v110_v20 = vld [vmem:[%s3236_s1 + $0x268] sm:$0xff]  ;;  %v125_v22 = vld [vmem:[%s3236_s1 + $0x2e0] sm:$0xff] }
  0x1a   :  { %1556 = vmatprep.subr.mxu1 %v85_v53  ;;  %1523 = vmatprep.subr.mxu0 %v52_v54  ;;  %v143_v21 = vld [vmem:[%s3236_s1 + $0x370] sm:$0xff]  ;;  %v158_v23 = vld [vmem:[%s3236_s1 + $0x3e8] sm:$0xff]  ;;  %v109_v24 = vld [vmem:[%s3236_s1 + $0x260] sm:$0xff] }
  0x1b   :  { %1557 = vmatpush3.msra.mxu1 %v69_v55  ;;  %1524 = vmatpush3.msra.mxu0 %v36_v56  ;;  %v142_v25 = vld [vmem:[%s3236_s1 + $0x368] sm:$0xff]  ;;  %v124_v26 = vld [vmem:[%s3236_s1 + $0x2d8] sm:$0xff]  ;;  %v157_v27 = vld [vmem:[%s3236_s1 + $0x3e0] sm:$0xff] }
  0x1c   :  { %1558 = vmatprep.subr.mxu1 %v84_v57  ;;  %1525 = vmatprep.subr.mxu0 %v51_v60  ;;  %v108_v28 = vld [vmem:[%s3236_s1 + $0x258] sm:$0xff]  ;;  %v141_v29 = vld [vmem:[%s3236_s1 + $0x360] sm:$0xff]  ;;  %v123_v30 = vld [vmem:[%s3236_s1 + $0x2d0] sm:$0xff] }
  0x1d   :  { %1559 = vmatpush3.msra.mxu1 %v68_v61  ;;  %1526 = vmatpush3.msra.mxu0 %v35_v62  ;;  %v156_v31 = vld [vmem:[%s3236_s1 + $0x3d8] sm:$0xff]  ;;  %v107_v32 = vld [vmem:[%s3236_s1 + $0x250] sm:$0xff]  ;;  %v122_v34 = vld [vmem:[%s3236_s1 + $0x2c8] sm:$0xff] }
  0x1e   :  { %1560 = vmatprep.subr.mxu1 %v83_v63  ;;  %1527 = vmatprep.subr.mxu0 %v50_v0  ;;  %v140_v33 = vld [vmem:[%s3236_s1 + $0x358] sm:$0xff]  ;;  %v155_v35 = vld [vmem:[%s3236_s1 + $0x3d0] sm:$0xff]  ;;  %v106_v36 = vld [vmem:[%s3236_s1 + $0x248] sm:$0xff] }
  0x1f   :  { %1561 = vmatpush3.msra.mxu1 %v67_v1  ;;  %1528 = vmatpush3.msra.mxu0 %v34_v2  ;;  %v139_v37 = vld [vmem:[%s3236_s1 + $0x350] sm:$0xff]  ;;  %v121_v38 = vld [vmem:[%s3236_s1 + $0x2c0] sm:$0xff]  ;;  %v154_v39 = vld [vmem:[%s3236_s1 + $0x3c8] sm:$0xff] }
  0x20   :  { %1562 = vmatprep.subr.mxu1 %v82_v3  ;;  %1529 = vmatprep.subr.mxu0 %v49_v6  ;;  %v105_v40 = vld [vmem:[%s3236_s1 + $0x240] sm:$0xff]  ;;  %v138_v41 = vld [vmem:[%s3236_s1 + $0x348] sm:$0xff]  ;;  %v120_v42 = vld [vmem:[%s3236_s1 + $0x2b8] sm:$0xff] }
  0x21   :  { %565 = vmatprep.mubr.f32.mxu0 %v399_v4  ;;  %1530 = vmatpush3.msra.mxu0 %v33_v7  ;;  %v153_v43 = vld [vmem:[%s3236_s1 + $0x3c0] sm:$0xff]  ;;  %v104_v44 = vld [vmem:[%s3236_s1 + $0x238] sm:$0xff]  ;;  %v119_v46 = vld [vmem:[%s3236_s1 + $0x2b0] sm:$0xff] }
  0x22   :  { %1563 = vmatpush3.msra.mxu1 %v66_v8  ;;  %566 = vmatmul.mubr.f32.vlgmr.msra.gmra.mxu0 %v391_v58  ;;  %v137_v45 = vld [vmem:[%s3236_s1 + $0x340] sm:$0xff]  ;;  %v152_v47 = vld [vmem:[%s3236_s1 + $0x3b8] sm:$0xff]  ;;  %v103_v49 = vld [vmem:[%s3236_s1 + $0x230] sm:$0xff] }
  0x23   :  { %1564 = vmatprep.subr.mxu1 %v81_v9  ;;  %1569 = vmatprep.subr.mxu0 %v128_v10  ;;  %v136_v50 = vld [vmem:[%s3236_s1 + $0x338] sm:$0xff]  ;;  %v118_v51 = vld [vmem:[%s3236_s1 + $0x2a8] sm:$0xff]  ;;  %v151_v52 = vld [vmem:[%s3236_s1 + $0x3b0] sm:$0xff] }
  0x24   :  { %1565 = vmatpush3.msra.mxu1 %v65_v11  ;;  %635 = vmatprep.mubr.f32.mxu1 %v400_v12  ;;  %v102_v53 = vld [vmem:[%s3236_s1 + $0x228] sm:$0xff]  ;;  %v135_v54 = vld [vmem:[%s3236_s1 + $0x330] sm:$0xff]  ;;  %v117_v55 = vld [vmem:[%s3236_s1 + $0x2a0] sm:$0xff] }
  0x25   :  { %1570 = vmatpush3.msra.mxu0 %v112_v13  ;;  %636 = vmatmul.mubr.f32.vlgmr.msra.gmra.mxu1 %v398_v5  ;;  %v150_v56 = vld [vmem:[%s3236_s1 + $0x3a8] sm:$0xff]  ;;  %v101_v57 = vld [vmem:[%s3236_s1 + $0x220] sm:$0xff]  ;;  %v116_v60 = vld [vmem:[%s3236_s1 + $0x298] sm:$0xff] }
  0x26   :  { %1571 = vmatprep.subr.mxu0 %v127_v14  ;;  %1604 = vmatprep.subr.mxu1 %v160_v15  ;;  %v28_v58 = vld [vmem:[%s3235_s0 + $0x8] sm:$0xff]  ;;  %v149_v61 = vld [vmem:[%s3236_s1 + $0x3a0] sm:$0xff]  ;;  %v100_v62 = vld [vmem:[%s3236_s1 + $0x218] sm:$0xff] }
  0x27   :  { %1572 = vmatpush3.msra.mxu0 %v111_v16  ;;  %1605 = vmatpush3.msra.mxu1 %v144_v17  ;;  %v134_v59 = vld [vmem:[%s3236_s1 + $0x328] sm:$0xff]  ;;  %v133_v63 = vld [vmem:[%s3236_s1 + $0x320] sm:$0xff]  ;;  %v115_v0 = vld [vmem:[%s3236_s1 + $0x290] sm:$0xff]  ;;  %v401_v1 = vcombine.high %v28_v58, %v28_v58  ;;  %v408_v4 = vrot.slane %v28_v58, %v2159_v48 }
  0x28   :  { %1573 = vmatprep.subr.mxu0 %v126_v18  ;;  %1606 = vmatprep.subr.mxu1 %v159_v19  ;;  %v148_v2 = vld [vmem:[%s3236_s1 + $0x398] sm:$0xff]  ;;  %v99_v3 = vld [vmem:[%s3236_s1 + $0x210] sm:$0xff]  ;;  %v114_v6 = vld [vmem:[%s3236_s1 + $0x288] sm:$0xff] }
  0x29   :  { %1574 = vmatpush3.msra.mxu0 %v110_v20  ;;  %1607 = vmatpush3.msra.mxu1 %v143_v21  ;;  %v132_v5 = vld [vmem:[%s3236_s1 + $0x318] sm:$0xff]  ;;  %v147_v7 = vld [vmem:[%s3236_s1 + $0x390] sm:$0xff]  ;;  %v98_v8 = vld [vmem:[%s3236_s1 + $0x208] sm:$0xff]  ;;  %v415_v11 = vrot.slane %v401_v1, %v2159_v48  ;;  %v416_v14 = vcombine.high %v408_v4, %v408_v4 }
  0x2a   :  { %1575 = vmatprep.subr.mxu0 %v125_v22  ;;  %1608 = vmatprep.subr.mxu1 %v158_v23  ;;  %v131_v9 = vld [vmem:[%s3236_s1 + $0x310] sm:$0xff]  ;;  %v113_v10 = vld [vmem:[%s3236_s1 + $0x280] sm:$0xff]  ;;  %v146_v12 = vld [vmem:[%s3236_s1 + $0x388] sm:$0xff] }
  0x2b   :  { %1576 = vmatpush3.msra.mxu0 %v109_v24  ;;  %1609 = vmatpush3.msra.mxu1 %v142_v25  ;;  %v97_v13 = vld [vmem:[%s3236_s1 + $0x200] sm:$0xff]  ;;  %v130_v15 = vld [vmem:[%s3236_s1 + $0x308] sm:$0xff]  ;;  %v192_v17 = vld [vmem:[%s3236_s1 + $0x4f8] sm:$0xff]  ;;  %v417_v19 = vcombine.high %v415_v11, %v415_v11 }
  0x2c   :  { %1577 = vmatprep.subr.mxu0 %v124_v26  ;;  %1610 = vmatprep.subr.mxu1 %v157_v27  ;;  %v145_v16 = vld [vmem:[%s3236_s1 + $0x380] sm:$0xff]  ;;  %v176_v20 = vld [vmem:[%s3236_s1 + $0x478] sm:$0xff]  ;;  %v191_v21 = vld [vmem:[%s3236_s1 + $0x4f0] sm:$0xff] }
  0x2d   :  { %1578 = vmatpush3.msra.mxu0 %v108_v28  ;;  %1611 = vmatpush3.msra.mxu1 %v141_v29  ;;  %v129_v18 = vld [vmem:[%s3236_s1 + $0x300] sm:$0xff]  ;;  %v224_v22 = vld [vmem:[%s3236_s1 + $0x5f8] sm:$0xff]  ;;  %v175_v23 = vld [vmem:[%s3236_s1 + $0x470] sm:$0xff] }
  0x2e   :  { %1579 = vmatprep.subr.mxu0 %v123_v30  ;;  %1612 = vmatprep.subr.mxu1 %v156_v31  ;;  %v208_v24 = vld [vmem:[%s3236_s1 + $0x578] sm:$0xff]  ;;  %v190_v25 = vld [vmem:[%s3236_s1 + $0x4e8] sm:$0xff]  ;;  %v223_v26 = vld [vmem:[%s3236_s1 + $0x5f0] sm:$0xff] }
  0x2f   :  { %1580 = vmatpush3.msra.mxu0 %v107_v32  ;;  %1613 = vmatpush3.msra.mxu1 %v140_v33  ;;  %v174_v27 = vld [vmem:[%s3236_s1 + $0x468] sm:$0xff]  ;;  %v207_v28 = vld [vmem:[%s3236_s1 + $0x570] sm:$0xff]  ;;  %v189_v29 = vld [vmem:[%s3236_s1 + $0x4e0] sm:$0xff] }
  0x30   :  { %1581 = vmatprep.subr.mxu0 %v122_v34  ;;  %1614 = vmatprep.subr.mxu1 %v155_v35  ;;  %v222_v30 = vld [vmem:[%s3236_s1 + $0x5e8] sm:$0xff]  ;;  %v173_v31 = vld [vmem:[%s3236_s1 + $0x460] sm:$0xff]  ;;  %v188_v33 = vld [vmem:[%s3236_s1 + $0x4d8] sm:$0xff] }
  0x31   :  { %1582 = vmatpush3.msra.mxu0 %v106_v36  ;;  %1615 = vmatpush3.msra.mxu1 %v139_v37  ;;  %v206_v32 = vld [vmem:[%s3236_s1 + $0x568] sm:$0xff]  ;;  %v221_v34 = vld [vmem:[%s3236_s1 + $0x5e0] sm:$0xff]  ;;  %v172_v35 = vld [vmem:[%s3236_s1 + $0x458] sm:$0xff] }
  0x32   :  { %1583 = vmatprep.subr.mxu0 %v121_v38  ;;  %1616 = vmatprep.subr.mxu1 %v154_v39  ;;  %v205_v36 = vld [vmem:[%s3236_s1 + $0x560] sm:$0xff]  ;;  %v187_v37 = vld [vmem:[%s3236_s1 + $0x4d0] sm:$0xff]  ;;  %v220_v38 = vld [vmem:[%s3236_s1 + $0x5d8] sm:$0xff] }
  0x33   :  { %1584 = vmatpush3.msra.mxu0 %v105_v40  ;;  %1617 = vmatpush3.msra.mxu1 %v138_v41  ;;  %v171_v39 = vld [vmem:[%s3236_s1 + $0x450] sm:$0xff]  ;;  %v204_v40 = vld [vmem:[%s3236_s1 + $0x558] sm:$0xff]  ;;  %v186_v41 = vld [vmem:[%s3236_s1 + $0x4c8] sm:$0xff] }
  0x34   :  { %1585 = vmatprep.subr.mxu0 %v120_v42  ;;  %1618 = vmatprep.subr.mxu1 %v153_v43  ;;  %v219_v42 = vld [vmem:[%s3236_s1 + $0x5d0] sm:$0xff]  ;;  %v170_v43 = vld [vmem:[%s3236_s1 + $0x448] sm:$0xff] }
  0x35   :  { %1586 = vmatpush3.msra.mxu0 %v104_v44  ;;  %1619 = vmatpush3.msra.mxu1 %v137_v45  ;;  %v203_v44 = vld [vmem:[%s3236_s1 + $0x550] sm:$0xff]  ;;  %v185_v45 = vld [vmem:[%s3236_s1 + $0x4c0] sm:$0xff]  ;;  %v182_v58 = vld [vmem:[%s3236_s1 + $0x4a8] sm:$0xff] }
  0x36   :  { %1587 = vmatprep.subr.mxu0 %v119_v46  ;;  %1620 = vmatprep.subr.mxu1 %v152_v47  ;;  %v218_v46 = vld [vmem:[%s3236_s1 + $0x5c8] sm:$0xff]  ;;  %v169_v47 = vld [vmem:[%s3236_s1 + $0x440] sm:$0xff]  ;;  %v29_v1 = vld [vmem:[%s3235_s0 + $0x10] sm:$0xff] }
  0x37   :  { %1588 = vmatpush3.msra.mxu0 %v103_v49  ;;  %1621 = vmatpush3.msra.mxu1 %v136_v50  ;;  %v202_v49 = vld [vmem:[%s3236_s1 + $0x548] sm:$0xff]  ;;  %v184_v50 = vld [vmem:[%s3236_s1 + $0x4b8] sm:$0xff] }
  0x38   :  { %1589 = vmatprep.subr.mxu0 %v118_v51  ;;  %1622 = vmatprep.subr.mxu1 %v151_v52  ;;  %v217_v51 = vld [vmem:[%s3236_s1 + $0x5c0] sm:$0xff]  ;;  %v168_v52 = vld [vmem:[%s3236_s1 + $0x438] sm:$0xff] }
  0x39   :  { %1590 = vmatpush3.msra.mxu0 %v102_v53  ;;  %1623 = vmatpush3.msra.mxu1 %v135_v54  ;;  %v201_v53 = vld [vmem:[%s3236_s1 + $0x540] sm:$0xff]  ;;  %v183_v54 = vld [vmem:[%s3236_s1 + $0x4b0] sm:$0xff] }
  0x3a   :  { %1591 = vmatprep.subr.mxu0 %v117_v55  ;;  %1624 = vmatprep.subr.mxu1 %v150_v56  ;;  %v216_v55 = vld [vmem:[%s3236_s1 + $0x5b8] sm:$0xff]  ;;  %v167_v56 = vld [vmem:[%s3236_s1 + $0x430] sm:$0xff] }
  0x3b   :  { %1592 = vmatpush3.msra.mxu0 %v101_v57  ;;  %1625 = vmatpush3.msra.mxu1 %v134_v59  ;;  %v200_v57 = vld [vmem:[%s3236_s1 + $0x538] sm:$0xff]  ;;  %v215_v59 = vld [vmem:[%s3236_s1 + $0x5b0] sm:$0xff] }
  0x3c   :  { %1593 = vmatprep.subr.mxu0 %v116_v60  ;;  %1626 = vmatprep.subr.mxu1 %v149_v61  ;;  %v166_v60 = vld [vmem:[%s3236_s1 + $0x428] sm:$0xff]  ;;  %v199_v61 = vld [vmem:[%s3236_s1 + $0x530] sm:$0xff] }
  0x3d   :  { %1594 = vmatpush3.msra.mxu0 %v100_v62  ;;  %1627 = vmatpush3.msra.mxu1 %v133_v63  ;;  %v181_v62 = vld [vmem:[%s3236_s1 + $0x4a0] sm:$0xff]  ;;  %v214_v63 = vld [vmem:[%s3236_s1 + $0x5a8] sm:$0xff] }
  0x3e   :  { %1595 = vmatprep.subr.mxu0 %v115_v0  ;;  %1628 = vmatprep.subr.mxu1 %v148_v2  ;;  %v165_v0 = vld [vmem:[%s3236_s1 + $0x420] sm:$0xff]  ;;  %v198_v2 = vld [vmem:[%s3236_s1 + $0x528] sm:$0xff] }
  0x3f   :  { %1596 = vmatpush3.msra.mxu0 %v99_v3  ;;  %1629 = vmatpush3.msra.mxu1 %v132_v5  ;;  %v180_v3 = vld [vmem:[%s3236_s1 + $0x498] sm:$0xff] }
  0x40   :  { %1597 = vmatprep.subr.mxu0 %v114_v6  ;;  %1630 = vmatprep.subr.mxu1 %v147_v7  ;;  %v164_v5 = vld [vmem:[%s3236_s1 + $0x418] sm:$0xff]  ;;  %v197_v6 = vld [vmem:[%s3236_s1 + $0x520] sm:$0xff]  ;;  %v179_v7 = vld [vmem:[%s3236_s1 + $0x490] sm:$0xff] }
  0x41   :  { %1598 = vmatpush3.msra.mxu0 %v98_v8  ;;  %1631 = vmatpush3.msra.mxu1 %v131_v9  ;;  %v418_v8 = vcombine.high %v29_v1, %v29_v1  ;;  %v212_v9 = vld [vmem:[%s3236_s1 + $0x598] sm:$0xff] }
  0x42   :  { %1599 = vmatprep.subr.mxu0 %v113_v10  ;;  %1632 = vmatprep.subr.mxu1 %v146_v12  ;;  %v163_v10 = vld [vmem:[%s3236_s1 + $0x410] sm:$0xff]  ;;  %v196_v12 = vld [vmem:[%s3236_s1 + $0x518] sm:$0xff] }
  0x43   :  { %1600 = vmatpush3.msra.mxu0 %v97_v13  ;;  %705 = vmatprep.mubr.f32.mxu0 %v416_v14  ;;  %v178_v13 = vld [vmem:[%s3236_s1 + $0x488] sm:$0xff]  ;;  %v211_v14 = vld [vmem:[%s3236_s1 + $0x590] sm:$0xff] }
  0x44   :  { %1633 = vmatpush3.msra.mxu1 %v130_v15  ;;  %706 = vmatmul.mubr.f32.vlgmr.msra.gmra.mxu0 %v408_v4  ;;  %v213_v4 = vld [vmem:[%s3236_s1 + $0x5a0] sm:$0xff]  ;;  %v162_v15 = vld [vmem:[%s3236_s1 + $0x408] sm:$0xff] }
  0x45   :  { %1634 = vmatprep.subr.mxu1 %v145_v16  ;;  %1639 = vmatprep.subr.mxu0 %v192_v17  ;;  %v195_v16 = vld [vmem:[%s3236_s1 + $0x510] sm:$0xff]  ;;  %v177_v17 = vld [vmem:[%s3236_s1 + $0x480] sm:$0xff] }
  0x46   :  { %1635 = vmatpush3.msra.mxu1 %v129_v18  ;;  %775 = vmatprep.mubr.f32.mxu1 %v417_v19  ;;  %v432_v18 = vrot.slane %v418_v8, %v2159_v48  ;;  %v210_v19 = vld [vmem:[%s3236_s1 + $0x588] sm:$0xff] }
  0x47   :  { %1640 = vmatpush3.msra.mxu0 %v176_v20  ;;  %776 = vmatmul.mubr.f32.vlgmr.msra.gmra.mxu1 %v415_v11  ;;  %v425_v11 = vrot.slane %v29_v1, %v2159_v48  ;;  %v161_v20 = vld [vmem:[%s3236_s1 + $0x400] sm:$0xff] }
  0x48   :  { %1641 = vmatprep.subr.mxu0 %v191_v21  ;;  %1674 = vmatprep.subr.mxu1 %v224_v22  ;;  %v194_v22 = vld [vmem:[%s3236_s1 + $0x508] sm:$0xff] }
  0x49   :  { %1642 = vmatpush3.msra.mxu0 %v175_v23  ;;  %1675 = vmatpush3.msra.mxu1 %v208_v24  ;;  %v433_v21 = vcombine.high %v425_v11, %v425_v11  ;;  %v209_v23 = vld [vmem:[%s3236_s1 + $0x580] sm:$0xff]  ;;  %v256_v24 = vld [vmem:[%s3236_s1 + $0x6f8] sm:$0xff] }
  0x4a   :  { %1643 = vmatprep.subr.mxu0 %v190_v25  ;;  %1676 = vmatprep.subr.mxu1 %v223_v26  ;;  %v193_v25 = vld [vmem:[%s3236_s1 + $0x500] sm:$0xff]  ;;  %v434_v26 = vcombine.high %v432_v18, %v432_v18 }
  0x4b   :  { %1644 = vmatpush3.msra.mxu0 %v174_v27  ;;  %1677 = vmatpush3.msra.mxu1 %v207_v28  ;;  %v240_v27 = vld [vmem:[%s3236_s1 + $0x678] sm:$0xff]  ;;  %v255_v28 = vld [vmem:[%s3236_s1 + $0x6f0] sm:$0xff] }
  0x4c   :  { %1645 = vmatprep.subr.mxu0 %v189_v29  ;;  %1678 = vmatprep.subr.mxu1 %v222_v30  ;;  %v288_v29 = vld [vmem:[%s3236_s1 + $0x7f8] sm:$0xff]  ;;  %v239_v30 = vld [vmem:[%s3236_s1 + $0x670] sm:$0xff] }
  0x4d   :  { %1646 = vmatpush3.msra.mxu0 %v173_v31  ;;  %1679 = vmatpush3.msra.mxu1 %v206_v32  ;;  %v272_v31 = vld [vmem:[%s3236_s1 + $0x778] sm:$0xff]  ;;  %v254_v32 = vld [vmem:[%s3236_s1 + $0x6e8] sm:$0xff] }
  0x4e   :  { %1647 = vmatprep.subr.mxu0 %v188_v33  ;;  %1680 = vmatprep.subr.mxu1 %v221_v34  ;;  %v287_v33 = vld [vmem:[%s3236_s1 + $0x7f0] sm:$0xff]  ;;  %v238_v34 = vld [vmem:[%s3236_s1 + $0x668] sm:$0xff] }
  0x4f   :  { %1648 = vmatpush3.msra.mxu0 %v172_v35  ;;  %1681 = vmatpush3.msra.mxu1 %v205_v36  ;;  %v271_v35 = vld [vmem:[%s3236_s1 + $0x770] sm:$0xff]  ;;  %v253_v36 = vld [vmem:[%s3236_s1 + $0x6e0] sm:$0xff] }
  0x50   :  { %1649 = vmatprep.subr.mxu0 %v187_v37  ;;  %1682 = vmatprep.subr.mxu1 %v220_v38  ;;  %v286_v37 = vld [vmem:[%s3236_s1 + $0x7e8] sm:$0xff]  ;;  %v237_v38 = vld [vmem:[%s3236_s1 + $0x660] sm:$0xff] }
  0x51   :  { %1650 = vmatpush3.msra.mxu0 %v171_v39  ;;  %1683 = vmatpush3.msra.mxu1 %v204_v40  ;;  %v270_v39 = vld [vmem:[%s3236_s1 + $0x768] sm:$0xff]  ;;  %v252_v40 = vld [vmem:[%s3236_s1 + $0x6d8] sm:$0xff] }
  0x52   :  { %1651 = vmatprep.subr.mxu0 %v186_v41  ;;  %1684 = vmatprep.subr.mxu1 %v219_v42  ;;  %v285_v41 = vld [vmem:[%s3236_s1 + $0x7e0] sm:$0xff]  ;;  %v236_v42 = vld [vmem:[%s3236_s1 + $0x658] sm:$0xff] }
  0x53   :  { %1652 = vmatpush3.msra.mxu0 %v170_v43  ;;  %1685 = vmatpush3.msra.mxu1 %v203_v44  ;;  %v269_v43 = vld [vmem:[%s3236_s1 + $0x760] sm:$0xff]  ;;  %v251_v44 = vld [vmem:[%s3236_s1 + $0x6d0] sm:$0xff] }
  0x54   :  { %1653 = vmatprep.subr.mxu0 %v185_v45  ;;  %1686 = vmatprep.subr.mxu1 %v218_v46  ;;  %v284_v45 = vld [vmem:[%s3236_s1 + $0x7d8] sm:$0xff]  ;;  %v235_v46 = vld [vmem:[%s3236_s1 + $0x650] sm:$0xff] }
  0x55   :  { %1654 = vmatpush3.msra.mxu0 %v169_v47  ;;  %1687 = vmatpush3.msra.mxu1 %v202_v49  ;;  %v268_v47 = vld [vmem:[%s3236_s1 + $0x758] sm:$0xff]  ;;  %v250_v49 = vld [vmem:[%s3236_s1 + $0x6c8] sm:$0xff] }
  0x56   :  { %1655 = vmatprep.subr.mxu0 %v184_v50  ;;  %1688 = vmatprep.subr.mxu1 %v217_v51  ;;  %v283_v50 = vld [vmem:[%s3236_s1 + $0x7d0] sm:$0xff]  ;;  %v234_v51 = vld [vmem:[%s3236_s1 + $0x648] sm:$0xff] }
  0x57   :  { %1656 = vmatpush3.msra.mxu0 %v168_v52  ;;  %1689 = vmatpush3.msra.mxu1 %v201_v53  ;;  %v267_v52 = vld [vmem:[%s3236_s1 + $0x750] sm:$0xff]  ;;  %v249_v53 = vld [vmem:[%s3236_s1 + $0x6c0] sm:$0xff] }
  0x58   :  { %1657 = vmatprep.subr.mxu0 %v183_v54  ;;  %1690 = vmatprep.subr.mxu1 %v216_v55  ;;  %v282_v54 = vld [vmem:[%s3236_s1 + $0x7c8] sm:$0xff]  ;;  %v233_v55 = vld [vmem:[%s3236_s1 + $0x640] sm:$0xff] }
  0x59   :  { %1658 = vmatpush3.msra.mxu0 %v167_v56  ;;  %1691 = vmatpush3.msra.mxu1 %v200_v57  ;;  %v266_v56 = vld [vmem:[%s3236_s1 + $0x748] sm:$0xff]  ;;  %v248_v57 = vld [vmem:[%s3236_s1 + $0x6b8] sm:$0xff] }
  0x5a   :  { %1659 = vmatprep.subr.mxu0 %v182_v58  ;;  %1692 = vmatprep.subr.mxu1 %v215_v59 }
  0x5b   :  { %1660 = vmatpush3.msra.mxu0 %v166_v60  ;;  %1693 = vmatpush3.msra.mxu1 %v199_v61 }
  0x5c   :  { %1661 = vmatprep.subr.mxu0 %v181_v62  ;;  %1694 = vmatprep.subr.mxu1 %v214_v63 }
  0x5d   :  { %1662 = vmatpush3.msra.mxu0 %v165_v0  ;;  %1695 = vmatpush3.msra.mxu1 %v198_v2 }
  0x5e   :  { %1663 = vmatprep.subr.mxu0 %v180_v3  ;;  %1696 = vmatprep.subr.mxu1 %v213_v4 }
  0x5f   :  { %1664 = vmatpush3.msra.mxu0 %v164_v5  ;;  %1697 = vmatpush3.msra.mxu1 %v197_v6 }
  0x60   :  { %1665 = vmatprep.subr.mxu0 %v179_v7  ;;  %1698 = vmatprep.subr.mxu1 %v212_v9 }
  0x61   :  { %1666 = vmatpush3.msra.mxu0 %v163_v10  ;;  %1699 = vmatpush3.msra.mxu1 %v196_v12 }
  0x62   :  { %1667 = vmatprep.subr.mxu0 %v178_v13  ;;  %1700 = vmatprep.subr.mxu1 %v211_v14 }
  0x63   :  { %1668 = vmatpush3.msra.mxu0 %v162_v15  ;;  %1701 = vmatpush3.msra.mxu1 %v195_v16 }
  0x64   :  { %1669 = vmatprep.subr.mxu0 %v177_v17  ;;  %1702 = vmatprep.subr.mxu1 %v210_v19 }
  0x65   :  { %1670 = vmatpush3.msra.mxu0 %v161_v20  ;;  %845 = vmatprep.mubr.f32.mxu0 %v433_v21 }
  0x66   :  { %1703 = vmatpush3.msra.mxu1 %v194_v22  ;;  %846 = vmatmul.mubr.f32.vlgmr.msra.gmra.mxu0 %v425_v11 }
  0x67   :  { %1704 = vmatprep.subr.mxu1 %v209_v23  ;;  %1709 = vmatprep.subr.mxu0 %v256_v24 }
  0x68   :  { %1705 = vmatpush3.msra.mxu1 %v193_v25  ;;  %915 = vmatprep.mubr.f32.mxu1 %v434_v26 }
  0x69   :  { %1710 = vmatpush3.msra.mxu0 %v240_v27  ;;  %916 = vmatmul.mubr.f32.vlgmr.msra.gmra.mxu1 %v432_v18 }
  0x6a   :  { %1711 = vmatprep.subr.mxu0 %v255_v28  ;;  %1744 = vmatprep.subr.mxu1 %v288_v29 }
  0x6b   :  { %1712 = vmatpush3.msra.mxu0 %v239_v30  ;;  %1745 = vmatpush3.msra.mxu1 %v272_v31 }
  0x6c   :  { %1713 = vmatprep.subr.mxu0 %v254_v32  ;;  %1746 = vmatprep.subr.mxu1 %v287_v33 }
  0x6d   :  { %1714 = vmatpush3.msra.mxu0 %v238_v34  ;;  %1747 = vmatpush3.msra.mxu1 %v271_v35 }
  0x6e   :  { %1715 = vmatprep.subr.mxu0 %v253_v36  ;;  %1748 = vmatprep.subr.mxu1 %v286_v37 }
  0x6f   :  { %1716 = vmatpush3.msra.mxu0 %v237_v38  ;;  %1749 = vmatpush3.msra.mxu1 %v270_v39 }
  0x70   :  { %1717 = vmatprep.subr.mxu0 %v252_v40  ;;  %1750 = vmatprep.subr.mxu1 %v285_v41 }
  0x71   :  { %1718 = vmatpush3.msra.mxu0 %v236_v42  ;;  %1751 = vmatpush3.msra.mxu1 %v269_v43 }
  0x72   :  { %1719 = vmatprep.subr.mxu0 %v251_v44  ;;  %1752 = vmatprep.subr.mxu1 %v284_v45 }
  0x73   :  { %1720 = vmatpush3.msra.mxu0 %v235_v46  ;;  %1753 = vmatpush3.msra.mxu1 %v268_v47 }
  0x74   :  { %1721 = vmatprep.subr.mxu0 %v250_v49  ;;  %1754 = vmatprep.subr.mxu1 %v283_v50 }
  0x75   :  { %1722 = vmatpush3.msra.mxu0 %v234_v51 }
  0x76   :  { %12 = vsyncpa [#allocation3], 0  ;;  %1755 = vmatpush3.msra.mxu1 %v267_v52  ;;  %1723 = vmatprep.subr.mxu0 %v249_v53  ;;  %v281_v58 = vld [vmem:[%s3236_s1 + $0x7c0] sm:$0xff]  ;;  %v232_v59 = vld [vmem:[%s3236_s1 + $0x638] sm:$0xff]  ;;  %vm498_vm0 = vcmask 130048   ;;  %vm1988_vm1 = vmmov 0  }
  0x77   :  { %1756 = vmatprep.subr.mxu1 %v282_v54  ;;  %1724 = vmatpush3.msra.mxu0 %v233_v55  ;;  %v265_v60 = vld [vmem:[%s3236_s1 + $0x740] sm:$0xff]  ;;  %v247_v61 = vld [vmem:[%s3236_s1 + $0x6b0] sm:$0xff]  ;;  %v280_v62 = vld [vmem:[%s3236_s1 + $0x7b8] sm:$0xff]  ;;  %vm1299_vm2 = vcmask 982016   ;;  %s1989_s30 = smov [#allocation2]   ;;  %vm1474_vm3 = vcmask 123904  }
  0x78   :  { %1757 = vmatpush3.msra.mxu1 %v266_v56  ;;  %1725 = vmatprep.subr.mxu0 %v248_v57  ;;  %v231_v63 = vld [vmem:[%s3236_s1 + $0x630] sm:$0xff]  ;;  %v264_v0 = vld [vmem:[%s3236_s1 + $0x738] sm:$0xff]  ;;  %v246_v1 = vld [vmem:[%s3236_s1 + $0x6a8] sm:$0xff]  ;;  %s1482_s8 = sshll.u32 %s1989_s30, 4  ;;  %s1483_s8 = int_to_ptr.vmem [resolvable:$true] %s1482_s8 }
  0x79   :  { %1758 = vmatprep.subr.mxu1 %v281_v58  ;;  %1726 = vmatpush3.msra.mxu0 %v232_v59  ;;  %v279_v2 = vld [vmem:[%s3236_s1 + $0x7b0] sm:$0xff]  ;;  %v230_v3 = vld [vmem:[%s3236_s1 + $0x628] sm:$0xff]  ;;  %v245_v5 = vld [vmem:[%s3236_s1 + $0x6a0] sm:$0xff]  ;;  %p1969_p1 = scmp.lt.s32.totalorder %s1483_s8, %s1483_s8 }
  0x7a   :  { %1759 = vmatpush3.msra.mxu1 %v265_v60  ;;  %1727 = vmatprep.subr.mxu0 %v247_v61  ;;  %v263_v4 = vld [vmem:[%s3236_s1 + $0x730] sm:$0xff]  ;;  %v278_v6 = vld [vmem:[%s3236_s1 + $0x7a8] sm:$0xff]  ;;  %v229_v7 = vld [vmem:[%s3236_s1 + $0x620] sm:$0xff] }
  0x7b   :  { %1760 = vmatprep.subr.mxu1 %v280_v62  ;;  %1728 = vmatpush3.msra.mxu0 %v231_v63  ;;  %v30_v8 = vld [vmem:[%s3235_s0 + $0x18] sm:$0xff]  ;;  %v262_v9 = vld [vmem:[%s3236_s1 + $0x728] sm:$0xff]  ;;  %v277_v11 = vld [vmem:[%s3236_s1 + $0x7a0] sm:$0xff] }
  0x7c   :  { %1761 = vmatpush3.msra.mxu1 %v264_v0  ;;  %1729 = vmatprep.subr.mxu0 %v246_v1  ;;  %v244_v10 = vld [vmem:[%s3236_s1 + $0x698] sm:$0xff]  ;;  %v261_v13 = vld [vmem:[%s3236_s1 + $0x720] sm:$0xff]  ;;  %v243_v14 = vld [vmem:[%s3236_s1 + $0x690] sm:$0xff]  ;;  %v435_v15 = vcombine.high %v30_v8, %v30_v8  ;;  %v442_v18 = vrot.slane %v30_v8, %v2159_v48 }
  0x7d   :  { %1762 = vmatprep.subr.mxu1 %v279_v2  ;;  %1730 = vmatpush3.msra.mxu0 %v230_v3  ;;  %v228_v12 = vld [vmem:[%s3236_s1 + $0x618] sm:$0xff]  ;;  %v227_v17 = vld [vmem:[%s3236_s1 + $0x610] sm:$0xff]  ;;  %v242_v20 = vld [vmem:[%s3236_s1 + $0x688] sm:$0xff] }
  0x7e   :  { %1763 = vmatpush3.msra.mxu1 %v263_v4  ;;  %1731 = vmatprep.subr.mxu0 %v245_v5  ;;  %v276_v16 = vld [vmem:[%s3236_s1 + $0x798] sm:$0xff]  ;;  %v275_v21 = vld [vmem:[%s3236_s1 + $0x790] sm:$0xff]  ;;  %v226_v22 = vld [vmem:[%s3236_s1 + $0x608] sm:$0xff]  ;;  %v449_v25 = vrot.slane %v435_v15, %v2159_v48  ;;  %v450_v28 = vcombine.high %v442_v18, %v442_v18 }
  0x7f   :  { %1764 = vmatprep.subr.mxu1 %v278_v6  ;;  %1732 = vmatpush3.msra.mxu0 %v229_v7  ;;  %v260_v19 = vld [vmem:[%s3236_s1 + $0x718] sm:$0xff]  ;;  %v259_v23 = vld [vmem:[%s3236_s1 + $0x710] sm:$0xff]  ;;  %v241_v24 = vld [vmem:[%s3236_s1 + $0x680] sm:$0xff] }
  0x80   :  { %1765 = vmatpush3.msra.mxu1 %v262_v9  ;;  %1733 = vmatprep.subr.mxu0 %v244_v10  ;;  %v274_v26 = vld [vmem:[%s3236_s1 + $0x788] sm:$0xff]  ;;  %v225_v27 = vld [vmem:[%s3236_s1 + $0x600] sm:$0xff]  ;;  %v320_v31 = vld [vmem:[%s3236_s1 + $0x8f8] sm:$0xff]  ;;  %v451_v33 = vcombine.high %v449_v25, %v449_v25 }
  0x81   :  { %1766 = vmatprep.subr.mxu1 %v277_v11  ;;  %1734 = vmatpush3.msra.mxu0 %v228_v12  ;;  %v258_v29 = vld [vmem:[%s3236_s1 + $0x708] sm:$0xff]  ;;  %v273_v30 = vld [vmem:[%s3236_s1 + $0x780] sm:$0xff]  ;;  %v304_v34 = vld [vmem:[%s3236_s1 + $0x878] sm:$0xff] }
  0x82   :  { %1767 = vmatpush3.msra.mxu1 %v261_v13  ;;  %1735 = vmatprep.subr.mxu0 %v243_v14  ;;  %v257_v32 = vld [vmem:[%s3236_s1 + $0x700] sm:$0xff]  ;;  %v319_v35 = vld [vmem:[%s3236_s1 + $0x8f0] sm:$0xff]  ;;  %v352_v36 = vld [vmem:[%s3236_s1 + $0x9f8] sm:$0xff] }
  0x83   :  { %1768 = vmatprep.subr.mxu1 %v276_v16  ;;  %1736 = vmatpush3.msra.mxu0 %v227_v17  ;;  %v303_v37 = vld [vmem:[%s3236_s1 + $0x870] sm:$0xff]  ;;  %v336_v38 = vld [vmem:[%s3236_s1 + $0x978] sm:$0xff]  ;;  %v318_v39 = vld [vmem:[%s3236_s1 + $0x8e8] sm:$0xff] }
  0x84   :  { %1769 = vmatpush3.msra.mxu1 %v260_v19  ;;  %1737 = vmatprep.subr.mxu0 %v242_v20  ;;  %v351_v40 = vld [vmem:[%s3236_s1 + $0x9f0] sm:$0xff]  ;;  %v302_v41 = vld [vmem:[%s3236_s1 + $0x868] sm:$0xff]  ;;  %v317_v43 = vld [vmem:[%s3236_s1 + $0x8e0] sm:$0xff] }
  0x85   :  { %1770 = vmatprep.subr.mxu1 %v275_v21  ;;  %1738 = vmatpush3.msra.mxu0 %v226_v22  ;;  %v335_v42 = vld [vmem:[%s3236_s1 + $0x970] sm:$0xff]  ;;  %v350_v44 = vld [vmem:[%s3236_s1 + $0x9e8] sm:$0xff]  ;;  %v301_v45 = vld [vmem:[%s3236_s1 + $0x860] sm:$0xff] }
  0x86   :  { %1771 = vmatpush3.msra.mxu1 %v259_v23  ;;  %1739 = vmatprep.subr.mxu0 %v241_v24  ;;  %v334_v46 = vld [vmem:[%s3236_s1 + $0x968] sm:$0xff]  ;;  %v316_v47 = vld [vmem:[%s3236_s1 + $0x8d8] sm:$0xff]  ;;  %v349_v49 = vld [vmem:[%s3236_s1 + $0x9e0] sm:$0xff] }
  0x87   :  { %1772 = vmatprep.subr.mxu1 %v274_v26  ;;  %1740 = vmatpush3.msra.mxu0 %v225_v27  ;;  %v300_v50 = vld [vmem:[%s3236_s1 + $0x858] sm:$0xff]  ;;  %v333_v51 = vld [vmem:[%s3236_s1 + $0x960] sm:$0xff]  ;;  %v315_v52 = vld [vmem:[%s3236_s1 + $0x8d0] sm:$0xff] }
  0x88   :  { %985 = vmatprep.mubr.f32.mxu0 %v450_v28  ;;  %1773 = vmatpush3.msra.mxu1 %v258_v29  ;;  %v348_v53 = vld [vmem:[%s3236_s1 + $0x9d8] sm:$0xff]  ;;  %v299_v54 = vld [vmem:[%s3236_s1 + $0x850] sm:$0xff]  ;;  %v314_v56 = vld [vmem:[%s3236_s1 + $0x8c8] sm:$0xff] }
  0x89   :  { %986 = vmatmul.mubr.f32.vlgmr.msra.gmra.mxu0 %v442_v18  ;;  %1774 = vmatprep.subr.mxu1 %v273_v30  ;;  %v332_v55 = vld [vmem:[%s3236_s1 + $0x958] sm:$0xff]  ;;  %v347_v57 = vld [vmem:[%s3236_s1 + $0x9d0] sm:$0xff]  ;;  %v298_v58 = vld [vmem:[%s3236_s1 + $0x848] sm:$0xff] }
  0x8a   :  { %1779 = vmatprep.subr.mxu0 %v320_v31  ;;  %1775 = vmatpush3.msra.mxu1 %v257_v32  ;;  %v331_v59 = vld [vmem:[%s3236_s1 + $0x950] sm:$0xff]  ;;  %v313_v60 = vld [vmem:[%s3236_s1 + $0x8c0] sm:$0xff]  ;;  %v346_v61 = vld [vmem:[%s3236_s1 + $0x9c8] sm:$0xff] }
  0x8b   :  { %1055 = vmatprep.mubr.f32.mxu1 %v451_v33  ;;  %1780 = vmatpush3.msra.mxu0 %v304_v34  ;;  %v297_v62 = vld [vmem:[%s3236_s1 + $0x840] sm:$0xff]  ;;  %v330_v63 = vld [vmem:[%s3236_s1 + $0x948] sm:$0xff]  ;;  %v312_v0 = vld [vmem:[%s3236_s1 + $0x8b8] sm:$0xff] }
  0x8c   :  { %1056 = vmatmul.mubr.f32.vlgmr.msra.gmra.mxu1 %v449_v25  ;;  %1781 = vmatprep.subr.mxu0 %v319_v35  ;;  %v345_v1 = vld [vmem:[%s3236_s1 + $0x9c0] sm:$0xff]  ;;  %v296_v2 = vld [vmem:[%s3236_s1 + $0x838] sm:$0xff]  ;;  %v311_v4 = vld [vmem:[%s3236_s1 + $0x8b0] sm:$0xff] }
  0x8d   :  { %1814 = vmatprep.subr.mxu1 %v352_v36  ;;  %1782 = vmatpush3.msra.mxu0 %v303_v37  ;;  %v329_v3 = vld [vmem:[%s3236_s1 + $0x940] sm:$0xff]  ;;  %v344_v5 = vld [vmem:[%s3236_s1 + $0x9b8] sm:$0xff]  ;;  %v295_v6 = vld [vmem:[%s3236_s1 + $0x830] sm:$0xff] }
  0x8e   :  { %1815 = vmatpush3.msra.mxu1 %v336_v38  ;;  %1783 = vmatprep.subr.mxu0 %v318_v39  ;;  %v328_v7 = vld [vmem:[%s3236_s1 + $0x938] sm:$0xff]  ;;  %v310_v8 = vld [vmem:[%s3236_s1 + $0x8a8] sm:$0xff]  ;;  %v343_v9 = vld [vmem:[%s3236_s1 + $0x9b0] sm:$0xff] }
  0x8f   :  { %1816 = vmatprep.subr.mxu1 %v351_v40  ;;  %1784 = vmatpush3.msra.mxu0 %v302_v41  ;;  %v294_v10 = vld [vmem:[%s3236_s1 + $0x828] sm:$0xff]  ;;  %v327_v11 = vld [vmem:[%s3236_s1 + $0x930] sm:$0xff]  ;;  %v309_v12 = vld [vmem:[%s3236_s1 + $0x8a0] sm:$0xff] }
  0x90   :  { %1817 = vmatpush3.msra.mxu1 %v335_v42  ;;  %1785 = vmatprep.subr.mxu0 %v317_v43  ;;  %v342_v13 = vld [vmem:[%s3236_s1 + $0x9a8] sm:$0xff]  ;;  %v293_v14 = vld [vmem:[%s3236_s1 + $0x820] sm:$0xff]  ;;  %v308_v17 = vld [vmem:[%s3236_s1 + $0x898] sm:$0xff]  ;;  %v1987_v42 = vmov 0.0  }
  0x91   :  { %1818 = vmatprep.subr.mxu1 %v350_v44  ;;  %1786 = vmatpush3.msra.mxu0 %v301_v45  ;;  %v31_v15 = vld [vmem:[%s3235_s0 + $0x20] sm:$0xff]  ;;  %v326_v16 = vld [vmem:[%s3236_s1 + $0x928] sm:$0xff]  ;;  %v292_v19 = vld [vmem:[%s3236_s1 + $0x818] sm:$0xff] }
  0x92   :  { %1819 = vmatpush3.msra.mxu1 %v334_v46  ;;  %1787 = vmatprep.subr.mxu0 %v316_v47  ;;  %v341_v18 = vld [vmem:[%s3236_s1 + $0x9a0] sm:$0xff]  ;;  %v307_v21 = vld [vmem:[%s3236_s1 + $0x890] sm:$0xff]  ;;  %v452_v22 = vcombine.high %v31_v15, %v31_v15  ;;  %v340_v23 = vld [vmem:[%s3236_s1 + $0x998] sm:$0xff]  ;;  %v459_v25 = vrot.slane %v31_v15, %v2159_v48 }
  0x93   :  { %1820 = vmatprep.subr.mxu1 %v349_v49  ;;  %1788 = vmatpush3.msra.mxu0 %v300_v50  ;;  %v325_v20 = vld [vmem:[%s3236_s1 + $0x920] sm:$0xff]  ;;  %v291_v24 = vld [vmem:[%s3236_s1 + $0x810] sm:$0xff]  ;;  %v324_v26 = vld [vmem:[%s3236_s1 + $0x918] sm:$0xff] }
  0x94   :  { %1821 = vmatpush3.msra.mxu1 %v333_v51  ;;  %1789 = vmatprep.subr.mxu0 %v315_v52  ;;  %v306_v27 = vld [vmem:[%s3236_s1 + $0x888] sm:$0xff]  ;;  %v339_v28 = vld [vmem:[%s3236_s1 + $0x990] sm:$0xff]  ;;  %v305_v31 = vld [vmem:[%s3236_s1 + $0x880] sm:$0xff]  ;;  %v466_v32 = vrot.slane %v452_v22, %v2159_v48  ;;  %v467_v35 = vcombine.high %v459_v25, %v459_v25 }
  0x95   :  { %1822 = vmatprep.subr.mxu1 %v348_v53  ;;  %1790 = vmatpush3.msra.mxu0 %v299_v54  ;;  %v290_v29 = vld [vmem:[%s3236_s1 + $0x808] sm:$0xff]  ;;  %v323_v30 = vld [vmem:[%s3236_s1 + $0x910] sm:$0xff]  ;;  %v289_v34 = vld [vmem:[%s3236_s1 + $0x800] sm:$0xff] }
  0x96   :  { %1823 = vmatpush3.msra.mxu1 %v332_v55  ;;  %1791 = vmatprep.subr.mxu0 %v314_v56  ;;  %v338_v33 = vld [vmem:[%s3236_s1 + $0x988] sm:$0xff]  ;;  %v337_v48 = vld [vmem:[%s3236_s1 + $0x980] sm:$0xff]  ;;  %v468_v39 = vcombine.high %v466_v32, %v466_v32  ;;  %v368_v40 = vld [vmem:[%s3236_s1 + $0xa78] sm:$0xff] }
  0x97   :  { %1824 = vmatprep.subr.mxu1 %v347_v57  ;;  %1792 = vmatpush3.msra.mxu0 %v298_v58  ;;  %v322_v36 = vld [vmem:[%s3236_s1 + $0x908] sm:$0xff]  ;;  %v321_v38 = vld [vmem:[%s3236_s1 + $0x900] sm:$0xff]  ;;  %v367_v43 = vld [vmem:[%s3236_s1 + $0xa70] sm:$0xff] }
  0x98   :  { %1825 = vmatpush3.msra.mxu1 %v331_v59  ;;  %1793 = vmatprep.subr.mxu0 %v313_v60  ;;  %v3017_v37 = vld.sshfl [vmem:[%s3235_s0 + $0x28] sm:$0x33 pattern:$0x76325410]  ;;  %v365_v45 = vld [vmem:[%s3236_s1 + $0xa60] sm:$0xff]  ;;  %v364_v46 = vld [vmem:[%s3236_s1 + $0xa58] sm:$0xff] }
  0x99   :  { %1826 = vmatprep.subr.mxu1 %v346_v61  ;;  %1794 = vmatpush3.msra.mxu0 %v297_v62  ;;  %v476_v41 = vcombine.high %v3017_v37, %v3017_v37  ;;  %v366_v44 = vld [vmem:[%s3236_s1 + $0xa68] sm:$0xff]  ;;  %v363_v47 = vld [vmem:[%s3236_s1 + $0xa50] sm:$0xff]  ;;  %v361_v50 = vld [vmem:[%s3236_s1 + $0xa40] sm:$0xff] }
  0x9a   :  { %1827 = vmatpush3.msra.mxu1 %v330_v63  ;;  %1795 = vmatprep.subr.mxu0 %v312_v0  ;;  %v362_v49 = vld [vmem:[%s3236_s1 + $0xa48] sm:$0xff]  ;;  %v360_v51 = vld [vmem:[%s3236_s1 + $0xa38] sm:$0xff]  ;;  %v359_v52 = vld [vmem:[%s3236_s1 + $0xa30] sm:$0xff] }
  0x9b   :  { %1828 = vmatprep.subr.mxu1 %v345_v1  ;;  %1796 = vmatpush3.msra.mxu0 %v296_v2  ;;  %v358_v53 = vld [vmem:[%s3236_s1 + $0xa28] sm:$0xff]  ;;  %v357_v54 = vld [vmem:[%s3236_s1 + $0xa20] sm:$0xff]  ;;  %v356_v55 = vld [vmem:[%s3236_s1 + $0xa18] sm:$0xff] }
  0x9c   :  { %1829 = vmatpush3.msra.mxu1 %v329_v3  ;;  %1797 = vmatprep.subr.mxu0 %v311_v4  ;;  %v355_v56 = vld [vmem:[%s3236_s1 + $0xa10] sm:$0xff]  ;;  %v354_v57 = vld [vmem:[%s3236_s1 + $0xa08] sm:$0xff]  ;;  %v353_v58 = vld [vmem:[%s3236_s1 + $0xa00] sm:$0xff] }
  0x9d   :  { %1830 = vmatprep.subr.mxu1 %v344_v5  ;;  %1798 = vmatpush3.msra.mxu0 %v295_v6  ;;  %v370_v59 = vld [vmem:[%s3236_s1 + $0xa88] sm:$0xff]  ;;  %v369_v60 = vld [vmem:[%s3236_s1 + $0xa80] sm:$0xff]  ;;  %v1291_v61 = vld [vmem:[%s3238_s3 + $0x70] sm:$0xff] }
  0x9e   :  { %1831 = vmatpush3.msra.mxu1 %v328_v7  ;;  %1799 = vmatprep.subr.mxu0 %v310_v8  ;;  %v1290_v62 = vld [vmem:[%s3238_s3 + $0x68] sm:$0xff]  ;;  %v1289_v63 = vld [vmem:[%s3238_s3 + $0x60] sm:$0xff]  ;;  %v1288_v0 = vld [vmem:[%s3238_s3 + $0x58] sm:$0xff] }
  0x9f   :  { %1832 = vmatprep.subr.mxu1 %v343_v9  ;;  %1800 = vmatpush3.msra.mxu0 %v294_v10  ;;  %v1287_v1 = vld [vmem:[%s3238_s3 + $0x50] sm:$0xff]  ;;  %v1286_v2 = vld [vmem:[%s3238_s3 + $0x48] sm:$0xff]  ;;  %v1285_v3 = vld [vmem:[%s3238_s3 + $0x40] sm:$0xff] }
  0xa0   :  { %1833 = vmatpush3.msra.mxu1 %v327_v11  ;;  %1801 = vmatprep.subr.mxu0 %v309_v12  ;;  %v1284_v4 = vld [vmem:[%s3238_s3 + $0x38] sm:$0xff]  ;;  %v1283_v5 = vld [vmem:[%s3238_s3 + $0x30] sm:$0xff]  ;;  %v1282_v6 = vld [vmem:[%s3238_s3 + $0x28] sm:$0xff] }
  0xa1   :  { %1834 = vmatprep.subr.mxu1 %v342_v13  ;;  %1802 = vmatpush3.msra.mxu0 %v293_v14  ;;  %v1281_v7 = vld [vmem:[%s3238_s3 + $0x20] sm:$0xff]  ;;  %v1280_v8 = vld [vmem:[%s3238_s3 + $0x18] sm:$0xff]  ;;  %v1279_v9 = vld [vmem:[%s3238_s3 + $0x10] sm:$0xff] }
  0xa2   :  { %1835 = vmatpush3.msra.mxu1 %v326_v16  ;;  %1803 = vmatprep.subr.mxu0 %v308_v17  ;;  %v1278_v10 = vld [vmem:[%s3238_s3 + $0x8] sm:$0xff]  ;;  %v1277_v11 = vld [vmem:[%s3238_s3] sm:$0xff] }
  0xa3   :  { %1836 = vmatprep.subr.mxu1 %v341_v18  ;;  %1804 = vmatpush3.msra.mxu0 %v292_v19  ;;  %v1490_v17 = vld [vmem:[%s3237_s2] ss:$0 sm:$0xff] }
  0xa4   :  { %1837 = vmatpush3.msra.mxu1 %v325_v20  ;;  %1805 = vmatprep.subr.mxu0 %v307_v21 }
  0xa5   :  { %1838 = vmatprep.subr.mxu1 %v340_v23  ;;  %1806 = vmatpush3.msra.mxu0 %v291_v24 }
  0xa6   :  { %1839 = vmatpush3.msra.mxu1 %v324_v26  ;;  %1807 = vmatprep.subr.mxu0 %v306_v27 }
  0xa7   :  { %1840 = vmatprep.subr.mxu1 %v339_v28  ;;  %1808 = vmatpush3.msra.mxu0 %v290_v29 }
  0xa8   :  { %1841 = vmatpush3.msra.mxu1 %v323_v30  ;;  %1809 = vmatprep.subr.mxu0 %v305_v31 }
  0xa9   :  { %1842 = vmatprep.subr.mxu1 %v338_v33  ;;  %1810 = vmatpush3.msra.mxu0 %v289_v34 }
  0xaa   :  { %1125 = vmatprep.mubr.f32.mxu0 %v467_v35  ;;  %1843 = vmatpush3.msra.mxu1 %v322_v36 }
  0xab   :  { %1126 = vmatmul.mubr.f32.vlgmr.msra.gmra.mxu0 %v459_v25  ;;  %1844 = vmatprep.subr.mxu1 %v337_v48 }
  0xac   :  { %1201 = vmatprep.subr.mxu0 %v1987_v42  ;;  %1845 = vmatpush3.msra.mxu1 %v321_v38 }
  0xad   :  { %1195 = vmatprep.mubr.f32.mxu1 %v468_v39  ;;  %1202 = vmatpush1.msra.mxu0 %v368_v40 }
  0xae   :  { %1196 = vmatmul.mubr.f32.vlgmr.msra.gmra.mxu1 %v466_v32  ;;  %1203 = vmatprep.subr.mxu0 %v1987_v42 }
  0xaf   :  { %1204 = vmatpush1.msra.mxu0 %v367_v43  ;;  %1492 = vmatprep.mubr.msk.f32.mxu0 %vm498_vm0, %v476_v41 }
  0xb0   :  { %1205 = vmatprep.subr.mxu0 %v1987_v42  ;;  %1881 = vmatprep.subr.mxu1 %v1987_v42 }
  0xb1   :  { %1206 = vmatpush1.msra.mxu0 %v366_v44  ;;  %1882 = vmatpush3.msra.mxu1 %v1291_v61  ;;  %v1393_v61 = vld [vmem:[%s3240_s5 + $0x70] sm:$0xff] }
  0xb2   :  { %1207 = vmatprep.subr.mxu0 %v1987_v42  ;;  %1883 = vmatprep.subr.mxu1 %v1987_v42 }
  0xb3   :  { %1208 = vmatpush1.msra.mxu0 %v365_v45  ;;  %1884 = vmatpush3.msra.mxu1 %v1290_v62  ;;  %v1392_v62 = vld [vmem:[%s3240_s5 + $0x68] sm:$0xff] }
  0xb4   :  { %1209 = vmatprep.subr.mxu0 %v1987_v42  ;;  %1885 = vmatprep.subr.mxu1 %v1987_v42 }
  0xb5   :  { %1210 = vmatpush1.msra.mxu0 %v364_v46  ;;  %1886 = vmatpush3.msra.mxu1 %v1289_v63  ;;  %v1391_v63 = vld [vmem:[%s3240_s5 + $0x60] sm:$0xff] }
  0xb6   :  { %1211 = vmatprep.subr.mxu0 %v1987_v42  ;;  %1887 = vmatprep.subr.mxu1 %v1987_v42 }
  0xb7   :  { %1212 = vmatpush1.msra.mxu0 %v363_v47  ;;  %1888 = vmatpush3.msra.mxu1 %v1288_v0  ;;  %v1390_v0 = vld [vmem:[%s3240_s5 + $0x58] sm:$0xff] }
  0xb8   :  { %1213 = vmatprep.subr.mxu0 %v1987_v42  ;;  %1889 = vmatprep.subr.mxu1 %v1987_v42 }
  0xb9   :  { %1214 = vmatpush1.msra.mxu0 %v362_v49  ;;  %1890 = vmatpush3.msra.mxu1 %v1287_v1  ;;  %v1389_v1 = vld [vmem:[%s3240_s5 + $0x50] sm:$0xff] }
  0xba   :  { %1215 = vmatprep.subr.mxu0 %v1987_v42  ;;  %1891 = vmatprep.subr.mxu1 %v1987_v42 }
  0xbb   :  { %1216 = vmatpush1.msra.mxu0 %v361_v50  ;;  %1892 = vmatpush3.msra.mxu1 %v1286_v2  ;;  %v1388_v2 = vld [vmem:[%s3240_s5 + $0x48] sm:$0xff] }
  0xbc   :  { %1217 = vmatprep.subr.mxu0 %v1987_v42  ;;  %1893 = vmatprep.subr.mxu1 %v1987_v42 }
  0xbd   :  { %1218 = vmatpush1.msra.mxu0 %v360_v51  ;;  %1894 = vmatpush3.msra.mxu1 %v1285_v3  ;;  %v1387_v3 = vld [vmem:[%s3240_s5 + $0x40] sm:$0xff] }
  0xbe   :  { %1219 = vmatprep.subr.mxu0 %v1987_v42  ;;  %1895 = vmatprep.subr.mxu1 %v1987_v42 }
  0xbf   :  { %1220 = vmatpush1.msra.mxu0 %v359_v52  ;;  %1896 = vmatpush3.msra.mxu1 %v1284_v4  ;;  %v1386_v4 = vld [vmem:[%s3240_s5 + $0x38] sm:$0xff] }
  0xc0   :  { %1221 = vmatprep.subr.mxu0 %v1987_v42  ;;  %1897 = vmatprep.subr.mxu1 %v1987_v42 }
  0xc1   :  { %1222 = vmatpush1.msra.mxu0 %v358_v53  ;;  %1898 = vmatpush3.msra.mxu1 %v1283_v5  ;;  %v1385_v5 = vld [vmem:[%s3240_s5 + $0x30] sm:$0xff] }
  0xc2   :  { %1223 = vmatprep.subr.mxu0 %v1987_v42  ;;  %1911 = vmatprep.mubr.msk.f32.mxu1 %vm1988_vm1, %v1987_v42 }
  0xc3   :  { %1224 = vmatpush1.msra.mxu0 %v357_v54  ;;  %1899 = vmatprep.subr.mxu1 %v1987_v42 }
  0xc4   :  { %1225 = vmatprep.subr.mxu0 %v1987_v42  ;;  %1900 = vmatpush3.msra.mxu1 %v1282_v6  ;;  %v1384_v6 = vld [vmem:[%s3240_s5 + $0x28] sm:$0xff] }
  0xc5   :  { %1226 = vmatpush1.msra.mxu0 %v356_v55  ;;  %1901 = vmatprep.subr.mxu1 %v1987_v42 }
  0xc6   :  { %1227 = vmatprep.subr.mxu0 %v1987_v42  ;;  %1902 = vmatpush3.msra.mxu1 %v1281_v7  ;;  %v1383_v7 = vld [vmem:[%s3240_s5 + $0x20] sm:$0xff] }
  0xc7   :  { %1228 = vmatpush1.msra.mxu0 %v355_v56  ;;  %1903 = vmatprep.subr.mxu1 %v1987_v42 }
  0xc8   :  { %1229 = vmatprep.subr.mxu0 %v1987_v42  ;;  %1904 = vmatpush3.msra.mxu1 %v1280_v8  ;;  %v1382_v8 = vld [vmem:[%s3240_s5 + $0x18] sm:$0xff] }
  0xc9   :  { %1230 = vmatpush1.msra.mxu0 %v354_v57  ;;  %1905 = vmatprep.subr.mxu1 %v1987_v42 }
  0xca   :  { %1231 = vmatprep.subr.mxu0 %v1987_v42  ;;  %1906 = vmatpush3.msra.mxu1 %v1279_v9  ;;  %v1381_v9 = vld [vmem:[%s3240_s5 + $0x10] sm:$0xff] }
  0xcb   :  { %1232 = vmatpush1.msra.mxu0 %v353_v58  ;;  %1907 = vmatprep.subr.mxu1 %v1987_v42 }
  0xcc   :  { %1261 = vmatprep.subr.mxu0 %v1987_v42  ;;  %1908 = vmatpush3.msra.mxu1 %v1278_v10  ;;  %v1380_v10 = vld [vmem:[%s3240_s5 + $0x8] sm:$0xff] }
  0xcd   :  { %1262 = vmatpush2.msra.mxu0 %v370_v59  ;;  %1909 = vmatprep.subr.mxu1 %v1987_v42 }
  0xce   :  { %1263 = vmatprep.subr.mxu0 %v1987_v42  ;;  %1910 = vmatpush3.msra.mxu1 %v1277_v11  ;;  %v1379_v11 = vld [vmem:[%s3240_s5] sm:$0xff] }
  0xcf   :  { %1264 = vmatpush2.msra.mxu0 %v369_v60  ;;  %1914 = vmatprep.subr.mxu1 %v1987_v42 }
  0xd0   :  { %1266 = vmatmul.mubr.f32.vlgmr.msra.gmra.mxu0 %v3017_v37 }
  0xe2   :  { %v1531_v12 = vpop.f32.mrf.mxu0 }
  0xe4   :  { %v1532_v13 = vpop.f32.mrf.mxu0 }
  0xe5   :  { %v1566_v14 = vpop.f32.mrf.mxu1  ;;  %v1533_v16 = vadd.f32 %v1532_v13, %v1531_v12  ;;  %v1494_v12 = vld [vmem:[%s3239_s4] ss:$0 sm:$0xff]  ;;  %s1964_s4 = scalar_lea.vmem %s1483_s8, 32 }
  0xe6   :  { %p1965_p0 = scmp.ne.s32.totalorder %s1483_s8, %s1964_s4  ;;  %p1970_p2 = scmp.lt.s32.totalorder %s1964_s4, %s1964_s4 }
  0xe7   :  { %v1567_v18 = vpop.f32.mrf.mxu1  ;;  %v568_v21 = vadd.f32 %v1533_v16, %v1490_v17 }
  0xe8   :  { %v1568_v22 = vadd.f32 %v1567_v18, %v1566_v14  ;;  %p1971_p3 = por %p1970_p2, %p1969_p1 }
  0xea   :  { %v638_v26 = vadd.f32 %v1568_v22, %v568_v21  ;;  %p1972_p4 = pnand %p1971_p3, %p1965_p0 }
 0x104   :  { %v1601_v15 = vpop.f32.mrf.mxu0 }
 0x106   :  { %v1602_v19 = vpop.f32.mrf.mxu0 }
 0x107   :  { %v1636_v20 = vpop.f32.mrf.mxu1  ;;  %v1603_v24 = vadd.f32 %v1602_v19, %v1601_v15 }
 0x109   :  { %v1637_v25 = vpop.f32.mrf.mxu1  ;;  %v708_v29 = vadd.f32 %v1603_v24, %v638_v26 }
 0x10a   :  { %v1638_v30 = vadd.f32 %v1637_v25, %v1636_v20 }
 0x10c   :  { %v778_v34 = vadd.f32 %v1638_v30, %v708_v29 }
 0x126   :  { %v1671_v23 = vpop.f32.mrf.mxu0 }
 0x128   :  { %v1672_v27 = vpop.f32.mrf.mxu0 }
 0x129   :  { %v1706_v28 = vpop.f32.mrf.mxu1  ;;  %v1673_v32 = vadd.f32 %v1672_v27, %v1671_v23 }
 0x12b   :  { %v1707_v33 = vpop.f32.mrf.mxu1  ;;  %v848_v48 = vadd.f32 %v1673_v32, %v778_v34 }
 0x12c   :  { %v1708_v37 = vadd.f32 %v1707_v33, %v1706_v28 }
 0x12e   :  { %v918_v41 = vadd.f32 %v1708_v37, %v848_v48 }
 0x149   :  { %v1741_v31 = vpop.f32.mrf.mxu0 }
 0x14b   :  { %v1742_v35 = vpop.f32.mrf.mxu0 }
 0x14c   :  { %v1776_v36 = vpop.f32.mrf.mxu1  ;;  %v1743_v39 = vadd.f32 %v1742_v35, %v1741_v31 }
 0x14e   :  { %v1777_v40 = vpop.f32.mrf.mxu1  ;;  %v988_v45 = vadd.f32 %v1743_v39, %v918_v41 }
 0x14f   :  { %v1778_v46 = vadd.f32 %v1777_v40, %v1776_v36 }
 0x151   :  { %v1058_v50 = vadd.f32 %v1778_v46, %v988_v45 }
 0x16b   :  { %v1811_v38 = vpop.f32.mrf.mxu0 }
 0x16d   :  { %v1812_v43 = vpop.f32.mrf.mxu0 }
 0x16e   :  { %v1846_v44 = vpop.f32.mrf.mxu1  ;;  %v1813_v47 = vadd.f32 %v1812_v43, %v1811_v38 }
 0x170   :  { %v1847_v49 = vpop.f32.mrf.mxu1  ;;  %v1128_v51 = vadd.f32 %v1813_v47, %v1058_v50 }
 0x171   :  { %v1848_v52 = vadd.f32 %v1847_v49, %v1846_v44 }
 0x173   :  { %v1198_v53 = vadd.f32 %v1848_v52, %v1128_v51 }
 0x190   :  { %v1267_v54 = vpop.f32.mrf.mxu0 }
 0x191   :  { %v1268_v55 = vadd.f32 %v1267_v54, %v1198_v53 }
 0x192   :  { %v1269_v56 = vpop.f32.mrf.mxu0 }
 0x193   :  { %v1493_v57 = vmul.f32 -1.442695, %v1268_v55 }
 0x195   :  { %1956 = vpow2.f32 %v1493_v57 }
 0x1a2   :  { %v1957_v58 = vpop.eup %1956 }
 0x1a3   :  { %v1274_v59 = vadd.f32 1.0, %v1957_v58 }
 0x1a5   :  { %1958 = vrcp.f32 %v1274_v59 }
 0x1b2   :  { %v1959_v60 = vpop.eup %1958 }
 0x1b3   :  { %1912 = vmatmul.mubr.msk.f32.vlgmr.msra.gmra.mxu1 %vm1299_vm2, %v1959_v60 }
 0x1b4   :  { %1944 = vmatprep.mubr.msk.f32.mxu1 %vm1988_vm1, %v1987_v42  ;;  %1915 = vmatpush3.msra.mxu1 %v1393_v61 }
 0x1b5   :  { %1916 = vmatprep.subr.mxu1 %v1987_v42 }
 0x1b6   :  { %1917 = vmatpush3.msra.mxu1 %v1392_v62 }
 0x1b7   :  { %1918 = vmatprep.subr.mxu1 %v1987_v42 }
 0x1b8   :  { %1919 = vmatpush3.msra.mxu1 %v1391_v63 }
 0x1b9   :  { %1920 = vmatprep.subr.mxu1 %v1987_v42 }
 0x1ba   :  { %1921 = vmatpush3.msra.mxu1 %v1390_v0 }
 0x1bb   :  { %1922 = vmatprep.subr.mxu1 %v1987_v42 }
 0x1bc   :  { %1923 = vmatpush3.msra.mxu1 %v1389_v1 }
 0x1bd   :  { %1924 = vmatprep.subr.mxu1 %v1987_v42 }
 0x1be   :  { %1925 = vmatpush3.msra.mxu1 %v1388_v2 }
 0x1bf   :  { %1926 = vmatprep.subr.mxu1 %v1987_v42 }
 0x1c0   :  { %1927 = vmatpush3.msra.mxu1 %v1387_v3 }
 0x1c1   :  { %1928 = vmatprep.subr.mxu1 %v1987_v42 }
 0x1c2   :  { %1929 = vmatpush3.msra.mxu1 %v1386_v4 }
 0x1c3   :  { %1930 = vmatprep.subr.mxu1 %v1987_v42 }
 0x1c4   :  { %1931 = vmatpush3.msra.mxu1 %v1385_v5 }
 0x1c5   :  { %1932 = vmatprep.subr.mxu1 %v1987_v42 }
 0x1c6   :  { %1933 = vmatpush3.msra.mxu1 %v1384_v6 }
 0x1c7   :  { %1934 = vmatprep.subr.mxu1 %v1987_v42 }
 0x1c8   :  { %1935 = vmatpush3.msra.mxu1 %v1383_v7 }
 0x1c9   :  { %1936 = vmatprep.subr.mxu1 %v1987_v42 }
 0x1ca   :  { %1937 = vmatpush3.msra.mxu1 %v1382_v8 }
 0x1cb   :  { %1938 = vmatprep.subr.mxu1 %v1987_v42 }
 0x1cc   :  { %1939 = vmatpush3.msra.mxu1 %v1381_v9 }
 0x1cd   :  { %1940 = vmatprep.subr.mxu1 %v1987_v42 }
 0x1ce   :  { %1941 = vmatpush3.msra.mxu1 %v1380_v10 }
 0x1cf   :  { %1942 = vmatprep.subr.mxu1 %v1987_v42  ;;  %v1497_v42 = vld [vmem:[%s3241_s6] ss:$0 sm:$0xff] }
 0x1d0   :  { %1943 = vmatpush3.msra.mxu1 %v1379_v11 }
 0x273   :  { %v1369_v13 = vpop.f32.mrf.mxu1 }
 0x274   :  { %v1370_v14 = vadd.f32 %v1494_v12, %v1369_v13 }
 0x275   :  { %v1913_v15 = vpop.f32.mrf.mxu1 }
 0x276   :  { %v1496_v16 = vmul.f32 -1.442695, %v1370_v14 }
 0x278   :  { %1960 = vpow2.f32 %v1496_v16 }
 0x285   :  { %v1961_v17 = vpop.eup %1960 }
 0x286   :  { %v1376_v18 = vadd.f32 1.0, %v1961_v17 }
 0x288   :  { %1962 = vrcp.f32 %v1376_v18 }
 0x295   :  { %v1963_v19 = vpop.eup %1962 }
 0x296   :  { %1945 = vmatmul.mubr.msk.f32.vlgmr.msra.gmra.mxu1 %vm1299_vm2, %v1963_v19 }
 0x356   :  { %v1470_v20 = vpop.f32.mrf.mxu1 }
 0x357   :  { %v1471_v21 = vadd.f32 %v1497_v42, %v1470_v20 }
 0x358   :  { %v1946_v22 = vpop.f32.mrf.mxu1 }
 0x359   :  { %1475 = vst.msk [vmem:[#allocation2] sm:$0x3] %vm1474_vm3, %v1471_v21 }
 0x35a   :  { %1975 = shalt.err (!%p1972_p4)
}
 0x35b   :  { %1485 = dma.vmem_to_hbm [thread:$0]  %s1483_s8, 32, %s3242_s7, [#allocation3]  }
 0x35c   :  { %1984 = dma.done.wait [#allocation3], 32  }
 0x35d   :  { %1985 = vsyncadd [#allocation3], 4294967264 }
 0x35e   :  { %1489 = vsyncpa [#allocation3], 1 }

// kernel: model_sigmoid_forward.3
= control target key start
LH: loop header
LB: loop body
LE: loop exit
PB: predicated region body
PF: predicated region fallthrough
CT: control target
= control target key end

     0   :  { %s3862_s18 = smov 0   ;;  %s6212_s0 = inlined_call_operand.vmem [shape: f32[2,64,64], index: 0, kind: input, shape index: {}]   ;;  %s6213_s1 = inlined_call_operand.vmem [shape: f32[5,64,720], index: 1, kind: input, shape index: {}]   ;;  %s6214_s2 = inlined_call_operand.vmem [shape: f32[1,720], index: 2, kind: input, shape index: {}]   ;;  %s6215_s3 = inlined_call_operand.vmem [shape: f32[30,60], index: 3, kind: input, shape index: {}]   ;;  %s6216_s4 = inlined_call_operand.vmem [shape: f32[30,60], index: 4, kind: input, shape index: {}]   ;;  %s6217_s5 = inlined_call_operand.vmem [shape: f32[2,30,360], index: 5, kind: output, shape index: {}]  }
   0x1 LB: > { %s3384_s19 = sadd.s32 4294967295, %s3828_s18   ;;  %p3388_p0 = scmp.ge.s32.totalorder %s3828_s18, 1  ;;  %s3828_s18 = sphi %s3862_s18, %s15_s18  }
   0x2   : > { %p187_p1 = scmp.lt.s32.totalorder %s3828_s18, 3 }
   0x4   : > { %p188_p2 = pnand %p3388_p0, %p187_p1 }
   0x6   : > { %191 = sbr.rel (%p188_p2) target bundleno = 901 (0x385), region = 40 }
   0xb   : > { %v3435_v0 = vld [vmem:[%s6213_s1 + $0x2d8] sm:$0xff]  ;;  %v3437_v1 = vld [vmem:[%s6213_s1 + $0x2e8] sm:$0xff]  ;;  %v3434_v2 = vld [vmem:[%s6213_s1 + $0x2d0] sm:$0xff]  ;;  %p215_p3 = scmp.lt.s32.totalorder %s3384_s19, 1  ;;  %vm338_vm0 = vcmask 1046528   ;;  %vm354_vm1 = vcmask 523264  }
   0xc   : > { %387 = vmatprep.subr.mxu0 %v3435_v0  ;;  %500 = vmatprep.subr.mxu1 %v3437_v1  ;;  %v3436_v3 = vld [vmem:[%s6213_s1 + $0x2e0] sm:$0xff]  ;;  %v3429_v4 = vld [vmem:[%s6213_s1 + $0x2a8] sm:$0xff]  ;;  %v3431_v5 = vld [vmem:[%s6213_s1 + $0x2b8] sm:$0xff]  ;;  %v6218_v39 = vmov 0.0   ;;  %vm1114_vm2 = vcmask 1045504   ;;  %vm1582_vm3 = vcmask 1044480  }
   0xd   : > { %388 = vmatpush1.msra.mxu0 %v3434_v2  ;;  %501 = vmatpush1.msra.mxu1 %v3436_v3  ;;  %v3428_v6 = vld [vmem:[%s6213_s1 + $0x2a0] sm:$0xff]  ;;  %v3430_v7 = vld [vmem:[%s6213_s1 + $0x2b0] sm:$0xff]  ;;  %v3423_v8 = vld [vmem:[%s6213_s1 + $0x278] sm:$0xff]  ;;  %s6370_s19 = smov (!%p215_p3, %s3384_s19), 1  ;;  %vm2050_vm4 = vcmask 1043456   ;;  %vm2553_vm5 = vcmask 490496  }
   0xe   : > { %389 = vmatprep.subr.mxu0 %v3429_v4  ;;  %502 = vmatprep.subr.mxu1 %v3431_v5  ;;  %v3425_v9 = vld [vmem:[%s6213_s1 + $0x288] sm:$0xff]  ;;  %v3422_v10 = vld [vmem:[%s6213_s1 + $0x270] sm:$0xff]  ;;  %v3424_v11 = vld [vmem:[%s6213_s1 + $0x280] sm:$0xff]  ;;  %s3754_s25 = sshll.u32 %s6370_s19, 6  ;;  %s3831_s9 = smov 24   ;;  %vm3206_vm6 = vcmask 195584  }
   0xf   : > { %390 = vmatpush1.msra.mxu0 %v3428_v6  ;;  %503 = vmatpush1.msra.mxu1 %v3430_v7  ;;  %v3417_v12 = vld [vmem:[%s6213_s1 + $0x248] sm:$0xff]  ;;  %v3419_v13 = vld [vmem:[%s6213_s1 + $0x258] sm:$0xff]  ;;  %v3416_v14 = vld [vmem:[%s6213_s1 + $0x240] sm:$0xff]  ;;  %s3936_s15 = scalar_lea.vmem %s6212_s0, %s3754_s25  ;;  %s3755_s10 = smul.u32 96, %s6370_s19  ;;  %vm3317_vm7 = vcmask 850944   ;;  %vm3327_vm8 = vcmask 848896  }
  0x10   : > { %391 = vmatprep.subr.mxu0 %v3423_v8  ;;  %504 = vmatprep.subr.mxu1 %v3425_v9  ;;  %v3418_v15 = vld [vmem:[%s6213_s1 + $0x250] sm:$0xff]  ;;  %v3411_v16 = vld [vmem:[%s6213_s1 + $0x218] sm:$0xff]  ;;  %v3413_v17 = vld [vmem:[%s6213_s1 + $0x228] sm:$0xff] }
  0x11   : > { %392 = vmatpush1.msra.mxu0 %v3422_v10  ;;  %505 = vmatpush1.msra.mxu1 %v3424_v11  ;;  %v3410_v18 = vld [vmem:[%s6213_s1 + $0x210] sm:$0xff]  ;;  %v3412_v19 = vld [vmem:[%s6213_s1 + $0x220] sm:$0xff]  ;;  %v3405_v20 = vld [vmem:[%s6213_s1 + $0x1e8] sm:$0xff]  ;;  %s6192_s13 = scalar_lea.vmem %s6217_s5, %s3755_s10 }
  0x12   : > { %393 = vmatprep.subr.mxu0 %v3417_v12  ;;  %506 = vmatprep.subr.mxu1 %v3419_v13  ;;  %v3407_v21 = vld [vmem:[%s6213_s1 + $0x1f8] sm:$0xff]  ;;  %v3404_v22 = vld [vmem:[%s6213_s1 + $0x1e0] sm:$0xff]  ;;  %v3406_v23 = vld [vmem:[%s6213_s1 + $0x1f0] sm:$0xff] }
  0x13   : > { %394 = vmatpush1.msra.mxu0 %v3416_v14  ;;  %507 = vmatpush1.msra.mxu1 %v3418_v15  ;;  %v3399_v24 = vld [vmem:[%s6213_s1 + $0x1b8] sm:$0xff]  ;;  %v3401_v25 = vld [vmem:[%s6213_s1 + $0x1c8] sm:$0xff]  ;;  %v3957_v26 = vld [vmem:[%s3936_s15] sm:$0xff] }
  0x14   : > { %395 = vmatprep.subr.mxu0 %v3411_v16  ;;  %508 = vmatprep.subr.mxu1 %v3413_v17  ;;  %v3398_v27 = vld [vmem:[%s6213_s1 + $0x1b0] sm:$0xff]  ;;  %v3400_v28 = vld [vmem:[%s6213_s1 + $0x1c0] sm:$0xff]  ;;  %v3966_v29 = vld [vmem:[%s3936_s15 + $0x8] sm:$0xff]  ;;  %v339_v30 = vrot.slane %v3957_v26, 1 }
  0x15   : > { %396 = vmatpush1.msra.mxu0 %v3410_v18  ;;  %509 = vmatpush1.msra.mxu1 %v3412_v19  ;;  %v3393_v31 = vld [vmem:[%s6213_s1 + $0x188] sm:$0xff]  ;;  %v3395_v32 = vld [vmem:[%s6213_s1 + $0x198] sm:$0xff]  ;;  %v340_v33 = vrot.slane %v3966_v29, 1  ;;  %v3977_v34 = vld [vmem:[%s3936_s15 + $0x10] sm:$0xff] }
  0x16   : > { %397 = vmatprep.subr.mxu0 %v3405_v20  ;;  %510 = vmatprep.subr.mxu1 %v3407_v21  ;;  %v3392_v35 = vld [vmem:[%s6213_s1 + $0x180] sm:$0xff]  ;;  %v3394_v36 = vld [vmem:[%s6213_s1 + $0x190] sm:$0xff]  ;;  %v342_v38 = vrot.slane %v3977_v34, 1  ;;  %v3991_v40 = vld [vmem:[%s3936_s15 + $0x18] sm:$0xff] }
  0x17   : > { %398 = vmatpush1.msra.mxu0 %v3404_v22  ;;  %511 = vmatpush1.msra.mxu1 %v3406_v23  ;;  %v3986_v37 = vsel %vm338_vm0, %v339_v30, %v340_v33  ;;  %v3439_v41 = vld [vmem:[%s6213_s1 + $0x2f8] sm:$0xff]  ;;  %v3438_v43 = vld [vmem:[%s6213_s1 + $0x2f0] sm:$0xff]  ;;  %v344_v46 = vrot.slane %v3991_v40, 1  ;;  %v4017_v47 = vld [vmem:[%s3936_s15 + $0x20] sm:$0xff] }
  0x18   : > { %399 = vmatprep.subr.mxu0 %v3399_v24  ;;  %512 = vmatprep.subr.mxu1 %v3401_v25  ;;  %v276_v42 = vld [vmem:[%s6213_s1 + $0x158] sm:$0xff]  ;;  %v275_v44 = vld [vmem:[%s6213_s1 + $0x150] sm:$0xff]  ;;  %v4013_v45 = vsel %vm338_vm0, %v340_v33, %v342_v38  ;;  %v3433_v48 = vld [vmem:[%s6213_s1 + $0x2c8] sm:$0xff]  ;;  %v346_v53 = vrot.slane %v4017_v47, 1 }
  0x19   : > { %400 = vmatpush1.msra.mxu0 %v3398_v27  ;;  %513 = vmatpush1.msra.mxu1 %v3400_v28  ;;  %v270_v49 = vld [vmem:[%s6213_s1 + $0x128] sm:$0xff]  ;;  %v3432_v50 = vld [vmem:[%s6213_s1 + $0x2c0] sm:$0xff]  ;;  %v4038_v52 = vsel %vm338_vm0, %v342_v38, %v344_v46  ;;  %v3427_v55 = vld [vmem:[%s6213_s1 + $0x298] sm:$0xff] }
  0x1a   : > { %401 = vmatprep.subr.mxu0 %v3393_v31  ;;  %514 = vmatprep.subr.mxu1 %v3395_v32  ;;  %v269_v51 = vld [vmem:[%s6213_s1 + $0x120] sm:$0xff]  ;;  %v4042_v54 = vld [vmem:[%s3936_s15 + $0x28] sm:$0xff]  ;;  %v264_v56 = vld [vmem:[%s6213_s1 + $0xf8] sm:$0xff]  ;;  %v4063_v59 = vsel %vm338_vm0, %v344_v46, %v346_v53 }
  0x1b   : > { %402 = vmatpush1.msra.mxu0 %v3392_v35  ;;  %435 = vmatprep.mubr.f32.mxu0 %v6218_v39  ;;  %v3426_v57 = vld [vmem:[%s6213_s1 + $0x290] sm:$0xff]  ;;  %v348_v60 = vrot.slane %v4042_v54, 1  ;;  %v3421_v62 = vld [vmem:[%s6213_s1 + $0x268] sm:$0xff]  ;;  %v3420_v0 = vld [vmem:[%s6213_s1 + $0x260] sm:$0xff] }
  0x1c   : > { %515 = vmatpush1.msra.mxu1 %v3394_v36  ;;  %548 = vmatprep.mubr.f32.mxu1 %v6218_v39  ;;  %v263_v58 = vld [vmem:[%s6213_s1 + $0xf0] sm:$0xff]  ;;  %v258_v63 = vld [vmem:[%s6213_s1 + $0xc8] sm:$0xff]  ;;  %v257_v1 = vld [vmem:[%s6213_s1 + $0xc0] sm:$0xff] }
  0x1d   : > { %3440 = vmatmul.mubr.msk.f32.vlgmr.msra.gmra.mxu0 %vm354_vm1, %v3986_v37  ;;  %3448 = vmatmul.mubr.msk.f32.vlgmr.msra.gmra.mxu1 %vm354_vm1, %v3986_v37  ;;  %v4067_v61 = vld [vmem:[%s3936_s15 + $0x30] sm:$0xff]  ;;  %v4088_v2 = vsel %vm338_vm0, %v346_v53, %v348_v60  ;;  %v4092_v4 = vld [vmem:[%s3936_s15 + $0x38] sm:$0xff]  ;;  %v3409_v11 = vld [vmem:[%s6213_s1 + $0x208] sm:$0xff] }
  0x1e   : > { %441 = vmatprep.mubr.f32.mxu0 %v6218_v39  ;;  %554 = vmatprep.mubr.f32.mxu1 %v6218_v39  ;;  %v350_v3 = vrot.slane %v4067_v61, 1  ;;  %v3415_v5 = vld [vmem:[%s6213_s1 + $0x238] sm:$0xff]  ;;  %v3414_v7 = vld [vmem:[%s6213_s1 + $0x230] sm:$0xff]  ;;  %v4116_v10 = vrot.slane %v4092_v4, 1  ;;  %v246_v12 = vld [vmem:[%s6213_s1 + $0x68] sm:$0xff] }
  0x1f   : > { %613 = vmatprep.subr.mxu0 %v3439_v41  ;;  %742 = vmatprep.subr.mxu1 %v276_v42  ;;  %v252_v6 = vld [vmem:[%s6213_s1 + $0x98] sm:$0xff]  ;;  %v251_v8 = vld [vmem:[%s6213_s1 + $0x90] sm:$0xff]  ;;  %v3408_v13 = vld [vmem:[%s6213_s1 + $0x200] sm:$0xff] }
  0x20   : > { %614 = vmatpush1.msra.mxu0 %v3438_v43  ;;  %743 = vmatpush1.msra.mxu1 %v275_v44  ;;  %v4113_v9 = vsel %vm338_vm0, %v348_v60, %v350_v3  ;;  %v245_v14 = vld [vmem:[%s6213_s1 + $0x60] sm:$0xff]  ;;  %v4138_v15 = vsel %vm338_vm0, %v350_v3, %v4116_v10  ;;  %v3403_v16 = vld [vmem:[%s6213_s1 + $0x1d8] sm:$0xff]  ;;  %v3402_v18 = vld [vmem:[%s6213_s1 + $0x1d0] sm:$0xff] }
  0x21   : > { %3441 = vmatmul.mubr.msk.f32.gmra.mxu0 %vm354_vm1, %v4013_v45  ;;  %3449 = vmatmul.mubr.msk.f32.gmra.mxu1 %vm354_vm1, %v4013_v45  ;;  %v240_v17 = vld [vmem:[%s6213_s1 + $0x38] sm:$0xff]  ;;  %v239_v19 = vld [vmem:[%s6213_s1 + $0x30] sm:$0xff]  ;;  %v3397_v20 = vld [vmem:[%s6213_s1 + $0x1a8] sm:$0xff] }
  0x22   : > { %447 = vmatprep.mubr.f32.mxu0 %v6218_v39  ;;  %560 = vmatprep.mubr.f32.mxu1 %v6218_v39  ;;  %v234_v21 = vld [vmem:[%s6213_s1 + $0x8] sm:$0xff]  ;;  %v3396_v22 = vld [vmem:[%s6213_s1 + $0x1a0] sm:$0xff]  ;;  %v280_v25 = vld [vmem:[%s6213_s1 + $0x178] sm:$0xff] }
  0x23   : > { %615 = vmatprep.subr.mxu0 %v3433_v48  ;;  %744 = vmatprep.subr.mxu1 %v270_v49  ;;  %v233_v23 = vld [vmem:[%s6213_s1] sm:$0xff]  ;;  %v278_v24 = vld [vmem:[%s6213_s1 + $0x168] sm:$0xff]  ;;  %v279_v28 = vld [vmem:[%s6213_s1 + $0x170] sm:$0xff] }
  0x24   : > { %616 = vmatpush1.msra.mxu0 %v3432_v50  ;;  %745 = vmatpush1.msra.mxu1 %v269_v51  ;;  %v277_v27 = vld [vmem:[%s6213_s1 + $0x160] sm:$0xff]  ;;  %v272_v30 = vld [vmem:[%s6213_s1 + $0x138] sm:$0xff]  ;;  %v274_v31 = vld [vmem:[%s6213_s1 + $0x148] sm:$0xff] }
  0x25   : > { %3442 = vmatmul.mubr.msk.f32.gmra.mxu0 %vm354_vm1, %v4038_v52  ;;  %3450 = vmatmul.mubr.msk.f32.gmra.mxu1 %vm354_vm1, %v4038_v52  ;;  %v271_v32 = vld [vmem:[%s6213_s1 + $0x130] sm:$0xff]  ;;  %v273_v33 = vld [vmem:[%s6213_s1 + $0x140] sm:$0xff]  ;;  %v266_v35 = vld [vmem:[%s6213_s1 + $0x108] sm:$0xff] }
  0x26   : > { %453 = vmatprep.mubr.f32.mxu0 %v6218_v39  ;;  %566 = vmatprep.mubr.f32.mxu1 %v6218_v39  ;;  %v268_v36 = vld [vmem:[%s6213_s1 + $0x118] sm:$0xff]  ;;  %v267_v38 = vld [vmem:[%s6213_s1 + $0x110] sm:$0xff]  ;;  %v262_v42 = vld [vmem:[%s6213_s1 + $0xe8] sm:$0xff] }
  0x27   : > { %617 = vmatprep.subr.mxu0 %v3427_v55  ;;  %746 = vmatprep.subr.mxu1 %v264_v56  ;;  %v260_v41 = vld [vmem:[%s6213_s1 + $0xd8] sm:$0xff]  ;;  %v259_v43 = vld [vmem:[%s6213_s1 + $0xd0] sm:$0xff]  ;;  %v261_v44 = vld [vmem:[%s6213_s1 + $0xe0] sm:$0xff] }
  0x28   : > { %618 = vmatpush1.msra.mxu0 %v3426_v57  ;;  %747 = vmatpush1.msra.mxu1 %v263_v58  ;;  %v256_v46 = vld [vmem:[%s6213_s1 + $0xb8] sm:$0xff]  ;;  %v253_v48 = vld [vmem:[%s6213_s1 + $0xa0] sm:$0xff]  ;;  %v255_v49 = vld [vmem:[%s6213_s1 + $0xb0] sm:$0xff] }
  0x29   : > { %3443 = vmatmul.mubr.msk.f32.gmra.mxu0 %vm354_vm1, %v4063_v59  ;;  %3451 = vmatmul.mubr.msk.f32.gmra.mxu1 %vm354_vm1, %v4063_v59  ;;  %v248_v50 = vld [vmem:[%s6213_s1 + $0x78] sm:$0xff]  ;;  %v250_v51 = vld [vmem:[%s6213_s1 + $0x88] sm:$0xff]  ;;  %v249_v53 = vld [vmem:[%s6213_s1 + $0x80] sm:$0xff] }
  0x2a   : > { %459 = vmatprep.mubr.f32.mxu0 %v6218_v39  ;;  %572 = vmatprep.mubr.f32.mxu1 %v6218_v39  ;;  %v242_v55 = vld [vmem:[%s6213_s1 + $0x48] sm:$0xff]  ;;  %v244_v56 = vld [vmem:[%s6213_s1 + $0x58] sm:$0xff]  ;;  %v241_v57 = vld [vmem:[%s6213_s1 + $0x40] sm:$0xff] }
  0x2b   : > { %619 = vmatprep.subr.mxu0 %v3421_v62  ;;  %748 = vmatprep.subr.mxu1 %v258_v63  ;;  %v243_v58 = vld [vmem:[%s6213_s1 + $0x50] sm:$0xff]  ;;  %v238_v60 = vld [vmem:[%s6213_s1 + $0x28] sm:$0xff]  ;;  %v237_v63 = vld [vmem:[%s6213_s1 + $0x20] sm:$0xff] }
  0x2c   : > { %620 = vmatpush1.msra.mxu0 %v3420_v0  ;;  %749 = vmatpush1.msra.mxu1 %v257_v1  ;;  %v235_v62 = vld [vmem:[%s6213_s1 + $0x10] sm:$0xff]  ;;  %v3531_v0 = vld [vmem:[%s6213_s1 + $0x458] sm:$0xff]  ;;  %v3533_v1 = vld [vmem:[%s6213_s1 + $0x468] sm:$0xff] }
  0x2d   : > { %3444 = vmatmul.mubr.msk.f32.gmra.mxu0 %vm354_vm1, %v4088_v2  ;;  %3452 = vmatmul.mubr.msk.f32.gmra.mxu1 %vm354_vm1, %v4088_v2  ;;  %v3532_v3 = vld [vmem:[%s6213_s1 + $0x460] sm:$0xff] }
  0x2e   : > { %465 = vmatprep.mubr.f32.mxu0 %v6218_v39  ;;  %578 = vmatprep.mubr.f32.mxu1 %v6218_v39 }
  0x2f   : > { %621 = vmatprep.subr.mxu0 %v3415_v5  ;;  %750 = vmatprep.subr.mxu1 %v252_v6  ;;  %v3525_v5 = vld [vmem:[%s6213_s1 + $0x428] sm:$0xff]  ;;  %v3527_v6 = vld [vmem:[%s6213_s1 + $0x438] sm:$0xff] }
  0x30   : > { %622 = vmatpush1.msra.mxu0 %v3414_v7  ;;  %751 = vmatpush1.msra.mxu1 %v251_v8  ;;  %v3524_v7 = vld [vmem:[%s6213_s1 + $0x420] sm:$0xff]  ;;  %v3526_v8 = vld [vmem:[%s6213_s1 + $0x430] sm:$0xff] }
  0x31   : > { %3445 = vmatmul.mubr.msk.f32.gmra.mxu0 %vm354_vm1, %v4113_v9  ;;  %3453 = vmatmul.mubr.msk.f32.gmra.mxu1 %vm354_vm1, %v4113_v9 }
  0x32   : > { %471 = vmatprep.mubr.f32.mxu0 %v6218_v39  ;;  %584 = vmatprep.mubr.f32.mxu1 %v6218_v39 }
  0x33   : > { %623 = vmatprep.subr.mxu0 %v3409_v11  ;;  %752 = vmatprep.subr.mxu1 %v246_v12  ;;  %v3518_v11 = vld [vmem:[%s6213_s1 + $0x3f0] sm:$0xff]  ;;  %v3520_v12 = vld [vmem:[%s6213_s1 + $0x400] sm:$0xff] }
  0x34   : > { %624 = vmatpush1.msra.mxu0 %v3408_v13  ;;  %753 = vmatpush1.msra.mxu1 %v245_v14  ;;  %v3513_v13 = vld [vmem:[%s6213_s1 + $0x3c8] sm:$0xff]  ;;  %v3515_v14 = vld [vmem:[%s6213_s1 + $0x3d8] sm:$0xff] }
  0x35   : > { %3446 = vmatmul.mubr.msk.f32.gmra.mxu0 %vm354_vm1, %v4138_v15  ;;  %3454 = vmatmul.mubr.msk.f32.gmra.mxu1 %vm354_vm1, %v4138_v15 }
  0x36   : > { %477 = vmatprep.mubr.f32.mxu0 %v6218_v39  ;;  %590 = vmatprep.mubr.f32.mxu1 %v6218_v39 }
  0x37   : > { %625 = vmatprep.subr.mxu0 %v3403_v16  ;;  %754 = vmatprep.subr.mxu1 %v240_v17  ;;  %v3514_v16 = vld [vmem:[%s6213_s1 + $0x3d0] sm:$0xff]  ;;  %v3507_v17 = vld [vmem:[%s6213_s1 + $0x398] sm:$0xff] }
  0x38   : > { %626 = vmatpush1.msra.mxu0 %v3402_v18  ;;  %755 = vmatpush1.msra.mxu1 %v239_v19  ;;  %v3509_v18 = vld [vmem:[%s6213_s1 + $0x3a8] sm:$0xff]  ;;  %v3506_v19 = vld [vmem:[%s6213_s1 + $0x390] sm:$0xff] }
  0x39   : > { %3447 = vmatmul.mubr.msk.f32.gmra.mxu0 %vm354_vm1, %v4116_v10  ;;  %3455 = vmatmul.mubr.msk.f32.gmra.mxu1 %vm354_vm1, %v4116_v10 }
  0x3a   : > { %627 = vmatprep.subr.mxu0 %v3397_v20  ;;  %756 = vmatprep.subr.mxu1 %v234_v21  ;;  %v3508_v20 = vld [vmem:[%s6213_s1 + $0x3a0] sm:$0xff]  ;;  %v3501_v21 = vld [vmem:[%s6213_s1 + $0x368] sm:$0xff] }
  0x3b   : > { %628 = vmatpush1.msra.mxu0 %v3396_v22  ;;  %661 = vmatprep.mubr.f32.mxu0 %v6218_v39  ;;  %v3503_v22 = vld [vmem:[%s6213_s1 + $0x378] sm:$0xff] }
  0x3c   : > { %757 = vmatpush1.msra.mxu1 %v233_v23  ;;  %790 = vmatprep.mubr.f32.mxu1 %v6218_v39  ;;  %v3500_v23 = vld [vmem:[%s6213_s1 + $0x360] sm:$0xff] }
  0x3d   : > { %3456 = vmatmul.mubr.msk.f32.vlgmr.msra.gmra.mxu0 %vm354_vm1, %v3986_v37  ;;  %3464 = vmatmul.mubr.msk.f32.vlgmr.msra.gmra.mxu1 %vm354_vm1, %v3957_v26  ;;  %v265_v37 = vld [vmem:[%s6213_s1 + $0x100] sm:$0xff] }
  0x3e   : > { %667 = vmatprep.mubr.f32.mxu0 %v6218_v39  ;;  %796 = vmatprep.mubr.f32.mxu1 %v6218_v39 }
  0x3f   : > { %855 = vmatprep.subr.mxu0 %v278_v24  ;;  %968 = vmatprep.subr.mxu1 %v280_v25  ;;  %v3502_v24 = vld [vmem:[%s6213_s1 + $0x370] sm:$0xff]  ;;  %v3495_v25 = vld [vmem:[%s6213_s1 + $0x338] sm:$0xff] }
  0x40   : > { %856 = vmatpush1.msra.mxu0 %v277_v27  ;;  %969 = vmatpush1.msra.mxu1 %v279_v28  ;;  %v3497_v27 = vld [vmem:[%s6213_s1 + $0x348] sm:$0xff]  ;;  %v3494_v28 = vld [vmem:[%s6213_s1 + $0x330] sm:$0xff] }
  0x41   : > { %3457 = vmatmul.mubr.msk.f32.gmra.mxu0 %vm354_vm1, %v4013_v45  ;;  %3465 = vmatmul.mubr.msk.f32.gmra.mxu1 %vm354_vm1, %v3966_v29  ;;  %v254_v45 = vld [vmem:[%s6213_s1 + $0xa8] sm:$0xff] }
  0x42   : > { %673 = vmatprep.mubr.f32.mxu0 %v6218_v39  ;;  %802 = vmatprep.mubr.f32.mxu1 %v6218_v39 }
  0x43   : > { %857 = vmatprep.subr.mxu0 %v272_v30  ;;  %970 = vmatprep.subr.mxu1 %v274_v31  ;;  %v3496_v30 = vld [vmem:[%s6213_s1 + $0x340] sm:$0xff]  ;;  %v1115_v31 = vrot.slane %v3957_v26, 2 }
  0x44   : > { %858 = vmatpush1.msra.mxu0 %v271_v32  ;;  %971 = vmatpush1.msra.mxu1 %v273_v33  ;;  %v1116_v32 = vrot.slane %v3966_v29, 2  ;;  %v3489_v33 = vld [vmem:[%s6213_s1 + $0x308] sm:$0xff] }
  0x45   : > { %3458 = vmatmul.mubr.msk.f32.gmra.mxu0 %vm354_vm1, %v4038_v52  ;;  %3466 = vmatmul.mubr.msk.f32.gmra.mxu1 %vm354_vm1, %v3977_v34  ;;  %v247_v52 = vld [vmem:[%s6213_s1 + $0x70] sm:$0xff] }
  0x46   : > { %679 = vmatprep.mubr.f32.mxu0 %v6218_v39  ;;  %808 = vmatprep.mubr.f32.mxu1 %v6218_v39 }
  0x47   : > { %859 = vmatprep.subr.mxu0 %v266_v35  ;;  %972 = vmatprep.subr.mxu1 %v268_v36  ;;  %v3491_v35 = vld [vmem:[%s6213_s1 + $0x318] sm:$0xff]  ;;  %v3488_v36 = vld [vmem:[%s6213_s1 + $0x300] sm:$0xff] }
  0x48   : > { %860 = vmatpush1.msra.mxu0 %v265_v37  ;;  %973 = vmatpush1.msra.mxu1 %v267_v38  ;;  %v3490_v37 = vld [vmem:[%s6213_s1 + $0x310] sm:$0xff]  ;;  %v4465_v38 = vsel %vm1114_vm2, %v1115_v31, %v1116_v32 }
  0x49   : > { %3459 = vmatmul.mubr.msk.f32.gmra.mxu0 %vm354_vm1, %v4063_v59  ;;  %3467 = vmatmul.mubr.msk.f32.gmra.mxu1 %vm354_vm1, %v3991_v40  ;;  %v236_v59 = vld [vmem:[%s6213_s1 + $0x18] sm:$0xff]  ;;  %v3606_v31 = vld [vmem:[%s6213_s1 + $0x5f0] sm:$0xff] }
  0x4a   : > { %685 = vmatprep.mubr.f32.mxu0 %v6218_v39  ;;  %814 = vmatprep.mubr.f32.mxu1 %v6218_v39 }
  0x4b   : > { %861 = vmatprep.subr.mxu0 %v260_v41  ;;  %974 = vmatprep.subr.mxu1 %v262_v42  ;;  %v1118_v41 = vrot.slane %v3977_v34, 2  ;;  %v3535_v42 = vld [vmem:[%s6213_s1 + $0x478] sm:$0xff] }
  0x4c   : > { %862 = vmatpush1.msra.mxu0 %v259_v43  ;;  %975 = vmatpush1.msra.mxu1 %v261_v44  ;;  %v3603_v43 = vld [vmem:[%s6213_s1 + $0x5d8] sm:$0xff]  ;;  %v3534_v44 = vld [vmem:[%s6213_s1 + $0x470] sm:$0xff] }
  0x4d   : > { %3460 = vmatmul.mubr.msk.f32.gmra.mxu0 %vm354_vm1, %v4088_v2  ;;  %3468 = vmatmul.mubr.msk.f32.gmra.mxu1 %vm354_vm1, %v4017_v47  ;;  %v3530_v2 = vld [vmem:[%s6213_s1 + $0x450] sm:$0xff] }
  0x4e   : > { %691 = vmatprep.mubr.f32.mxu0 %v6218_v39  ;;  %820 = vmatprep.mubr.f32.mxu1 %v6218_v39 }
  0x4f   : > { %863 = vmatprep.subr.mxu0 %v254_v45  ;;  %976 = vmatprep.subr.mxu1 %v256_v46  ;;  %v3602_v45 = vld [vmem:[%s6213_s1 + $0x5d0] sm:$0xff]  ;;  %v4489_v46 = vsel %vm1114_vm2, %v1116_v32, %v1118_v41 }
  0x50   : > { %864 = vmatpush1.msra.mxu0 %v253_v48  ;;  %977 = vmatpush1.msra.mxu1 %v255_v49  ;;  %v1120_v48 = vrot.slane %v3991_v40, 2  ;;  %v3529_v49 = vld [vmem:[%s6213_s1 + $0x448] sm:$0xff] }
  0x51   : > { %3461 = vmatmul.mubr.msk.f32.gmra.mxu0 %vm354_vm1, %v4113_v9  ;;  %3469 = vmatmul.mubr.msk.f32.gmra.mxu1 %vm354_vm1, %v4042_v54  ;;  %v3519_v9 = vld [vmem:[%s6213_s1 + $0x3f8] sm:$0xff] }
  0x52   : > { %697 = vmatprep.mubr.f32.mxu0 %v6218_v39  ;;  %826 = vmatprep.mubr.f32.mxu1 %v6218_v39 }
  0x53   : > { %865 = vmatprep.subr.mxu0 %v248_v50  ;;  %978 = vmatprep.subr.mxu1 %v250_v51  ;;  %v3597_v50 = vld [vmem:[%s6213_s1 + $0x5a8] sm:$0xff]  ;;  %v3528_v51 = vld [vmem:[%s6213_s1 + $0x440] sm:$0xff] }
  0x54   : > { %866 = vmatpush1.msra.mxu0 %v247_v52  ;;  %979 = vmatpush1.msra.mxu1 %v249_v53  ;;  %v3596_v52 = vld [vmem:[%s6213_s1 + $0x5a0] sm:$0xff]  ;;  %v4511_v53 = vsel %vm1114_vm2, %v1118_v41, %v1120_v48  ;;  %v1590_v41 = vrot.slane %v4017_v47, 3 }
  0x55   : > { %3462 = vmatmul.mubr.msk.f32.gmra.mxu0 %vm354_vm1, %v4138_v15  ;;  %3470 = vmatmul.mubr.msk.f32.gmra.mxu1 %vm354_vm1, %v4067_v61  ;;  %v3512_v15 = vld [vmem:[%s6213_s1 + $0x3c0] sm:$0xff] }
  0x56   : > { %703 = vmatprep.mubr.f32.mxu0 %v6218_v39  ;;  %832 = vmatprep.mubr.f32.mxu1 %v6218_v39 }
  0x57   : > { %867 = vmatprep.subr.mxu0 %v242_v55  ;;  %980 = vmatprep.subr.mxu1 %v244_v56  ;;  %v1122_v55 = vrot.slane %v4017_v47, 2  ;;  %v3523_v56 = vld [vmem:[%s6213_s1 + $0x418] sm:$0xff] }
  0x58   : > { %868 = vmatpush1.msra.mxu0 %v241_v57  ;;  %981 = vmatpush1.msra.mxu1 %v243_v58  ;;  %v3591_v57 = vld [vmem:[%s6213_s1 + $0x578] sm:$0xff]  ;;  %v3522_v58 = vld [vmem:[%s6213_s1 + $0x410] sm:$0xff] }
  0x59   : > { %3463 = vmatmul.mubr.msk.f32.gmra.mxu0 %vm354_vm1, %v4116_v10  ;;  %3471 = vmatmul.mubr.msk.f32.gmra.mxu1 %vm354_vm1, %v4092_v4  ;;  %v3521_v10 = vld [vmem:[%s6213_s1 + $0x408] sm:$0xff] }
  0x5a   : > { %869 = vmatprep.subr.mxu0 %v236_v59  ;;  %982 = vmatprep.subr.mxu1 %v238_v60  ;;  %v3590_v59 = vld [vmem:[%s6213_s1 + $0x570] sm:$0xff]  ;;  %v4533_v60 = vsel %vm1114_vm2, %v1120_v48, %v1122_v55  ;;  %v3587_v48 = vld [vmem:[%s6213_s1 + $0x558] sm:$0xff] }
  0x5b   : > { %870 = vmatpush1.msra.mxu0 %v235_v62  ;;  %903 = vmatprep.mubr.f32.mxu0 %v6218_v39  ;;  %v1124_v62 = vrot.slane %v4042_v54, 2 }
  0x5c   : > { %983 = vmatpush1.msra.mxu1 %v237_v63  ;;  %1016 = vmatprep.mubr.f32.mxu1 %v6218_v39  ;;  %v3517_v63 = vld [vmem:[%s6213_s1 + $0x3e8] sm:$0xff] }
  0x5d   : > { %3472 = vmatmul.mubr.msk.f32.vlgmr.msra.gmra.mxu0 %vm354_vm1, %v3957_v26  ;;  %3480 = vmatmul.mubr.msk.f32.vlgmr.msra.gmra.mxu1 %vm354_vm1, %v3957_v26 }
  0x5e   : > { %909 = vmatprep.mubr.f32.mxu0 %v6218_v39  ;;  %1022 = vmatprep.mubr.f32.mxu1 %v6218_v39 }
  0x5f   : > { %1162 = vmatprep.subr.mxu0 %v3531_v0  ;;  %1275 = vmatprep.subr.mxu1 %v3533_v1  ;;  %v3585_v0 = vld [vmem:[%s6213_s1 + $0x548] sm:$0xff]  ;;  %v3516_v1 = vld [vmem:[%s6213_s1 + $0x3e0] sm:$0xff] }
  0x60   : > { %1163 = vmatpush1.msra.mxu0 %v3530_v2  ;;  %1276 = vmatpush1.msra.mxu1 %v3532_v3  ;;  %v3584_v2 = vld [vmem:[%s6213_s1 + $0x540] sm:$0xff]  ;;  %v4555_v3 = vsel %vm1114_vm2, %v1122_v55, %v1124_v62  ;;  %v3583_v55 = vld [vmem:[%s6213_s1 + $0x538] sm:$0xff] }
  0x61   : > { %3473 = vmatmul.mubr.msk.f32.gmra.mxu0 %vm354_vm1, %v3966_v29  ;;  %3481 = vmatmul.mubr.msk.f32.gmra.mxu1 %vm354_vm1, %v3966_v29 }
  0x62   : > { %915 = vmatprep.mubr.f32.mxu0 %v6218_v39  ;;  %1028 = vmatprep.mubr.f32.mxu1 %v6218_v39 }
  0x63   : > { %1164 = vmatprep.subr.mxu0 %v3525_v5  ;;  %1277 = vmatprep.subr.mxu1 %v3527_v6  ;;  %v1126_v5 = vrot.slane %v4067_v61, 2  ;;  %v3511_v6 = vld [vmem:[%s6213_s1 + $0x3b8] sm:$0xff] }
  0x64   : > { %1165 = vmatpush1.msra.mxu0 %v3524_v7  ;;  %1278 = vmatpush1.msra.mxu1 %v3526_v8  ;;  %v3579_v7 = vld [vmem:[%s6213_s1 + $0x518] sm:$0xff]  ;;  %v3510_v8 = vld [vmem:[%s6213_s1 + $0x3b0] sm:$0xff] }
  0x65   : > { %3474 = vmatmul.mubr.msk.f32.gmra.mxu0 %vm354_vm1, %v3977_v34  ;;  %3482 = vmatmul.mubr.msk.f32.gmra.mxu1 %vm354_vm1, %v3977_v34 }
  0x66   : > { %921 = vmatprep.mubr.f32.mxu0 %v6218_v39  ;;  %1034 = vmatprep.mubr.f32.mxu1 %v6218_v39 }
  0x67   : > { %1166 = vmatprep.subr.mxu0 %v3519_v9  ;;  %1279 = vmatprep.subr.mxu1 %v3521_v10  ;;  %v3578_v9 = vld [vmem:[%s6213_s1 + $0x510] sm:$0xff]  ;;  %v4577_v10 = vsel %vm1114_vm2, %v1124_v62, %v1126_v5  ;;  %v3576_v62 = vld [vmem:[%s6213_s1 + $0x500] sm:$0xff] }
  0x68   : > { %1167 = vmatpush1.msra.mxu0 %v3518_v11  ;;  %1280 = vmatpush1.msra.mxu1 %v3520_v12  ;;  %v4580_v11 = vrot.slane %v4092_v4, 2  ;;  %v3505_v12 = vld [vmem:[%s6213_s1 + $0x388] sm:$0xff] }
  0x69   : > { %3475 = vmatmul.mubr.msk.f32.gmra.mxu0 %vm354_vm1, %v3991_v40  ;;  %3483 = vmatmul.mubr.msk.f32.gmra.mxu1 %vm354_vm1, %v3991_v40 }
  0x6a   : > { %927 = vmatprep.mubr.f32.mxu0 %v6218_v39  ;;  %1040 = vmatprep.mubr.f32.mxu1 %v6218_v39 }
  0x6b   : > { %1168 = vmatprep.subr.mxu0 %v3513_v13  ;;  %1281 = vmatprep.subr.mxu1 %v3515_v14  ;;  %v3573_v13 = vld [vmem:[%s6213_s1 + $0x4e8] sm:$0xff]  ;;  %v3504_v14 = vld [vmem:[%s6213_s1 + $0x380] sm:$0xff] }
  0x6c   : > { %1169 = vmatpush1.msra.mxu0 %v3512_v15  ;;  %1282 = vmatpush1.msra.mxu1 %v3514_v16  ;;  %v3572_v15 = vld [vmem:[%s6213_s1 + $0x4e0] sm:$0xff]  ;;  %v4602_v16 = vsel %vm1114_vm2, %v1126_v5, %v4580_v11  ;;  %v3563_v5 = vld [vmem:[%s6213_s1 + $0x498] sm:$0xff] }
  0x6d   : > { %3476 = vmatmul.mubr.msk.f32.gmra.mxu0 %vm354_vm1, %v4017_v47  ;;  %3484 = vmatmul.mubr.msk.f32.gmra.mxu1 %vm354_vm1, %v4017_v47  ;;  %v3592_v47 = vld [vmem:[%s6213_s1 + $0x580] sm:$0xff] }
  0x6e   : > { %933 = vmatprep.mubr.f32.mxu0 %v6218_v39  ;;  %1046 = vmatprep.mubr.f32.mxu1 %v6218_v39 }
  0x6f   : > { %1170 = vmatprep.subr.mxu0 %v3507_v17  ;;  %1283 = vmatprep.subr.mxu1 %v3509_v18  ;;  %v3499_v17 = vld [vmem:[%s6213_s1 + $0x358] sm:$0xff] }
  0x70   : > { %1171 = vmatpush1.msra.mxu0 %v3506_v19  ;;  %1284 = vmatpush1.msra.mxu1 %v3508_v20  ;;  %v3567_v18 = vld [vmem:[%s6213_s1 + $0x4b8] sm:$0xff]  ;;  %v3498_v19 = vld [vmem:[%s6213_s1 + $0x350] sm:$0xff] }
  0x71   : > { %3477 = vmatmul.mubr.msk.f32.gmra.mxu0 %vm354_vm1, %v4042_v54  ;;  %3485 = vmatmul.mubr.msk.f32.gmra.mxu1 %vm354_vm1, %v4042_v54  ;;  %v3566_v20 = vld [vmem:[%s6213_s1 + $0x4b0] sm:$0xff] }
  0x72   : > { %939 = vmatprep.mubr.f32.mxu0 %v6218_v39  ;;  %1052 = vmatprep.mubr.f32.mxu1 %v6218_v39 }
  0x73   : > { %1172 = vmatprep.subr.mxu0 %v3501_v21  ;;  %1285 = vmatprep.subr.mxu1 %v3503_v22  ;;  %v1583_v21 = vrot.slane %v3957_v26, 3  ;;  %v1584_v22 = vrot.slane %v3966_v29, 3  ;;  %v3560_v26 = vld [vmem:[%s6213_s1 + $0x480] sm:$0xff] }
  0x74   : > { %1173 = vmatpush1.msra.mxu0 %v3500_v23  ;;  %1286 = vmatpush1.msra.mxu1 %v3502_v24  ;;  %v3493_v23 = vld [vmem:[%s6213_s1 + $0x328] sm:$0xff] }
  0x75   : > { %3478 = vmatmul.mubr.msk.f32.gmra.mxu0 %vm354_vm1, %v4067_v61  ;;  %3486 = vmatmul.mubr.msk.f32.gmra.mxu1 %vm354_vm1, %v4067_v61  ;;  %v3561_v24 = vld [vmem:[%s6213_s1 + $0x488] sm:$0xff]  ;;  %v4641_v29 = vsel %vm1582_vm3, %v1583_v21, %v1584_v22 }
  0x76   : > { %945 = vmatprep.mubr.f32.mxu0 %v6218_v39  ;;  %1058 = vmatprep.mubr.f32.mxu1 %v6218_v39  ;;  %v3657_v21 = vld [vmem:[%s6213_s1 + $0x6c8] sm:$0xff] }
  0x77   : > { %1174 = vmatprep.subr.mxu0 %v3495_v25  ;;  %1287 = vmatprep.subr.mxu1 %v3497_v27  ;;  %v3492_v25 = vld [vmem:[%s6213_s1 + $0x320] sm:$0xff]  ;;  %v1586_v27 = vrot.slane %v3977_v34, 3 }
  0x78   : > { %1175 = vmatpush1.msra.mxu0 %v3494_v28  ;;  %1288 = vmatpush1.msra.mxu1 %v3496_v30  ;;  %v3605_v28 = vld [vmem:[%s6213_s1 + $0x5e8] sm:$0xff]  ;;  %v3607_v30 = vld [vmem:[%s6213_s1 + $0x5f8] sm:$0xff]  ;;  %v3604_v34 = vld [vmem:[%s6213_s1 + $0x5e0] sm:$0xff] }
  0x79   : > { %3479 = vmatmul.mubr.msk.f32.gmra.mxu0 %vm354_vm1, %v4092_v4  ;;  %3487 = vmatmul.mubr.msk.f32.gmra.mxu1 %vm354_vm1, %v4092_v4  ;;  %v4665_v32 = vsel %vm1582_vm3, %v1584_v22, %v1586_v27  ;;  %v3659_v22 = vld [vmem:[%s6213_s1 + $0x6d8] sm:$0xff] }
  0x7a   : > { %1176 = vmatprep.subr.mxu0 %v3489_v33  ;;  %1289 = vmatprep.subr.mxu1 %v3491_v35  ;;  %v1588_v33 = vrot.slane %v3991_v40, 3  ;;  %v3599_v35 = vld [vmem:[%s6213_s1 + $0x5b8] sm:$0xff]  ;;  %v3598_v40 = vld [vmem:[%s6213_s1 + $0x5b0] sm:$0xff] }
  0x7b   : > { %1177 = vmatpush1.msra.mxu0 %v3488_v36  ;;  %1210 = vmatprep.mubr.f32.mxu0 %v6218_v39  ;;  %v3601_v36 = vld [vmem:[%s6213_s1 + $0x5c8] sm:$0xff] }
  0x7c   : > { %1290 = vmatpush1.msra.mxu1 %v3490_v37  ;;  %1323 = vmatprep.mubr.f32.mxu1 %v6218_v39  ;;  %v3600_v37 = vld [vmem:[%s6213_s1 + $0x5c0] sm:$0xff] }
  0x7d   : > { %3536 = vmatmul.mubr.msk.f32.vlgmr.msra.gmra.mxu0 %vm354_vm1, %v4465_v38  ;;  %3544 = vmatmul.mubr.msk.f32.vlgmr.msra.gmra.mxu1 %vm354_vm1, %v4465_v38 }
  0x7e   : > { %1216 = vmatprep.mubr.f32.mxu0 %v6218_v39  ;;  %1329 = vmatprep.mubr.f32.mxu1 %v6218_v39 }
  0x7f   : > { %1388 = vmatprep.subr.mxu0 %v3535_v42  ;;  %1630 = vmatprep.subr.mxu1 %v3603_v43  ;;  %v3593_v42 = vld [vmem:[%s6213_s1 + $0x588] sm:$0xff]  ;;  %v3595_v43 = vld [vmem:[%s6213_s1 + $0x598] sm:$0xff] }
  0x80   : > { %1389 = vmatpush1.msra.mxu0 %v3534_v44  ;;  %1631 = vmatpush1.msra.mxu1 %v3602_v45  ;;  %v3594_v44 = vld [vmem:[%s6213_s1 + $0x590] sm:$0xff]  ;;  %v4709_v45 = vsel %vm1582_vm3, %v1588_v33, %v1590_v41 }
  0x81   : > { %3537 = vmatmul.mubr.msk.f32.gmra.mxu0 %vm354_vm1, %v4489_v46  ;;  %3545 = vmatmul.mubr.msk.f32.gmra.mxu1 %vm354_vm1, %v4489_v46 }
  0x82   : > { %1222 = vmatprep.mubr.f32.mxu0 %v6218_v39  ;;  %1335 = vmatprep.mubr.f32.mxu1 %v6218_v39 }
  0x83   : > { %1390 = vmatprep.subr.mxu0 %v3529_v49  ;;  %1632 = vmatprep.subr.mxu1 %v3597_v50  ;;  %v3589_v49 = vld [vmem:[%s6213_s1 + $0x568] sm:$0xff]  ;;  %v3588_v50 = vld [vmem:[%s6213_s1 + $0x560] sm:$0xff] }
  0x84   : > { %1391 = vmatpush1.msra.mxu0 %v3528_v51  ;;  %1633 = vmatpush1.msra.mxu1 %v3596_v52  ;;  %v1594_v52 = vrot.slane %v4067_v61, 3  ;;  %v3580_v61 = vld [vmem:[%s6213_s1 + $0x520] sm:$0xff] }
  0x85   : > { %3538 = vmatmul.mubr.msk.f32.gmra.mxu0 %vm354_vm1, %v4511_v53  ;;  %3546 = vmatmul.mubr.msk.f32.gmra.mxu1 %vm354_vm1, %v4511_v53 }
  0x86   : > { %1228 = vmatprep.mubr.f32.mxu0 %v6218_v39  ;;  %1341 = vmatprep.mubr.f32.mxu1 %v6218_v39 }
  0x87   : > { %1392 = vmatprep.subr.mxu0 %v3523_v56  ;;  %1634 = vmatprep.subr.mxu1 %v3591_v57  ;;  %v3582_v56 = vld [vmem:[%s6213_s1 + $0x530] sm:$0xff] }
  0x88   : > { %1393 = vmatpush1.msra.mxu0 %v3522_v58  ;;  %1635 = vmatpush1.msra.mxu1 %v3590_v59  ;;  %v4756_v58 = vrot.slane %v4092_v4, 3  ;;  %v3575_v59 = vld [vmem:[%s6213_s1 + $0x4f8] sm:$0xff]  ;;  %v3574_v4 = vld [vmem:[%s6213_s1 + $0x4f0] sm:$0xff] }
  0x89   : > { %3539 = vmatmul.mubr.msk.f32.gmra.mxu0 %vm354_vm1, %v4533_v60  ;;  %3547 = vmatmul.mubr.msk.f32.gmra.mxu1 %vm354_vm1, %v4533_v60 }
  0x8a   : > { %1234 = vmatprep.mubr.f32.mxu0 %v6218_v39  ;;  %1347 = vmatprep.mubr.f32.mxu1 %v6218_v39 }
  0x8b   : > { %1394 = vmatprep.subr.mxu0 %v3517_v63  ;;  %1636 = vmatprep.subr.mxu1 %v3585_v0  ;;  %v4778_v63 = vsel %vm1582_vm3, %v1594_v52, %v4756_v58  ;;  %v3569_v0 = vld [vmem:[%s6213_s1 + $0x4c8] sm:$0xff] }
  0x8c   : > { %1395 = vmatpush1.msra.mxu0 %v3516_v1  ;;  %1637 = vmatpush1.msra.mxu1 %v3584_v2  ;;  %v3571_v1 = vld [vmem:[%s6213_s1 + $0x4d8] sm:$0xff]  ;;  %v3568_v2 = vld [vmem:[%s6213_s1 + $0x4c0] sm:$0xff] }
  0x8d   : > { %3540 = vmatmul.mubr.msk.f32.gmra.mxu0 %vm354_vm1, %v4555_v3  ;;  %3548 = vmatmul.mubr.msk.f32.gmra.mxu1 %vm354_vm1, %v4555_v3 }
  0x8e   : > { %1240 = vmatprep.mubr.f32.mxu0 %v6218_v39  ;;  %1353 = vmatprep.mubr.f32.mxu1 %v6218_v39 }
  0x8f   : > { %1396 = vmatprep.subr.mxu0 %v3511_v6  ;;  %1638 = vmatprep.subr.mxu1 %v3579_v7  ;;  %v3565_v6 = vld [vmem:[%s6213_s1 + $0x4a8] sm:$0xff]  ;;  %v3562_v7 = vld [vmem:[%s6213_s1 + $0x490] sm:$0xff] }
  0x90   : > { %1397 = vmatpush1.msra.mxu0 %v3510_v8  ;;  %1639 = vmatpush1.msra.mxu1 %v3578_v9  ;;  %v3564_v8 = vld [vmem:[%s6213_s1 + $0x4a0] sm:$0xff]  ;;  %v3675_v9 = vld [vmem:[%s6213_s1 + $0x758] sm:$0xff] }
  0x91   : > { %3541 = vmatmul.mubr.msk.f32.gmra.mxu0 %vm354_vm1, %v4577_v10  ;;  %3549 = vmatmul.mubr.msk.f32.gmra.mxu1 %vm354_vm1, %v4577_v10 }
  0x92   : > { %1246 = vmatprep.mubr.f32.mxu0 %v6218_v39  ;;  %1359 = vmatprep.mubr.f32.mxu1 %v6218_v39 }
  0x93   : > { %1398 = vmatprep.subr.mxu0 %v3505_v12  ;;  %1640 = vmatprep.subr.mxu1 %v3573_v13  ;;  %v3676_v12 = vld [vmem:[%s6213_s1 + $0x760] sm:$0xff]  ;;  %v3669_v13 = vld [vmem:[%s6213_s1 + $0x728] sm:$0xff] }
  0x94   : > { %1399 = vmatpush1.msra.mxu0 %v3504_v14  ;;  %1641 = vmatpush1.msra.mxu1 %v3572_v15  ;;  %v3671_v14 = vld [vmem:[%s6213_s1 + $0x738] sm:$0xff]  ;;  %v3668_v15 = vld [vmem:[%s6213_s1 + $0x720] sm:$0xff] }
  0x95   : > { %3542 = vmatmul.mubr.msk.f32.gmra.mxu0 %vm354_vm1, %v4602_v16  ;;  %3550 = vmatmul.mubr.msk.f32.gmra.mxu1 %vm354_vm1, %v4602_v16 }
  0x96   : > { %1252 = vmatprep.mubr.f32.mxu0 %v6218_v39  ;;  %1365 = vmatprep.mubr.f32.mxu1 %v6218_v39 }
  0x97   : > { %1400 = vmatprep.subr.mxu0 %v3499_v17  ;;  %1642 = vmatprep.subr.mxu1 %v3567_v18  ;;  %v3663_v17 = vld [vmem:[%s6213_s1 + $0x6f8] sm:$0xff]  ;;  %v3665_v18 = vld [vmem:[%s6213_s1 + $0x708] sm:$0xff] }
  0x98   : > { %1401 = vmatpush1.msra.mxu0 %v3498_v19  ;;  %1643 = vmatpush1.msra.mxu1 %v3566_v20  ;;  %v3662_v19 = vld [vmem:[%s6213_s1 + $0x6f0] sm:$0xff]  ;;  %v3664_v20 = vld [vmem:[%s6213_s1 + $0x700] sm:$0xff] }
  0x99   : > { %3543 = vmatmul.mubr.msk.f32.gmra.mxu0 %vm354_vm1, %v4580_v11  ;;  %3551 = vmatmul.mubr.msk.f32.gmra.mxu1 %vm354_vm1, %v4580_v11 }
  0x9a   : > { %1402 = vmatprep.subr.mxu0 %v3493_v23  ;;  %1644 = vmatprep.subr.mxu1 %v3561_v24  ;;  %v3656_v23 = vld [vmem:[%s6213_s1 + $0x6c0] sm:$0xff]  ;;  %v3658_v24 = vld [vmem:[%s6213_s1 + $0x6d0] sm:$0xff] }
  0x9b   : > { %1403 = vmatpush1.msra.mxu0 %v3492_v25  ;;  %1436 = vmatprep.mubr.f32.mxu0 %v6218_v39  ;;  %v3651_v25 = vld [vmem:[%s6213_s1 + $0x698] sm:$0xff] }
  0x9c   : > { %1645 = vmatpush1.msra.mxu1 %v3560_v26  ;;  %1678 = vmatprep.mubr.f32.mxu1 %v6218_v39  ;;  %v3653_v26 = vld [vmem:[%s6213_s1 + $0x6a8] sm:$0xff] }
  0x9d   : > { %3552 = vmatmul.mubr.msk.f32.vlgmr.msra.gmra.mxu0 %vm354_vm1, %v4465_v38  ;;  %3608 = vmatmul.mubr.msk.f32.vlgmr.msra.gmra.mxu1 %vm354_vm1, %v4641_v29  ;;  %v4687_v38 = vsel %vm1582_vm3, %v1586_v27, %v1588_v33  ;;  %v3652_v27 = vld [vmem:[%s6213_s1 + $0x6a0] sm:$0xff]  ;;  %v3641_v33 = vld [vmem:[%s6213_s1 + $0x648] sm:$0xff] }
  0x9e   : > { %1442 = vmatprep.mubr.f32.mxu0 %v6218_v39  ;;  %1684 = vmatprep.mubr.f32.mxu1 %v6218_v39 }
  0x9f   : > { %1743 = vmatprep.subr.mxu0 %v3605_v28  ;;  %1856 = vmatprep.subr.mxu1 %v3607_v30  ;;  %v3645_v28 = vld [vmem:[%s6213_s1 + $0x668] sm:$0xff]  ;;  %v3647_v30 = vld [vmem:[%s6213_s1 + $0x678] sm:$0xff] }
  0xa0   : > { %1744 = vmatpush1.msra.mxu0 %v3604_v34  ;;  %1857 = vmatpush1.msra.mxu1 %v3606_v31  ;;  %v3644_v34 = vld [vmem:[%s6213_s1 + $0x660] sm:$0xff]  ;;  %v3646_v31 = vld [vmem:[%s6213_s1 + $0x670] sm:$0xff] }
  0xa1   : > { %3553 = vmatmul.mubr.msk.f32.gmra.mxu0 %vm354_vm1, %v4489_v46  ;;  %3609 = vmatmul.mubr.msk.f32.gmra.mxu1 %vm354_vm1, %v4665_v32  ;;  %v1592_v46 = vrot.slane %v4042_v54, 3  ;;  %v3586_v54 = vld [vmem:[%s6213_s1 + $0x550] sm:$0xff] }
  0xa2   : > { %1448 = vmatprep.mubr.f32.mxu0 %v6218_v39  ;;  %1690 = vmatprep.mubr.f32.mxu1 %v6218_v39 }
  0xa3   : > { %1745 = vmatprep.subr.mxu0 %v3599_v35  ;;  %1858 = vmatprep.subr.mxu1 %v3601_v36  ;;  %v4731_v51 = vsel %vm1582_vm3, %v1590_v41, %v1592_v46  ;;  %v4753_v57 = vsel %vm1582_vm3, %v1592_v46, %v1594_v52  ;;  %v3638_v35 = vld [vmem:[%s6213_s1 + $0x630] sm:$0xff]  ;;  %v3640_v36 = vld [vmem:[%s6213_s1 + $0x640] sm:$0xff] }
  0xa4   : > { %1746 = vmatpush1.msra.mxu0 %v3598_v40  ;;  %1859 = vmatpush1.msra.mxu1 %v3600_v37  ;;  %v3814_v40 = vld [vmem:[%s3936_s15] sm:$0xff]  ;;  %v3816_v46 = vld [vmem:[%s3936_s15 + $0x10] sm:$0xff] }
  0xa5   : > { %3554 = vmatmul.mubr.msk.f32.gmra.mxu0 %vm354_vm1, %v4511_v53  ;;  %3610 = vmatmul.mubr.msk.f32.gmra.mxu1 %vm354_vm1, %v4687_v38  ;;  %v3581_v53 = vld [vmem:[%s6213_s1 + $0x528] sm:$0xff]  ;;  %v2051_v37 = vrot.slane %v3814_v40, 4  ;;  %v3643_v40 = vld [vmem:[%s6213_s1 + $0x658] sm:$0xff] }
  0xa6   : > { %1454 = vmatprep.mubr.f32.mxu0 %v6218_v39  ;;  %1696 = vmatprep.mubr.f32.mxu1 %v6218_v39 }
  0xa7   : > { %1747 = vmatprep.subr.mxu0 %v3593_v42  ;;  %1860 = vmatprep.subr.mxu1 %v3595_v43  ;;  %v3633_v42 = vld [vmem:[%s6213_s1 + $0x608] sm:$0xff]  ;;  %v3635_v43 = vld [vmem:[%s6213_s1 + $0x618] sm:$0xff] }
  0xa8   : > { %1748 = vmatpush1.msra.mxu0 %v3592_v47  ;;  %1861 = vmatpush1.msra.mxu1 %v3594_v44  ;;  %v3632_v47 = vld [vmem:[%s6213_s1 + $0x600] sm:$0xff]  ;;  %v3634_v44 = vld [vmem:[%s6213_s1 + $0x610] sm:$0xff] }
  0xa9   : > { %3555 = vmatmul.mubr.msk.f32.gmra.mxu0 %vm354_vm1, %v4533_v60  ;;  %3611 = vmatmul.mubr.msk.f32.gmra.mxu1 %vm354_vm1, %v4709_v45  ;;  %v3577_v60 = vld [vmem:[%s6213_s1 + $0x508] sm:$0xff] }
  0xaa   : > { %1460 = vmatprep.mubr.f32.mxu0 %v6218_v39  ;;  %1702 = vmatprep.mubr.f32.mxu1 %v6218_v39 }
  0xab   : > { %1749 = vmatprep.subr.mxu0 %v3587_v48  ;;  %1862 = vmatprep.subr.mxu1 %v3589_v49  ;;  %v2054_v48 = vrot.slane %v3816_v46, 4  ;;  %v3679_v49 = vld [vmem:[%s6213_s1 + $0x778] sm:$0xff] }
  0xac   : > { %1750 = vmatpush1.msra.mxu0 %v3586_v54  ;;  %1863 = vmatpush1.msra.mxu1 %v3588_v50 }
  0xad   : > { %3556 = vmatmul.mubr.msk.f32.gmra.mxu0 %vm354_vm1, %v4555_v3  ;;  %3612 = vmatmul.mubr.msk.f32.gmra.mxu1 %vm354_vm1, %v4731_v51  ;;  %v3570_v3 = vld [vmem:[%s6213_s1 + $0x4d0] sm:$0xff] }
  0xae   : > { %1466 = vmatprep.mubr.f32.mxu0 %v6218_v39  ;;  %1708 = vmatprep.mubr.f32.mxu1 %v6218_v39 }
  0xaf   : > { %1751 = vmatprep.subr.mxu0 %v3581_v53  ;;  %1864 = vmatprep.subr.mxu1 %v3583_v55  ;;  %v3817_v53 = vld [vmem:[%s3936_s15 + $0x18] sm:$0xff] }
  0xb0   : > { %1752 = vmatpush1.msra.mxu0 %v3580_v61  ;;  %1865 = vmatpush1.msra.mxu1 %v3582_v56  ;;  %v2056_v55 = vrot.slane %v3817_v53, 4 }
  0xb1   : > { %3557 = vmatmul.mubr.msk.f32.gmra.mxu0 %vm354_vm1, %v4577_v10  ;;  %3613 = vmatmul.mubr.msk.f32.gmra.mxu1 %vm354_vm1, %v4753_v57  ;;  %v3677_v10 = vld [vmem:[%s6213_s1 + $0x768] sm:$0xff] }
  0xb2   : > { %1472 = vmatprep.mubr.f32.mxu0 %v6218_v39  ;;  %1714 = vmatprep.mubr.f32.mxu1 %v6218_v39 }
  0xb3   : > { %1753 = vmatprep.subr.mxu0 %v3575_v59  ;;  %1866 = vmatprep.subr.mxu1 %v3577_v60  ;;  %v3672_v60 = vld [vmem:[%s6213_s1 + $0x740] sm:$0xff] }
  0xb4   : > { %1754 = vmatpush1.msra.mxu0 %v3574_v4  ;;  %1867 = vmatpush1.msra.mxu1 %v3576_v62  ;;  %v5007_v4 = vsel %vm2050_vm4, %v2054_v48, %v2056_v55  ;;  %v3818_v62 = vld [vmem:[%s3936_s15 + $0x20] sm:$0xff] }
  0xb5   : > { %3558 = vmatmul.mubr.msk.f32.gmra.mxu0 %vm354_vm1, %v4602_v16  ;;  %3614 = vmatmul.mubr.msk.f32.gmra.mxu1 %vm354_vm1, %v4778_v63  ;;  %v3670_v16 = vld [vmem:[%s6213_s1 + $0x730] sm:$0xff] }
  0xb6   : > { %1478 = vmatprep.mubr.f32.mxu0 %v6218_v39  ;;  %1720 = vmatprep.mubr.f32.mxu1 %v6218_v39 }
  0xb7   : > { %1755 = vmatprep.subr.mxu0 %v3569_v0  ;;  %1868 = vmatprep.subr.mxu1 %v3571_v1 }
  0xb8   : > { %1756 = vmatpush1.msra.mxu0 %v3568_v2  ;;  %1869 = vmatpush1.msra.mxu1 %v3570_v3  ;;  %v3667_v2 = vld [vmem:[%s6213_s1 + $0x718] sm:$0xff] }
  0xb9   : > { %3559 = vmatmul.mubr.msk.f32.gmra.mxu0 %vm354_vm1, %v4580_v11  ;;  %3615 = vmatmul.mubr.msk.f32.gmra.mxu1 %vm354_vm1, %v4756_v58  ;;  %v3674_v11 = vld [vmem:[%s6213_s1 + $0x750] sm:$0xff] }
  0xba   : > { %1757 = vmatprep.subr.mxu0 %v3563_v5  ;;  %1870 = vmatprep.subr.mxu1 %v3565_v6  ;;  %v3666_v6 = vld [vmem:[%s6213_s1 + $0x710] sm:$0xff] }
  0xbb   : > { %1758 = vmatpush1.msra.mxu0 %v3562_v7  ;;  %1791 = vmatprep.mubr.f32.mxu0 %v6218_v39 }
  0xbc   : > { %1871 = vmatpush1.msra.mxu1 %v3564_v8  ;;  %1904 = vmatprep.mubr.f32.mxu1 %v6218_v39  ;;  %v3819_v8 = vld [vmem:[%s3936_s15 + $0x28] sm:$0xff] }
  0xbd   : > { %3616 = vmatmul.mubr.msk.f32.vlgmr.msra.gmra.mxu0 %vm354_vm1, %v4641_v29  ;;  %3624 = vmatmul.mubr.msk.f32.vlgmr.msra.gmra.mxu1 %vm354_vm1, %v4641_v29  ;;  %v3650_v29 = vld [vmem:[%s6213_s1 + $0x690] sm:$0xff] }
  0xbe   : > { %1797 = vmatprep.mubr.f32.mxu0 %v6218_v39  ;;  %1910 = vmatprep.mubr.f32.mxu1 %v6218_v39 }
  0xbf   : > { %2098 = vmatprep.subr.mxu0 %v3675_v9  ;;  %2211 = vmatprep.subr.mxu1 %v3677_v10  ;;  %v2060_v9 = vrot.slane %v3819_v8, 4 }
  0xc0   : > { %2099 = vmatpush1.msra.mxu0 %v3674_v11  ;;  %2212 = vmatpush1.msra.mxu1 %v3676_v12  ;;  %v3661_v12 = vld [vmem:[%s6213_s1 + $0x6e8] sm:$0xff] }
  0xc1   : > { %3617 = vmatmul.mubr.msk.f32.gmra.mxu0 %vm354_vm1, %v4665_v32  ;;  %3625 = vmatmul.mubr.msk.f32.gmra.mxu1 %vm354_vm1, %v4665_v32  ;;  %v3639_v32 = vld [vmem:[%s6213_s1 + $0x638] sm:$0xff] }
  0xc2   : > { %1803 = vmatprep.mubr.f32.mxu0 %v6218_v39  ;;  %1916 = vmatprep.mubr.f32.mxu1 %v6218_v39 }
  0xc3   : > { %2100 = vmatprep.subr.mxu0 %v3669_v13  ;;  %2213 = vmatprep.subr.mxu1 %v3671_v14 }
  0xc4   : > { %2101 = vmatpush1.msra.mxu0 %v3668_v15  ;;  %2214 = vmatpush1.msra.mxu1 %v3670_v16  ;;  %v3660_v15 = vld [vmem:[%s6213_s1 + $0x6e0] sm:$0xff] }
  0xc5   : > { %3618 = vmatmul.mubr.msk.f32.gmra.mxu0 %vm354_vm1, %v4687_v38  ;;  %3626 = vmatmul.mubr.msk.f32.gmra.mxu1 %vm354_vm1, %v4687_v38  ;;  %v3815_v38 = vld [vmem:[%s3936_s15 + $0x8] sm:$0xff] }
  0xc6   : > { %1809 = vmatprep.mubr.f32.mxu0 %v6218_v39  ;;  %1922 = vmatprep.mubr.f32.mxu1 %v6218_v39  ;;  %v2052_v41 = vrot.slane %v3815_v38, 4 }
  0xc7   : > { %2102 = vmatprep.subr.mxu0 %v3663_v17  ;;  %2215 = vmatprep.subr.mxu1 %v3665_v18  ;;  %v3820_v17 = vld [vmem:[%s3936_s15 + $0x30] sm:$0xff] }
  0xc8   : > { %2103 = vmatpush1.msra.mxu0 %v3662_v19  ;;  %2216 = vmatpush1.msra.mxu1 %v3664_v20  ;;  %v4983_v52 = vsel %vm2050_vm4, %v2052_v41, %v2054_v48  ;;  %v2062_v18 = vrot.slane %v3820_v17, 4 }
  0xc9   : > { %3619 = vmatmul.mubr.msk.f32.gmra.mxu0 %vm354_vm1, %v4709_v45  ;;  %3627 = vmatmul.mubr.msk.f32.gmra.mxu1 %vm354_vm1, %v4709_v45  ;;  %v4961_v45 = vsel %vm2050_vm4, %v2051_v37, %v2052_v41  ;;  %v3642_v41 = vld [vmem:[%s6213_s1 + $0x650] sm:$0xff] }
  0xca   : > { %1815 = vmatprep.mubr.f32.mxu0 %v6218_v39  ;;  %1928 = vmatprep.mubr.f32.mxu1 %v6218_v39 }
  0xcb   : > { %2104 = vmatprep.subr.mxu0 %v3657_v21  ;;  %2217 = vmatprep.subr.mxu1 %v3659_v22  ;;  %v3655_v21 = vld [vmem:[%s6213_s1 + $0x6b8] sm:$0xff] }
  0xcc   : > { %2105 = vmatpush1.msra.mxu0 %v3656_v23  ;;  %2218 = vmatpush1.msra.mxu1 %v3658_v24  ;;  %v3654_v24 = vld [vmem:[%s6213_s1 + $0x6b0] sm:$0xff] }
  0xcd   : > { %3620 = vmatmul.mubr.msk.f32.gmra.mxu0 %vm354_vm1, %v4731_v51  ;;  %3628 = vmatmul.mubr.msk.f32.gmra.mxu1 %vm354_vm1, %v4731_v51  ;;  %v3678_v51 = vld [vmem:[%s6213_s1 + $0x770] sm:$0xff] }
  0xce   : > { %1821 = vmatprep.mubr.f32.mxu0 %v6218_v39  ;;  %1934 = vmatprep.mubr.f32.mxu1 %v6218_v39 }
  0xcf   : > { %2106 = vmatprep.subr.mxu0 %v3651_v25  ;;  %2219 = vmatprep.subr.mxu1 %v3653_v26  ;;  %v5079_v25 = vsel %vm2050_vm4, %v2060_v9, %v2062_v18  ;;  %v3821_v26 = vld [vmem:[%s3936_s15 + $0x38] sm:$0xff] }
  0xd0   : > { %2107 = vmatpush1.msra.mxu0 %v3650_v29  ;;  %2220 = vmatpush1.msra.mxu1 %v3652_v27  ;;  %v5082_v29 = vrot.slane %v3821_v26, 4 }
  0xd1   : > { %3621 = vmatmul.mubr.msk.f32.gmra.mxu0 %vm354_vm1, %v4753_v57  ;;  %3629 = vmatmul.mubr.msk.f32.gmra.mxu1 %vm354_vm1, %v4753_v57  ;;  %v3673_v57 = vld [vmem:[%s6213_s1 + $0x748] sm:$0xff] }
  0xd2   : > { %1827 = vmatprep.mubr.f32.mxu0 %v6218_v39  ;;  %1940 = vmatprep.mubr.f32.mxu1 %v6218_v39 }
  0xd3   : > { %2108 = vmatprep.subr.mxu0 %v3645_v28  ;;  %2221 = vmatprep.subr.mxu1 %v3647_v30  ;;  %v3649_v30 = vld [vmem:[%s6213_s1 + $0x688] sm:$0xff] }
  0xd4   : > { %2109 = vmatpush1.msra.mxu0 %v3644_v34  ;;  %2222 = vmatpush1.msra.mxu1 %v3646_v31 }
  0xd5   : > { %3622 = vmatmul.mubr.msk.f32.gmra.mxu0 %vm354_vm1, %v4778_v63  ;;  %3630 = vmatmul.mubr.msk.f32.gmra.mxu1 %vm354_vm1, %v4778_v63  ;;  %v2058_v63 = vrot.slane %v3818_v62, 4 }
  0xd6   : > { %1833 = vmatprep.mubr.f32.mxu0 %v6218_v39  ;;  %1946 = vmatprep.mubr.f32.mxu1 %v6218_v39 }
  0xd7   : > { %2110 = vmatprep.subr.mxu0 %v3639_v32  ;;  %2223 = vmatprep.subr.mxu1 %v3641_v33  ;;  %v5031_v7 = vsel %vm2050_vm4, %v2056_v55, %v2058_v63  ;;  %v5055_v16 = vsel %vm2050_vm4, %v2058_v63, %v2060_v9  ;;  %v3648_v32 = vld [vmem:[%s6213_s1 + $0x680] sm:$0xff]  ;;  %v5106_v33 = vsel %vm2050_vm4, %v2062_v18, %v5082_v29 }
  0xd8   : > { %2111 = vmatpush1.msra.mxu0 %v3638_v35  ;;  %2224 = vmatpush1.msra.mxu1 %v3640_v36 }
  0xd9   : > { %3623 = vmatmul.mubr.msk.f32.gmra.mxu0 %vm354_vm1, %v4756_v58  ;;  %3631 = vmatmul.mubr.msk.f32.gmra.mxu1 %vm354_vm1, %v4756_v58 }
  0xda   : > { %2112 = vmatprep.subr.mxu0 %v3633_v42  ;;  %2225 = vmatprep.subr.mxu1 %v3635_v43 }
  0xdb   : > { %2113 = vmatpush1.msra.mxu0 %v3632_v47  ;;  %2146 = vmatprep.mubr.f32.mxu0 %v6218_v39  ;;  %v3637_v47 = vld [vmem:[%s6213_s1 + $0x628] sm:$0xff] }
  0xdc   : > { %2226 = vmatpush1.msra.mxu1 %v3634_v44  ;;  %2259 = vmatprep.mubr.f32.mxu1 %v6218_v39  ;;  %v3636_v44 = vld [vmem:[%s6213_s1 + $0x620] sm:$0xff] }
  0xdd   : > { %v4969_v54 = vpop.f32.mrf.mxu0  ;;  %v4971_v50 = vpop.f32.mrf.mxu1  ;;  %3680 = vmatmul.mubr.msk.f32.vlgmr.msra.gmra.mxu0 %vm354_vm1, %v4961_v45  ;;  %3688 = vmatmul.mubr.msk.f32.vlgmr.msra.gmra.mxu1 %vm354_vm1, %v4961_v45 }
  0xde   : > { %2152 = vmatprep.mubr.f32.mxu0 %v6218_v39  ;;  %2265 = vmatprep.mubr.f32.mxu1 %v6218_v39 }
  0xdf   : > { %v4986_v61 = vpop.f32.mrf.mxu0  ;;  %v4988_v56 = vpop.f32.mrf.mxu1  ;;  %2324 = vmatprep.subr.mxu0 %v3679_v49 }
  0xe0   : > { %2325 = vmatpush1.msra.mxu0 %v3678_v51 }
  0xe1   : > { %v4993_v58 = vpop.f32.mrf.mxu0  ;;  %v4995_v59 = vpop.f32.mrf.mxu1  ;;  %3681 = vmatmul.mubr.msk.f32.gmra.mxu0 %vm354_vm1, %v4983_v52  ;;  %3689 = vmatmul.mubr.msk.f32.gmra.mxu1 %vm354_vm1, %v4983_v52 }
  0xe2   : > { %2158 = vmatprep.mubr.f32.mxu0 %v6218_v39  ;;  %2271 = vmatprep.mubr.f32.mxu1 %v6218_v39 }
  0xe3   : > { %v5010_v0 = vpop.f32.mrf.mxu0  ;;  %v5012_v1 = vpop.f32.mrf.mxu1  ;;  %2326 = vmatprep.subr.mxu0 %v3673_v57 }
  0xe4   : > { %2327 = vmatpush1.msra.mxu0 %v3672_v60 }
  0xe5   : > { %v5017_v3 = vpop.f32.mrf.mxu0  ;;  %v5019_v5 = vpop.f32.mrf.mxu1  ;;  %3682 = vmatmul.mubr.msk.f32.gmra.mxu0 %vm354_vm1, %v5007_v4  ;;  %3690 = vmatmul.mubr.msk.f32.gmra.mxu1 %vm354_vm1, %v5007_v4 }
  0xe6   : > { %2164 = vmatprep.mubr.f32.mxu0 %v6218_v39  ;;  %2277 = vmatprep.mubr.f32.mxu1 %v6218_v39 }
  0xe7   : > { %v5034_v10 = vpop.f32.mrf.mxu0  ;;  %v5036_v11 = vpop.f32.mrf.mxu1  ;;  %2328 = vmatprep.subr.mxu0 %v3667_v2 }
  0xe8   : > { %2329 = vmatpush1.msra.mxu0 %v3666_v6 }
  0xe9   : > { %v5041_v13 = vpop.f32.mrf.mxu0  ;;  %v5043_v14 = vpop.f32.mrf.mxu1  ;;  %3683 = vmatmul.mubr.msk.f32.gmra.mxu0 %vm354_vm1, %v5031_v7  ;;  %3691 = vmatmul.mubr.msk.f32.gmra.mxu1 %vm354_vm1, %v5031_v7 }
  0xea   : > { %2170 = vmatprep.mubr.f32.mxu0 %v6218_v39  ;;  %2283 = vmatprep.mubr.f32.mxu1 %v6218_v39 }
  0xeb   : > { %v5058_v19 = vpop.f32.mrf.mxu0  ;;  %v5060_v20 = vpop.f32.mrf.mxu1  ;;  %2330 = vmatprep.subr.mxu0 %v3661_v12 }
  0xec   : > { %2331 = vmatpush1.msra.mxu0 %v3660_v15 }
  0xed   : > { %v5065_v22 = vpop.f32.mrf.mxu0  ;;  %v5067_v23 = vpop.f32.mrf.mxu1  ;;  %3684 = vmatmul.mubr.msk.f32.gmra.mxu0 %vm354_vm1, %v5055_v16  ;;  %3692 = vmatmul.mubr.msk.f32.gmra.mxu1 %vm354_vm1, %v5055_v16 }
  0xee   : > { %2176 = vmatprep.mubr.f32.mxu0 %v6218_v39  ;;  %2289 = vmatprep.mubr.f32.mxu1 %v6218_v39 }
  0xef   : > { %v5084_v27 = vpop.f32.mrf.mxu0  ;;  %v5086_v28 = vpop.f32.mrf.mxu1  ;;  %2332 = vmatprep.subr.mxu0 %v3655_v21 }
  0xf0   : > { %2333 = vmatpush1.msra.mxu0 %v3654_v24 }
  0xf1   : > { %v5091_v34 = vpop.f32.mrf.mxu0  ;;  %v5093_v31 = vpop.f32.mrf.mxu1  ;;  %3685 = vmatmul.mubr.msk.f32.gmra.mxu0 %vm354_vm1, %v5079_v25  ;;  %3693 = vmatmul.mubr.msk.f32.gmra.mxu1 %vm354_vm1, %v5079_v25 }
  0xf2   : > { %2182 = vmatprep.mubr.f32.mxu0 %v6218_v39  ;;  %2295 = vmatprep.mubr.f32.mxu1 %v6218_v39 }
  0xf3   : > { %v5108_v35 = vpop.f32.mrf.mxu0  ;;  %v5110_v36 = vpop.f32.mrf.mxu1  ;;  %2334 = vmatprep.subr.mxu0 %v3649_v30 }
  0xf4   : > { %2335 = vmatpush1.msra.mxu0 %v3648_v32 }
  0xf5   : > { %v5115_v37 = vpop.f32.mrf.mxu0  ;;  %v5117_v38 = vpop.f32.mrf.mxu1  ;;  %3686 = vmatmul.mubr.msk.f32.gmra.mxu0 %vm354_vm1, %v5106_v33  ;;  %3694 = vmatmul.mubr.msk.f32.gmra.mxu1 %vm354_vm1, %v5106_v33 }
  0xf6   : > { %2188 = vmatprep.mubr.f32.mxu0 %v6218_v39  ;;  %2301 = vmatprep.mubr.f32.mxu1 %v6218_v39 }
  0xf7   : > { %v5128_v42 = vpop.f32.mrf.mxu0  ;;  %v5130_v43 = vpop.f32.mrf.mxu1  ;;  %2336 = vmatprep.subr.mxu0 %v3643_v40 }
  0xf8   : > { %2337 = vmatpush1.msra.mxu0 %v3642_v41 }
  0xf9   : > { %v479_v46 = vpop.f32.mrf.mxu0  ;;  %v5138_v48 = vpop.f32.mrf.mxu1  ;;  %3687 = vmatmul.mubr.msk.f32.gmra.mxu0 %vm354_vm1, %v5082_v29  ;;  %3695 = vmatmul.mubr.msk.f32.gmra.mxu1 %vm354_vm1, %v5082_v29 }
  0xfa   : > { %2338 = vmatprep.subr.mxu0 %v3637_v47  ;;  %2372 = vmatprep.mubr.f32.mxu0 %v6218_v39 }
  0xfb   : > { %v5145_v49 = vpop.f32.mrf.mxu0  ;;  %v5147_v51 = vpop.f32.mrf.mxu1  ;;  %2339 = vmatpush1.msra.mxu0 %v3636_v44  ;;  %2648 = vmatprep.mubr.f32.mxu1 %v6218_v39 }
  0xfd   : > { %v663_v53 = vpop.f32.mrf.mxu0  ;;  %v792_v55 = vpop.f32.mrf.mxu1  ;;  %3696 = vmatmul.mubr.msk.f32.vlgmr.msra.gmra.mxu0 %vm354_vm1, %v4961_v45 }
  0xfe   : > { %v5153_v57 = vadd.f32 %v792_v55, %v4969_v54  ;;  %2378 = vmatprep.mubr.f32.mxu0 %v6218_v39 }
  0xff   : > { %v5156_v60 = vpop.f32.mrf.mxu0  ;;  %v5158_v62 = vpop.f32.mrf.mxu1 }
 0x100   : > { %6228 = vst [vmem:[#allocation2_spill] sm:$0xff] %v5156_v60 }
 0x101   : > { %v669_v63 = vpop.f32.mrf.mxu0  ;;  %v798_v2 = vpop.f32.mrf.mxu1  ;;  %3697 = vmatmul.mubr.msk.f32.gmra.mxu0 %vm354_vm1, %v4983_v52 }
 0x102   : > { %v5163_v6 = vadd.f32 %v798_v2, %v4993_v58  ;;  %2384 = vmatprep.mubr.f32.mxu0 %v6218_v39 }
 0x103   : > { %v5166_v45 = vpop.f32.mrf.mxu0  ;;  %v5168_v54 = vpop.f32.mrf.mxu1 }
 0x104   : > { %6229 = vst [vmem:[#allocation3_spill] sm:$0xff] %v5166_v45 }
 0x105   : > { %v675_v8 = vpop.f32.mrf.mxu0  ;;  %v804_v9 = vpop.f32.mrf.mxu1  ;;  %3698 = vmatmul.mubr.msk.f32.gmra.mxu0 %vm354_vm1, %v5007_v4 }
 0x106   : > { %v5173_v12 = vadd.f32 %v804_v9, %v5017_v3  ;;  %2390 = vmatprep.mubr.f32.mxu0 %v6218_v39 }
 0x107   : > { %v5176_v52 = vpop.f32.mrf.mxu0  ;;  %v5178_v58 = vpop.f32.mrf.mxu1 }
 0x108   : > { %6230 = vst [vmem:[#allocation4_spill] sm:$0xff] %v5176_v52 }
 0x109   : > { %v681_v15 = vpop.f32.mrf.mxu0  ;;  %v810_v17 = vpop.f32.mrf.mxu1  ;;  %3699 = vmatmul.mubr.msk.f32.gmra.mxu0 %vm354_vm1, %v5031_v7 }
 0x10a   : > { %v5183_v18 = vadd.f32 %v810_v17, %v5041_v13  ;;  %2396 = vmatprep.mubr.f32.mxu0 %v6218_v39 }
 0x10b   : > { %v5186_v4 = vpop.f32.mrf.mxu0  ;;  %v5188_v3 = vpop.f32.mrf.mxu1 }
 0x10c   : > { %6231 = vst [vmem:[#allocation5_spill] sm:$0xff] %v5186_v4 }
 0x10d   : > { %v687_v21 = vpop.f32.mrf.mxu0  ;;  %v816_v24 = vpop.f32.mrf.mxu1  ;;  %3700 = vmatmul.mubr.msk.f32.gmra.mxu0 %vm354_vm1, %v5055_v16 }
 0x10e   : > { %v5193_v26 = vadd.f32 %v816_v24, %v5065_v22  ;;  %2402 = vmatprep.mubr.f32.mxu0 %v6218_v39 }
 0x10f   : > { %v5196_v7 = vpop.f32.mrf.mxu0  ;;  %v5198_v13 = vpop.f32.mrf.mxu1 }
 0x110   : > { %6232 = vst [vmem:[#allocation6_spill] sm:$0xff] %v5196_v7 }
 0x111   : > { %v693_v30 = vpop.f32.mrf.mxu0  ;;  %v822_v32 = vpop.f32.mrf.mxu1  ;;  %3701 = vmatmul.mubr.msk.f32.gmra.mxu0 %vm354_vm1, %v5079_v25 }
 0x112   : > { %v5203_v40 = vadd.f32 %v822_v32, %v5091_v34  ;;  %2408 = vmatprep.mubr.f32.mxu0 %v6218_v39 }
 0x113   : > { %v5206_v16 = vpop.f32.mrf.mxu0  ;;  %v5208_v22 = vpop.f32.mrf.mxu1 }
 0x114   : > { %6233 = vst [vmem:[#allocation7_spill] sm:$0xff] %v5206_v16 }
 0x115   : > { %v699_v41 = vpop.f32.mrf.mxu0  ;;  %v828_v47 = vpop.f32.mrf.mxu1  ;;  %3702 = vmatmul.mubr.msk.f32.gmra.mxu0 %vm354_vm1, %v5106_v33 }
 0x116   : > { %v5213_v44 = vadd.f32 %v828_v47, %v5115_v37  ;;  %2414 = vmatprep.mubr.f32.mxu0 %v6218_v39 }
 0x117   : > { %v5216_v25 = vpop.f32.mrf.mxu0  ;;  %v5218_v34 = vpop.f32.mrf.mxu1 }
 0x118   : > { %6234 = vst [vmem:[#allocation8_spill] sm:$0xff] %v5216_v25 }
 0x119   : > { %v705_v55 = vpop.f32.mrf.mxu0  ;;  %v834_v2 = vpop.f32.mrf.mxu1  ;;  %3703 = vmatmul.mubr.msk.f32.gmra.mxu0 %vm354_vm1, %v5082_v29 }
 0x11a   : > { %v5222_v9 = vadd.f32 %v834_v2, %v479_v46  ;;  %2826 = vmatprep.mubr.f32.mxu0 %v6218_v39 }
 0x11b   : > { %v5225_v17 = vpop.f32.mrf.mxu0  ;;  %v5227_v33 = vpop.f32.mrf.mxu1 }
 0x11c   : > { %6235 = vst [vmem:[#allocation9_spill] sm:$0xff] %v5225_v17 }
 0x11d   : > { %v905_v37 = vpop.f32.mrf.mxu0  ;;  %v1018_v24 = vpop.f32.mrf.mxu1 }
 0x11e   : > { %v906_v32 = vadd.f32 %v905_v37, %v4971_v50  ;;  %v5230_v47 = vadd.f32 %v1018_v24, %v663_v53 }
 0x11f   : > { %v907_v25 = vpop.f32.mrf.mxu0  ;;  %v5232_v16 = vpop.f32.mrf.mxu1 }
 0x120   : > { %6236 = vst [vmem:[#allocation10_spill] sm:$0xff] %v5230_v47 }
 0x121   : > { %v911_v7 = vpop.f32.mrf.mxu0  ;;  %v1024_v4 = vpop.f32.mrf.mxu1 }
 0x122   : > { %v912_v29 = vadd.f32 %v911_v7, %v4995_v59  ;;  %v5235_v46 = vadd.f32 %v1024_v4, %v669_v63 }
 0x123   : > { %v913_v2 = vpop.f32.mrf.mxu0  ;;  %v5237_v39 = vpop.f32.mrf.mxu1 }
 0x124   : > { %6237 = vst [vmem:[#allocation11_spill] sm:$0xff] %v5235_v46  ;;  %6238 = vst [vmem:[#allocation12_spill] sm:$0xff] %v5237_v39 }
 0x125   : > { %v917_v17 = vpop.f32.mrf.mxu0  ;;  %v1030_v52 = vpop.f32.mrf.mxu1 }
 0x126   : > { %v918_v45 = vadd.f32 %v917_v17, %v5019_v5  ;;  %v5240_v60 = vadd.f32 %v1030_v52, %v675_v8 }
 0x127   : > { %v919_v50 = vpop.f32.mrf.mxu0  ;;  %v5242_v53 = vpop.f32.mrf.mxu1 }
 0x128   : > { %6239 = vst [vmem:[#allocation13_spill] sm:$0xff] %v5240_v60 }
 0x129   : > { %v923_v37 = vpop.f32.mrf.mxu0  ;;  %v1036_v24 = vpop.f32.mrf.mxu1 }
 0x12a   : > { %v5245_v47 = vadd.f32 %v923_v37, %v5043_v14  ;;  %v5247_v59 = vadd.f32 %v1036_v24, %v681_v15 }
 0x12b   : > { %v925_v63 = vpop.f32.mrf.mxu0  ;;  %v5249_v4 = vpop.f32.mrf.mxu1 }
 0x12c   : > { %6240 = vst [vmem:[#allocation14_spill] sm:$0xff] %v5247_v59 }
 0x12d   : > { %v929_v7 = vpop.f32.mrf.mxu0  ;;  %v1042_v46 = vpop.f32.mrf.mxu1 }
 0x12e   : > { %v5252_v39 = vadd.f32 %v929_v7, %v5067_v23  ;;  %v5254_v5 = vadd.f32 %v1042_v46, %v687_v21 }
 0x12f   : > { %v5256_v8 = vpop.f32.mrf.mxu0  ;;  %v5258_v52 = vpop.f32.mrf.mxu1 }
 0x130   : > { %6241 = vst [vmem:[#allocation15_spill] sm:$0xff] %v5254_v5  ;;  %6242 = vst [vmem:[#allocation16_spill] sm:$0xff] %v5258_v52 }
 0x131   : > { %v935_v17 = vpop.f32.mrf.mxu0  ;;  %v1048_v60 = vpop.f32.mrf.mxu1 }
 0x132   : > { %v5261_v14 = vadd.f32 %v935_v17, %v5093_v31  ;;  %v5263_v15 = vadd.f32 %v1048_v60, %v693_v30 }
 0x133   : > { %v5265_v37 = vpop.f32.mrf.mxu0  ;;  %v5267_v24 = vpop.f32.mrf.mxu1 }
 0x134   : > { %6243 = vst [vmem:[#allocation17_spill] sm:$0xff] %v5263_v15  ;;  %6244 = vst [vmem:[#allocation18_spill] sm:$0xff] %v5267_v24 }
 0x135   : > { %v941_v59 = vpop.f32.mrf.mxu0  ;;  %v1054_v23 = vpop.f32.mrf.mxu1 }
 0x136   : > { %v5270_v21 = vadd.f32 %v941_v59, %v5117_v38  ;;  %v5272_v46 = vadd.f32 %v1054_v23, %v699_v41  ;;  %v795_v41 = vadd.f32 %v5158_v62, %v4986_v61  ;;  %v908_v59 = vadd.f32 %v907_v25, %v4988_v56 }
 0x137   : > { %v5274_v7 = vpop.f32.mrf.mxu0  ;;  %v5276_v5 = vpop.f32.mrf.mxu1  ;;  %v914_v61 = vadd.f32 %v913_v2, %v5012_v1 }
 0x138   : > { %6245 = vst [vmem:[#allocation19_spill] sm:$0xff] %v5272_v46  ;;  %6246 = vst [vmem:[#allocation20_spill] sm:$0xff] %v5276_v5  ;;  %v801_v5 = vadd.f32 %v5168_v54, %v5010_v0  ;;  %v920_v0 = vadd.f32 %v919_v50, %v5036_v11 }
 0x139   : > { %v947_v52 = vpop.f32.mrf.mxu0  ;;  %v1060_v31 = vpop.f32.mrf.mxu1 }
 0x13a   : > { %v5279_v60 = vadd.f32 %v947_v52, %v5138_v48  ;;  %v5281_v30 = vadd.f32 %v1060_v31, %v705_v55 }
 0x13b   : > { %v5283_v17 = vpop.f32.mrf.mxu0  ;;  %v5285_v15 = vpop.f32.mrf.mxu1 }
 0x13c   : > { %6247 = vst [vmem:[#allocation21_spill] sm:$0xff] %v5281_v30  ;;  %6248 = vst [vmem:[#allocation22_spill] sm:$0xff] %v5285_v15 }
 0x13d   : > { %v1212_v24 = vpop.f32.mrf.mxu0  ;;  %v1325_v38 = vpop.f32.mrf.mxu1 }
 0x13e   : > { %v5291_v23 = vadd.f32 %v1212_v24, %v5153_v57  ;;  %v5293_v46 = vadd.f32 %v1325_v38, %v906_v32 }
 0x13f   : > { %v1214_v48 = vpop.f32.mrf.mxu0  ;;  %v1327_v52 = vpop.f32.mrf.mxu1 }
 0x140   : > { %v5295_v55 = vadd.f32 %v1214_v48, %v795_v41  ;;  %v5297_v31 = vadd.f32 %v1327_v52, %v908_v59  ;;  %v807_v59 = vadd.f32 %v5178_v58, %v5034_v10  ;;  %v813_v48 = vadd.f32 %v5188_v3, %v5058_v19 }
 0x141   : > { %v1218_v30 = vpop.f32.mrf.mxu0  ;;  %v1331_v15 = vpop.f32.mrf.mxu1  ;;  %v926_v10 = vadd.f32 %v925_v63, %v5060_v20  ;;  %v932_v19 = vadd.f32 %v5256_v8, %v5086_v28  ;;  %v938_v28 = vadd.f32 %v5265_v37, %v5110_v36  ;;  %v944_v36 = vadd.f32 %v5274_v7, %v5130_v43 }
 0x142   : > { %v5303_v56 = vadd.f32 %v1218_v30, %v5163_v6  ;;  %v5305_v57 = vadd.f32 %v1331_v15, %v912_v29  ;;  %v950_v43 = vadd.f32 %v5283_v17, %v5147_v51 }
 0x143   : > { %v1220_v62 = vpop.f32.mrf.mxu0  ;;  %v1333_v25 = vpop.f32.mrf.mxu1 }
 0x144   : > { %v5307_v32 = vadd.f32 %v1220_v62, %v801_v5  ;;  %v5309_v24 = vadd.f32 %v1333_v25, %v914_v61  ;;  %v819_v25 = vadd.f32 %v5198_v13, %v5084_v27  ;;  %v825_v27 = vadd.f32 %v5208_v22, %v5108_v35 }
 0x145   : > { %v1224_v38 = vpop.f32.mrf.mxu0  ;;  %v1337_v41 = vpop.f32.mrf.mxu1  ;;  %v831_v35 = vadd.f32 %v5218_v34, %v5128_v42  ;;  %v837_v42 = vadd.f32 %v5227_v33, %v5145_v49  ;;  %v6250_v33 = vld [vmem:[#allocation10_spill] sm:$0xff] }
 0x146   : > { %v5315_v1 = vadd.f32 %v1224_v38, %v5173_v12  ;;  %v5317_v6 = vadd.f32 %v1337_v41, %v918_v45 }
 0x147   : > { %v1226_v54 = vpop.f32.mrf.mxu0  ;;  %v1339_v29 = vpop.f32.mrf.mxu1 }
 0x148   : > { %v5319_v2 = vadd.f32 %v1226_v54, %v807_v59  ;;  %v5321_v5 = vadd.f32 %v1339_v29, %v920_v0 }
 0x149   : > { %v1230_v15 = vpop.f32.mrf.mxu0  ;;  %v1343_v30 = vpop.f32.mrf.mxu1 }
 0x14a   : > { %v5327_v11 = vadd.f32 %v1230_v15, %v5183_v18  ;;  %v5330_v12 = vadd.f32 %v1343_v30, %v5245_v47 }
 0x14b   : > { %v1232_v45 = vpop.f32.mrf.mxu0  ;;  %v1345_v58 = vpop.f32.mrf.mxu1 }
 0x14c   : > { %v5332_v50 = vadd.f32 %v1232_v45, %v813_v48  ;;  %v5334_v52 = vadd.f32 %v1345_v58, %v926_v10 }
 0x14d   : > { %v1236_v61 = vpop.f32.mrf.mxu0  ;;  %v1349_v62 = vpop.f32.mrf.mxu1 }
 0x14e   : > { %v5341_v20 = vadd.f32 %v1236_v61, %v5193_v26  ;;  %v5344_v18 = vadd.f32 %v1349_v62, %v5252_v39 }
 0x14f   : > { %v1238_v3 = vpop.f32.mrf.mxu0  ;;  %v1351_v47 = vpop.f32.mrf.mxu1 }
 0x150   : > { %v5346_v63 = vadd.f32 %v1238_v3, %v819_v25  ;;  %v5348_v38 = vadd.f32 %v1351_v47, %v932_v19  ;;  %v6249_v19 = vld [vmem:[#allocation2_spill] sm:$0xff] }
 0x151   : > { %v1242_v41 = vpop.f32.mrf.mxu0  ;;  %v1355_v59 = vpop.f32.mrf.mxu1  ;;  %v1021_v49 = vadd.f32 %v5232_v16, %v6249_v19  ;;  %v6256_v19 = vld [vmem:[#allocation5_spill] sm:$0xff] }
 0x152   : > { %v5355_v26 = vadd.f32 %v1242_v41, %v5203_v40  ;;  %v5358_v39 = vadd.f32 %v1355_v59, %v5261_v14 }
 0x153   : > { %v1244_v13 = vpop.f32.mrf.mxu0  ;;  %v1357_v8 = vpop.f32.mrf.mxu1 }
 0x154   : > { %v5360_v0 = vadd.f32 %v1244_v13, %v825_v27  ;;  %v5362_v54 = vadd.f32 %v1357_v8, %v938_v28  ;;  %v6251_v27 = vld [vmem:[#allocation3_spill] sm:$0xff]  ;;  %v6252_v28 = vld [vmem:[#allocation12_spill] sm:$0xff] }
 0x155   : > { %v1248_v29 = vpop.f32.mrf.mxu0  ;;  %v1361_v15 = vpop.f32.mrf.mxu1  ;;  %v1027_v13 = vadd.f32 %v6252_v28, %v6251_v27  ;;  %v6253_v8 = vld [vmem:[#allocation11_spill] sm:$0xff]  ;;  %v6258_v28 = vld [vmem:[#allocation6_spill] sm:$0xff] }
 0x156   : > { %v5369_v40 = vadd.f32 %v1248_v29, %v5213_v44  ;;  %v5372_v22 = vadd.f32 %v1361_v15, %v5270_v21 }
 0x157   : > { %v1250_v14 = vpop.f32.mrf.mxu0  ;;  %v1363_v37 = vpop.f32.mrf.mxu1 }
 0x158   : > { %v5374_v30 = vadd.f32 %v1250_v14, %v831_v35  ;;  %v5376_v48 = vadd.f32 %v1363_v37, %v944_v36  ;;  %v6254_v37 = vld [vmem:[#allocation4_spill] sm:$0xff] }
 0x159   : > { %v1254_v10 = vpop.f32.mrf.mxu0  ;;  %v1367_v45 = vpop.f32.mrf.mxu1 }
 0x15a   : > { %v5383_v44 = vadd.f32 %v1254_v10, %v5222_v9  ;;  %v5386_v34 = vadd.f32 %v1367_v45, %v5279_v60  ;;  %v1033_v10 = vadd.f32 %v5242_v53, %v6254_v37  ;;  %v6255_v45 = vld [vmem:[#allocation13_spill] sm:$0xff] }
 0x15b   : > { %v1256_v21 = vpop.f32.mrf.mxu0  ;;  %v1369_v7 = vpop.f32.mrf.mxu1 }
 0x15c   : > { %v5388_v58 = vadd.f32 %v1256_v21, %v837_v42  ;;  %v5390_v61 = vadd.f32 %v1369_v7, %v950_v43 }
 0x15d   : > { %v1438_v62 = vpop.f32.mrf.mxu0  ;;  %v1680_v25 = vpop.f32.mrf.mxu1 }
 0x15e   : > { %v5395_v3 = vadd.f32 %v1438_v62, %v6250_v33  ;;  %v5398_v51 = vadd.f32 %v1680_v25, %v5291_v23  ;;  %v6257_v33 = vld [vmem:[#allocation14_spill] sm:$0xff] }
 0x15f   : > { %v1440_v9 = vpop.f32.mrf.mxu0  ;;  %v1682_v60 = vpop.f32.mrf.mxu1 }
 0x160   : > { %v5400_v17 = vadd.f32 %v1440_v9, %v1021_v49  ;;  %v5403_v47 = vadd.f32 %v1682_v60, %v5295_v55  ;;  %v1039_v49 = vadd.f32 %v5249_v4, %v6256_v19 }
 0x161   : > { %v1444_v41 = vpop.f32.mrf.mxu0  ;;  %v1686_v59 = vpop.f32.mrf.mxu1 }
 0x162   : > { %v5408_v16 = vadd.f32 %v1444_v41, %v6253_v8  ;;  %v5411_v29 = vadd.f32 %v1686_v59, %v5303_v56 }
 0x163   : > { %v1446_v23 = vpop.f32.mrf.mxu0  ;;  %v1688_v15 = vpop.f32.mrf.mxu1 }
 0x164   : > { %v5413_v35 = vadd.f32 %v1446_v23, %v1027_v13  ;;  %v5416_v36 = vadd.f32 %v1688_v15, %v5307_v32  ;;  %v6259_v13 = vld [vmem:[#allocation16_spill] sm:$0xff]  ;;  %v6260_v23 = vld [vmem:[#allocation15_spill] sm:$0xff] }
 0x165   : > { %v1450_v55 = vpop.f32.mrf.mxu0  ;;  %v1692_v14 = vpop.f32.mrf.mxu1  ;;  %v1045_v8 = vadd.f32 %v6259_v13, %v6258_v28 }
 0x166   : > { %v5421_v42 = vadd.f32 %v1450_v55, %v6255_v45  ;;  %v5424_v43 = vadd.f32 %v1692_v14, %v5315_v1 }
 0x167   : > { %v1452_v56 = vpop.f32.mrf.mxu0  ;;  %v1694_v21 = vpop.f32.mrf.mxu1 }
 0x168   : > { %v5426_v7 = vadd.f32 %v1452_v56, %v1033_v10  ;;  %v5429_v62 = vadd.f32 %v1694_v21, %v5319_v2  ;;  %v6262_v56 = vld [vmem:[#allocation18_spill] sm:$0xff] }
 0x169   : > { %v1456_v32 = vpop.f32.mrf.mxu0  ;;  %v1698_v25 = vpop.f32.mrf.mxu1 }
 0x16a   : > { %v5434_v53 = vadd.f32 %v1456_v32, %v6257_v33  ;;  %v5437_v9 = vadd.f32 %v1698_v25, %v5327_v11  ;;  %v6263_v32 = vld [vmem:[#allocation17_spill] sm:$0xff] }
 0x16b   : > { %v1458_v1 = vpop.f32.mrf.mxu0  ;;  %v1700_v60 = vpop.f32.mrf.mxu1 }
 0x16c   : > { %v5439_v41 = vadd.f32 %v1458_v1, %v1039_v49  ;;  %v5442_v59 = vadd.f32 %v1700_v60, %v5332_v50  ;;  %v6261_v50 = vld [vmem:[#allocation7_spill] sm:$0xff]  ;;  %v6266_v60 = vld [vmem:[#allocation8_spill] sm:$0xff] }
 0x16d   : > { %v1462_v2 = vpop.f32.mrf.mxu0  ;;  %v1704_v27 = vpop.f32.mrf.mxu1  ;;  %v1051_v21 = vadd.f32 %v6262_v56, %v6261_v50  ;;  %v6272_v50 = vld [vmem:[#allocation22_spill] sm:$0xff] }
 0x16e   : > { %v1513_v4 = vadd.f32 %v1462_v2, %v6260_v23  ;;  %v5448_v15 = vadd.f32 %v1704_v27, %v5341_v20  ;;  %v6268_v27 = vld [vmem:[#allocation19_spill] sm:$0xff] }
 0x16f   : > { %v1464_v55 = vpop.f32.mrf.mxu0  ;;  %v1706_v11 = vpop.f32.mrf.mxu1 }
 0x170   : > { %v1514_v14 = vadd.f32 %v1464_v55, %v1045_v8  ;;  %v5451_v37 = vadd.f32 %v1706_v11, %v5346_v63  ;;  %v6267_v63 = vld [vmem:[#allocation20_spill] sm:$0xff] }
 0x171   : > { %v1468_v10 = vpop.f32.mrf.mxu0  ;;  %v5453_v45 = vpop.f32.mrf.mxu1  ;;  %v1057_v2 = vadd.f32 %v6267_v63, %v6266_v60 }
 0x172   : > { %v5458_v25 = vadd.f32 %v1468_v10, %v6263_v32  ;;  %v6271_v10 = vld [vmem:[#allocation9_spill] sm:$0xff] }
 0x173   : > { %v1470_v19 = vpop.f32.mrf.mxu0  ;;  %v5460_v49 = vpop.f32.mrf.mxu1  ;;  %v1063_v56 = vadd.f32 %v6272_v50, %v6271_v10 }
 0x174   : > { %6264 = vst [vmem:[#allocation2_spill] sm:$0xff] %v5458_v25  ;;  %v5462_v20 = vadd.f32 %v1470_v19, %v1051_v21  ;;  %v6273_v21 = vld [vmem:[#allocation21_spill] sm:$0xff] }
 0x175   : > { %v1474_v33 = vpop.f32.mrf.mxu0  ;;  %v5464_v1 = vpop.f32.mrf.mxu1 }
 0x176   : > { %6265 = vst [vmem:[#allocation10_spill] sm:$0xff] %v5462_v20  ;;  %v5469_v28 = vadd.f32 %v1474_v33, %v6268_v27 }
 0x177   : > { %v1476_v13 = vpop.f32.mrf.mxu0  ;;  %v5471_v8 = vpop.f32.mrf.mxu1 }
 0x178   : > { %6269 = vst [vmem:[#allocation3_spill] sm:$0xff] %v5469_v28  ;;  %v5473_v23 = vadd.f32 %v1476_v13, %v1057_v2 }
 0x179   : > { %v1480_v55 = vpop.f32.mrf.mxu0  ;;  %v5475_v11 = vpop.f32.mrf.mxu1 }
 0x17a   : > { %6270 = vst [vmem:[#allocation12_spill] sm:$0xff] %v5473_v23  ;;  %v5480_v32 = vadd.f32 %v1480_v55, %v6273_v21 }
 0x17b   : > { %v1482_v19 = vpop.f32.mrf.mxu0  ;;  %v5482_v25 = vpop.f32.mrf.mxu1 }
 0x17c   : > { %6274 = vst [vmem:[#allocation11_spill] sm:$0xff] %v5480_v32  ;;  %v5484_v60 = vadd.f32 %v1482_v19, %v1063_v56 }
 0x17d   : > { %v1793_v33 = vpop.f32.mrf.mxu0  ;;  %v1906_v63 = vpop.f32.mrf.mxu1 }
 0x17e   : > { %6275 = vst [vmem:[#allocation4_spill] sm:$0xff] %v5484_v60  ;;  %v5487_v27 = vadd.f32 %v1793_v33, %v5293_v46  ;;  %v5490_v2 = vadd.f32 %v1906_v63, %v5395_v3 }
 0x17f   : > { %v1795_v13 = vpop.f32.mrf.mxu0  ;;  %v1908_v20 = vpop.f32.mrf.mxu1 }
 0x180   : > { %6276 = vst [vmem:[#allocation13_spill] sm:$0xff] %v5487_v27  ;;  %6277 = vst [vmem:[#allocation5_spill] sm:$0xff] %v5490_v2  ;;  %v5493_v10 = vadd.f32 %v1795_v13, %v5297_v31  ;;  %v5496_v55 = vadd.f32 %v1908_v20, %v5400_v17 }
 0x181   : > { %v1799_v50 = vpop.f32.mrf.mxu0  ;;  %v1912_v21 = vpop.f32.mrf.mxu1 }
 0x182   : > { %6278 = vst [vmem:[#allocation14_spill] sm:$0xff] %v5493_v10  ;;  %6279 = vst [vmem:[#allocation6_spill] sm:$0xff] %v5496_v55  ;;  %v5499_v56 = vadd.f32 %v1799_v50, %v5305_v57  ;;  %v5502_v19 = vadd.f32 %v1912_v21, %v5408_v16 }
 0x183   : > { %v1801_v46 = vpop.f32.mrf.mxu0  ;;  %v1914_v33 = vpop.f32.mrf.mxu1 }
 0x184   : > { %6280 = vst [vmem:[#allocation16_spill] sm:$0xff] %v5499_v56  ;;  %6281 = vst [vmem:[#allocation15_spill] sm:$0xff] %v5502_v19  ;;  %v5505_v3 = vadd.f32 %v1801_v46, %v5309_v24  ;;  %v5508_v63 = vadd.f32 %v1914_v33, %v5413_v35 }
 0x185   : > { %v1805_v31 = vpop.f32.mrf.mxu0  ;;  %v1918_v13 = vpop.f32.mrf.mxu1 }
 0x186   : > { %6282 = vst [vmem:[#allocation7_spill] sm:$0xff] %v5505_v3  ;;  %6283 = vst [vmem:[#allocation18_spill] sm:$0xff] %v5508_v63  ;;  %v5511_v17 = vadd.f32 %v1805_v31, %v5317_v6  ;;  %v5514_v20 = vadd.f32 %v1918_v13, %v5421_v42 }
 0x187   : > { %v1807_v57 = vpop.f32.mrf.mxu0  ;;  %v1920_v50 = vpop.f32.mrf.mxu1 }
 0x188   : > { %6284 = vst [vmem:[#allocation17_spill] sm:$0xff] %v5511_v17  ;;  %6285 = vst [vmem:[#allocation8_spill] sm:$0xff] %v5514_v20  ;;  %v5517_v16 = vadd.f32 %v1807_v57, %v5321_v5  ;;  %v5520_v21 = vadd.f32 %v1920_v50, %v5426_v7  ;;  %v1995_v17 = vadd.f32 %v5475_v11, %v5383_v44 }
 0x189   : > { %v1811_v24 = vpop.f32.mrf.mxu0  ;;  %v1924_v46 = vpop.f32.mrf.mxu1 }
 0x18a   : > { %6286 = vst [vmem:[#allocation20_spill] sm:$0xff] %v5517_v16  ;;  %6287 = vst [vmem:[#allocation19_spill] sm:$0xff] %v5520_v21  ;;  %v5523_v35 = vadd.f32 %v1811_v24, %v5330_v12  ;;  %v5526_v33 = vadd.f32 %v1924_v46, %v5434_v53 }
 0x18b   : > { %v1813_v6 = vpop.f32.mrf.mxu0  ;;  %v1926_v31 = vpop.f32.mrf.mxu1 }
 0x18c   : > { %6288 = vst [vmem:[#allocation9_spill] sm:$0xff] %v5523_v35  ;;  %6289 = vst [vmem:[#allocation22_spill] sm:$0xff] %v5526_v33  ;;  %v5529_v42 = vadd.f32 %v1813_v6, %v5334_v52  ;;  %v5532_v13 = vadd.f32 %v1926_v31, %v5439_v41  ;;  %v1996_v35 = vadd.f32 %v5482_v25, %v5388_v58 }
 0x18d   : > { %v1817_v5 = vpop.f32.mrf.mxu0  ;;  %v1930_v57 = vpop.f32.mrf.mxu1  ;;  %v1983_v25 = vadd.f32 %v5453_v45, %v5355_v26 }
 0x18e   : > { %6290 = vst [vmem:[#allocation21_spill] sm:$0xff] %v5529_v42  ;;  %6291 = vst [vmem:[#allocation23_spill] sm:$0xff] %v5532_v13  ;;  %v5535_v7 = vadd.f32 %v1817_v5, %v5344_v18  ;;  %v5537_v50 = vadd.f32 %v1930_v57, %v1513_v4 }
 0x18f   : > { %v1819_v12 = vpop.f32.mrf.mxu0  ;;  %v1932_v24 = vpop.f32.mrf.mxu1 }
 0x190   : > { %6292 = vst [vmem:[#allocation24_spill] sm:$0xff] %v5535_v7  ;;  %6293 = vst [vmem:[#allocation25_spill] sm:$0xff] %v5537_v50  ;;  %v5540_v53 = vadd.f32 %v1819_v12, %v5348_v38  ;;  %v5542_v46 = vadd.f32 %v1932_v24, %v1514_v14 }
 0x191   : > { %v5544_v2 = vpop.f32.mrf.mxu0  ;;  %v5546_v52 = vpop.f32.mrf.mxu1 }
 0x192   : > { %6294 = vst [vmem:[#allocation26_spill] sm:$0xff] %v5542_v46  ;;  %6295 = vst [vmem:[#allocation27_spill] sm:$0xff] %v5546_v52 }
 0x193   : > { %v5548_v41 = vpop.f32.mrf.mxu0  ;;  %v5550_v6 = vpop.f32.mrf.mxu1 }
 0x194   : > { %6296 = vst [vmem:[#allocation28_spill] sm:$0xff] %v5550_v6 }
 0x195   : > { %v5552_v31 = vpop.f32.mrf.mxu0  ;;  %v5554_v18 = vpop.f32.mrf.mxu1 }
 0x196   : > { %6297 = vst [vmem:[#allocation29_spill] sm:$0xff] %v5554_v18 }
 0x197   : > { %v5556_v4 = vpop.f32.mrf.mxu0  ;;  %v5558_v5 = vpop.f32.mrf.mxu1 }
 0x198   : > { %6298 = vst [vmem:[#allocation30_spill] sm:$0xff] %v5558_v5 }
 0x199   : > { %v5560_v38 = vpop.f32.mrf.mxu0  ;;  %v5562_v14 = vpop.f32.mrf.mxu1 }
 0x19a   : > { %6299 = vst [vmem:[#allocation31_spill] sm:$0xff] %v5562_v14  ;;  %v2471_v14 = vlaneseq }
 0x19b   : > { %v5564_v57 = vpop.f32.mrf.mxu0  ;;  %v5566_v12 = vpop.f32.mrf.mxu1 }
 0x19c   : > { %6300 = vst [vmem:[#allocation32_spill] sm:$0xff] %v5566_v12 }
 0x19d   : > { %v5568_v24 = vpop.f32.mrf.mxu0  ;;  %v5570_v55 = vpop.f32.mrf.mxu1 }
 0x19e   : > { %6301 = vst [vmem:[#allocation33_spill] sm:$0xff] %v5570_v55 }
 0x19f   : > { %v5572_v19 = vpop.f32.mrf.mxu0  ;;  %v5574_v63 = vpop.f32.mrf.mxu1 }
 0x1a0   : > { %6302 = vst [vmem:[#allocation34_spill] sm:$0xff] %v5574_v63 }
 0x1a1   : > { %v5576_v20 = vpop.f32.mrf.mxu0  ;;  %v5578_v21 = vpop.f32.mrf.mxu1 }
 0x1a2   : > { %6303 = vst [vmem:[#allocation35_spill] sm:$0xff] %v5578_v21  ;;  %v5600_v21 = vshrl.u32 %v2471_v14, 7  ;;  %v5615_v14 = vld [vmem:[%s6214_s2] sm:$0x3f] }
 0x1a3   : > { %v5580_v33 = vpop.f32.mrf.mxu0  ;;  %v5582_v13 = vpop.f32.mrf.mxu1 }
 0x1a4   : > { %6304 = vst [vmem:[#allocation36_spill] sm:$0xff] %v5582_v13 }
 0x1a5   : > { %v5584_v50 = vpop.f32.mrf.mxu0  ;;  %v5586_v46 = vpop.f32.mrf.mxu1 }
 0x1a6   : > { %6305 = vst [vmem:[#allocation37_spill] sm:$0xff] %v5586_v46  ;;  %v2477_v46 = vsub.s32 1, %v5600_v21 }
 0x1a7   : > { %v2162_v52 = vpop.f32.mrf.mxu0  ;;  %v5588_v6 = vpop.f32.mrf.mxu1 }
 0x1a8   : > { %6306 = vst [vmem:[#allocation38_spill] sm:$0xff] %v5588_v6  ;;  %v2473_v6 = vsub.s32 0, %v5600_v21 }
 0x1a9   : > { %v2166_v18 = vpop.f32.mrf.mxu0  ;;  %v5590_v28 = vpop.f32.mrf.mxu1 }
 0x1aa   : > { %6307 = vst [vmem:[#allocation39_spill] sm:$0xff] %v5590_v28  ;;  %v1990_v28 = vadd.f32 %v5471_v8, %v5374_v30  ;;  %v5624_v30 = vrot.slane %v5615_v14, %v2477_v46  ;;  %v5629_v7 = vrot.slane %v5615_v14, %v2473_v6  ;;  %v2428_v6 = vadd.f32 %v5580_v33, %v5416_v36 }
 0x1ab   : > { %v2168_v12 = vpop.f32.mrf.mxu0  ;;  %v5592_v60 = vpop.f32.mrf.mxu1  ;;  %v1998_v36 = vadd.f32 %v5564_v57, %v5390_v61  ;;  %v2422_v33 = vadd.f32 %v5572_v19, %v5403_v47  ;;  %v1992_v47 = vadd.f32 %v5556_v4, %v5376_v48  ;;  %v1986_v48 = vadd.f32 %v5548_v41, %v5362_v54  ;;  %v5752_v54 = vld [vmem:[%s6215_s3] sm:$0xff] }
 0x1ac   : > { %6308 = vst [vmem:[#allocation40_spill] sm:$0xff] %v5592_v60  ;;  %v1989_v60 = vadd.f32 %v5464_v1, %v5369_v40  ;;  %v5717_v19 = vadd.f32 %v5624_v30, %v2428_v6 }
 0x1ad   : > { %v2172_v5 = vpop.f32.mrf.mxu0  ;;  %v5594_v23 = vpop.f32.mrf.mxu1  ;;  %v5734_v4 = vadd.f32 %v5624_v30, %v2422_v33 }
 0x1ae   : > { %6309 = vst [vmem:[#allocation41_spill] sm:$0xff] %v5594_v23  ;;  %v1984_v23 = vadd.f32 %v5460_v49, %v5360_v0  ;;  %v2445_v45 = vadd.f32 %v2172_v5, %v5448_v15 }
 0x1af   : > { %v2174_v55 = vpop.f32.mrf.mxu0  ;;  %v5596_v27 = vpop.f32.mrf.mxu1 }
 0x1b0   : > { %6310 = vst [vmem:[#allocation42_spill] sm:$0xff] %v5596_v27 }
 0x1b1   : > { %v2178_v32 = vpop.f32.mrf.mxu0  ;;  %v5598_v63 = vpop.f32.mrf.mxu1 }
 0x1b3   : > { %v2180_v10 = vpop.f32.mrf.mxu0  ;;  %v5602_v13 = vpop.f32.mrf.mxu1 }
 0x1b4   : > { %v2452_v1 = vadd.f32 %v2180_v10, %v1984_v23  ;;  %v2439_v10 = vadd.f32 %v2166_v18, %v5437_v9  ;;  %v5675_v9 = vadd.f32 %v5629_v7, %v2445_v45  ;;  %v2454_v41 = vadd.f32 %v5602_v13, %v1986_v48 }
 0x1b5   : > { %v2184_v56 = vpop.f32.mrf.mxu0  ;;  %v5619_v42 = vpop.f32.mrf.mxu1  ;;  %v6314_v13 = vld [vmem:[#allocation41_spill] sm:$0xff] }
 0x1b6   : > { %v2457_v27 = vadd.f32 %v2184_v56, %v1989_v60  ;;  %v2440_v60 = vadd.f32 %v2168_v12, %v5442_v59  ;;  %v2434_v56 = vadd.f32 %v2162_v52, %v5429_v62  ;;  %v2433_v59 = vadd.f32 %v5584_v50, %v5424_v43 }
 0x1b7   : > { %v2186_v3 = vpop.f32.mrf.mxu0  ;;  %v2299_v0 = vpop.f32.mrf.mxu1  ;;  %v2481_v52 = vsub.s32 2, %v5600_v21  ;;  %v2427_v43 = vadd.f32 %v5576_v20, %v5411_v29  ;;  %v5690_v50 = vadd.f32 %v5629_v7, %v2439_v10  ;;  %v2485_v12 = vsub.s32 3, %v5600_v21 }
 0x1b8   : > { %v2458_v8 = vadd.f32 %v2186_v3, %v1990_v28  ;;  %v2446_v3 = vadd.f32 %v2174_v55, %v5451_v37  ;;  %v5649_v23 = vadd.f32 %v5629_v7, %v2457_v27  ;;  %v5657_v37 = vadd.f32 %v5624_v30, %v2452_v1 }
 0x1b9   : > { %v2190_v16 = vpop.f32.mrf.mxu0  ;;  %v2303_v15 = vpop.f32.mrf.mxu1  ;;  %v5683_v62 = vadd.f32 %v5624_v30, %v2440_v60  ;;  %v1997_v29 = vadd.f32 %v5560_v38, %v5386_v34  ;;  %v2421_v20 = vadd.f32 %v5568_v24, %v5398_v51  ;;  %v1991_v34 = vadd.f32 %v5552_v31, %v5372_v22 }
 0x1ba   : > { %v2463_v44 = vadd.f32 %v2190_v16, %v1995_v17  ;;  %v2451_v16 = vadd.f32 %v2178_v32, %v1983_v25  ;;  %v5643_v26 = vadd.f32 %v5624_v30, %v2458_v8  ;;  %v5723_v51 = vrot.slane %v5615_v14, %v2481_v52 }
 0x1bb   : > { %v2192_v11 = vpop.f32.mrf.mxu0  ;;  %v2305_v18 = vpop.f32.mrf.mxu1  ;;  %v5726_v38 = vadd.f32 %v5629_v7, %v2427_v43  ;;  %v2465_v24 = vadd.f32 %v2303_v15, %v1997_v29  ;;  %v2460_v22 = vadd.f32 %v2299_v0, %v1992_v47  ;;  %v1985_v31 = vadd.f32 %v5544_v2, %v5358_v39  ;;  %v5788_v15 = vld [vmem:[%s6215_s3 + $0x8] sm:$0xff]  ;;  %v6320_v43 = vld [vmem:[#allocation9_spill] sm:$0xff]  ;;  %v6323_v29 = vld [vmem:[#allocation20_spill] sm:$0xff] }
 0x1bc   : > { %v2464_v58 = vadd.f32 %v2192_v11, %v1996_v35  ;;  %v5637_v49 = vadd.f32 %v5629_v7, %v2463_v44  ;;  %v5662_v55 = vadd.f32 %v5629_v7, %v2451_v16  ;;  %v5669_v35 = vadd.f32 %v5624_v30, %v2446_v3 }
 0x1bd   : > { %v5631_v40 = vpop.f32.mrf.mxu0  ;;  %v5701_v44 = vadd.f32 %v5624_v30, %v2434_v56  ;;  %v5709_v11 = vadd.f32 %v5629_v7, %v2433_v59  ;;  %v2466_v57 = vadd.f32 %v2305_v18, %v1998_v36  ;;  %v5743_v25 = vadd.f32 %v5629_v7, %v2421_v20  ;;  %v6311_v7 = vld [vmem:[#allocation42_spill] sm:$0xff]  ;;  %v6317_v56 = vld [vmem:[#allocation21_spill] sm:$0xff]  ;;  %v6318_v59 = vld [vmem:[#allocation40_spill] sm:$0xff] }
 0x1be   : > { %v5634_v17 = vadd.f32 %v5624_v30, %v2464_v58  ;;  %v5737_v58 = vrot.slane %v5615_v14, %v2485_v12  ;;  %v2459_v1 = vadd.f32 %v5619_v42, %v1991_v34  ;;  %v2453_v39 = vadd.f32 %v5598_v63, %v1985_v31  ;;  %v6313_v63 = vld [vmem:[#allocation24_spill] sm:$0xff]  ;;  %v6321_v18 = vld [vmem:[#allocation39_spill] sm:$0xff]  ;;  %v6324_v20 = vld [vmem:[#allocation38_spill] sm:$0xff] }
 0x1bf   : > { %v5639_v28 = vpop.f32.mrf.mxu0  ;;  %v5761_v2 = vadd.f32 %v5723_v51, %v2465_v24  ;;  %v2448_v0 = vadd.f32 %v6311_v7, %v5540_v53  ;;  %v2447_v45 = vadd.f32 %v6314_v13, %v6313_v63  ;;  %v6316_v53 = vmov 0.0   ;;  %v6326_v34 = vld [vmem:[#allocation17_spill] sm:$0xff]  ;;  %v6332_v63 = vld [vmem:[#allocation16_spill] sm:$0xff]  ;;  %v6333_v13 = vld [vmem:[#allocation35_spill] sm:$0xff] }
 0x1c0   : > { %3704 = vmatprep.subr.msk.mxu1 %vm2050_vm4, %v5634_v17  ;;  %v5756_v30 = vadd.f32 %v5737_v58, %v2466_v57  ;;  %v5769_v3 = vadd.f32 %v5737_v58, %v2460_v22  ;;  %v5778_v60 = vadd.f32 %v5723_v51, %v2459_v1  ;;  %v2442_v6 = vadd.f32 %v6318_v59, %v6317_v56  ;;  %v6327_v24 = vld [vmem:[#allocation37_spill] sm:$0xff]  ;;  %v5820_v1 = vld [vmem:[%s6215_s3 + $0x10] sm:$0xff] }
 0x1c1   : > { %v5651_v32 = vpop.f32.mrf.mxu0  ;;  %3705 = vmatpush1.msk.msra.mxu1 %vm2050_vm4, %v5637_v49  ;;  %v5793_v52 = vadd.f32 %v5737_v58, %v2454_v41  ;;  %v2441_v36 = vadd.f32 %v6321_v18, %v6320_v43  ;;  %v5799_v33 = vadd.f32 %v5723_v51, %v2453_v39  ;;  %v2436_v47 = vadd.f32 %v6324_v20, %v6323_v29  ;;  %v6329_v41 = vld [vmem:[#allocation7_spill] sm:$0xff]  ;;  %v6330_v39 = vld [vmem:[#allocation36_spill] sm:$0xff]  ;;  %v6335_v18 = vld [vmem:[#allocation14_spill] sm:$0xff] }
 0x1c2   : > { %2602 = vmatprep.subr.mxu1 %v5643_v26  ;;  %6312 = vst [vmem:[#allocation42_spill] sm:$0xff] %v5769_v3  ;;  %6315 = vst [vmem:[#allocation24_spill] sm:$0xff] %v5778_v60  ;;  %v5805_v57 = vadd.f32 %v5737_v58, %v2448_v0  ;;  %v2435_v48 = vadd.f32 %v6327_v24, %v6326_v34  ;;  %v5813_v22 = vadd.f32 %v5723_v51, %v2447_v45  ;;  %v6336_v29 = vld [vmem:[#allocation34_spill] sm:$0xff]  ;;  %v6338_v24 = vld [vmem:[#allocation31_spill] sm:$0xff] }
 0x1c3   : > { %v5664_v27 = vpop.f32.mrf.mxu0  ;;  %2603 = vmatpush1.msra.mxu1 %v5649_v23  ;;  %6319 = vst [vmem:[#allocation41_spill] sm:$0xff] %v5793_v52  ;;  %6322 = vst [vmem:[#allocation21_spill] sm:$0xff] %v5799_v33  ;;  %v2430_v7 = vadd.f32 %v6330_v39, %v6329_v41  ;;  %v5825_v0 = vadd.f32 %v5737_v58, %v2442_v6  ;;  %v2429_v45 = vadd.f32 %v6333_v13, %v6332_v63  ;;  %v6337_v6 = vld [vmem:[#allocation11_spill] sm:$0xff]  ;;  %v6339_v41 = vld [vmem:[#allocation13_spill] sm:$0xff] }
 0x1c4   : > { %2604 = vmatprep.subr.mxu1 %v5657_v37  ;;  %6325 = vst [vmem:[#allocation40_spill] sm:$0xff] %v5805_v57  ;;  %6328 = vst [vmem:[#allocation9_spill] sm:$0xff] %v5813_v22  ;;  %v5831_v56 = vadd.f32 %v5723_v51, %v2441_v36  ;;  %v2493_v59 = vsub.s32 5, %v5600_v21  ;;  %v2424_v20 = vadd.f32 %v6336_v29, %v6335_v18  ;;  %v6340_v39 = vld [vmem:[#allocation33_spill] sm:$0xff]  ;;  %v6341_v29 = vld [vmem:[#allocation12_spill] sm:$0xff] }
 0x1c5   : > { %v5677_v46 = vpop.f32.mrf.mxu0  ;;  %2605 = vmatpush1.msra.mxu1 %v5662_v55  ;;  %6331 = vst [vmem:[#allocation39_spill] sm:$0xff] %v5825_v0  ;;  %v5838_v34 = vadd.f32 %v5737_v58, %v2436_v47  ;;  %v1999_v36 = vadd.f32 %v6338_v24, %v6337_v6  ;;  %v2423_v63 = vadd.f32 %v6340_v39, %v6339_v41  ;;  %v5856_v47 = vld [vmem:[%s6215_s3 + $0x18] sm:$0x3f]  ;;  %v6342_v6 = vld [vmem:[#allocation30_spill] sm:$0xff]  ;;  %v6344_v41 = vld [vmem:[#allocation32_spill] sm:$0xff] }
 0x1c6   : > { %2606 = vmatprep.subr.mxu1 %v5669_v35  ;;  %6334 = vst [vmem:[#allocation20_spill] sm:$0xff] %v5831_v56  ;;  %v5848_v13 = vadd.f32 %v5723_v51, %v2435_v48  ;;  %v1994_v24 = vadd.f32 %v6342_v6, %v6341_v29  ;;  %v5863_v48 = vadd.f32 %v5737_v58, %v2430_v7 }
 0x1c7   : > { %v5692_v5 = vpop.f32.mrf.mxu0  ;;  %2607 = vmatpush1.msra.mxu1 %v5675_v9 }
 0x1c8   : > { %2608 = vmatprep.subr.mxu1 %v5683_v62 }
 0x1c9   : > { %v5711_v61 = vpop.f32.mrf.mxu0  ;;  %2609 = vmatpush1.msra.mxu1 %v5690_v50 }
 0x1ca   : > { %2610 = vmatprep.subr.mxu1 %v5701_v44 }
 0x1cb   : > { %v5728_v8 = vpop.f32.mrf.mxu0  ;;  %2611 = vmatpush1.msra.mxu1 %v5709_v11 }
 0x1cc   : > { %2612 = vmatprep.subr.mxu1 %v5717_v19 }
 0x1cd   : > { %v5746_v16 = vpop.f32.mrf.mxu0  ;;  %2613 = vmatpush1.msra.mxu1 %v5726_v38 }
 0x1ce   : > { %2614 = vmatprep.subr.mxu1 %v5734_v4 }
 0x1cf   : > { %v5763_v42 = vpop.f32.mrf.mxu0  ;;  %2615 = vmatpush1.msra.mxu1 %v5743_v25 }
 0x1d0   : > { %3706 = vmatmul.mubr.msk.f32.vlgmr.msra.gmra.mxu1 %vm2553_vm5, %v5752_v54  ;;  %3710 = vmatprep.subr.msk.mxu1 %vm2050_vm4, %v5756_v30 }
 0x1d1   : > { %v5780_v10 = vpop.f32.mrf.mxu0  ;;  %3711 = vmatpush1.msk.msra.mxu1 %vm2050_vm4, %v5761_v2  ;;  %2654 = vmatprep.mubr.f32.mxu1 %v6316_v53 }
 0x1d2   : > { %2691 = vmatprep.subr.mxu1 %v5769_v3 }
 0x1d3   : > { %v2406_v12 = vpop.f32.mrf.mxu0  ;;  %2692 = vmatpush1.msra.mxu1 %v5778_v60 }
 0x1d4   : > { %3707 = vmatmul.mubr.msk.f32.gmra.mxu1 %vm2553_vm5, %v5788_v15  ;;  %2693 = vmatprep.subr.mxu1 %v5793_v52  ;;  %v5872_v52 = vrot.slane %v5615_v14, %v2493_v59  ;;  %v5884_v59 = vadd.f32 %v5723_v51, %v2423_v63 }
 0x1d5   : > { %v2410_v31 = vpop.f32.mrf.mxu0  ;;  %2694 = vmatpush1.msra.mxu1 %v5799_v33  ;;  %2660 = vmatprep.mubr.f32.mxu1 %v6316_v53  ;;  %v5869_v33 = vadd.f32 %v5723_v51, %v2429_v45  ;;  %v6348_v45 = vld [vmem:[#allocation28_spill] sm:$0xff] }
 0x1d6   : > { %2695 = vmatprep.subr.mxu1 %v5805_v57 }
 0x1d7   : > { %v2412_v43 = vpop.f32.mrf.mxu0  ;;  %2696 = vmatpush1.msra.mxu1 %v5813_v22  ;;  %v2489_v22 = vsub.s32 4, %v5600_v21  ;;  %v6345_v21 = vld [vmem:[#allocation3_spill] sm:$0xff] }
 0x1d8   : > { %3708 = vmatmul.mubr.msk.f32.gmra.mxu1 %vm2553_vm5, %v5820_v1  ;;  %2697 = vmatprep.subr.mxu1 %v5825_v0  ;;  %v6343_v0 = vld [vmem:[#allocation4_spill] sm:$0xff]  ;;  %v2462_v7 = vadd.f32 %v2412_v43, %v1994_v24 }
 0x1d9   : > { %v2416_v18 = vpop.f32.mrf.mxu0  ;;  %2698 = vmatpush1.msra.mxu1 %v5831_v56  ;;  %2666 = vmatprep.mubr.f32.mxu1 %v6316_v53  ;;  %v2000_v39 = vadd.f32 %v6344_v41, %v6343_v0  ;;  %v6346_v56 = vld [vmem:[#allocation29_spill] sm:$0xff]  ;;  %v5876_v0 = vadd.f32 %v5737_v58, %v2424_v20  ;;  %v6349_v58 = vld [vmem:[#allocation2_spill] sm:$0xff] }
 0x1da   : > { %2699 = vmatprep.subr.mxu1 %v5838_v34  ;;  %v1993_v57 = vadd.f32 %v6346_v56, %v6345_v21  ;;  %v2467_v60 = vadd.f32 %v2416_v18, %v1999_v36  ;;  %v6347_v56 = vld [vmem:[#allocation10_spill] sm:$0xff]  ;;  %v5887_v36 = vrot.slane %v5615_v14, %v2489_v22  ;;  %v5903_v22 = vadd.f32 %v5872_v52, %v2462_v7 }
 0x1db   : > { %v2418_v3 = vpop.f32.mrf.mxu0  ;;  %2700 = vmatpush1.msra.mxu1 %v5848_v13  ;;  %v1988_v6 = vadd.f32 %v6348_v45, %v6347_v56  ;;  %v6360_v45 = vld [vmem:[#allocation5_spill] sm:$0xff] }
 0x1dc   : > { %v2468_v29 = vadd.f32 %v2418_v3, %v2000_v39  ;;  %3709 = vmatmul.mubr.msk.f32.gmra.mxu1 %vm2553_vm5, %v5856_v47  ;;  %2701 = vmatprep.subr.mxu1 %v5863_v48  ;;  %v6350_v3 = vld [vmem:[#allocation27_spill] sm:$0xff]  ;;  %v2461_v20 = vadd.f32 %v2410_v31, %v1993_v57  ;;  %v5898_v51 = vadd.f32 %v5887_v36, %v2467_v60  ;;  %v6351_v57 = vld [vmem:[#allocation26_spill] sm:$0xff] }
 0x1dd   : > { %2702 = vmatpush1.msra.mxu1 %v5869_v33  ;;  %2737 = vmatprep.mubr.f32.mxu1 %v6316_v53  ;;  %v1987_v43 = vadd.f32 %v6350_v3, %v6349_v58  ;;  %v2456_v24 = vadd.f32 %v2406_v12, %v1988_v6  ;;  %v2450_v31 = vadd.f32 %v5763_v42, %v6351_v57 }
 0x1de   : > { %v5894_v18 = vadd.f32 %v5872_v52, %v2468_v29  ;;  %2703 = vmatprep.subr.mxu1 %v5876_v0  ;;  %v5916_v60 = vadd.f32 %v5887_v36, %v2461_v20 }
 0x1df   : > { %2704 = vmatpush1.msra.mxu1 %v5884_v59  ;;  %v2455_v14 = vadd.f32 %v5780_v10, %v1987_v43  ;;  %v6352_v10 = vld [vmem:[#allocation25_spill] sm:$0xff]  ;;  %v5924_v63 = vadd.f32 %v5872_v52, %v2456_v24  ;;  %v5938_v39 = vadd.f32 %v5872_v52, %v2450_v31 }
 0x1e0   : > { %3712 = vmatmul.mubr.msk.f32.vlgmr.msra.gmra.mxu1 %vm2553_vm5, %v5752_v54  ;;  %3716 = vmatprep.subr.msk.mxu0 %vm2050_vm4, %v5894_v18  ;;  %v2449_v12 = vadd.f32 %v5746_v16, %v6352_v10 }
 0x1e1   : > { %3722 = vmatprep.subr.msk.mxu1 %vm2050_vm4, %v5634_v17  ;;  %3717 = vmatpush1.msk.msra.mxu0 %vm2050_vm4, %v5898_v51  ;;  %v6353_v17 = vld [vmem:[#allocation23_spill] sm:$0xff]  ;;  %v5931_v41 = vadd.f32 %v5887_v36, %v2455_v14 }
 0x1e2   : > { %3723 = vmatpush1.msk.msra.mxu1 %vm2050_vm4, %v5637_v49  ;;  %2780 = vmatprep.subr.mxu0 %v5903_v22  ;;  %v2444_v42 = vadd.f32 %v5728_v8, %v6353_v17  ;;  %v6354_v49 = vld [vmem:[#allocation22_spill] sm:$0xff] }
 0x1e3   : > { %2885 = vmatprep.subr.mxu1 %v5643_v26  ;;  %2743 = vmatprep.mubr.f32.mxu1 %v6316_v53  ;;  %v2443_v16 = vadd.f32 %v5711_v61, %v6354_v49  ;;  %v6355_v26 = vld [vmem:[#allocation19_spill] sm:$0xff]  ;;  %v6356_v61 = vld [vmem:[#allocation8_spill] sm:$0xff] }
 0x1e4   : > { %2781 = vmatpush1.msra.mxu0 %v5916_v60  ;;  %2886 = vmatpush1.msra.mxu1 %v5649_v23  ;;  %v2438_v8 = vadd.f32 %v5692_v5, %v6355_v26  ;;  %v5948_v23 = vadd.f32 %v5887_v36, %v2449_v12  ;;  %v2437_v21 = vadd.f32 %v5677_v46, %v6356_v61 }
 0x1e5   : > { %3713 = vmatmul.mubr.msk.f32.gmra.mxu1 %vm2553_vm5, %v5788_v15  ;;  %2782 = vmatprep.subr.mxu0 %v5924_v63  ;;  %v5955_v7 = vadd.f32 %v5872_v52, %v2444_v42  ;;  %v5962_v29 = vadd.f32 %v5887_v36, %v2443_v16 }
 0x1e6   : > { %2887 = vmatprep.subr.mxu1 %v5657_v37  ;;  %2783 = vmatpush1.msra.mxu0 %v5931_v41  ;;  %v6357_v37 = vld [vmem:[#allocation18_spill] sm:$0xff]  ;;  %v2518_v56 = vadd.f32 %v5872_v52, %v2438_v8  ;;  %v2517_v6 = vadd.f32 %v5887_v36, %v2437_v21 }
 0x1e7   : > { %2888 = vmatpush1.msra.mxu1 %v5662_v55  ;;  %2784 = vmatprep.subr.mxu0 %v5938_v39  ;;  %v2432_v5 = vadd.f32 %v5664_v27, %v6357_v37  ;;  %v6358_v55 = vld [vmem:[#allocation15_spill] sm:$0xff] }
 0x1e8   : > { %2889 = vmatprep.subr.mxu1 %v5669_v35  ;;  %2749 = vmatprep.mubr.f32.mxu1 %v6316_v53  ;;  %v2431_v46 = vadd.f32 %v5651_v32, %v6358_v55  ;;  %v6359_v35 = vld [vmem:[#allocation6_spill] sm:$0xff] }
 0x1e9   : > { %2785 = vmatpush1.msra.mxu0 %v5948_v23  ;;  %2890 = vmatpush1.msra.mxu1 %v5675_v9  ;;  %v2426_v27 = vadd.f32 %v5639_v28, %v6359_v35  ;;  %v2425_v9 = vadd.f32 %v5631_v40, %v6360_v45  ;;  %v2512_v32 = vadd.f32 %v5872_v52, %v2432_v5 }
 0x1ea   : > { %3714 = vmatmul.mubr.msk.f32.gmra.mxu1 %vm2553_vm5, %v5820_v1  ;;  %2786 = vmatprep.subr.mxu0 %v5955_v7  ;;  %v2511_v28 = vadd.f32 %v5887_v36, %v2431_v46 }
 0x1eb   : > { %2891 = vmatprep.subr.mxu1 %v5683_v62  ;;  %2787 = vmatpush1.msra.mxu0 %v5962_v29  ;;  %v2506_v62 = vadd.f32 %v5872_v52, %v2426_v27  ;;  %v2505_v40 = vadd.f32 %v5887_v36, %v2425_v9  ;;  %v2854_v52 = vld [vmem:[%s6216_s4 + $0x18] sm:$0x3f] }
 0x1ec   : > { %2892 = vmatpush1.msra.mxu1 %v5690_v50  ;;  %2788 = vmatprep.subr.mxu0 %v2518_v56  ;;  %v2851_v50 = vld [vmem:[%s6216_s4] sm:$0xff] }
 0x1ed   : > { %2893 = vmatprep.subr.mxu1 %v5701_v44  ;;  %2755 = vmatprep.mubr.f32.mxu1 %v6316_v53  ;;  %v6361_v44 = vld [vmem:[#allocation42_spill] sm:$0xff] }
 0x1ee   : > { %2789 = vmatpush1.msra.mxu0 %v2517_v6  ;;  %2894 = vmatpush1.msra.mxu1 %v5709_v11  ;;  %v2852_v11 = vld [vmem:[%s6216_s4 + $0x8] sm:$0xff] }
 0x1ef   : > { %3715 = vmatmul.mubr.msk.f32.gmra.mxu1 %vm2553_vm5, %v5856_v47  ;;  %2790 = vmatprep.subr.mxu0 %v2512_v32 }
 0x1f0   : > { %2895 = vmatprep.subr.mxu1 %v5717_v19  ;;  %2791 = vmatpush1.msra.mxu0 %v2511_v28  ;;  %v6362_v19 = vld [vmem:[#allocation24_spill] sm:$0xff] }
 0x1f1   : > { %2896 = vmatpush1.msra.mxu1 %v5726_v38  ;;  %2792 = vmatprep.subr.mxu0 %v2506_v62  ;;  %v6363_v38 = vld [vmem:[#allocation41_spill] sm:$0xff] }
 0x1f2   : > { %2897 = vmatprep.subr.mxu1 %v5734_v4  ;;  %2793 = vmatpush1.msra.mxu0 %v2505_v40  ;;  %v6364_v4 = vld [vmem:[#allocation21_spill] sm:$0xff] }
 0x1f3   : > { %2898 = vmatpush1.msra.mxu1 %v5743_v25  ;;  %2931 = vmatprep.mubr.f32.mxu1 %v6316_v53  ;;  %v6365_v25 = vld [vmem:[#allocation40_spill] sm:$0xff] }
 0x1f4   : > { %3718 = vmatmul.mubr.msk.f32.vlgmr.msra.gmra.mxu0 %vm2553_vm5, %v5752_v54  ;;  %3724 = vmatmul.mubr.msk.f32.vlgmr.msra.gmra.mxu1 %vm2553_vm5, %v2851_v50  ;;  %v2853_v54 = vld [vmem:[%s6216_s4 + $0x10] sm:$0xff] }
 0x1f5   : > { %3728 = vmatprep.subr.msk.mxu0 %vm2050_vm4, %v5756_v30  ;;  %3734 = vmatprep.subr.msk.mxu1 %vm2050_vm4, %v5894_v18  ;;  %v6366_v30 = vld [vmem:[#allocation9_spill] sm:$0xff] }
 0x1f6   : > { %3729 = vmatpush1.msk.msra.mxu0 %vm2050_vm4, %v5761_v2  ;;  %3735 = vmatpush1.msk.msra.mxu1 %vm2050_vm4, %v5898_v51  ;;  %v6367_v2 = vld [vmem:[#allocation39_spill] sm:$0xff] }
 0x1f7   : > { %2974 = vmatprep.subr.mxu0 %v6361_v44  ;;  %3063 = vmatprep.subr.mxu1 %v5903_v22 }
 0x1f8   : > { %2832 = vmatprep.mubr.f32.mxu0 %v6316_v53  ;;  %2937 = vmatprep.mubr.f32.mxu1 %v6316_v53 }
 0x1f9   : > { %2975 = vmatpush1.msra.mxu0 %v6362_v19  ;;  %3064 = vmatpush1.msra.mxu1 %v5916_v60 }
 0x1fa   : > { %3719 = vmatmul.mubr.msk.f32.gmra.mxu0 %vm2553_vm5, %v5788_v15  ;;  %3725 = vmatmul.mubr.msk.f32.gmra.mxu1 %vm2553_vm5, %v2852_v11  ;;  %v6368_v15 = vld [vmem:[#allocation20_spill] sm:$0xff] }
 0x1fb   : > { %2976 = vmatprep.subr.mxu0 %v6363_v38  ;;  %3065 = vmatprep.subr.mxu1 %v5924_v63 }
 0x1fc   : > { %2977 = vmatpush1.msra.mxu0 %v6364_v4  ;;  %3066 = vmatpush1.msra.mxu1 %v5931_v41 }
 0x1fd   : > { %2978 = vmatprep.subr.mxu0 %v6365_v25  ;;  %3067 = vmatprep.subr.mxu1 %v5938_v39 }
 0x1fe   : > { %2838 = vmatprep.mubr.f32.mxu0 %v6316_v53  ;;  %2943 = vmatprep.mubr.f32.mxu1 %v6316_v53 }
 0x1ff   : > { %2979 = vmatpush1.msra.mxu0 %v6366_v30  ;;  %3068 = vmatpush1.msra.mxu1 %v5948_v23 }
 0x200   : > { %3720 = vmatmul.mubr.msk.f32.gmra.mxu0 %vm2553_vm5, %v5820_v1  ;;  %3726 = vmatmul.mubr.msk.f32.gmra.mxu1 %vm2553_vm5, %v2853_v54 }
 0x201   : > { %2980 = vmatprep.subr.mxu0 %v6367_v2  ;;  %3069 = vmatprep.subr.mxu1 %v5955_v7 }
 0x202   : > { %2981 = vmatpush1.msra.mxu0 %v6368_v15  ;;  %3070 = vmatpush1.msra.mxu1 %v5962_v29 }
 0x203   : > { %2982 = vmatprep.subr.mxu0 %v5838_v34  ;;  %3071 = vmatprep.subr.mxu1 %v2518_v56 }
 0x204   : > { %2844 = vmatprep.mubr.f32.mxu0 %v6316_v53  ;;  %2949 = vmatprep.mubr.f32.mxu1 %v6316_v53 }
 0x205   : > { %2983 = vmatpush1.msra.mxu0 %v5848_v13  ;;  %3072 = vmatpush1.msra.mxu1 %v2517_v6 }
 0x206   : > { %3721 = vmatmul.mubr.msk.f32.gmra.mxu0 %vm2553_vm5, %v5856_v47  ;;  %3727 = vmatmul.mubr.msk.f32.gmra.mxu1 %vm2553_vm5, %v2854_v52 }
 0x207   : > { %2984 = vmatprep.subr.mxu0 %v5863_v48  ;;  %3073 = vmatprep.subr.mxu1 %v2512_v32 }
 0x208   : > { %2985 = vmatpush1.msra.mxu0 %v5869_v33  ;;  %3074 = vmatpush1.msra.mxu1 %v2511_v28 }
 0x209   : > { %2986 = vmatprep.subr.mxu0 %v5876_v0  ;;  %3075 = vmatprep.subr.mxu1 %v2506_v62 }
 0x20a   : > { %2987 = vmatpush1.msra.mxu0 %v5884_v59  ;;  %3020 = vmatprep.mubr.f32.mxu0 %v6316_v53 }
 0x20b   : > { %3076 = vmatpush1.msra.mxu1 %v2505_v40  ;;  %3109 = vmatprep.mubr.f32.mxu1 %v6316_v53 }
 0x20c   : > { %3730 = vmatmul.mubr.msk.f32.vlgmr.msra.gmra.mxu0 %vm2553_vm5, %v2851_v50  ;;  %3736 = vmatmul.mubr.msk.f32.vlgmr.msra.gmra.mxu1 %vm2553_vm5, %v2851_v50 }
 0x20d   : > { %3026 = vmatprep.mubr.f32.mxu0 %v6316_v53  ;;  %3115 = vmatprep.mubr.f32.mxu1 %v6316_v53 }
 0x210   : > { %3731 = vmatmul.mubr.msk.f32.gmra.mxu0 %vm2553_vm5, %v2852_v11  ;;  %3737 = vmatmul.mubr.msk.f32.gmra.mxu1 %vm2553_vm5, %v2852_v11 }
 0x211   : > { %3032 = vmatprep.mubr.f32.mxu0 %v6316_v53  ;;  %3121 = vmatprep.mubr.f32.mxu1 %v6316_v53 }
 0x214   : > { %3732 = vmatmul.mubr.msk.f32.gmra.mxu0 %vm2553_vm5, %v2853_v54  ;;  %3738 = vmatmul.mubr.msk.f32.gmra.mxu1 %vm2553_vm5, %v2853_v54 }
 0x215   : > { %3038 = vmatprep.mubr.f32.mxu0 %v6316_v53  ;;  %3127 = vmatprep.mubr.f32.mxu1 %v6316_v53 }
 0x218   : > { %3733 = vmatmul.mubr.msk.f32.gmra.mxu0 %vm2553_vm5, %v2854_v52  ;;  %3739 = vmatmul.mubr.msk.f32.gmra.mxu1 %vm2553_vm5, %v2854_v52 }
 0x290   : > { %v6070_v33 = vpop.f32.mrf.mxu1 }
 0x292   : > { %v6072_v1 = vpop.f32.mrf.mxu1 }
 0x294   : > { %v6074_v34 = vpop.f32.mrf.mxu1 }
 0x296   : > { %v6076_v13 = vpop.f32.mrf.mxu1 }
 0x298   : > { %v6078_v47 = vpop.f32.mrf.mxu1 }
 0x29a   : > { %v6080_v48 = vpop.f32.mrf.mxu1 }
 0x29c   : > { %v6082_v0 = vpop.f32.mrf.mxu1 }
 0x29e   : > { %v6084_v59 = vpop.f32.mrf.mxu1 }
 0x2a0   : > { %v2739_v53 = vpop.f32.mrf.mxu1 }
 0x2a2   : > { %v2741_v36 = vpop.f32.mrf.mxu1 }
 0x2a5   : > { %v2745_v58 = vpop.f32.mrf.mxu1 }
 0x2a7   : > { %v2747_v3 = vpop.f32.mrf.mxu1 }
 0x2aa   : > { %v2751_v43 = vpop.f32.mrf.mxu1 }
 0x2ac   : > { %v2753_v20 = vpop.f32.mrf.mxu1 }
 0x2af   : > { %v6086_v18 = vpop.f32.mrf.mxu1 }
 0x2b1   : > { %v6088_v24 = vpop.f32.mrf.mxu1 }
 0x2b4   : > { %v2828_v51 = vpop.f32.mrf.mxu0  ;;  %v6090_v14 = vpop.f32.mrf.mxu1 }
 0x2b5   : > { %v3134_v22 = vmax.f32 %v6070_v33, %v6090_v14 }
 0x2b6   : > { %v2830_v57 = vpop.f32.mrf.mxu0  ;;  %v6094_v31 = vpop.f32.mrf.mxu1 }
 0x2b7   : > { %v3135_v60 = vmax.f32 %v6072_v1, %v6094_v31 }
 0x2ba   : > { %v2834_v10 = vpop.f32.mrf.mxu0  ;;  %v6098_v12 = vpop.f32.mrf.mxu1 }
 0x2bb   : > { %v3140_v63 = vmax.f32 %v6074_v34, %v6098_v12 }
 0x2bc   : > { %v2836_v17 = vpop.f32.mrf.mxu0  ;;  %v6102_v42 = vpop.f32.mrf.mxu1 }
 0x2bd   : > { %v3141_v41 = vmax.f32 %v6076_v13, %v6102_v42 }
 0x2c0   : > { %v2840_v49 = vpop.f32.mrf.mxu0  ;;  %v6106_v16 = vpop.f32.mrf.mxu1 }
 0x2c1   : > { %v3146_v39 = vmax.f32 %v6078_v47, %v6106_v16 }
 0x2c2   : > { %v2842_v26 = vpop.f32.mrf.mxu0  ;;  %v6110_v8 = vpop.f32.mrf.mxu1 }
 0x2c3   : > { %v3147_v23 = vmax.f32 %v6080_v48, %v6110_v8 }
 0x2c6   : > { %v2846_v61 = vpop.f32.mrf.mxu0  ;;  %v6114_v21 = vpop.f32.mrf.mxu1 }
 0x2c7   : > { %v3152_v7 = vmax.f32 %v6082_v0, %v6114_v21 }
 0x2c8   : > { %v2848_v37 = vpop.f32.mrf.mxu0  ;;  %v6118_v5 = vpop.f32.mrf.mxu1 }
 0x2c9   : > { %v3153_v29 = vmax.f32 %v6084_v59, %v6118_v5 }
 0x2cc   : > { %v3022_v55 = vpop.f32.mrf.mxu0  ;;  %v3111_v46 = vpop.f32.mrf.mxu1 }
 0x2cd   : > { %v3136_v56 = vmax.f32 %v2739_v53, %v3022_v55  ;;  %v3138_v35 = vmax.f32 %v2828_v51, %v3111_v46 }
 0x2ce   : > { %v3024_v27 = vpop.f32.mrf.mxu0  ;;  %v3113_v45 = vpop.f32.mrf.mxu1 }
 0x2cf   : > { %3174 = vrot.lane.b32.xlu0 %v3136_v56, %s3831_s9  ;;  %3178 = vrot.lane.b32.xlu1 %v3138_v35, %s3831_s9  ;;  %v3137_v6 = vmax.f32 %v2741_v36, %v3024_v27  ;;  %v3139_v32 = vmax.f32 %v2830_v57, %v3113_v45 }
 0x2d0   : > { %v3028_v9 = vpop.f32.mrf.mxu0  ;;  %v3117_v28 = vpop.f32.mrf.mxu1 }
 0x2d1   : > { %v6126_v40 = vmax.f32 %v2745_v58, %v3028_v9  ;;  %v3144_v19 = vmax.f32 %v2834_v10, %v3117_v28 }
 0x2d2   : > { %v3030_v62 = vpop.f32.mrf.mxu0  ;;  %v3119_v44 = vpop.f32.mrf.mxu1 }
 0x2d3   : > { %3176 = vrot.lane.b32.xlu0 %v3137_v6, %s3831_s9  ;;  %3180 = vrot.lane.b32.xlu1 %v3139_v32, %s3831_s9  ;;  %v3143_v50 = vmax.f32 %v2747_v3, %v3030_v62  ;;  %v3145_v38 = vmax.f32 %v2836_v17, %v3119_v44 }
 0x2d4   : > { %v3034_v11 = vpop.f32.mrf.mxu0  ;;  %v3123_v4 = vpop.f32.mrf.mxu1 }
 0x2d5   : > { %v6133_v54 = vmax.f32 %v2751_v43, %v3034_v11  ;;  %v3150_v52 = vmax.f32 %v2840_v49, %v3123_v4 }
 0x2d6   : > { %v3036_v25 = vpop.f32.mrf.mxu0  ;;  %v3125_v2 = vpop.f32.mrf.mxu1 }
 0x2d7   : > { %3182 = vrot.lane.b32.xlu0 %v6126_v40, %s3831_s9  ;;  %3184 = vrot.lane.b32.xlu1 %v3143_v50, %s3831_s9  ;;  %v3149_v30 = vmax.f32 %v2753_v20, %v3036_v25  ;;  %v3151_v53 = vmax.f32 %v2842_v26, %v3125_v2 }
 0x2d8   : > { %v3040_v15 = vpop.f32.mrf.mxu0  ;;  %v3129_v36 = vpop.f32.mrf.mxu1 }
 0x2d9   : > { %v6141_v3 = vmax.f32 %v6086_v18, %v3040_v15  ;;  %v3156_v51 = vmax.f32 %v2846_v61, %v3129_v36 }
 0x2da   : > { %v3042_v58 = vpop.f32.mrf.mxu0  ;;  %v3131_v20 = vpop.f32.mrf.mxu1 }
 0x2db   : > { %3186 = vrot.lane.b32.xlu0 %v3144_v19, %s3831_s9  ;;  %3188 = vrot.lane.b32.xlu1 %v3145_v38, %s3831_s9  ;;  %v3155_v43 = vmax.f32 %v6088_v24, %v3042_v58  ;;  %v3157_v57 = vmax.f32 %v2848_v37, %v3131_v20 }
 0x2df   : > { %3190 = vrot.lane.b32.xlu0 %v6133_v54, %s3831_s9  ;;  %3192 = vrot.lane.b32.xlu1 %v3149_v30, %s3831_s9 }
 0x2e3   : > { %3194 = vrot.lane.b32.xlu0 %v3150_v52, %s3831_s9  ;;  %3196 = vrot.lane.b32.xlu1 %v3151_v53, %s3831_s9 }
 0x2e7   : > { %3198 = vrot.lane.b32.xlu0 %v6141_v3, %s3831_s9  ;;  %3200 = vrot.lane.b32.xlu1 %v3155_v43, %s3831_s9 }
 0x2eb   : > { %3202 = vrot.lane.b32.xlu0 %v3156_v51, %s3831_s9  ;;  %3204 = vrot.lane.b32.xlu1 %v3157_v57, %s3831_s9 }
 0x341   : > { %v3175_v10 = vpop.permute.xlu0 %3174  ;;  %v3179_v17 = vpop.permute.xlu1 %3178 }
 0x345   : > { %v3177_v49 = vpop.permute.xlu0 %3176  ;;  %v3181_v18 = vpop.permute.xlu1 %3180 }
 0x346   : > { %v3207_v26 = vsel %vm3206_vm6, %v3175_v10, %v3177_v49  ;;  %v3208_v24 = vsel %vm3206_vm6, %v3177_v49, %v3179_v17  ;;  %v3209_v55 = vsel %vm3206_vm6, %v3179_v17, %v3181_v18 }
 0x347   : > { %v3231_v61 = vmax.f32 %v3134_v22, %v3207_v26  ;;  %v3232_v37 = vmax.f32 %v3135_v60, %v3208_v24  ;;  %v3233_v46 = vmax.f32 %v3136_v56, %v3209_v55 }
 0x349   : > { %v3740_v35 = vmul.f32 -1.442695, %v3231_v61  ;;  %v3741_v27 = vmul.f32 -1.442695, %v3232_v37  ;;  %v3742_v45 = vmul.f32 -1.442695, %v3233_v46  ;;  %v3183_v9 = vpop.permute.xlu0 %3182  ;;  %v3185_v6 = vpop.permute.xlu1 %3184 }
 0x34a   : > { %v3210_v32 = vsel %vm3206_vm6, %v3183_v9, %v3185_v6 }
 0x34b   : > { %3766 = vpow2.f32 %v3740_v35  ;;  %v3234_v28 = vmax.f32 %v3140_v63, %v3210_v32 }
 0x34c   : > { %3768 = vpow2.f32 %v3741_v27 }
 0x34d   : > { %3770 = vpow2.f32 %v3742_v45  ;;  %v3743_v33 = vmul.f32 -1.442695, %v3234_v28  ;;  %v3187_v14 = vpop.permute.xlu0 %3186  ;;  %v3189_v22 = vpop.permute.xlu1 %3188 }
 0x34e   : > { %v3211_v1 = vsel %vm3206_vm6, %v3185_v6, %v3187_v14  ;;  %v3212_v31 = vsel %vm3206_vm6, %v3187_v14, %v3189_v22 }
 0x34f   : > { %3772 = vpow2.f32 %v3743_v33  ;;  %v3235_v60 = vmax.f32 %v3141_v41, %v3211_v1  ;;  %v3236_v56 = vmax.f32 %v6126_v40, %v3212_v31 }
 0x351   : > { %v3744_v62 = vmul.f32 -1.442695, %v3235_v60  ;;  %v3745_v50 = vmul.f32 -1.442695, %v3236_v56  ;;  %v3191_v34 = vpop.permute.xlu0 %3190  ;;  %v3193_v12 = vpop.permute.xlu1 %3192 }
 0x352   : > { %v3213_v63 = vsel %vm3206_vm6, %v3191_v34, %v3193_v12 }
 0x353   : > { %3774 = vpow2.f32 %v3744_v62  ;;  %v3237_v44 = vmax.f32 %v3146_v39, %v3213_v63 }
 0x354   : > { %3776 = vpow2.f32 %v3745_v50 }
 0x355   : > { %v3746_v11 = vmul.f32 -1.442695, %v3237_v44  ;;  %v3195_v19 = vpop.permute.xlu0 %3194  ;;  %v3197_v38 = vpop.permute.xlu1 %3196 }
 0x356   : > { %v3214_v13 = vsel %vm3206_vm6, %v3193_v12, %v3195_v19  ;;  %v3215_v42 = vsel %vm3206_vm6, %v3195_v19, %v3197_v38 }
 0x357   : > { %3778 = vpow2.f32 %v3746_v11  ;;  %v3238_v41 = vmax.f32 %v3147_v23, %v3214_v13  ;;  %v3239_v4 = vmax.f32 %v6133_v54, %v3215_v42 }
 0x358   : > { %v3767_v40 = vpop.eup %3766 }
 0x359   : > { %v3769_v25 = vpop.eup %3768  ;;  %v3279_v30 = vadd.f32 1.0, %v3767_v40  ;;  %v3199_v47 = vpop.permute.xlu0 %3198  ;;  %v3747_v15 = vmul.f32 -1.442695, %v3238_v41  ;;  %v3748_v8 = vmul.f32 -1.442695, %v3239_v4 }
 0x35a   : > { %v3201_v16 = vpop.permute.xlu1 %3200  ;;  %v3771_v39 = vpop.eup %3770  ;;  %v3280_v2 = vadd.f32 1.0, %v3769_v25 }
 0x35b   : > { %v3216_v52 = vsel %vm3206_vm6, %v3199_v47, %v3201_v16  ;;  %3780 = vrcp.f32 %v3279_v30  ;;  %v3281_v53 = vadd.f32 1.0, %v3771_v39 }
 0x35c   : > { %v3240_v36 = vmax.f32 %v3152_v7, %v3216_v52  ;;  %v3773_v48 = vpop.eup %3772  ;;  %3782 = vrcp.f32 %v3280_v2 }
 0x35d   : > { %3784 = vrcp.f32 %v3281_v53  ;;  %v3282_v23 = vadd.f32 1.0, %v3773_v48  ;;  %v3203_v58 = vpop.permute.xlu0 %3202 }
 0x35e   : > { %v3749_v54 = vmul.f32 -1.442695, %v3240_v36  ;;  %v3205_v43 = vpop.permute.xlu1 %3204  ;;  %3786 = vpow2.f32 %v3747_v15  ;;  %v3217_v20 = vsel %vm3206_vm6, %v3201_v16, %v3203_v58 }
 0x35f   : > { %v3218_v51 = vsel %vm3206_vm6, %v3203_v58, %v3205_v43  ;;  %3788 = vrcp.f32 %v3282_v23  ;;  %v3241_v0 = vmax.f32 %v3153_v29, %v3217_v20 }
 0x360   : > { %v3242_v21 = vmax.f32 %v6141_v3, %v3218_v51  ;;  %v3775_v7 = vpop.eup %3774  ;;  %3790 = vpow2.f32 %v3748_v8 }
 0x361   : > { %v3777_v57 = vpop.eup %3776  ;;  %v3283_v10 = vadd.f32 1.0, %v3775_v7  ;;  %3792 = vpow2.f32 %v3749_v54  ;;  %v3750_v17 = vmul.f32 -1.442695, %v3241_v0 }
 0x362   : > { %v3284_v49 = vadd.f32 1.0, %v3777_v57  ;;  %v3751_v18 = vmul.f32 -1.442695, %v3242_v21 }
 0x363   : > { %3794 = vrcp.f32 %v3283_v10 }
 0x364   : > { %v3779_v26 = vpop.eup %3778  ;;  %3796 = vrcp.f32 %v3284_v49 }
 0x365   : > { %v3285_v24 = vadd.f32 1.0, %v3779_v26  ;;  %3798 = vpow2.f32 %v3750_v17 }
 0x366   : > { %3800 = vpow2.f32 %v3751_v18 }
 0x367   : > { %3802 = vrcp.f32 %v3285_v24 }
 0x368   : > { %v3781_v59 = vpop.eup %3780 }
 0x369   : > { %v3783_v5 = vpop.eup %3782  ;;  %3315 = vst [vmem:[%s6192_s13] sm:$0xff] %v3781_v59 }
 0x36a   : > { %v3785_v29 = vpop.eup %3784  ;;  %3316 = vst [vmem:[%s6192_s13 + $0x8] sm:$0xff] %v3783_v5 }
 0x36b   : > { %v3787_v3 = vpop.eup %3786  ;;  %3318 = vst.msk [vmem:[%s6192_s13 + $0x10] sm:$0xff] %vm3317_vm7, %v3785_v29 }
 0x36c   : > { %v3789_v55 = vpop.eup %3788  ;;  %v3286_v61 = vadd.f32 1.0, %v3787_v3 }
 0x36d   : > { %v3791_v37 = vpop.eup %3790  ;;  %3319 = vst [vmem:[%s6192_s13 + $0x18] sm:$0xff] %v3789_v55 }
 0x36e   : > { %v3793_v46 = vpop.eup %3792  ;;  %3804 = vrcp.f32 %v3286_v61  ;;  %v3287_v35 = vadd.f32 1.0, %v3791_v37 }
 0x36f   : > { %v3288_v27 = vadd.f32 1.0, %v3793_v46 }
 0x370   : > { %v3795_v45 = vpop.eup %3794  ;;  %3806 = vrcp.f32 %v3287_v35 }
 0x371   : > { %v3797_v9 = vpop.eup %3796  ;;  %3320 = vst [vmem:[%s6192_s13 + $0x20] sm:$0xff] %v3795_v45  ;;  %3808 = vrcp.f32 %v3288_v27 }
 0x372   : > { %v3799_v6 = vpop.eup %3798  ;;  %3321 = vst.msk [vmem:[%s6192_s13 + $0x28] sm:$0xff] %vm3317_vm7, %v3797_v9 }
 0x373   : > { %v3801_v32 = vpop.eup %3800  ;;  %v3289_v28 = vadd.f32 1.0, %v3799_v6 }
 0x374   : > { %v3803_v33 = vpop.eup %3802  ;;  %v3290_v14 = vadd.f32 1.0, %v3801_v32 }
 0x375   : > { %3322 = vst [vmem:[%s6192_s13 + $0x30] sm:$0xff] %v3803_v33  ;;  %3810 = vrcp.f32 %v3289_v28 }
 0x376   : > { %3812 = vrcp.f32 %v3290_v14 }
 0x37b   : > { %v3805_v22 = vpop.eup %3804 }
 0x37c   : > { %3323 = vst [vmem:[%s6192_s13 + $0x38] sm:$0xff] %v3805_v22 }
 0x37d   : > { %v3807_v1 = vpop.eup %3806 }
 0x37e   : > { %v3809_v31 = vpop.eup %3808  ;;  %3324 = vst.msk [vmem:[%s6192_s13 + $0x40] sm:$0xff] %vm3317_vm7, %v3807_v1 }
 0x37f   : > { %3325 = vst [vmem:[%s6192_s13 + $0x48] sm:$0x3f] %v3809_v31 }
 0x382   : > { %v3811_v60 = vpop.eup %3810 }
 0x383   : > { %v3813_v56 = vpop.eup %3812  ;;  %3326 = vst [vmem:[%s6192_s13 + $0x50] sm:$0x3f] %v3811_v60 }
 0x384   : > { %3328 = vst.msk [vmem:[%s6192_s13 + $0x58] sm:$0x3f] %vm3327_vm8, %v3813_v56 }
 0x385 PF: > { %s15_s18 = sadd.s32 1, %s3828_s18  }
 0x386   : > { %p12_p4 = scmp.ge.s32.totalorder %s15_s18, 4  }
 0x388   :  { %14 = sbr.rel (!%p12_p4) target bundleno = 1 (0x1), region = 74 }

// kernel: model_sigmoid_forward.4
= control target key start
LH: loop header
LB: loop body
LE: loop exit
PB: predicated region body
PF: predicated region fallthrough
CT: control target
= control target key end

     0   :  { %s4524_s18 = smov 0   ;;  %s8052_s0 = inlined_call_operand.vmem [shape: f32[2,30,360], index: 0, kind: input, shape index: {}]   ;;  %s8053_s1 = inlined_call_operand.vmem [shape: f32[5,360,416], index: 1, kind: input, shape index: {}]   ;;  %s8054_s2 = inlined_call_operand.vmem [shape: f32[1,416], index: 2, kind: input, shape index: {}]   ;;  %s8055_s3 = inlined_call_operand.vmem [shape: f32[13,26], index: 3, kind: input, shape index: {}]   ;;  %s8056_s4 = inlined_call_operand.vmem [shape: f32[13,26], index: 4, kind: input, shape index: {}]   ;;  %s8057_s5 = inlined_call_operand.vmem [shape: f32[2,13,208], index: 5, kind: output, shape index: {}]  }
   0x1 LB: > { %s3642_s19 = sadd.s32 4294967295, %s4490_s18   ;;  %p3646_p0 = scmp.ge.s32.totalorder %s4490_s18, 1  ;;  %s4490_s18 = sphi %s4524_s18, %s15_s18  }
   0x2   : > { %p187_p1 = scmp.lt.s32.totalorder %s4490_s18, 3 }
   0x4   : > { %p188_p2 = pnand %p3646_p0, %p187_p1 }
   0x6   : > { %191 = sbr.rel (%p188_p2) target bundleno = 1117 (0x45d), region = 40 }
   0xb   : > { %v3711_v0 = vld [vmem:[%s8053_s1 + $0x788] sm:$0xff]  ;;  %v3710_v2 = vld [vmem:[%s8053_s1 + $0x780] sm:$0xff]  ;;  %p4570_p3 = scmp.lt.s32.totalorder %s3642_s19, 1  ;;  %vm610_vm0 = vcmask 1046528   ;;  %vm640_vm1 = vcmask 850944   ;;  %v3713_v58 = vld [vmem:[%s8053_s1 + $0x798] sm:$0xff] }
   0xc   : > { %v3827_v1 = vld [vmem:[%s8053_s1 + $0xb28] sm:$0xff]  ;;  %649 = vmatprep.subr.mxu0 %v3711_v0  ;;  %v3826_v3 = vld [vmem:[%s8053_s1 + $0xb20] sm:$0xff]  ;;  %v3712_v60 = vld [vmem:[%s8053_s1 + $0x790] sm:$0xff]  ;;  %v8058_v61 = vmov 0.0   ;;  %vm1550_vm2 = vcmask 1045504   ;;  %vm2141_vm3 = vcmask 1044480  }
   0xd   : > { %744 = vmatprep.subr.mxu1 %v3827_v1  ;;  %v3707_v4 = vld [vmem:[%s8053_s1 + $0x768] sm:$0xff]  ;;  %650 = vmatpush1.msra.mxu0 %v3710_v2  ;;  %v3706_v6 = vld [vmem:[%s8053_s1 + $0x760] sm:$0xff]  ;;  %s8099_s19 = smov (!%p4570_p3, %s3642_s19), 1  ;;  %v3709_v63 = vld [vmem:[%s8053_s1 + $0x778] sm:$0xff]  ;;  %vm2732_vm4 = vcmask 1043456   ;;  %vm3189_vm5 = vcmask 1041408  }
   0xe   : > { %v3823_v5 = vld [vmem:[%s8053_s1 + $0xb08] sm:$0xff]  ;;  %745 = vmatpush1.msra.mxu1 %v3826_v3  ;;  %v3822_v7 = vld [vmem:[%s8053_s1 + $0xb00] sm:$0xff]  ;;  %651 = vmatprep.subr.mxu0 %v3707_v4  ;;  %s4433_s6 = smul.u32 96, %s8099_s19  ;;  %v3708_v1 = vld [vmem:[%s8053_s1 + $0x770] sm:$0xff]  ;;  %vm3182_vm6 = vcmask 211968   ;;  %s4493_s30 = smov 48  }
   0xf   : > { %v3703_v8 = vld [vmem:[%s8053_s1 + $0x748] sm:$0xff]  ;;  %746 = vmatprep.subr.mxu1 %v3823_v5  ;;  %v3702_v10 = vld [vmem:[%s8053_s1 + $0x740] sm:$0xff]  ;;  %652 = vmatpush1.msra.mxu0 %v3706_v6  ;;  %v3705_v3 = vld [vmem:[%s8053_s1 + $0x758] sm:$0xff]  ;;  %vm3544_vm7 = vcmask 392192   ;;  %s4432_s7 = sshll.u32 %s8099_s19, 5  ;;  %vm3582_vm8 = vcmask 654336  }
  0x10   : > { %v3819_v9 = vld [vmem:[%s8053_s1 + $0xae8] sm:$0xff]  ;;  %v3818_v11 = vld [vmem:[%s8053_s1 + $0xae0] sm:$0xff]  ;;  %747 = vmatpush1.msra.mxu1 %v3822_v7  ;;  %653 = vmatprep.subr.mxu0 %v3703_v8  ;;  %s4656_s27 = scalar_lea.vmem %s8052_s0, %s4433_s6  ;;  %v3704_v5 = vld [vmem:[%s8053_s1 + $0x750] sm:$0xff]  ;;  %s224_s6 = scalar_lea.vmem %s8057_s5, %s4432_s7  ;;  %vm3585_vm9 = vcmask 651264  }
  0x11   : > { %v3699_v12 = vld [vmem:[%s8053_s1 + $0x728] sm:$0xff]  ;;  %748 = vmatprep.subr.mxu1 %v3819_v9  ;;  %v3698_v14 = vld [vmem:[%s8053_s1 + $0x720] sm:$0xff]  ;;  %654 = vmatpush1.msra.mxu0 %v3702_v10  ;;  %v4677_v42 = vld [vmem:[%s4656_s27 + $0x10] sm:$0xff] }
  0x12   : > { %v3815_v13 = vld [vmem:[%s8053_s1 + $0xac8] sm:$0xff]  ;;  %v3814_v15 = vld [vmem:[%s8053_s1 + $0xac0] sm:$0xff]  ;;  %749 = vmatpush1.msra.mxu1 %v3818_v11  ;;  %655 = vmatprep.subr.mxu0 %v3699_v12  ;;  %v617_v50 = vrot.slane %v4677_v42, 1  ;;  %v3701_v7 = vld [vmem:[%s8053_s1 + $0x738] sm:$0xff] }
  0x13   : > { %v3695_v16 = vld [vmem:[%s8053_s1 + $0x708] sm:$0xff]  ;;  %750 = vmatprep.subr.mxu1 %v3815_v13  ;;  %v3694_v18 = vld [vmem:[%s8053_s1 + $0x700] sm:$0xff]  ;;  %656 = vmatpush1.msra.mxu0 %v3698_v14  ;;  %v3700_v9 = vld [vmem:[%s8053_s1 + $0x730] sm:$0xff] }
  0x14   : > { %v3811_v17 = vld [vmem:[%s8053_s1 + $0xaa8] sm:$0xff]  ;;  %v3810_v19 = vld [vmem:[%s8053_s1 + $0xaa0] sm:$0xff]  ;;  %751 = vmatpush1.msra.mxu1 %v3814_v15  ;;  %657 = vmatprep.subr.mxu0 %v3695_v16  ;;  %v3697_v11 = vld [vmem:[%s8053_s1 + $0x718] sm:$0xff] }
  0x15   : > { %v3691_v20 = vld [vmem:[%s8053_s1 + $0x6e8] sm:$0xff]  ;;  %752 = vmatprep.subr.mxu1 %v3811_v17  ;;  %v3690_v22 = vld [vmem:[%s8053_s1 + $0x6e0] sm:$0xff]  ;;  %658 = vmatpush1.msra.mxu0 %v3694_v18  ;;  %v3696_v13 = vld [vmem:[%s8053_s1 + $0x710] sm:$0xff] }
  0x16   : > { %v3807_v21 = vld [vmem:[%s8053_s1 + $0xa88] sm:$0xff]  ;;  %v3806_v23 = vld [vmem:[%s8053_s1 + $0xa80] sm:$0xff]  ;;  %753 = vmatpush1.msra.mxu1 %v3810_v19  ;;  %659 = vmatprep.subr.mxu0 %v3691_v20  ;;  %v3693_v15 = vld [vmem:[%s8053_s1 + $0x6f8] sm:$0xff] }
  0x17   : > { %v3687_v24 = vld [vmem:[%s8053_s1 + $0x6c8] sm:$0xff]  ;;  %754 = vmatprep.subr.mxu1 %v3807_v21  ;;  %v3686_v26 = vld [vmem:[%s8053_s1 + $0x6c0] sm:$0xff]  ;;  %660 = vmatpush1.msra.mxu0 %v3690_v22  ;;  %v3692_v17 = vld [vmem:[%s8053_s1 + $0x6f0] sm:$0xff] }
  0x18   : > { %v3803_v25 = vld [vmem:[%s8053_s1 + $0xa68] sm:$0xff]  ;;  %v3802_v27 = vld [vmem:[%s8053_s1 + $0xa60] sm:$0xff]  ;;  %755 = vmatpush1.msra.mxu1 %v3806_v23  ;;  %661 = vmatprep.subr.mxu0 %v3687_v24  ;;  %v3689_v19 = vld [vmem:[%s8053_s1 + $0x6d8] sm:$0xff] }
  0x19   : > { %v3683_v28 = vld [vmem:[%s8053_s1 + $0x6a8] sm:$0xff]  ;;  %756 = vmatprep.subr.mxu1 %v3803_v25  ;;  %v3682_v30 = vld [vmem:[%s8053_s1 + $0x6a0] sm:$0xff]  ;;  %662 = vmatpush1.msra.mxu0 %v3686_v26  ;;  %v3688_v21 = vld [vmem:[%s8053_s1 + $0x6d0] sm:$0xff] }
  0x1a   : > { %v3799_v29 = vld [vmem:[%s8053_s1 + $0xa48] sm:$0xff]  ;;  %v3798_v31 = vld [vmem:[%s8053_s1 + $0xa40] sm:$0xff]  ;;  %757 = vmatpush1.msra.mxu1 %v3802_v27  ;;  %663 = vmatprep.subr.mxu0 %v3683_v28  ;;  %v3685_v23 = vld [vmem:[%s8053_s1 + $0x6b8] sm:$0xff] }
  0x1b   : > { %v3679_v32 = vld [vmem:[%s8053_s1 + $0x688] sm:$0xff]  ;;  %758 = vmatprep.subr.mxu1 %v3799_v29  ;;  %v3678_v34 = vld [vmem:[%s8053_s1 + $0x680] sm:$0xff]  ;;  %664 = vmatpush1.msra.mxu0 %v3682_v30  ;;  %v3684_v25 = vld [vmem:[%s8053_s1 + $0x6b0] sm:$0xff] }
  0x1c   : > { %v3795_v33 = vld [vmem:[%s8053_s1 + $0xa28] sm:$0xff]  ;;  %v3794_v35 = vld [vmem:[%s8053_s1 + $0xa20] sm:$0xff]  ;;  %759 = vmatpush1.msra.mxu1 %v3798_v31  ;;  %665 = vmatprep.subr.mxu0 %v3679_v32  ;;  %v3681_v27 = vld [vmem:[%s8053_s1 + $0x698] sm:$0xff] }
  0x1d   : > { %v3675_v36 = vld [vmem:[%s8053_s1 + $0x668] sm:$0xff]  ;;  %760 = vmatprep.subr.mxu1 %v3795_v33  ;;  %v3674_v38 = vld [vmem:[%s8053_s1 + $0x660] sm:$0xff]  ;;  %666 = vmatpush1.msra.mxu0 %v3678_v34  ;;  %v3680_v29 = vld [vmem:[%s8053_s1 + $0x690] sm:$0xff] }
  0x1e   : > { %v3791_v37 = vld [vmem:[%s8053_s1 + $0xa08] sm:$0xff]  ;;  %v3790_v39 = vld [vmem:[%s8053_s1 + $0xa00] sm:$0xff]  ;;  %761 = vmatpush1.msra.mxu1 %v3794_v35  ;;  %667 = vmatprep.subr.mxu0 %v3675_v36  ;;  %v3677_v31 = vld [vmem:[%s8053_s1 + $0x678] sm:$0xff] }
  0x1f   : > { %v3671_v40 = vld [vmem:[%s8053_s1 + $0x648] sm:$0xff]  ;;  %762 = vmatprep.subr.mxu1 %v3791_v37  ;;  %v3670_v44 = vld [vmem:[%s8053_s1 + $0x640] sm:$0xff]  ;;  %668 = vmatpush1.msra.mxu0 %v3674_v38  ;;  %v3676_v33 = vld [vmem:[%s8053_s1 + $0x670] sm:$0xff] }
  0x20   : > { %v3787_v41 = vld [vmem:[%s8053_s1 + $0x9e8] sm:$0xff]  ;;  %v3786_v45 = vld [vmem:[%s8053_s1 + $0x9e0] sm:$0xff]  ;;  %763 = vmatpush1.msra.mxu1 %v3790_v39  ;;  %669 = vmatprep.subr.mxu0 %v3671_v40  ;;  %v3673_v35 = vld [vmem:[%s8053_s1 + $0x658] sm:$0xff] }
  0x21   : > { %v4680_v43 = vld [vmem:[%s4656_s27 + $0x28] sm:$0xff]  ;;  %764 = vmatprep.subr.mxu1 %v3787_v41  ;;  %v3666_v48 = vld [vmem:[%s8053_s1 + $0x620] sm:$0xff]  ;;  %670 = vmatpush1.msra.mxu0 %v3670_v44  ;;  %v3672_v37 = vld [vmem:[%s8053_s1 + $0x650] sm:$0xff] }
  0x22   : > { %v3667_v46 = vld [vmem:[%s8053_s1 + $0x628] sm:$0xff]  ;;  %v3782_v49 = vld [vmem:[%s8053_s1 + $0x9c0] sm:$0xff]  ;;  %v618_v51 = vrot.slane %v4680_v43, 1  ;;  %765 = vmatpush1.msra.mxu1 %v3786_v45  ;;  %802 = vmatprep.mubr.f32.mxu1 %v8058_v61  ;;  %v3669_v39 = vld [vmem:[%s8053_s1 + $0x638] sm:$0xff] }
  0x23   : > { %v3783_v47 = vld [vmem:[%s8053_s1 + $0x9c8] sm:$0xff]  ;;  %671 = vmatprep.subr.mxu0 %v3667_v46  ;;  %v3662_v54 = vld [vmem:[%s8053_s1 + $0x600] sm:$0xff]  ;;  %v3668_v41 = vld [vmem:[%s8053_s1 + $0x630] sm:$0xff] }
  0x24   : > { %v3663_v52 = vld [vmem:[%s8053_s1 + $0x608] sm:$0xff]  ;;  %766 = vmatprep.subr.mxu1 %v3783_v47  ;;  %v3778_v55 = vld [vmem:[%s8053_s1 + $0x9a0] sm:$0xff]  ;;  %672 = vmatpush1.msra.mxu0 %v3666_v48  ;;  %v4720_v57 = vsel %vm610_vm0, %v617_v50, %v618_v51  ;;  %v3665_v45 = vld [vmem:[%s8053_s1 + $0x618] sm:$0xff] }
  0x25   : > { %v3779_v53 = vld [vmem:[%s8053_s1 + $0x9a8] sm:$0xff]  ;;  %767 = vmatpush1.msra.mxu1 %v3782_v49  ;;  %673 = vmatprep.subr.mxu0 %v3663_v52  ;;  %v3658_v59 = vld [vmem:[%s8053_s1 + $0x5e0] sm:$0xff]  ;;  %v3664_v47 = vld [vmem:[%s8053_s1 + $0x610] sm:$0xff] }
  0x26   : > { %v3659_v56 = vld [vmem:[%s8053_s1 + $0x5e8] sm:$0xff]  ;;  %768 = vmatprep.subr.mxu1 %v3779_v53  ;;  %674 = vmatpush1.msra.mxu0 %v3662_v54  ;;  %v3654_v0 = vld [vmem:[%s8053_s1 + $0x5c0] sm:$0xff]  ;;  %v3661_v49 = vld [vmem:[%s8053_s1 + $0x5f8] sm:$0xff] }
  0x27   : > { %769 = vmatpush1.msra.mxu1 %v3778_v55  ;;  %675 = vmatprep.subr.mxu0 %v3659_v56  ;;  %v3655_v62 = vld [vmem:[%s8053_s1 + $0x5c8] sm:$0xff]  ;;  %v3650_v4 = vld [vmem:[%s8053_s1 + $0x5a0] sm:$0xff]  ;;  %v3660_v52 = vld [vmem:[%s8053_s1 + $0x5f0] sm:$0xff] }
  0x28   : > { %3830 = vmatmul.mubr.msk.f32.vlgmr.msra.gmra.mxu1 %vm640_vm1, %v4720_v57  ;;  %827 = vmatprep.subr.mxu1 %v3713_v58  ;;  %v3651_v2 = vld [vmem:[%s8053_s1 + $0x5a8] sm:$0xff]  ;;  %v3774_v8 = vld [vmem:[%s8053_s1 + $0x980] sm:$0xff]  ;;  %v3657_v54 = vld [vmem:[%s8053_s1 + $0x5d8] sm:$0xff] }
  0x29   : > { %676 = vmatpush1.msra.mxu0 %v3658_v59  ;;  %828 = vmatpush1.msra.mxu1 %v3712_v60  ;;  %v3775_v6 = vld [vmem:[%s8053_s1 + $0x988] sm:$0xff]  ;;  %v3770_v12 = vld [vmem:[%s8053_s1 + $0x960] sm:$0xff]  ;;  %v3656_v56 = vld [vmem:[%s8053_s1 + $0x5d0] sm:$0xff] }
  0x2a   : > { %677 = vmatprep.subr.mxu0 %v3655_v62  ;;  %829 = vmatprep.subr.mxu1 %v3709_v63  ;;  %v3771_v10 = vld [vmem:[%s8053_s1 + $0x968] sm:$0xff]  ;;  %v3766_v16 = vld [vmem:[%s8053_s1 + $0x940] sm:$0xff]  ;;  %v3653_v59 = vld [vmem:[%s8053_s1 + $0x5b8] sm:$0xff] }
  0x2b   : > { %678 = vmatpush1.msra.mxu0 %v3654_v0  ;;  %830 = vmatpush1.msra.mxu1 %v3708_v1  ;;  %v3767_v14 = vld [vmem:[%s8053_s1 + $0x948] sm:$0xff]  ;;  %v3762_v20 = vld [vmem:[%s8053_s1 + $0x920] sm:$0xff]  ;;  %v3652_v0 = vld [vmem:[%s8053_s1 + $0x5b0] sm:$0xff] }
  0x2c   : > { %679 = vmatprep.subr.mxu0 %v3651_v2  ;;  %831 = vmatprep.subr.mxu1 %v3705_v3  ;;  %v3763_v18 = vld [vmem:[%s8053_s1 + $0x928] sm:$0xff]  ;;  %v3758_v24 = vld [vmem:[%s8053_s1 + $0x900] sm:$0xff]  ;;  %v4924_v2 = vld [vmem:[%s4656_s27 + $0x18] sm:$0xff] }
  0x2d   : > { %680 = vmatpush1.msra.mxu0 %v3650_v4  ;;  %832 = vmatpush1.msra.mxu1 %v3704_v5  ;;  %v3759_v22 = vld [vmem:[%s8053_s1 + $0x908] sm:$0xff]  ;;  %v3754_v28 = vld [vmem:[%s8053_s1 + $0x8e0] sm:$0xff]  ;;  %v3777_v4 = vld [vmem:[%s8053_s1 + $0x998] sm:$0xff] }
  0x2e   : > { %681 = vmatprep.subr.mxu0 %v3775_v6  ;;  %833 = vmatprep.subr.mxu1 %v3701_v7  ;;  %v3755_v26 = vld [vmem:[%s8053_s1 + $0x8e8] sm:$0xff]  ;;  %v3750_v32 = vld [vmem:[%s8053_s1 + $0x8c0] sm:$0xff]  ;;  %v3776_v6 = vld [vmem:[%s8053_s1 + $0x990] sm:$0xff] }
  0x2f   : > { %682 = vmatpush2.msra.mxu0 %v3774_v8  ;;  %834 = vmatpush1.msra.mxu1 %v3700_v9  ;;  %v3751_v30 = vld [vmem:[%s8053_s1 + $0x8c8] sm:$0xff]  ;;  %v3746_v36 = vld [vmem:[%s8053_s1 + $0x8a0] sm:$0xff]  ;;  %v3737_v43 = vld [vmem:[%s8053_s1 + $0x858] sm:$0xff] }
  0x30   : > { %683 = vmatprep.subr.mxu0 %v3771_v10  ;;  %835 = vmatprep.subr.mxu1 %v3697_v11  ;;  %v3747_v34 = vld [vmem:[%s8053_s1 + $0x8a8] sm:$0xff]  ;;  %v3742_v40 = vld [vmem:[%s8053_s1 + $0x880] sm:$0xff]  ;;  %v3773_v10 = vld [vmem:[%s8053_s1 + $0x978] sm:$0xff] }
  0x31   : > { %684 = vmatpush2.msra.mxu0 %v3770_v12  ;;  %836 = vmatpush1.msra.mxu1 %v3696_v13  ;;  %v3743_v38 = vld [vmem:[%s8053_s1 + $0x888] sm:$0xff]  ;;  %v3738_v46 = vld [vmem:[%s8053_s1 + $0x860] sm:$0xff]  ;;  %v612_v12 = vrot.slane %v4924_v2, 1 }
  0x32   : > { %685 = vmatprep.subr.mxu0 %v3767_v14  ;;  %837 = vmatprep.subr.mxu1 %v3693_v15  ;;  %v3739_v44 = vld [vmem:[%s8053_s1 + $0x868] sm:$0xff]  ;;  %v3734_v50 = vld [vmem:[%s8053_s1 + $0x840] sm:$0xff]  ;;  %v3772_v14 = vld [vmem:[%s8053_s1 + $0x970] sm:$0xff] }
  0x33   : > { %686 = vmatpush2.msra.mxu0 %v3766_v16  ;;  %838 = vmatpush1.msra.mxu1 %v3692_v17  ;;  %v3735_v48 = vld [vmem:[%s8053_s1 + $0x848] sm:$0xff]  ;;  %v3730_v55 = vld [vmem:[%s8053_s1 + $0x820] sm:$0xff]  ;;  %v3769_v16 = vld [vmem:[%s8053_s1 + $0x958] sm:$0xff] }
  0x34   : > { %687 = vmatprep.subr.mxu0 %v3763_v18  ;;  %839 = vmatprep.subr.mxu1 %v3689_v19  ;;  %v3731_v53 = vld [vmem:[%s8053_s1 + $0x828] sm:$0xff]  ;;  %v3726_v60 = vld [vmem:[%s8053_s1 + $0x800] sm:$0xff]  ;;  %v3768_v19 = vld [vmem:[%s8053_s1 + $0x950] sm:$0xff] }
  0x35   : > { %688 = vmatpush2.msra.mxu0 %v3762_v20  ;;  %840 = vmatpush1.msra.mxu1 %v3688_v21  ;;  %v3727_v58 = vld [vmem:[%s8053_s1 + $0x808] sm:$0xff]  ;;  %v4915_v63 = vld [vmem:[%s4656_s27 + $0x20] sm:$0xff]  ;;  %v3765_v21 = vld [vmem:[%s8053_s1 + $0x938] sm:$0xff] }
  0x36   : > { %689 = vmatprep.subr.mxu0 %v3759_v22  ;;  %841 = vmatprep.subr.mxu1 %v3685_v23  ;;  %v4912_v62 = vld [vmem:[%s4656_s27 + $0x8] sm:$0xff]  ;;  %v4921_v1 = vld [vmem:[%s4656_s27] sm:$0xff]  ;;  %v615_v8 = vrot.slane %v4915_v63, 1  ;;  %v3829_v22 = vld [vmem:[%s8053_s1 + $0xb38] sm:$0xff] }
  0x37   : > { %690 = vmatpush2.msra.mxu0 %v3758_v24  ;;  %842 = vmatpush1.msra.mxu1 %v3684_v25  ;;  %v3723_v3 = vld [vmem:[%s8053_s1 + $0x7e8] sm:$0xff]  ;;  %v3722_v5 = vld [vmem:[%s8053_s1 + $0x7e0] sm:$0xff]  ;;  %v614_v7 = vrot.slane %v4912_v62, 1  ;;  %v611_v11 = vrot.slane %v4921_v1, 1  ;;  %v3764_v23 = vld [vmem:[%s8053_s1 + $0x930] sm:$0xff] }
  0x38   : > { %691 = vmatprep.subr.mxu0 %v3755_v26  ;;  %843 = vmatprep.subr.mxu1 %v3681_v27  ;;  %v3719_v9 = vld [vmem:[%s8053_s1 + $0x7c8] sm:$0xff]  ;;  %v3718_v13 = vld [vmem:[%s8053_s1 + $0x7c0] sm:$0xff]  ;;  %v3828_v24 = vld [vmem:[%s8053_s1 + $0xb30] sm:$0xff] }
  0x39   : > { %692 = vmatpush2.msra.mxu0 %v3754_v28  ;;  %844 = vmatpush1.msra.mxu1 %v3680_v29  ;;  %v3715_v15 = vld [vmem:[%s8053_s1 + $0x7a8] sm:$0xff]  ;;  %v3714_v17 = vld [vmem:[%s8053_s1 + $0x7a0] sm:$0xff]  ;;  %v4966_v18 = vsel %vm610_vm0, %v614_v7, %v615_v8  ;;  %v4974_v20 = vsel %vm610_vm0, %v611_v11, %v612_v12  ;;  %v3761_v25 = vld [vmem:[%s8053_s1 + $0x918] sm:$0xff] }
  0x3a   : > { %693 = vmatprep.subr.mxu0 %v3751_v30  ;;  %845 = vmatprep.subr.mxu1 %v3677_v31  ;;  %v3825_v26 = vld [vmem:[%s8053_s1 + $0xb18] sm:$0xff]  ;;  %v3760_v27 = vld [vmem:[%s8053_s1 + $0x910] sm:$0xff] }
  0x3b   : > { %694 = vmatpush2.msra.mxu0 %v3750_v32  ;;  %846 = vmatpush1.msra.mxu1 %v3676_v33  ;;  %v3824_v28 = vld [vmem:[%s8053_s1 + $0xb10] sm:$0xff]  ;;  %v3757_v29 = vld [vmem:[%s8053_s1 + $0x8f8] sm:$0xff] }
  0x3c   : > { %695 = vmatprep.subr.mxu0 %v3747_v34  ;;  %847 = vmatprep.subr.mxu1 %v3673_v35  ;;  %v3821_v30 = vld [vmem:[%s8053_s1 + $0xaf8] sm:$0xff]  ;;  %v3756_v31 = vld [vmem:[%s8053_s1 + $0x8f0] sm:$0xff] }
  0x3d   : > { %696 = vmatpush2.msra.mxu0 %v3746_v36  ;;  %848 = vmatpush1.msra.mxu1 %v3672_v37  ;;  %v3820_v32 = vld [vmem:[%s8053_s1 + $0xaf0] sm:$0xff]  ;;  %v5015_v33 = vld [vmem:[%s4656_s27 + $0x38] sm:$0xff] }
  0x3e   : > { %697 = vmatprep.subr.mxu0 %v3743_v38  ;;  %849 = vmatprep.subr.mxu1 %v3669_v39  ;;  %v3753_v34 = vld [vmem:[%s8053_s1 + $0x8d8] sm:$0xff]  ;;  %v3752_v36 = vld [vmem:[%s8053_s1 + $0x8d0] sm:$0xff]  ;;  %v5033_v39 = vld [vmem:[%s4656_s27 + $0x40] sm:$0xff] }
  0x3f   : > { %698 = vmatpush2.msra.mxu0 %v3742_v40  ;;  %850 = vmatpush1.msra.mxu1 %v3668_v41  ;;  %v3817_v35 = vld [vmem:[%s8053_s1 + $0xad8] sm:$0xff]  ;;  %v3816_v37 = vld [vmem:[%s8053_s1 + $0xad0] sm:$0xff] }
  0x40   : > { %699 = vmatprep.subr.mxu0 %v3739_v44  ;;  %851 = vmatprep.subr.mxu1 %v3665_v45  ;;  %v5030_v38 = vld [vmem:[%s4656_s27 + $0x30] sm:$0xff]  ;;  %v3749_v40 = vld [vmem:[%s8053_s1 + $0x8b8] sm:$0xff]  ;;  %v622_v44 = vrot.slane %v5015_v33, 1 }
  0x41   : > { %700 = vmatpush2.msra.mxu0 %v3738_v46  ;;  %852 = vmatpush1.msra.mxu1 %v3664_v47  ;;  %v3813_v41 = vld [vmem:[%s8053_s1 + $0xab8] sm:$0xff]  ;;  %v3748_v45 = vld [vmem:[%s8053_s1 + $0x8b0] sm:$0xff] }
  0x42   : > { %701 = vmatprep.subr.mxu0 %v3735_v48  ;;  %853 = vmatprep.subr.mxu1 %v3661_v49  ;;  %v3812_v46 = vld [vmem:[%s8053_s1 + $0xab0] sm:$0xff]  ;;  %v3745_v47 = vld [vmem:[%s8053_s1 + $0x898] sm:$0xff]  ;;  %v620_v49 = vrot.slane %v5030_v38, 1 }
  0x43   : > { %702 = vmatpush2.msra.mxu0 %v3734_v50  ;;  %854 = vmatpush1.msra.mxu1 %v3660_v52  ;;  %v3809_v48 = vld [vmem:[%s8053_s1 + $0xa98] sm:$0xff]  ;;  %v624_v50 = vrot.slane %v5033_v39, 1  ;;  %v3744_v52 = vld [vmem:[%s8053_s1 + $0x890] sm:$0xff] }
  0x44   : > { %703 = vmatprep.subr.mxu0 %v3731_v53  ;;  %855 = vmatprep.subr.mxu1 %v3657_v54  ;;  %v3808_v53 = vld [vmem:[%s8053_s1 + $0xa90] sm:$0xff] }
  0x45   : > { %704 = vmatpush2.msra.mxu0 %v3730_v55  ;;  %856 = vmatpush1.msra.mxu1 %v3656_v56  ;;  %v5063_v54 = vld [vmem:[%s4656_s27 + $0x50] sm:$0x3f]  ;;  %v5068_v55 = vsel %vm610_vm0, %v615_v8, %v622_v44  ;;  %v3741_v56 = vld [vmem:[%s8053_s1 + $0x878] sm:$0xff] }
  0x46   : > { %705 = vmatprep.subr.mxu0 %v3727_v58  ;;  %857 = vmatprep.subr.mxu1 %v3653_v59  ;;  %v3805_v58 = vld [vmem:[%s8053_s1 + $0xa78] sm:$0xff]  ;;  %v5077_v59 = vld [vmem:[%s4656_s27 + $0x48] sm:$0x3f] }
  0x47   : > { %706 = vmatpush2.msra.mxu0 %v3726_v60  ;;  %858 = vmatpush1.msra.mxu1 %v3652_v0  ;;  %v5080_v60 = vld [vmem:[%s4656_s27 + $0x58] sm:$0x3f]  ;;  %v5085_v0 = vsel %vm610_vm0, %v612_v12, %v620_v49  ;;  %v5110_v7 = vrot.slane %v5077_v59, 1 }
  0x48   : > { %707 = vmatprep.subr.mxu0 %v3723_v3  ;;  %859 = vmatprep.subr.mxu1 %v3777_v4  ;;  %v5090_v3 = vsel %vm610_vm0, %v618_v51, %v624_v50  ;;  %v5093_v4 = vrot.slane %v5063_v54, 1  ;;  %v3801_v51 = vld [vmem:[%s8053_s1 + $0xa58] sm:$0xff]  ;;  %v5113_v8 = vrot.slane %v5080_v60, 1 }
  0x49   : > { %708 = vmatpush2.msra.mxu0 %v3722_v5  ;;  %860 = vmatpush2.msra.mxu1 %v3776_v6  ;;  %v3740_v5 = vld [vmem:[%s8053_s1 + $0x870] sm:$0xff]  ;;  %v3733_v12 = vld [vmem:[%s8053_s1 + $0x838] sm:$0xff] }
  0x4a   : > { %709 = vmatprep.subr.mxu0 %v3719_v9  ;;  %861 = vmatprep.subr.mxu1 %v3773_v10  ;;  %v3804_v6 = vld [vmem:[%s8053_s1 + $0xa70] sm:$0xff]  ;;  %v5126_v11 = vsel %vm610_vm0, %v622_v44, %v5093_v4  ;;  %v413_v44 = vld [vmem:[%s8053_s1 + $0x580] sm:$0xff] }
  0x4b   : > { %710 = vmatpush2.msra.mxu0 %v3718_v13  ;;  %862 = vmatpush2.msra.mxu1 %v3772_v14  ;;  %v3736_v9 = vld [vmem:[%s8053_s1 + $0x850] sm:$0xff]  ;;  %v3797_v13 = vld [vmem:[%s8053_s1 + $0xa38] sm:$0xff]  ;;  %v5136_v14 = vsel %vm610_vm0, %v620_v49, %v5110_v7  ;;  %v405_v49 = vld [vmem:[%s8053_s1 + $0x540] sm:$0xff] }
  0x4c   : > { %711 = vmatprep.subr.mxu0 %v3715_v15  ;;  %863 = vmatprep.subr.mxu1 %v3769_v16  ;;  %v3800_v10 = vld [vmem:[%s8053_s1 + $0xa50] sm:$0xff]  ;;  %v5140_v15 = vsel %vm610_vm0, %v624_v50, %v5113_v8  ;;  %v286_v50 = vld [vmem:[%s8053_s1 + $0x188] sm:$0xff] }
  0x4d   : > { %712 = vmatpush2.msra.mxu0 %v3714_v17  ;;  %713 = vmatprep.mubr.f32.mxu0 %v4966_v18  ;;  %v3732_v16 = vld [vmem:[%s8053_s1 + $0x830] sm:$0xff] }
  0x4e   : > { %864 = vmatpush2.msra.mxu1 %v3768_v19  ;;  %714 = vmatmul.mubr.f32.vlgmr.msra.gmra.mxu0 %v4974_v20  ;;  %v3796_v17 = vld [vmem:[%s8053_s1 + $0xa30] sm:$0xff]  ;;  %v3729_v19 = vld [vmem:[%s8053_s1 + $0x818] sm:$0xff] }
  0x4f   : > { %865 = vmatprep.subr.mxu1 %v3765_v21  ;;  %922 = vmatprep.subr.mxu0 %v3829_v22  ;;  %v3793_v21 = vld [vmem:[%s8053_s1 + $0xa18] sm:$0xff]  ;;  %v3728_v22 = vld [vmem:[%s8053_s1 + $0x810] sm:$0xff] }
  0x50   : > { %866 = vmatpush2.msra.mxu1 %v3764_v23  ;;  %923 = vmatpush1.msra.mxu0 %v3828_v24  ;;  %v3792_v23 = vld [vmem:[%s8053_s1 + $0xa10] sm:$0xff]  ;;  %v3725_v24 = vld [vmem:[%s8053_s1 + $0x7f8] sm:$0xff] }
  0x51   : > { %867 = vmatprep.subr.mxu1 %v3761_v25  ;;  %924 = vmatprep.subr.mxu0 %v3825_v26  ;;  %v3789_v25 = vld [vmem:[%s8053_s1 + $0x9f8] sm:$0xff]  ;;  %v3724_v26 = vld [vmem:[%s8053_s1 + $0x7f0] sm:$0xff] }
  0x52   : > { %868 = vmatpush2.msra.mxu1 %v3760_v27  ;;  %925 = vmatpush1.msra.mxu0 %v3824_v28  ;;  %v3788_v27 = vld [vmem:[%s8053_s1 + $0x9f0] sm:$0xff]  ;;  %v3721_v28 = vld [vmem:[%s8053_s1 + $0x7d8] sm:$0xff] }
  0x53   : > { %869 = vmatprep.subr.mxu1 %v3757_v29  ;;  %926 = vmatprep.subr.mxu0 %v3821_v30  ;;  %v3785_v29 = vld [vmem:[%s8053_s1 + $0x9d8] sm:$0xff]  ;;  %v3720_v30 = vld [vmem:[%s8053_s1 + $0x7d0] sm:$0xff] }
  0x54   : > { %870 = vmatpush2.msra.mxu1 %v3756_v31  ;;  %927 = vmatpush1.msra.mxu0 %v3820_v32  ;;  %v3784_v31 = vld [vmem:[%s8053_s1 + $0x9d0] sm:$0xff]  ;;  %v3717_v32 = vld [vmem:[%s8053_s1 + $0x7b8] sm:$0xff] }
  0x55   : > { %871 = vmatprep.subr.mxu1 %v3753_v34  ;;  %928 = vmatprep.subr.mxu0 %v3817_v35  ;;  %v3781_v34 = vld [vmem:[%s8053_s1 + $0x9b8] sm:$0xff]  ;;  %v3716_v35 = vld [vmem:[%s8053_s1 + $0x7b0] sm:$0xff] }
  0x56   : > { %872 = vmatpush2.msra.mxu1 %v3752_v36  ;;  %929 = vmatpush1.msra.mxu0 %v3816_v37  ;;  %v3780_v36 = vld [vmem:[%s8053_s1 + $0x9b0] sm:$0xff]  ;;  %v298_v37 = vld [vmem:[%s8053_s1 + $0x1e8] sm:$0xff] }
  0x57   : > { %873 = vmatprep.subr.mxu1 %v3749_v40  ;;  %930 = vmatprep.subr.mxu0 %v3813_v41  ;;  %v414_v40 = vld [vmem:[%s8053_s1 + $0x588] sm:$0xff]  ;;  %v297_v41 = vld [vmem:[%s8053_s1 + $0x1e0] sm:$0xff] }
  0x58   : > { %874 = vmatpush2.msra.mxu1 %v3748_v45  ;;  %931 = vmatpush1.msra.mxu0 %v3812_v46  ;;  %v410_v45 = vld [vmem:[%s8053_s1 + $0x568] sm:$0xff]  ;;  %v293_v46 = vld [vmem:[%s8053_s1 + $0x1c0] sm:$0xff] }
  0x59   : > { %875 = vmatprep.subr.mxu1 %v3745_v47  ;;  %932 = vmatprep.subr.mxu0 %v3809_v48  ;;  %v406_v47 = vld [vmem:[%s8053_s1 + $0x548] sm:$0xff]  ;;  %v289_v48 = vld [vmem:[%s8053_s1 + $0x1a0] sm:$0xff] }
  0x5a   : > { %876 = vmatpush2.msra.mxu1 %v3744_v52  ;;  %933 = vmatpush1.msra.mxu0 %v3808_v53  ;;  %v402_v52 = vld [vmem:[%s8053_s1 + $0x528] sm:$0xff]  ;;  %v285_v53 = vld [vmem:[%s8053_s1 + $0x180] sm:$0xff] }
  0x5b   : > { %719 = vmatprep.mubr.f32.mxu0 %v5068_v55  ;;  %808 = vmatprep.mubr.f32.mxu1 %v8058_v61 }
  0x5c   : > { %877 = vmatprep.subr.mxu1 %v3741_v56  ;;  %934 = vmatprep.subr.mxu0 %v3805_v58  ;;  %v401_v56 = vld [vmem:[%s8053_s1 + $0x520] sm:$0xff]  ;;  %v282_v58 = vld [vmem:[%s8053_s1 + $0x168] sm:$0xff] }
  0x5d   : > { %720 = vmatmul.mubr.f32.gmra.mxu0 %v5085_v0  ;;  %3831 = vmatmul.mubr.msk.f32.gmra.mxu1 %vm640_vm1, %v5090_v3 }
  0x5e   : > { %878 = vmatpush2.msra.mxu1 %v3740_v5  ;;  %935 = vmatpush1.msra.mxu0 %v3804_v6  ;;  %v398_v5 = vld [vmem:[%s8053_s1 + $0x508] sm:$0xff]  ;;  %v281_v6 = vld [vmem:[%s8053_s1 + $0x160] sm:$0xff] }
  0x5f   : > { %879 = vmatprep.subr.mxu1 %v3737_v43  ;;  %936 = vmatprep.subr.mxu0 %v3801_v51  ;;  %v397_v43 = vld [vmem:[%s8053_s1 + $0x500] sm:$0xff]  ;;  %v278_v51 = vld [vmem:[%s8053_s1 + $0x148] sm:$0xff] }
  0x60   : > { %880 = vmatpush2.msra.mxu1 %v3736_v9  ;;  %937 = vmatpush1.msra.mxu0 %v3800_v10  ;;  %v394_v9 = vld [vmem:[%s8053_s1 + $0x4e8] sm:$0xff]  ;;  %v277_v10 = vld [vmem:[%s8053_s1 + $0x140] sm:$0xff] }
  0x61   : > { %725 = vmatprep.mubr.f32.mxu0 %v5126_v11  ;;  %814 = vmatprep.mubr.f32.mxu1 %v8058_v61 }
  0x62   : > { %881 = vmatprep.subr.mxu1 %v3733_v12  ;;  %938 = vmatprep.subr.mxu0 %v3797_v13  ;;  %v393_v12 = vld [vmem:[%s8053_s1 + $0x4e0] sm:$0xff]  ;;  %v274_v13 = vld [vmem:[%s8053_s1 + $0x128] sm:$0xff] }
  0x63   : > { %726 = vmatmul.mubr.f32.gmra.mxu0 %v5136_v14  ;;  %3832 = vmatmul.mubr.msk.f32.gmra.mxu1 %vm640_vm1, %v5140_v15 }
  0x64   : > { %882 = vmatpush2.msra.mxu1 %v3732_v16  ;;  %939 = vmatpush1.msra.mxu0 %v3796_v17  ;;  %v390_v16 = vld [vmem:[%s8053_s1 + $0x4c8] sm:$0xff]  ;;  %v273_v17 = vld [vmem:[%s8053_s1 + $0x120] sm:$0xff] }
  0x65   : > { %883 = vmatprep.subr.mxu1 %v3729_v19  ;;  %940 = vmatprep.subr.mxu0 %v3793_v21  ;;  %v389_v19 = vld [vmem:[%s8053_s1 + $0x4c0] sm:$0xff]  ;;  %v270_v21 = vld [vmem:[%s8053_s1 + $0x108] sm:$0xff] }
  0x66   : > { %884 = vmatpush2.msra.mxu1 %v3728_v22  ;;  %941 = vmatpush1.msra.mxu0 %v3792_v23  ;;  %v269_v22 = vld [vmem:[%s8053_s1 + $0x100] sm:$0xff] }
  0x67   : > { %731 = vmatprep.mubr.f32.mxu0 %v5093_v4  ;;  %820 = vmatprep.mubr.f32.mxu1 %v8058_v61  ;;  %v385_v23 = vld [vmem:[%s8053_s1 + $0x4a0] sm:$0xff] }
  0x68   : > { %885 = vmatprep.subr.mxu1 %v3725_v24  ;;  %942 = vmatprep.subr.mxu0 %v3789_v25  ;;  %v266_v24 = vld [vmem:[%s8053_s1 + $0xe8] sm:$0xff]  ;;  %v381_v25 = vld [vmem:[%s8053_s1 + $0x480] sm:$0xff] }
  0x69   : > { %732 = vmatmul.mubr.f32.gmra.mxu0 %v5110_v7  ;;  %3833 = vmatmul.mubr.msk.f32.gmra.mxu1 %vm640_vm1, %v5113_v8 }
  0x6a   : > { %886 = vmatpush2.msra.mxu1 %v3724_v26  ;;  %943 = vmatpush1.msra.mxu0 %v3788_v27  ;;  %v262_v26 = vld [vmem:[%s8053_s1 + $0xc8] sm:$0xff]  ;;  %v261_v27 = vld [vmem:[%s8053_s1 + $0xc0] sm:$0xff] }
  0x6b   : > { %887 = vmatprep.subr.mxu1 %v3721_v28  ;;  %944 = vmatprep.subr.mxu0 %v3785_v29  ;;  %v377_v28 = vld [vmem:[%s8053_s1 + $0x460] sm:$0xff]  ;;  %v258_v29 = vld [vmem:[%s8053_s1 + $0xa8] sm:$0xff] }
  0x6c   : > { %888 = vmatpush2.msra.mxu1 %v3720_v30  ;;  %945 = vmatpush1.msra.mxu0 %v3784_v31  ;;  %v373_v30 = vld [vmem:[%s8053_s1 + $0x440] sm:$0xff]  ;;  %v254_v31 = vld [vmem:[%s8053_s1 + $0x88] sm:$0xff] }
  0x6d   : > { %889 = vmatprep.subr.mxu1 %v3717_v32  ;;  %946 = vmatprep.subr.mxu0 %v3781_v34  ;;  %v253_v32 = vld [vmem:[%s8053_s1 + $0x80] sm:$0xff] }
  0x6e   : > { %890 = vmatpush2.msra.mxu1 %v3716_v35  ;;  %891 = vmatprep.mubr.f32.mxu1 %v4966_v18  ;;  %v294_v18 = vld [vmem:[%s8053_s1 + $0x1c8] sm:$0xff]  ;;  %v369_v34 = vld [vmem:[%s8053_s1 + $0x420] sm:$0xff] }
  0x6f   : > { %947 = vmatpush1.msra.mxu0 %v3780_v36  ;;  %980 = vmatprep.mubr.f32.mxu0 %v8058_v61  ;;  %v250_v35 = vld [vmem:[%s8053_s1 + $0x68] sm:$0xff]  ;;  %v365_v36 = vld [vmem:[%s8053_s1 + $0x400] sm:$0xff] }
  0x70   : > { %892 = vmatmul.mubr.f32.vlgmr.msra.gmra.mxu1 %v4974_v20  ;;  %3834 = vmatmul.mubr.msk.f32.vlgmr.msra.gmra.mxu0 %vm640_vm1, %v4720_v57  ;;  %v409_v20 = vld [vmem:[%s8053_s1 + $0x560] sm:$0xff]  ;;  %v290_v57 = vld [vmem:[%s8053_s1 + $0x1a8] sm:$0xff] }
  0x71   : > { %1013 = vmatprep.subr.mxu0 %v298_v37  ;;  %1108 = vmatprep.subr.mxu1 %v414_v40  ;;  %v246_v37 = vld [vmem:[%s8053_s1 + $0x48] sm:$0xff]  ;;  %v300_v40 = vld [vmem:[%s8053_s1 + $0x1f8] sm:$0xff] }
  0x72   : > { %1014 = vmatpush1.msra.mxu0 %v297_v41  ;;  %1109 = vmatpush1.msra.mxu1 %v413_v44  ;;  %v245_v41 = vld [vmem:[%s8053_s1 + $0x40] sm:$0xff]  ;;  %v299_v44 = vld [vmem:[%s8053_s1 + $0x1f0] sm:$0xff] }
  0x73   : > { %1015 = vmatprep.subr.mxu0 %v294_v18  ;;  %1110 = vmatprep.subr.mxu1 %v410_v45  ;;  %v242_v18 = vld [vmem:[%s8053_s1 + $0x28] sm:$0xff]  ;;  %v296_v45 = vld [vmem:[%s8053_s1 + $0x1d8] sm:$0xff] }
  0x74   : > { %1016 = vmatpush1.msra.mxu0 %v293_v46  ;;  %1111 = vmatpush1.msra.mxu1 %v409_v20  ;;  %v241_v46 = vld [vmem:[%s8053_s1 + $0x20] sm:$0xff]  ;;  %v295_v20 = vld [vmem:[%s8053_s1 + $0x1d0] sm:$0xff] }
  0x75   : > { %1017 = vmatprep.subr.mxu0 %v290_v57  ;;  %1112 = vmatprep.subr.mxu1 %v406_v47  ;;  %v238_v57 = vld [vmem:[%s8053_s1 + $0x8] sm:$0xff]  ;;  %v292_v47 = vld [vmem:[%s8053_s1 + $0x1b8] sm:$0xff] }
  0x76   : > { %1018 = vmatpush1.msra.mxu0 %v289_v48  ;;  %1113 = vmatpush1.msra.mxu1 %v405_v49  ;;  %v291_v48 = vld [vmem:[%s8053_s1 + $0x1b0] sm:$0xff]  ;;  %v362_v49 = vld [vmem:[%s8053_s1 + $0x3e8] sm:$0xff] }
  0x77   : > { %1019 = vmatprep.subr.mxu0 %v286_v50  ;;  %1114 = vmatprep.subr.mxu1 %v402_v52  ;;  %v288_v50 = vld [vmem:[%s8053_s1 + $0x198] sm:$0xff]  ;;  %v361_v52 = vld [vmem:[%s8053_s1 + $0x3e0] sm:$0xff] }
  0x78   : > { %1020 = vmatpush1.msra.mxu0 %v285_v53  ;;  %1115 = vmatpush1.msra.mxu1 %v401_v56  ;;  %v287_v53 = vld [vmem:[%s8053_s1 + $0x190] sm:$0xff]  ;;  %v358_v56 = vld [vmem:[%s8053_s1 + $0x3c8] sm:$0xff] }
  0x79   : > { %1021 = vmatprep.subr.mxu0 %v282_v58  ;;  %1116 = vmatprep.subr.mxu1 %v398_v5  ;;  %v284_v58 = vld [vmem:[%s8053_s1 + $0x178] sm:$0xff]  ;;  %v357_v5 = vld [vmem:[%s8053_s1 + $0x3c0] sm:$0xff] }
  0x7a   : > { %1022 = vmatpush1.msra.mxu0 %v281_v6  ;;  %1117 = vmatpush1.msra.mxu1 %v397_v43  ;;  %v283_v6 = vld [vmem:[%s8053_s1 + $0x170] sm:$0xff]  ;;  %v354_v43 = vld [vmem:[%s8053_s1 + $0x3a8] sm:$0xff] }
  0x7b   : > { %1023 = vmatprep.subr.mxu0 %v278_v51  ;;  %1118 = vmatprep.subr.mxu1 %v394_v9  ;;  %v280_v51 = vld [vmem:[%s8053_s1 + $0x158] sm:$0xff]  ;;  %v353_v9 = vld [vmem:[%s8053_s1 + $0x3a0] sm:$0xff] }
  0x7c   : > { %1024 = vmatpush1.msra.mxu0 %v277_v10  ;;  %1119 = vmatpush1.msra.mxu1 %v393_v12  ;;  %v279_v10 = vld [vmem:[%s8053_s1 + $0x150] sm:$0xff]  ;;  %v350_v12 = vld [vmem:[%s8053_s1 + $0x388] sm:$0xff] }
  0x7d   : > { %897 = vmatprep.mubr.f32.mxu1 %v5068_v55  ;;  %986 = vmatprep.mubr.f32.mxu0 %v8058_v61  ;;  %v386_v55 = vld [vmem:[%s8053_s1 + $0x4a8] sm:$0xff] }
  0x7e   : > { %1025 = vmatprep.subr.mxu0 %v274_v13  ;;  %1120 = vmatprep.subr.mxu1 %v390_v16  ;;  %v276_v13 = vld [vmem:[%s8053_s1 + $0x138] sm:$0xff]  ;;  %v349_v16 = vld [vmem:[%s8053_s1 + $0x380] sm:$0xff] }
  0x7f   : > { %898 = vmatmul.mubr.f32.gmra.mxu1 %v5085_v0  ;;  %3835 = vmatmul.mubr.msk.f32.gmra.mxu0 %vm640_vm1, %v5090_v3  ;;  %v382_v0 = vld [vmem:[%s8053_s1 + $0x488] sm:$0xff]  ;;  %v265_v3 = vld [vmem:[%s8053_s1 + $0xe0] sm:$0xff] }
  0x80   : > { %1026 = vmatpush1.msra.mxu0 %v273_v17  ;;  %1121 = vmatpush1.msra.mxu1 %v389_v19  ;;  %v275_v17 = vld [vmem:[%s8053_s1 + $0x130] sm:$0xff]  ;;  %v346_v19 = vld [vmem:[%s8053_s1 + $0x368] sm:$0xff] }
  0x81   : > { %1027 = vmatprep.subr.mxu0 %v270_v21  ;;  %1122 = vmatprep.subr.mxu1 %v386_v55  ;;  %v272_v21 = vld [vmem:[%s8053_s1 + $0x118] sm:$0xff]  ;;  %v345_v55 = vld [vmem:[%s8053_s1 + $0x360] sm:$0xff] }
  0x82   : > { %1028 = vmatpush1.msra.mxu0 %v269_v22  ;;  %1123 = vmatpush1.msra.mxu1 %v385_v23  ;;  %v271_v22 = vld [vmem:[%s8053_s1 + $0x110] sm:$0xff]  ;;  %v342_v23 = vld [vmem:[%s8053_s1 + $0x348] sm:$0xff] }
  0x83   : > { %903 = vmatprep.mubr.f32.mxu1 %v5126_v11  ;;  %992 = vmatprep.mubr.f32.mxu0 %v8058_v61  ;;  %v378_v11 = vld [vmem:[%s8053_s1 + $0x468] sm:$0xff] }
  0x84   : > { %1029 = vmatprep.subr.mxu0 %v266_v24  ;;  %1124 = vmatprep.subr.mxu1 %v382_v0  ;;  %v268_v24 = vld [vmem:[%s8053_s1 + $0xf8] sm:$0xff]  ;;  %v341_v0 = vld [vmem:[%s8053_s1 + $0x340] sm:$0xff] }
  0x85   : > { %904 = vmatmul.mubr.f32.gmra.mxu1 %v5136_v14  ;;  %3836 = vmatmul.mubr.msk.f32.gmra.mxu0 %vm640_vm1, %v5140_v15  ;;  %v374_v14 = vld [vmem:[%s8053_s1 + $0x448] sm:$0xff]  ;;  %v257_v15 = vld [vmem:[%s8053_s1 + $0xa0] sm:$0xff] }
  0x86   : > { %1030 = vmatpush1.msra.mxu0 %v265_v3  ;;  %1125 = vmatpush1.msra.mxu1 %v381_v25  ;;  %v267_v3 = vld [vmem:[%s8053_s1 + $0xf0] sm:$0xff]  ;;  %v338_v25 = vld [vmem:[%s8053_s1 + $0x328] sm:$0xff] }
  0x87   : > { %1031 = vmatprep.subr.mxu0 %v262_v26  ;;  %1126 = vmatprep.subr.mxu1 %v378_v11  ;;  %v264_v26 = vld [vmem:[%s8053_s1 + $0xd8] sm:$0xff]  ;;  %v337_v11 = vld [vmem:[%s8053_s1 + $0x320] sm:$0xff] }
  0x88   : > { %1032 = vmatpush1.msra.mxu0 %v261_v27  ;;  %1127 = vmatpush1.msra.mxu1 %v377_v28  ;;  %v263_v27 = vld [vmem:[%s8053_s1 + $0xd0] sm:$0xff]  ;;  %v334_v28 = vld [vmem:[%s8053_s1 + $0x308] sm:$0xff] }
  0x89   : > { %909 = vmatprep.mubr.f32.mxu1 %v5093_v4  ;;  %998 = vmatprep.mubr.f32.mxu0 %v8058_v61  ;;  %v370_v4 = vld [vmem:[%s8053_s1 + $0x428] sm:$0xff] }
  0x8a   : > { %1033 = vmatprep.subr.mxu0 %v258_v29  ;;  %1128 = vmatprep.subr.mxu1 %v374_v14  ;;  %v260_v29 = vld [vmem:[%s8053_s1 + $0xb8] sm:$0xff]  ;;  %v333_v14 = vld [vmem:[%s8053_s1 + $0x300] sm:$0xff] }
  0x8b   : > { %910 = vmatmul.mubr.f32.gmra.mxu1 %v5110_v7  ;;  %3837 = vmatmul.mubr.msk.f32.gmra.mxu0 %vm640_vm1, %v5113_v8  ;;  %v366_v7 = vld [vmem:[%s8053_s1 + $0x408] sm:$0xff]  ;;  %v249_v8 = vld [vmem:[%s8053_s1 + $0x60] sm:$0xff] }
  0x8c   : > { %1034 = vmatpush1.msra.mxu0 %v257_v15  ;;  %1129 = vmatpush1.msra.mxu1 %v373_v30  ;;  %v259_v15 = vld [vmem:[%s8053_s1 + $0xb0] sm:$0xff]  ;;  %v330_v30 = vld [vmem:[%s8053_s1 + $0x2e8] sm:$0xff] }
  0x8d   : > { %1035 = vmatprep.subr.mxu0 %v254_v31  ;;  %1130 = vmatprep.subr.mxu1 %v370_v4  ;;  %v256_v31 = vld [vmem:[%s8053_s1 + $0x98] sm:$0xff]  ;;  %v329_v4 = vld [vmem:[%s8053_s1 + $0x2e0] sm:$0xff] }
  0x8e   : > { %1036 = vmatpush1.msra.mxu0 %v253_v32  ;;  %1131 = vmatpush1.msra.mxu1 %v369_v34  ;;  %v255_v32 = vld [vmem:[%s8053_s1 + $0x90] sm:$0xff]  ;;  %v326_v34 = vld [vmem:[%s8053_s1 + $0x2c8] sm:$0xff] }
  0x8f   : > { %1037 = vmatprep.subr.mxu0 %v250_v35  ;;  %1132 = vmatprep.subr.mxu1 %v366_v7  ;;  %v252_v35 = vld [vmem:[%s8053_s1 + $0x78] sm:$0xff]  ;;  %v325_v7 = vld [vmem:[%s8053_s1 + $0x2c0] sm:$0xff] }
  0x90   : > { %1038 = vmatpush1.msra.mxu0 %v249_v8  ;;  %1133 = vmatpush1.msra.mxu1 %v365_v36  ;;  %v251_v8 = vld [vmem:[%s8053_s1 + $0x70] sm:$0xff]  ;;  %v322_v36 = vld [vmem:[%s8053_s1 + $0x2a8] sm:$0xff] }
  0x91   : > { %1166 = vmatprep.mubr.f32.mxu1 %v8058_v61  ;;  %1039 = vmatprep.subr.mxu0 %v246_v37  ;;  %v248_v37 = vld [vmem:[%s8053_s1 + $0x58] sm:$0xff] }
  0x92   : > { %3838 = vmatmul.mubr.msk.f32.vlgmr.msra.gmra.mxu1 %vm640_vm1, %v4677_v42  ;;  %1191 = vmatprep.subr.mxu1 %v300_v40  ;;  %v237_v42 = vld [vmem:[%s8053_s1] sm:$0xff] }
  0x93   : > { %1040 = vmatpush1.msra.mxu0 %v245_v41  ;;  %1192 = vmatpush1.msra.mxu1 %v299_v44  ;;  %v321_v40 = vld [vmem:[%s8053_s1 + $0x2a0] sm:$0xff]  ;;  %v247_v41 = vld [vmem:[%s8053_s1 + $0x50] sm:$0xff]  ;;  %v318_v44 = vld [vmem:[%s8053_s1 + $0x288] sm:$0xff] }
  0x94   : > { %1041 = vmatprep.subr.mxu0 %v242_v18  ;;  %1193 = vmatprep.subr.mxu1 %v296_v45  ;;  %v244_v18 = vld [vmem:[%s8053_s1 + $0x38] sm:$0xff]  ;;  %v317_v45 = vld [vmem:[%s8053_s1 + $0x280] sm:$0xff] }
  0x95   : > { %1042 = vmatpush1.msra.mxu0 %v241_v46  ;;  %1194 = vmatpush1.msra.mxu1 %v295_v20  ;;  %v243_v46 = vld [vmem:[%s8053_s1 + $0x30] sm:$0xff]  ;;  %v314_v20 = vld [vmem:[%s8053_s1 + $0x268] sm:$0xff] }
  0x96   : > { %1043 = vmatprep.subr.mxu0 %v238_v57  ;;  %1195 = vmatprep.subr.mxu1 %v292_v47  ;;  %v240_v57 = vld [vmem:[%s8053_s1 + $0x18] sm:$0xff]  ;;  %v313_v47 = vld [vmem:[%s8053_s1 + $0x260] sm:$0xff] }
  0x97   : > { %1044 = vmatpush1.msra.mxu0 %v237_v42  ;;  %1196 = vmatpush1.msra.mxu1 %v291_v48  ;;  %v239_v42 = vld [vmem:[%s8053_s1 + $0x10] sm:$0xff]  ;;  %v310_v48 = vld [vmem:[%s8053_s1 + $0x248] sm:$0xff] }
  0x98   : > { %1045 = vmatprep.subr.mxu0 %v362_v49  ;;  %1197 = vmatprep.subr.mxu1 %v288_v50  ;;  %v364_v49 = vld [vmem:[%s8053_s1 + $0x3f8] sm:$0xff]  ;;  %v309_v50 = vld [vmem:[%s8053_s1 + $0x240] sm:$0xff] }
  0x99   : > { %1046 = vmatpush2.msra.mxu0 %v361_v52  ;;  %1198 = vmatpush1.msra.mxu1 %v287_v53  ;;  %v363_v52 = vld [vmem:[%s8053_s1 + $0x3f0] sm:$0xff]  ;;  %v306_v53 = vld [vmem:[%s8053_s1 + $0x228] sm:$0xff] }
  0x9a   : > { %1047 = vmatprep.subr.mxu0 %v358_v56  ;;  %1199 = vmatprep.subr.mxu1 %v284_v58  ;;  %v360_v56 = vld [vmem:[%s8053_s1 + $0x3d8] sm:$0xff]  ;;  %v305_v58 = vld [vmem:[%s8053_s1 + $0x220] sm:$0xff] }
  0x9b   : > { %1048 = vmatpush2.msra.mxu0 %v357_v5  ;;  %1200 = vmatpush1.msra.mxu1 %v283_v6  ;;  %v359_v5 = vld [vmem:[%s8053_s1 + $0x3d0] sm:$0xff]  ;;  %v302_v6 = vld [vmem:[%s8053_s1 + $0x208] sm:$0xff] }
  0x9c   : > { %1049 = vmatprep.subr.mxu0 %v354_v43  ;;  %1201 = vmatprep.subr.mxu1 %v280_v51  ;;  %v356_v43 = vld [vmem:[%s8053_s1 + $0x3b8] sm:$0xff]  ;;  %v301_v51 = vld [vmem:[%s8053_s1 + $0x200] sm:$0xff] }
  0x9d   : > { %1050 = vmatpush2.msra.mxu0 %v353_v9  ;;  %1202 = vmatpush1.msra.mxu1 %v279_v10  ;;  %v355_v9 = vld [vmem:[%s8053_s1 + $0x3b0] sm:$0xff]  ;;  %v352_v10 = vld [vmem:[%s8053_s1 + $0x398] sm:$0xff] }
  0x9e   : > { %1051 = vmatprep.subr.mxu0 %v350_v12  ;;  %1203 = vmatprep.subr.mxu1 %v276_v13  ;;  %v416_v12 = vld [vmem:[%s8053_s1 + $0x598] sm:$0xff]  ;;  %v351_v13 = vld [vmem:[%s8053_s1 + $0x390] sm:$0xff] }
  0x9f   : > { %1052 = vmatpush2.msra.mxu0 %v349_v16  ;;  %1204 = vmatpush1.msra.mxu1 %v275_v17  ;;  %v415_v16 = vld [vmem:[%s8053_s1 + $0x590] sm:$0xff]  ;;  %v348_v17 = vld [vmem:[%s8053_s1 + $0x378] sm:$0xff] }
  0xa0   : > { %1053 = vmatprep.subr.mxu0 %v346_v19  ;;  %1205 = vmatprep.subr.mxu1 %v272_v21  ;;  %v412_v19 = vld [vmem:[%s8053_s1 + $0x578] sm:$0xff] }
  0xa1   : > { %1054 = vmatpush2.msra.mxu0 %v345_v55  ;;  %1206 = vmatpush1.msra.mxu1 %v271_v22  ;;  %v344_v21 = vld [vmem:[%s8053_s1 + $0x358] sm:$0xff]  ;;  %v343_v22 = vld [vmem:[%s8053_s1 + $0x350] sm:$0xff] }
  0xa2   : > { %1055 = vmatprep.subr.mxu0 %v342_v23  ;;  %1207 = vmatprep.subr.mxu1 %v268_v24  ;;  %v408_v55 = vld [vmem:[%s8053_s1 + $0x558] sm:$0xff]  ;;  %v407_v23 = vld [vmem:[%s8053_s1 + $0x550] sm:$0xff] }
  0xa3   : > { %1056 = vmatpush2.msra.mxu0 %v341_v0  ;;  %1208 = vmatpush1.msra.mxu1 %v267_v3  ;;  %v340_v24 = vld [vmem:[%s8053_s1 + $0x338] sm:$0xff]  ;;  %v339_v0 = vld [vmem:[%s8053_s1 + $0x330] sm:$0xff]  ;;  %v5664_v3 = vld [vmem:[%s4656_s27 + $0x28] sm:$0xff] }
  0xa4   : > { %1057 = vmatprep.subr.mxu0 %v338_v25  ;;  %1209 = vmatprep.subr.mxu1 %v264_v26  ;;  %v336_v25 = vld [vmem:[%s8053_s1 + $0x318] sm:$0xff] }
  0xa5   : > { %1058 = vmatpush2.msra.mxu0 %v337_v11  ;;  %1210 = vmatpush1.msra.mxu1 %v263_v27  ;;  %v400_v26 = vld [vmem:[%s8053_s1 + $0x518] sm:$0xff]  ;;  %v335_v11 = vld [vmem:[%s8053_s1 + $0x310] sm:$0xff] }
  0xa6   : > { %1059 = vmatprep.subr.mxu0 %v334_v28  ;;  %1211 = vmatprep.subr.mxu1 %v260_v29  ;;  %v399_v27 = vld [vmem:[%s8053_s1 + $0x510] sm:$0xff]  ;;  %v332_v28 = vld [vmem:[%s8053_s1 + $0x2f8] sm:$0xff] }
  0xa7   : > { %1060 = vmatpush2.msra.mxu0 %v333_v14  ;;  %1212 = vmatpush1.msra.mxu1 %v259_v15  ;;  %v331_v29 = vld [vmem:[%s8053_s1 + $0x2f0] sm:$0xff]  ;;  %v328_v14 = vld [vmem:[%s8053_s1 + $0x2d8] sm:$0xff] }
  0xa8   : > { %1061 = vmatprep.subr.mxu0 %v330_v30  ;;  %1213 = vmatprep.subr.mxu1 %v256_v31  ;;  %v392_v15 = vld [vmem:[%s8053_s1 + $0x4d8] sm:$0xff]  ;;  %v391_v30 = vld [vmem:[%s8053_s1 + $0x4d0] sm:$0xff] }
  0xa9   : > { %1062 = vmatpush2.msra.mxu0 %v329_v4  ;;  %1214 = vmatpush1.msra.mxu1 %v255_v32  ;;  %v324_v31 = vld [vmem:[%s8053_s1 + $0x2b8] sm:$0xff]  ;;  %v323_v4 = vld [vmem:[%s8053_s1 + $0x2b0] sm:$0xff] }
  0xaa   : > { %1063 = vmatprep.subr.mxu0 %v326_v34  ;;  %1215 = vmatprep.subr.mxu1 %v252_v35  ;;  %v320_v32 = vld [vmem:[%s8053_s1 + $0x298] sm:$0xff]  ;;  %v319_v35 = vld [vmem:[%s8053_s1 + $0x290] sm:$0xff] }
  0xab   : > { %1064 = vmatpush2.msra.mxu0 %v325_v7  ;;  %1216 = vmatpush1.msra.mxu1 %v251_v8  ;;  %v384_v34 = vld [vmem:[%s8053_s1 + $0x498] sm:$0xff]  ;;  %v383_v7 = vld [vmem:[%s8053_s1 + $0x490] sm:$0xff] }
  0xac   : > { %1065 = vmatprep.subr.mxu0 %v322_v36  ;;  %1217 = vmatprep.subr.mxu1 %v248_v37  ;;  %v380_v8 = vld [vmem:[%s8053_s1 + $0x478] sm:$0xff]  ;;  %v315_v36 = vld [vmem:[%s8053_s1 + $0x270] sm:$0xff] }
  0xad   : > { %1066 = vmatpush2.msra.mxu0 %v321_v40  ;;  %1218 = vmatpush1.msra.mxu1 %v247_v41  ;;  %v379_v37 = vld [vmem:[%s8053_s1 + $0x470] sm:$0xff]  ;;  %v312_v40 = vld [vmem:[%s8053_s1 + $0x258] sm:$0xff] }
  0xae   : > { %1067 = vmatprep.subr.mxu0 %v318_v44  ;;  %1219 = vmatprep.subr.mxu1 %v244_v18  ;;  %v376_v41 = vld [vmem:[%s8053_s1 + $0x458] sm:$0xff]  ;;  %v311_v44 = vld [vmem:[%s8053_s1 + $0x250] sm:$0xff] }
  0xaf   : > { %1068 = vmatpush2.msra.mxu0 %v317_v45  ;;  %1220 = vmatpush1.msra.mxu1 %v243_v46  ;;  %v375_v18 = vld [vmem:[%s8053_s1 + $0x450] sm:$0xff]  ;;  %v308_v45 = vld [vmem:[%s8053_s1 + $0x238] sm:$0xff] }
  0xb0   : > { %1069 = vmatprep.subr.mxu0 %v314_v20  ;;  %1221 = vmatprep.subr.mxu1 %v240_v57  ;;  %v372_v46 = vld [vmem:[%s8053_s1 + $0x438] sm:$0xff]  ;;  %v307_v20 = vld [vmem:[%s8053_s1 + $0x230] sm:$0xff] }
  0xb1   : > { %1070 = vmatpush2.msra.mxu0 %v313_v47  ;;  %1222 = vmatpush1.msra.mxu1 %v239_v42  ;;  %v371_v57 = vld [vmem:[%s8053_s1 + $0x430] sm:$0xff]  ;;  %v304_v47 = vld [vmem:[%s8053_s1 + $0x218] sm:$0xff] }
  0xb2   : > { %1071 = vmatprep.subr.mxu0 %v310_v48  ;;  %1223 = vmatprep.subr.mxu1 %v364_v49  ;;  %v368_v42 = vld [vmem:[%s8053_s1 + $0x418] sm:$0xff]  ;;  %v303_v48 = vld [vmem:[%s8053_s1 + $0x210] sm:$0xff] }
  0xb3   : > { %1072 = vmatpush2.msra.mxu0 %v309_v50  ;;  %1224 = vmatpush2.msra.mxu1 %v363_v52  ;;  %v367_v49 = vld [vmem:[%s8053_s1 + $0x410] sm:$0xff]  ;;  %v5790_v50 = vld [vmem:[%s4656_s27 + $0x8] sm:$0xff] }
  0xb4   : > { %1073 = vmatprep.subr.mxu0 %v306_v53  ;;  %1225 = vmatprep.subr.mxu1 %v360_v56  ;;  %v3907_v52 = vld [vmem:[%s8053_s1 + $0xd28] sm:$0xff]  ;;  %v3906_v56 = vld [vmem:[%s8053_s1 + $0xd20] sm:$0xff] }
  0xb5   : > { %1074 = vmatpush2.msra.mxu0 %v305_v58  ;;  %1226 = vmatpush2.msra.mxu1 %v359_v5  ;;  %v4023_v53 = vld [vmem:[%s8053_s1 + $0x10c8] sm:$0xff]  ;;  %v4022_v58 = vld [vmem:[%s8053_s1 + $0x10c0] sm:$0xff] }
  0xb6   : > { %1075 = vmatprep.subr.mxu0 %v302_v6  ;;  %1227 = vmatprep.subr.mxu1 %v356_v43  ;;  %v5807_v5 = vld [vmem:[%s4656_s27] sm:$0xff]  ;;  %v5811_v6 = vld [vmem:[%s4656_s27 + $0x10] sm:$0xff]  ;;  %v3903_v43 = vld [vmem:[%s8053_s1 + $0xd08] sm:$0xff] }
  0xb7   : > { %1076 = vmatpush2.msra.mxu0 %v301_v51  ;;  %1077 = vmatprep.mubr.f32.mxu0 %v4912_v62  ;;  %v347_v62 = vld [vmem:[%s8053_s1 + $0x370] sm:$0xff]  ;;  %v4019_v51 = vld [vmem:[%s8053_s1 + $0x10a8] sm:$0xff] }
  0xb8   : > { %1228 = vmatpush2.msra.mxu1 %v355_v9  ;;  %1078 = vmatmul.mubr.f32.vlgmr.msra.gmra.mxu0 %v4921_v1  ;;  %v411_v1 = vld [vmem:[%s8053_s1 + $0x570] sm:$0xff]  ;;  %v3902_v9 = vld [vmem:[%s8053_s1 + $0xd00] sm:$0xff] }
  0xb9   : > { %1229 = vmatprep.subr.mxu1 %v352_v10  ;;  %1286 = vmatprep.subr.mxu0 %v416_v12  ;;  %v4018_v10 = vld [vmem:[%s8053_s1 + $0x10a0] sm:$0xff]  ;;  %v3899_v12 = vld [vmem:[%s8053_s1 + $0xce8] sm:$0xff] }
  0xba   : > { %1230 = vmatpush2.msra.mxu1 %v351_v13  ;;  %1287 = vmatpush1.msra.mxu0 %v415_v16  ;;  %v4015_v13 = vld [vmem:[%s8053_s1 + $0x1088] sm:$0xff]  ;;  %v5834_v16 = vld [vmem:[%s4656_s27 + $0x20] sm:$0xff] }
  0xbb   : > { %1231 = vmatprep.subr.mxu1 %v348_v17  ;;  %1288 = vmatprep.subr.mxu0 %v412_v19  ;;  %v3898_v17 = vld [vmem:[%s8053_s1 + $0xce0] sm:$0xff] }
  0xbc   : > { %1083 = vmatprep.mubr.f32.mxu0 %v4915_v63  ;;  %1232 = vmatpush2.msra.mxu1 %v347_v62  ;;  %v404_v63 = vld [vmem:[%s8053_s1 + $0x538] sm:$0xff]  ;;  %v4014_v19 = vld [vmem:[%s8053_s1 + $0x1080] sm:$0xff] }
  0xbd   : > { %1289 = vmatpush1.msra.mxu0 %v411_v1  ;;  %1233 = vmatprep.subr.mxu1 %v344_v21  ;;  %v5844_v62 = vld [vmem:[%s4656_s27 + $0x18] sm:$0xff]  ;;  %v3895_v1 = vld [vmem:[%s8053_s1 + $0xcc8] sm:$0xff] }
  0xbe   : > { %1084 = vmatmul.mubr.f32.gmra.mxu0 %v4924_v2  ;;  %1290 = vmatprep.subr.mxu0 %v408_v55  ;;  %v403_v2 = vld [vmem:[%s8053_s1 + $0x530] sm:$0xff]  ;;  %v4011_v21 = vld [vmem:[%s8053_s1 + $0x1068] sm:$0xff]  ;;  %v3894_v55 = vld [vmem:[%s8053_s1 + $0xcc0] sm:$0xff] }
  0xbf   : > { %1172 = vmatprep.mubr.f32.mxu1 %v8058_v61  ;;  %1234 = vmatpush2.msra.mxu1 %v343_v22  ;;  %v4010_v22 = vld [vmem:[%s8053_s1 + $0x1060] sm:$0xff] }
  0xc0   : > { %1291 = vmatpush1.msra.mxu0 %v407_v23  ;;  %3839 = vmatmul.mubr.msk.f32.gmra.mxu1 %vm640_vm1, %v5664_v3  ;;  %v3891_v23 = vld [vmem:[%s8053_s1 + $0xca8] sm:$0xff] }
  0xc1   : > { %1235 = vmatprep.subr.mxu1 %v340_v24  ;;  %1292 = vmatprep.subr.mxu0 %v404_v63  ;;  %v4007_v24 = vld [vmem:[%s8053_s1 + $0x1048] sm:$0xff]  ;;  %v5869_v63 = vld [vmem:[%s4656_s27 + $0x38] sm:$0xff] }
  0xc2   : > { %1089 = vmatprep.mubr.f32.mxu0 %v5015_v33  ;;  %1236 = vmatpush2.msra.mxu1 %v339_v0  ;;  %v396_v33 = vld [vmem:[%s8053_s1 + $0x4f8] sm:$0xff]  ;;  %v3890_v0 = vld [vmem:[%s8053_s1 + $0xca0] sm:$0xff] }
  0xc3   : > { %1293 = vmatpush1.msra.mxu0 %v403_v2  ;;  %1237 = vmatprep.subr.mxu1 %v336_v25  ;;  %v4006_v2 = vld [vmem:[%s8053_s1 + $0x1040] sm:$0xff]  ;;  %v5879_v25 = vld [vmem:[%s4656_s27 + $0x30] sm:$0xff] }
  0xc4   : > { %1090 = vmatmul.mubr.f32.gmra.mxu0 %v5030_v38  ;;  %1294 = vmatprep.subr.mxu0 %v400_v26  ;;  %v395_v38 = vld [vmem:[%s8053_s1 + $0x4f0] sm:$0xff]  ;;  %v3887_v26 = vld [vmem:[%s8053_s1 + $0xc88] sm:$0xff] }
  0xc5   : > { %1178 = vmatprep.mubr.f32.mxu1 %v8058_v61  ;;  %1238 = vmatpush2.msra.mxu1 %v335_v11  ;;  %v4003_v11 = vld [vmem:[%s8053_s1 + $0x1028] sm:$0xff] }
  0xc6   : > { %1295 = vmatpush1.msra.mxu0 %v399_v27  ;;  %3840 = vmatmul.mubr.msk.f32.gmra.mxu1 %vm640_vm1, %v5033_v39  ;;  %v327_v39 = vld [vmem:[%s8053_s1 + $0x2d0] sm:$0xff]  ;;  %v3886_v27 = vld [vmem:[%s8053_s1 + $0xc80] sm:$0xff] }
  0xc7   : > { %1239 = vmatprep.subr.mxu1 %v332_v28  ;;  %1296 = vmatprep.subr.mxu0 %v396_v33  ;;  %v5893_v28 = vld [vmem:[%s4656_s27 + $0x40] sm:$0xff] }
  0xc8   : > { %1095 = vmatprep.mubr.f32.mxu0 %v5063_v54  ;;  %1240 = vmatpush2.msra.mxu1 %v331_v29  ;;  %v388_v54 = vld [vmem:[%s8053_s1 + $0x4b8] sm:$0xff]  ;;  %v4002_v33 = vld [vmem:[%s8053_s1 + $0x1020] sm:$0xff]  ;;  %v3883_v29 = vld [vmem:[%s8053_s1 + $0xc68] sm:$0xff] }
  0xc9   : > { %1297 = vmatpush1.msra.mxu0 %v395_v38  ;;  %1241 = vmatprep.subr.mxu1 %v328_v14  ;;  %v3999_v38 = vld [vmem:[%s8053_s1 + $0x1008] sm:$0xff]  ;;  %v5907_v14 = vld [vmem:[%s4656_s27 + $0x50] sm:$0x3f] }
  0xca   : > { %1096 = vmatmul.mubr.f32.gmra.mxu0 %v5077_v59  ;;  %1298 = vmatprep.subr.mxu0 %v392_v15  ;;  %v387_v59 = vld [vmem:[%s8053_s1 + $0x4b0] sm:$0xff]  ;;  %v3882_v15 = vld [vmem:[%s8053_s1 + $0xc60] sm:$0xff] }
  0xcb   : > { %1184 = vmatprep.mubr.f32.mxu1 %v8058_v61  ;;  %1242 = vmatpush2.msra.mxu1 %v327_v39  ;;  %v3998_v39 = vld [vmem:[%s8053_s1 + $0x1000] sm:$0xff] }
  0xcc   : > { %1299 = vmatpush1.msra.mxu0 %v391_v30  ;;  %3841 = vmatmul.mubr.msk.f32.gmra.mxu1 %vm640_vm1, %v5080_v60  ;;  %v316_v60 = vld [vmem:[%s8053_s1 + $0x278] sm:$0xff]  ;;  %v5917_v30 = vld [vmem:[%s4656_s27 + $0x48] sm:$0x3f] }
  0xcd   : > { %1243 = vmatprep.subr.mxu1 %v324_v31  ;;  %1300 = vmatprep.subr.mxu0 %v388_v54  ;;  %v3879_v31 = vld [vmem:[%s8053_s1 + $0xc48] sm:$0xff] }
  0xce   : > { %1244 = vmatpush2.msra.mxu1 %v323_v4  ;;  %1301 = vmatpush1.msra.mxu0 %v387_v59  ;;  %v3995_v54 = vld [vmem:[%s8053_s1 + $0xfe8] sm:$0xff]  ;;  %v3878_v4 = vld [vmem:[%s8053_s1 + $0xc40] sm:$0xff] }
  0xcf   : > { %1245 = vmatprep.subr.mxu1 %v320_v32  ;;  %1302 = vmatprep.subr.mxu0 %v384_v34  ;;  %v3994_v59 = vld [vmem:[%s8053_s1 + $0xfe0] sm:$0xff]  ;;  %v5934_v32 = vld [vmem:[%s4656_s27 + $0x58] sm:$0x3f]  ;;  %v3875_v34 = vld [vmem:[%s8053_s1 + $0xc28] sm:$0xff] }
  0xd0   : > { %1246 = vmatpush2.msra.mxu1 %v319_v35  ;;  %1303 = vmatpush1.msra.mxu0 %v383_v7  ;;  %v3991_v35 = vld [vmem:[%s8053_s1 + $0xfc8] sm:$0xff]  ;;  %v3874_v7 = vld [vmem:[%s8053_s1 + $0xc20] sm:$0xff] }
  0xd1   : > { %1247 = vmatprep.subr.mxu1 %v316_v60  ;;  %1304 = vmatprep.subr.mxu0 %v380_v8  ;;  %v3990_v60 = vld [vmem:[%s8053_s1 + $0xfc0] sm:$0xff]  ;;  %v3871_v8 = vld [vmem:[%s8053_s1 + $0xc08] sm:$0xff] }
  0xd2   : > { %1248 = vmatpush2.msra.mxu1 %v315_v36  ;;  %1305 = vmatpush1.msra.mxu0 %v379_v37  ;;  %v3987_v36 = vld [vmem:[%s8053_s1 + $0xfa8] sm:$0xff]  ;;  %v3870_v37 = vld [vmem:[%s8053_s1 + $0xc00] sm:$0xff] }
  0xd3   : > { %1249 = vmatprep.subr.mxu1 %v312_v40  ;;  %1306 = vmatprep.subr.mxu0 %v376_v41  ;;  %v3986_v40 = vld [vmem:[%s8053_s1 + $0xfa0] sm:$0xff]  ;;  %v3867_v41 = vld [vmem:[%s8053_s1 + $0xbe8] sm:$0xff] }
  0xd4   : > { %1250 = vmatpush2.msra.mxu1 %v311_v44  ;;  %1307 = vmatpush1.msra.mxu0 %v375_v18  ;;  %v3983_v44 = vld [vmem:[%s8053_s1 + $0xf88] sm:$0xff]  ;;  %v3866_v18 = vld [vmem:[%s8053_s1 + $0xbe0] sm:$0xff] }
  0xd5   : > { %1251 = vmatprep.subr.mxu1 %v308_v45  ;;  %1308 = vmatprep.subr.mxu0 %v372_v46  ;;  %v3982_v45 = vld [vmem:[%s8053_s1 + $0xf80] sm:$0xff]  ;;  %v3863_v46 = vld [vmem:[%s8053_s1 + $0xbc8] sm:$0xff] }
  0xd6   : > { %1252 = vmatpush2.msra.mxu1 %v307_v20  ;;  %1309 = vmatpush1.msra.mxu0 %v371_v57  ;;  %v3979_v20 = vld [vmem:[%s8053_s1 + $0xf68] sm:$0xff]  ;;  %v3862_v57 = vld [vmem:[%s8053_s1 + $0xbc0] sm:$0xff] }
  0xd7   : > { %1253 = vmatprep.subr.mxu1 %v304_v47  ;;  %1310 = vmatprep.subr.mxu0 %v368_v42  ;;  %v3978_v47 = vld [vmem:[%s8053_s1 + $0xf60] sm:$0xff]  ;;  %v1557_v42 = vrot.slane %v5811_v6, 2 }
  0xd8   : > { %1254 = vmatpush2.msra.mxu1 %v303_v48  ;;  %1255 = vmatprep.mubr.f32.mxu1 %v5790_v50  ;;  %v1558_v48 = vrot.slane %v5664_v3, 2 }
  0xd9   : > { %1311 = vmatpush1.msra.mxu0 %v367_v49  ;;  %1344 = vmatprep.mubr.f32.mxu0 %v8058_v61  ;;  %v3859_v49 = vld [vmem:[%s8053_s1 + $0xba8] sm:$0xff] }
  0xda   : > { %1256 = vmatmul.mubr.f32.vlgmr.msra.gmra.mxu1 %v5807_v5  ;;  %3842 = vmatmul.mubr.msk.f32.vlgmr.msra.gmra.mxu0 %vm640_vm1, %v5811_v6  ;;  %v6006_v6 = vsel %vm1550_vm2, %v1557_v42, %v1558_v48 }
  0xdb   : > { %1588 = vmatprep.subr.mxu0 %v3907_v52  ;;  %1683 = vmatprep.subr.mxu1 %v4023_v53  ;;  %v3975_v52 = vld [vmem:[%s8053_s1 + $0xf48] sm:$0xff]  ;;  %v3858_v53 = vld [vmem:[%s8053_s1 + $0xba0] sm:$0xff] }
  0xdc   : > { %1589 = vmatpush1.msra.mxu0 %v3906_v56  ;;  %1684 = vmatpush1.msra.mxu1 %v4022_v58  ;;  %v3974_v56 = vld [vmem:[%s8053_s1 + $0xf40] sm:$0xff]  ;;  %v3855_v58 = vld [vmem:[%s8053_s1 + $0xb88] sm:$0xff] }
  0xdd   : > { %1590 = vmatprep.subr.mxu0 %v3903_v43  ;;  %1685 = vmatprep.subr.mxu1 %v4019_v51  ;;  %v3909_v43 = vld [vmem:[%s8053_s1 + $0xd38] sm:$0xff]  ;;  %v3854_v51 = vld [vmem:[%s8053_s1 + $0xb80] sm:$0xff] }
  0xde   : > { %1261 = vmatprep.mubr.f32.mxu1 %v5834_v16  ;;  %1591 = vmatpush1.msra.mxu0 %v3902_v9  ;;  %v3908_v9 = vld [vmem:[%s8053_s1 + $0xd30] sm:$0xff] }
  0xdf   : > { %1686 = vmatpush1.msra.mxu1 %v4018_v10  ;;  %1592 = vmatprep.subr.mxu0 %v3899_v12  ;;  %v3851_v10 = vld [vmem:[%s8053_s1 + $0xb68] sm:$0xff]  ;;  %v3905_v12 = vld [vmem:[%s8053_s1 + $0xd18] sm:$0xff] }
  0xe0   : > { %1262 = vmatmul.mubr.f32.gmra.mxu1 %v5844_v62  ;;  %1687 = vmatprep.subr.mxu1 %v4015_v13  ;;  %v3850_v13 = vld [vmem:[%s8053_s1 + $0xb60] sm:$0xff] }
  0xe1   : > { %1350 = vmatprep.mubr.f32.mxu0 %v8058_v61  ;;  %1593 = vmatpush1.msra.mxu0 %v3898_v17  ;;  %v3904_v17 = vld [vmem:[%s8053_s1 + $0xd10] sm:$0xff] }
  0xe2   : > { %1688 = vmatpush1.msra.mxu1 %v4014_v19  ;;  %3843 = vmatmul.mubr.msk.f32.gmra.mxu0 %vm640_vm1, %v5664_v3  ;;  %v3847_v19 = vld [vmem:[%s8053_s1 + $0xb48] sm:$0xff]  ;;  %v4017_v3 = vld [vmem:[%s8053_s1 + $0x1098] sm:$0xff] }
  0xe3   : > { %1594 = vmatprep.subr.mxu0 %v3895_v1  ;;  %1689 = vmatprep.subr.mxu1 %v4011_v21  ;;  %v3901_v1 = vld [vmem:[%s8053_s1 + $0xcf8] sm:$0xff]  ;;  %v3846_v21 = vld [vmem:[%s8053_s1 + $0xb40] sm:$0xff] }
  0xe4   : > { %1267 = vmatprep.mubr.f32.mxu1 %v5869_v63  ;;  %1595 = vmatpush1.msra.mxu0 %v3894_v55  ;;  %v3900_v55 = vld [vmem:[%s8053_s1 + $0xcf0] sm:$0xff] }
  0xe5   : > { %1690 = vmatpush1.msra.mxu1 %v4010_v22  ;;  %1596 = vmatprep.subr.mxu0 %v3891_v23  ;;  %v3971_v22 = vld [vmem:[%s8053_s1 + $0xf28] sm:$0xff]  ;;  %v3897_v23 = vld [vmem:[%s8053_s1 + $0xcd8] sm:$0xff] }
  0xe6   : > { %1268 = vmatmul.mubr.f32.gmra.mxu1 %v5879_v25  ;;  %1691 = vmatprep.subr.mxu1 %v4007_v24  ;;  %v3970_v24 = vld [vmem:[%s8053_s1 + $0xf20] sm:$0xff] }
  0xe7   : > { %1356 = vmatprep.mubr.f32.mxu0 %v8058_v61  ;;  %1597 = vmatpush1.msra.mxu0 %v3890_v0  ;;  %v3896_v0 = vld [vmem:[%s8053_s1 + $0xcd0] sm:$0xff] }
  0xe8   : > { %1692 = vmatpush1.msra.mxu1 %v4006_v2  ;;  %3844 = vmatmul.mubr.msk.f32.gmra.mxu0 %vm640_vm1, %v5893_v28  ;;  %v3967_v2 = vld [vmem:[%s8053_s1 + $0xf08] sm:$0xff] }
  0xe9   : > { %1598 = vmatprep.subr.mxu0 %v3887_v26  ;;  %1693 = vmatprep.subr.mxu1 %v4003_v11  ;;  %v3893_v26 = vld [vmem:[%s8053_s1 + $0xcb8] sm:$0xff]  ;;  %v3966_v11 = vld [vmem:[%s8053_s1 + $0xf00] sm:$0xff] }
  0xea   : > { %1273 = vmatprep.mubr.f32.mxu1 %v5907_v14  ;;  %1599 = vmatpush1.msra.mxu0 %v3886_v27  ;;  %v3892_v27 = vld [vmem:[%s8053_s1 + $0xcb0] sm:$0xff] }
  0xeb   : > { %1694 = vmatpush1.msra.mxu1 %v4002_v33  ;;  %1600 = vmatprep.subr.mxu0 %v3883_v29  ;;  %v3963_v33 = vld [vmem:[%s8053_s1 + $0xee8] sm:$0xff]  ;;  %v3889_v29 = vld [vmem:[%s8053_s1 + $0xc98] sm:$0xff] }
  0xec   : > { %1274 = vmatmul.mubr.f32.gmra.mxu1 %v5917_v30  ;;  %1695 = vmatprep.subr.mxu1 %v3999_v38  ;;  %v3962_v38 = vld [vmem:[%s8053_s1 + $0xee0] sm:$0xff] }
  0xed   : > { %1362 = vmatprep.mubr.f32.mxu0 %v8058_v61  ;;  %1601 = vmatpush1.msra.mxu0 %v3882_v15  ;;  %v3888_v15 = vld [vmem:[%s8053_s1 + $0xc90] sm:$0xff] }
  0xee   : > { %1696 = vmatpush1.msra.mxu1 %v3998_v39  ;;  %3845 = vmatmul.mubr.msk.f32.gmra.mxu0 %vm640_vm1, %v5934_v32  ;;  %v3959_v39 = vld [vmem:[%s8053_s1 + $0xec8] sm:$0xff] }
  0xef   : > { %1602 = vmatprep.subr.mxu0 %v3879_v31  ;;  %1697 = vmatprep.subr.mxu1 %v3995_v54  ;;  %v3885_v31 = vld [vmem:[%s8053_s1 + $0xc78] sm:$0xff]  ;;  %v3958_v54 = vld [vmem:[%s8053_s1 + $0xec0] sm:$0xff] }
  0xf0   : > { %1603 = vmatpush1.msra.mxu0 %v3878_v4  ;;  %1698 = vmatpush1.msra.mxu1 %v3994_v59  ;;  %v3884_v4 = vld [vmem:[%s8053_s1 + $0xc70] sm:$0xff]  ;;  %v3955_v59 = vld [vmem:[%s8053_s1 + $0xea8] sm:$0xff] }
  0xf1   : > { %1604 = vmatprep.subr.mxu0 %v3875_v34  ;;  %1699 = vmatprep.subr.mxu1 %v3991_v35  ;;  %v3881_v34 = vld [vmem:[%s8053_s1 + $0xc58] sm:$0xff]  ;;  %v3954_v35 = vld [vmem:[%s8053_s1 + $0xea0] sm:$0xff] }
  0xf2   : > { %1605 = vmatpush1.msra.mxu0 %v3874_v7  ;;  %1700 = vmatpush1.msra.mxu1 %v3990_v60  ;;  %v3880_v7 = vld [vmem:[%s8053_s1 + $0xc50] sm:$0xff]  ;;  %v3951_v60 = vld [vmem:[%s8053_s1 + $0xe88] sm:$0xff] }
  0xf3   : > { %1606 = vmatprep.subr.mxu0 %v3871_v8  ;;  %1701 = vmatprep.subr.mxu1 %v3987_v36  ;;  %v3877_v8 = vld [vmem:[%s8053_s1 + $0xc38] sm:$0xff]  ;;  %v3950_v36 = vld [vmem:[%s8053_s1 + $0xe80] sm:$0xff] }
  0xf4   : > { %1607 = vmatpush1.msra.mxu0 %v3870_v37  ;;  %1702 = vmatpush1.msra.mxu1 %v3986_v40  ;;  %v3876_v37 = vld [vmem:[%s8053_s1 + $0xc30] sm:$0xff]  ;;  %v3947_v40 = vld [vmem:[%s8053_s1 + $0xe68] sm:$0xff] }
  0xf5   : > { %1608 = vmatprep.subr.mxu0 %v3867_v41  ;;  %1703 = vmatprep.subr.mxu1 %v3983_v44  ;;  %v3873_v41 = vld [vmem:[%s8053_s1 + $0xc18] sm:$0xff]  ;;  %v804_v44 = vpop.f32.mrf.mxu1 }
  0xf6   : > { %1609 = vmatpush1.msra.mxu0 %v3866_v18  ;;  %1704 = vmatpush1.msra.mxu1 %v3982_v45  ;;  %v3946_v18 = vld [vmem:[%s8053_s1 + $0xe60] sm:$0xff]  ;;  %v3872_v45 = vld [vmem:[%s8053_s1 + $0xc10] sm:$0xff] }
  0xf7   : > { %1610 = vmatprep.subr.mxu0 %v3863_v46  ;;  %1705 = vmatprep.subr.mxu1 %v3979_v20  ;;  %v3943_v46 = vld [vmem:[%s8053_s1 + $0xe48] sm:$0xff]  ;;  %v3869_v20 = vld [vmem:[%s8053_s1 + $0xbf8] sm:$0xff] }
  0xf8   : > { %1611 = vmatpush1.msra.mxu0 %v3862_v57  ;;  %1706 = vmatpush1.msra.mxu1 %v3978_v47  ;;  %v3942_v57 = vld [vmem:[%s8053_s1 + $0xe40] sm:$0xff]  ;;  %v3868_v47 = vld [vmem:[%s8053_s1 + $0xbf0] sm:$0xff] }
  0xf9   : > { %1612 = vmatprep.subr.mxu0 %v3859_v49  ;;  %1707 = vmatprep.subr.mxu1 %v3975_v52  ;;  %v3939_v49 = vld [vmem:[%s8053_s1 + $0xe28] sm:$0xff]  ;;  %v3865_v52 = vld [vmem:[%s8053_s1 + $0xbd8] sm:$0xff] }
  0xfa   : > { %1613 = vmatpush1.msra.mxu0 %v3858_v53  ;;  %1708 = vmatpush1.msra.mxu1 %v3974_v56  ;;  %v806_v56 = vpop.f32.mrf.mxu1 }
  0xfb   : > { %1741 = vmatprep.mubr.f32.mxu1 %v8058_v61  ;;  %1614 = vmatprep.subr.mxu0 %v3855_v58  ;;  %v3938_v58 = vld [vmem:[%s8053_s1 + $0xe20] sm:$0xff] }
  0xfc   : > { %4026 = vmatmul.mubr.msk.f32.vlgmr.msra.gmra.mxu1 %vm640_vm1, %v6006_v6  ;;  %1766 = vmatprep.subr.mxu1 %v3909_v43  ;;  %v3864_v43 = vld [vmem:[%s8053_s1 + $0xbd0] sm:$0xff] }
  0xfd   : > { %1615 = vmatpush1.msra.mxu0 %v3854_v51  ;;  %1767 = vmatpush1.msra.mxu1 %v3908_v9  ;;  %v3935_v9 = vld [vmem:[%s8053_s1 + $0xe08] sm:$0xff] }
  0xfe   : > { %1616 = vmatprep.subr.mxu0 %v3851_v10  ;;  %1768 = vmatprep.subr.mxu1 %v3905_v12  ;;  %v3861_v10 = vld [vmem:[%s8053_s1 + $0xbb8] sm:$0xff] }
  0xff   : > { %1617 = vmatpush1.msra.mxu0 %v3850_v13  ;;  %1769 = vmatpush1.msra.mxu1 %v3904_v17  ;;  %v3934_v13 = vld [vmem:[%s8053_s1 + $0xe00] sm:$0xff]  ;;  %v3860_v17 = vld [vmem:[%s8053_s1 + $0xbb0] sm:$0xff] }
 0x100   : > { %1618 = vmatprep.subr.mxu0 %v3847_v19  ;;  %1770 = vmatprep.subr.mxu1 %v3901_v1  ;;  %v3931_v19 = vld [vmem:[%s8053_s1 + $0xde8] sm:$0xff]  ;;  %v3857_v1 = vld [vmem:[%s8053_s1 + $0xb98] sm:$0xff] }
 0x101   : > { %1619 = vmatpush1.msra.mxu0 %v3846_v21  ;;  %1771 = vmatpush1.msra.mxu1 %v3900_v55  ;;  %v3930_v21 = vld [vmem:[%s8053_s1 + $0xde0] sm:$0xff]  ;;  %v3856_v55 = vld [vmem:[%s8053_s1 + $0xb90] sm:$0xff] }
 0x102   : > { %1620 = vmatprep.subr.mxu0 %v3971_v22  ;;  %1772 = vmatprep.subr.mxu1 %v3897_v23  ;;  %v3927_v22 = vld [vmem:[%s8053_s1 + $0xdc8] sm:$0xff]  ;;  %v3853_v23 = vld [vmem:[%s8053_s1 + $0xb78] sm:$0xff] }
 0x103   : > { %1621 = vmatpush2.msra.mxu0 %v3970_v24  ;;  %1773 = vmatpush1.msra.mxu1 %v3896_v0  ;;  %v3926_v24 = vld [vmem:[%s8053_s1 + $0xdc0] sm:$0xff]  ;;  %v3852_v0 = vld [vmem:[%s8053_s1 + $0xb70] sm:$0xff] }
 0x104   : > { %1622 = vmatprep.subr.mxu0 %v3967_v2  ;;  %1774 = vmatprep.subr.mxu1 %v3893_v26  ;;  %v3923_v2 = vld [vmem:[%s8053_s1 + $0xda8] sm:$0xff]  ;;  %v3849_v26 = vld [vmem:[%s8053_s1 + $0xb58] sm:$0xff] }
 0x105   : > { %1623 = vmatpush2.msra.mxu0 %v3966_v11  ;;  %1775 = vmatpush1.msra.mxu1 %v3892_v27  ;;  %v3922_v11 = vld [vmem:[%s8053_s1 + $0xda0] sm:$0xff]  ;;  %v3848_v27 = vld [vmem:[%s8053_s1 + $0xb50] sm:$0xff] }
 0x106   : > { %1624 = vmatprep.subr.mxu0 %v3963_v33  ;;  %1776 = vmatprep.subr.mxu1 %v3889_v29  ;;  %v3919_v33 = vld [vmem:[%s8053_s1 + $0xd88] sm:$0xff]  ;;  %v3973_v29 = vld [vmem:[%s8053_s1 + $0xf38] sm:$0xff] }
 0x107   : > { %1625 = vmatpush2.msra.mxu0 %v3962_v38  ;;  %1777 = vmatpush1.msra.mxu1 %v3888_v15  ;;  %v3918_v38 = vld [vmem:[%s8053_s1 + $0xd80] sm:$0xff]  ;;  %v3972_v15 = vld [vmem:[%s8053_s1 + $0xf30] sm:$0xff] }
 0x108   : > { %1626 = vmatprep.subr.mxu0 %v3959_v39  ;;  %1778 = vmatprep.subr.mxu1 %v3885_v31  ;;  %v1554_v39 = vrot.slane %v5790_v50, 2  ;;  %v1555_v31 = vrot.slane %v5834_v16, 2  ;;  %v3914_v50 = vld [vmem:[%s8053_s1 + $0xd60] sm:$0xff]  ;;  %v3968_v16 = vld [vmem:[%s8053_s1 + $0xf10] sm:$0xff] }
 0x109   : > { %1627 = vmatpush2.msra.mxu0 %v3958_v54  ;;  %1779 = vmatpush1.msra.mxu1 %v3884_v4  ;;  %v3915_v54 = vld [vmem:[%s8053_s1 + $0xd68] sm:$0xff]  ;;  %v3969_v4 = vld [vmem:[%s8053_s1 + $0xf18] sm:$0xff] }
 0x10a   : > { %1628 = vmatprep.subr.mxu0 %v3955_v59  ;;  %1780 = vmatprep.subr.mxu1 %v3881_v34  ;;  %v1551_v59 = vrot.slane %v5807_v5, 2  ;;  %v1552_v34 = vrot.slane %v5844_v62, 2  ;;  %v3965_v5 = vld [vmem:[%s8053_s1 + $0xef8] sm:$0xff] }
 0x10b   : > { %1629 = vmatpush2.msra.mxu0 %v3954_v35  ;;  %1781 = vmatpush1.msra.mxu1 %v3880_v7  ;;  %v3911_v35 = vld [vmem:[%s8053_s1 + $0xd48] sm:$0xff] }
 0x10c   : > { %1630 = vmatprep.subr.mxu0 %v3951_v60  ;;  %1782 = vmatprep.subr.mxu1 %v3877_v8  ;;  %v3910_v60 = vld [vmem:[%s8053_s1 + $0xd40] sm:$0xff]  ;;  %v6242_v8 = vsel %vm1550_vm2, %v1554_v39, %v1555_v31  ;;  %v4009_v39 = vld [vmem:[%s8053_s1 + $0x1058] sm:$0xff] }
 0x10d   : > { %1631 = vmatpush2.msra.mxu0 %v3950_v36  ;;  %1783 = vmatpush1.msra.mxu1 %v3876_v37  ;;  %v3964_v37 = vld [vmem:[%s8053_s1 + $0xef0] sm:$0xff] }
 0x10e   : > { %1632 = vmatprep.subr.mxu0 %v3947_v40  ;;  %1784 = vmatprep.subr.mxu1 %v3873_v41  ;;  %v715_v42 = vpop.f32.mrf.mxu0  ;;  %v6250_v40 = vsel %vm1550_vm2, %v1551_v59, %v1552_v34  ;;  %v1562_v41 = vrot.slane %v5869_v63, 2  ;;  %v3960_v63 = vld [vmem:[%s8053_s1 + $0xed0] sm:$0xff]  ;;  %v3941_v59 = vld [vmem:[%s8053_s1 + $0xe38] sm:$0xff] }
 0x10f   : > { %1633 = vmatpush2.msra.mxu0 %v3946_v18  ;;  %1785 = vmatpush1.msra.mxu1 %v3872_v45  ;;  %v6146_v53 = vadd.f32 %v804_v44, %v715_v42  ;;  %v3961_v45 = vld [vmem:[%s8053_s1 + $0xed8] sm:$0xff]  ;;  %v1564_v42 = vrot.slane %v5893_v28, 2  ;;  %v3956_v28 = vld [vmem:[%s8053_s1 + $0xeb0] sm:$0xff] }
 0x110   : > { %1634 = vmatprep.subr.mxu0 %v3943_v46  ;;  %1786 = vmatprep.subr.mxu1 %v3869_v20  ;;  %v717_v51 = vpop.f32.mrf.mxu0  ;;  %v4025_v46 = vld [vmem:[%s8053_s1 + $0x10d8] sm:$0xff] }
 0x111   : > { %1635 = vmatpush2.msra.mxu0 %v3942_v57  ;;  %1787 = vmatpush1.msra.mxu1 %v3868_v47  ;;  %v6160_v12 = vadd.f32 %v806_v56, %v717_v51  ;;  %v4024_v57 = vld [vmem:[%s8053_s1 + $0x10d0] sm:$0xff]  ;;  %v1560_v47 = vrot.slane %v5879_v25, 2  ;;  %v6278_v56 = vsel %vm1550_vm2, %v1555_v31, %v1562_v41 }
 0x112   : > { %1636 = vmatprep.subr.mxu0 %v3939_v49  ;;  %1788 = vmatprep.subr.mxu1 %v3865_v52  ;;  %v3957_v49 = vld [vmem:[%s8053_s1 + $0xeb8] sm:$0xff] }
 0x113   : > { %1637 = vmatpush2.msra.mxu0 %v3938_v58  ;;  %1789 = vmatpush1.msra.mxu1 %v3864_v43  ;;  %v4021_v52 = vld [vmem:[%s8053_s1 + $0x10b8] sm:$0xff]  ;;  %v4020_v43 = vld [vmem:[%s8053_s1 + $0x10b0] sm:$0xff] }
 0x114   : > { %1638 = vmatprep.subr.mxu0 %v3935_v9  ;;  %1790 = vmatprep.subr.mxu1 %v3861_v10  ;;  %v6289_v9 = vsel %vm1550_vm2, %v1552_v34, %v1560_v47  ;;  %v6294_v10 = vsel %vm1550_vm2, %v1558_v48, %v1564_v42  ;;  %v4016_v48 = vld [vmem:[%s8053_s1 + $0x1090] sm:$0xff]  ;;  %v4005_v34 = vld [vmem:[%s8053_s1 + $0x1038] sm:$0xff] }
 0x115   : > { %1639 = vmatpush2.msra.mxu0 %v3934_v13  ;;  %1791 = vmatpush1.msra.mxu1 %v3860_v17  ;;  %v6297_v13 = vrot.slane %v5907_v14, 2  ;;  %v3952_v14 = vld [vmem:[%s8053_s1 + $0xe90] sm:$0xff] }
 0x116   : > { %1640 = vmatprep.subr.mxu0 %v3931_v19  ;;  %1792 = vmatprep.subr.mxu1 %v3857_v1  ;;  %v3953_v1 = vld [vmem:[%s8053_s1 + $0xe98] sm:$0xff] }
 0x117   : > { %1641 = vmatpush2.msra.mxu0 %v3930_v21  ;;  %1793 = vmatpush1.msra.mxu1 %v3856_v55  ;;  %v6316_v55 = vrot.slane %v5917_v30, 2  ;;  %v6332_v30 = vsel %vm1550_vm2, %v1562_v41, %v6297_v13 }
 0x118   : > { %1642 = vmatprep.subr.mxu0 %v3927_v22  ;;  %1794 = vmatprep.subr.mxu1 %v3853_v23  ;;  %v6319_v22 = vrot.slane %v5934_v32, 2  ;;  %v3949_v23 = vld [vmem:[%s8053_s1 + $0xe78] sm:$0xff] }
 0x119   : > { %1643 = vmatpush2.msra.mxu0 %v3926_v24  ;;  %1795 = vmatpush1.msra.mxu1 %v3852_v0  ;;  %v4013_v24 = vld [vmem:[%s8053_s1 + $0x1078] sm:$0xff] }
 0x11a   : > { %1644 = vmatprep.subr.mxu0 %v3923_v2  ;;  %1796 = vmatprep.subr.mxu1 %v3849_v26  ;;  %v3948_v2 = vld [vmem:[%s8053_s1 + $0xe70] sm:$0xff] }
 0x11b   : > { %1645 = vmatpush2.msra.mxu0 %v3922_v11  ;;  %1797 = vmatpush1.msra.mxu1 %v3848_v27  ;;  %v4012_v26 = vld [vmem:[%s8053_s1 + $0x1070] sm:$0xff]  ;;  %v6344_v27 = vsel %vm1550_vm2, %v1560_v47, %v6316_v55 }
 0x11c   : > { %1646 = vmatprep.subr.mxu0 %v3919_v33  ;;  %1798 = vmatprep.subr.mxu1 %v3973_v29  ;;  %v6348_v33 = vsel %vm1550_vm2, %v1564_v42, %v6319_v22  ;;  %v3996_v47 = vld [vmem:[%s8053_s1 + $0xff0] sm:$0xff]  ;;  %v3929_v42 = vld [vmem:[%s8053_s1 + $0xdd8] sm:$0xff] }
 0x11d   : > { %1647 = vmatpush2.msra.mxu0 %v3918_v38  ;;  %1799 = vmatpush2.msra.mxu1 %v3972_v15  ;;  %v721_v62 = vpop.f32.mrf.mxu0  ;;  %v810_v7 = vpop.f32.mrf.mxu1  ;;  %v3945_v15 = vld [vmem:[%s8053_s1 + $0xe58] sm:$0xff] }
 0x11e   : > { %1648 = vmatprep.subr.mxu0 %v3915_v54  ;;  %1800 = vmatprep.subr.mxu1 %v3969_v4  ;;  %v6244_v36 = vadd.f32 %v810_v7, %v721_v62  ;;  %v3944_v54 = vld [vmem:[%s8053_s1 + $0xe50] sm:$0xff]  ;;  %v3937_v7 = vld [vmem:[%s8053_s1 + $0xe18] sm:$0xff] }
 0x11f   : > { %1649 = vmatpush2.msra.mxu0 %v3914_v50  ;;  %1801 = vmatpush2.msra.mxu1 %v3968_v16  ;;  %v723_v44 = vpop.f32.mrf.mxu0  ;;  %v812_v18 = vpop.f32.mrf.mxu1  ;;  %v4008_v4 = vld [vmem:[%s8053_s1 + $0x1050] sm:$0xff] }
 0x120   : > { %1650 = vmatprep.subr.mxu0 %v3911_v35  ;;  %1802 = vmatprep.subr.mxu1 %v3965_v5  ;;  %v6259_v20 = vadd.f32 %v812_v18, %v723_v44  ;;  %v3940_v50 = vld [vmem:[%s8053_s1 + $0xe30] sm:$0xff] }
 0x121   : > { %1651 = vmatpush2.msra.mxu0 %v3910_v60  ;;  %1652 = vmatprep.mubr.f32.mxu0 %v6242_v8  ;;  %v4004_v16 = vld [vmem:[%s8053_s1 + $0x1030] sm:$0xff]  ;;  %v4001_v60 = vld [vmem:[%s8053_s1 + $0x1018] sm:$0xff] }
 0x122   : > { %1803 = vmatpush2.msra.mxu1 %v3964_v37  ;;  %1653 = vmatmul.mubr.f32.vlgmr.msra.gmra.mxu0 %v6250_v40  ;;  %v3936_v44 = vld [vmem:[%s8053_s1 + $0xe10] sm:$0xff] }
 0x123   : > { %1804 = vmatprep.subr.mxu1 %v3961_v45  ;;  %1861 = vmatprep.subr.mxu0 %v4025_v46  ;;  %v727_v58 = vpop.f32.mrf.mxu0  ;;  %v816_v25 = vpop.f32.mrf.mxu1  ;;  %v4000_v18 = vld [vmem:[%s8053_s1 + $0x1010] sm:$0xff]  ;;  %v3933_v46 = vld [vmem:[%s8053_s1 + $0xdf8] sm:$0xff] }
 0x124   : > { %1805 = vmatpush2.msra.mxu1 %v3960_v63  ;;  %1862 = vmatpush1.msra.mxu0 %v4024_v57  ;;  %v6286_v51 = vadd.f32 %v816_v25, %v727_v58  ;;  %v3997_v63 = vld [vmem:[%s8053_s1 + $0xff8] sm:$0xff]  ;;  %v3932_v57 = vld [vmem:[%s8053_s1 + $0xdf0] sm:$0xff] }
 0x125   : > { %1806 = vmatprep.subr.mxu1 %v3957_v49  ;;  %1863 = vmatprep.subr.mxu0 %v4021_v52  ;;  %v729_v17 = vpop.f32.mrf.mxu0  ;;  %v818_v19 = vpop.f32.mrf.mxu1  ;;  %v3993_v49 = vld [vmem:[%s8053_s1 + $0xfd8] sm:$0xff]  ;;  %v3928_v52 = vld [vmem:[%s8053_s1 + $0xdd0] sm:$0xff] }
 0x126   : > { %1658 = vmatprep.mubr.f32.mxu0 %v6278_v56  ;;  %1747 = vmatprep.mubr.f32.mxu1 %v8058_v61  ;;  %v6307_v21 = vadd.f32 %v818_v19, %v729_v17  ;;  %v3992_v58 = vld [vmem:[%s8053_s1 + $0xfd0] sm:$0xff]  ;;  %v3925_v25 = vld [vmem:[%s8053_s1 + $0xdb8] sm:$0xff] }
 0x127   : > { %1807 = vmatpush2.msra.mxu1 %v3956_v28  ;;  %1864 = vmatpush1.msra.mxu0 %v4020_v43  ;;  %v3989_v28 = vld [vmem:[%s8053_s1 + $0xfb8] sm:$0xff]  ;;  %v3924_v43 = vld [vmem:[%s8053_s1 + $0xdb0] sm:$0xff] }
 0x128   : > { %1659 = vmatmul.mubr.f32.gmra.mxu0 %v6289_v9  ;;  %4027 = vmatmul.mubr.msk.f32.gmra.mxu1 %vm640_vm1, %v6294_v10  ;;  %v3988_v17 = vld [vmem:[%s8053_s1 + $0xfb0] sm:$0xff]  ;;  %v3921_v19 = vld [vmem:[%s8053_s1 + $0xd98] sm:$0xff] }
 0x129   : > { %1808 = vmatprep.subr.mxu1 %v3953_v1  ;;  %1865 = vmatprep.subr.mxu0 %v4017_v3  ;;  %v733_v32 = vpop.f32.mrf.mxu0  ;;  %v822_v0 = vpop.f32.mrf.mxu1  ;;  %v3985_v1 = vld [vmem:[%s8053_s1 + $0xf98] sm:$0xff]  ;;  %v3920_v3 = vld [vmem:[%s8053_s1 + $0xd90] sm:$0xff] }
 0x12a   : > { %1809 = vmatpush2.msra.mxu1 %v3952_v14  ;;  %1866 = vmatpush1.msra.mxu0 %v4016_v48  ;;  %v6340_v11 = vadd.f32 %v822_v0, %v733_v32  ;;  %v3984_v14 = vld [vmem:[%s8053_s1 + $0xf90] sm:$0xff]  ;;  %v3917_v48 = vld [vmem:[%s8053_s1 + $0xd78] sm:$0xff] }
 0x12b   : > { %1810 = vmatprep.subr.mxu1 %v3949_v23  ;;  %1867 = vmatprep.subr.mxu0 %v4013_v24  ;;  %v735_v29 = vpop.f32.mrf.mxu0  ;;  %v824_v38 = vpop.f32.mrf.mxu1  ;;  %v3981_v23 = vld [vmem:[%s8053_s1 + $0xf78] sm:$0xff]  ;;  %v3916_v24 = vld [vmem:[%s8053_s1 + $0xd70] sm:$0xff] }
 0x12c   : > { %1664 = vmatprep.mubr.f32.mxu0 %v6332_v30  ;;  %1753 = vmatprep.mubr.f32.mxu1 %v8058_v61  ;;  %v6358_v31 = vadd.f32 %v824_v38, %v735_v29  ;;  %v3980_v32 = vld [vmem:[%s8053_s1 + $0xf70] sm:$0xff]  ;;  %v3913_v0 = vld [vmem:[%s8053_s1 + $0xd58] sm:$0xff] }
 0x12d   : > { %1811 = vmatpush2.msra.mxu1 %v3948_v2  ;;  %1868 = vmatpush1.msra.mxu0 %v4012_v26  ;;  %v3977_v2 = vld [vmem:[%s8053_s1 + $0xf58] sm:$0xff]  ;;  %v3912_v26 = vld [vmem:[%s8053_s1 + $0xd50] sm:$0xff] }
 0x12e   : > { %1665 = vmatmul.mubr.f32.gmra.mxu0 %v6344_v27  ;;  %4028 = vmatmul.mubr.msk.f32.gmra.mxu1 %vm640_vm1, %v6348_v33 }
 0x12f   : > { %1812 = vmatprep.subr.mxu1 %v3945_v15  ;;  %1869 = vmatprep.subr.mxu0 %v4009_v39  ;;  %v3976_v15 = vld [vmem:[%s8053_s1 + $0xf50] sm:$0xff] }
 0x130   : > { %1813 = vmatpush2.msra.mxu1 %v3944_v54  ;;  %1870 = vmatpush1.msra.mxu0 %v4008_v4  ;;  %v893_v35 = vpop.f32.mrf.mxu1  ;;  %v982_v5 = vpop.f32.mrf.mxu0 }
 0x131   : > { %1814 = vmatprep.subr.mxu1 %v3941_v59  ;;  %1871 = vmatprep.subr.mxu0 %v4005_v34  ;;  %v6381_v62 = vadd.f32 %v982_v5, %v893_v35  ;;  %v4095_v59 = vld [vmem:[%s8053_s1 + $0x12c8] sm:$0xff] }
 0x132   : > { %1670 = vmatprep.mubr.f32.mxu0 %v6297_v13  ;;  %1759 = vmatprep.mubr.f32.mxu1 %v8058_v61  ;;  %v895_v37 = vpop.f32.mrf.mxu1  ;;  %v984_v41 = vpop.f32.mrf.mxu0  ;;  %v4211_v34 = vld [vmem:[%s8053_s1 + $0x1668] sm:$0xff] }
 0x133   : > { %1815 = vmatpush2.msra.mxu1 %v3940_v50  ;;  %1872 = vmatpush1.msra.mxu0 %v4004_v16  ;;  %v6397_v45 = vadd.f32 %v984_v41, %v895_v37  ;;  %v4094_v16 = vld [vmem:[%s8053_s1 + $0x12c0] sm:$0xff]  ;;  %v4091_v35 = vld [vmem:[%s8053_s1 + $0x12a8] sm:$0xff] }
 0x134   : > { %1671 = vmatmul.mubr.f32.gmra.mxu0 %v6316_v55  ;;  %4029 = vmatmul.mubr.msk.f32.gmra.mxu1 %vm640_vm1, %v6319_v22  ;;  %v4207_v5 = vld [vmem:[%s8053_s1 + $0x1648] sm:$0xff] }
 0x135   : > { %1816 = vmatprep.subr.mxu1 %v3937_v7  ;;  %1873 = vmatprep.subr.mxu0 %v4001_v60 }
 0x136   : > { %1817 = vmatpush2.msra.mxu1 %v3936_v44  ;;  %1874 = vmatpush1.msra.mxu0 %v4000_v18  ;;  %v4087_v18 = vld [vmem:[%s8053_s1 + $0x1288] sm:$0xff] }
 0x137   : > { %1818 = vmatprep.subr.mxu1 %v3933_v46  ;;  %1875 = vmatprep.subr.mxu0 %v3997_v63  ;;  %v4203_v46 = vld [vmem:[%s8053_s1 + $0x1628] sm:$0xff] }
 0x138   : > { %1819 = vmatpush2.msra.mxu1 %v3932_v57  ;;  %1876 = vmatpush1.msra.mxu0 %v3996_v47  ;;  %v4086_v57 = vld [vmem:[%s8053_s1 + $0x1280] sm:$0xff]  ;;  %v4083_v47 = vld [vmem:[%s8053_s1 + $0x1268] sm:$0xff] }
 0x139   : > { %1820 = vmatprep.subr.mxu1 %v3929_v42  ;;  %1877 = vmatprep.subr.mxu0 %v3993_v49  ;;  %v4199_v42 = vld [vmem:[%s8053_s1 + $0x1608] sm:$0xff] }
 0x13a   : > { %1821 = vmatpush2.msra.mxu1 %v3928_v52  ;;  %1878 = vmatpush1.msra.mxu0 %v3992_v58 }
 0x13b   : > { %1822 = vmatprep.subr.mxu1 %v3925_v25  ;;  %1879 = vmatprep.subr.mxu0 %v3989_v28 }
 0x13c   : > { %1823 = vmatpush2.msra.mxu1 %v3924_v43  ;;  %1880 = vmatpush1.msra.mxu0 %v3988_v17  ;;  %v4079_v43 = vld [vmem:[%s8053_s1 + $0x1248] sm:$0xff] }
 0x13d   : > { %1824 = vmatprep.subr.mxu1 %v3921_v19  ;;  %1881 = vmatprep.subr.mxu0 %v3985_v1  ;;  %v4195_v17 = vld [vmem:[%s8053_s1 + $0x15e8] sm:$0xff]  ;;  %v4078_v1 = vld [vmem:[%s8053_s1 + $0x1240] sm:$0xff] }
 0x13e   : > { %1825 = vmatpush2.msra.mxu1 %v3920_v3  ;;  %1882 = vmatpush1.msra.mxu0 %v3984_v14  ;;  %v4075_v3 = vld [vmem:[%s8053_s1 + $0x1228] sm:$0xff] }
 0x13f   : > { %1826 = vmatprep.subr.mxu1 %v3917_v48  ;;  %1883 = vmatprep.subr.mxu0 %v3981_v23  ;;  %v899_v29 = vpop.f32.mrf.mxu1  ;;  %v988_v38 = vpop.f32.mrf.mxu0  ;;  %v4191_v14 = vld [vmem:[%s8053_s1 + $0x15c8] sm:$0xff]  ;;  %v4074_v48 = vld [vmem:[%s8053_s1 + $0x1220] sm:$0xff] }
 0x140   : > { %1827 = vmatpush2.msra.mxu1 %v3916_v24  ;;  %1884 = vmatpush1.msra.mxu0 %v3980_v32  ;;  %v6474_v39 = vadd.f32 %v988_v38, %v899_v29  ;;  %v4187_v23 = vld [vmem:[%s8053_s1 + $0x15a8] sm:$0xff]  ;;  %v4070_v24 = vld [vmem:[%s8053_s1 + $0x1200] sm:$0xff] }
 0x141   : > { %1828 = vmatprep.subr.mxu1 %v3913_v0  ;;  %1885 = vmatprep.subr.mxu0 %v3977_v2  ;;  %v901_v54 = vpop.f32.mrf.mxu1  ;;  %v990_v4 = vpop.f32.mrf.mxu0  ;;  %v4067_v32 = vld [vmem:[%s8053_s1 + $0x11e8] sm:$0xff]  ;;  %v4066_v2 = vld [vmem:[%s8053_s1 + $0x11e0] sm:$0xff] }
 0x142   : > { %1829 = vmatpush2.msra.mxu1 %v3912_v26  ;;  %1830 = vmatprep.mubr.f32.mxu1 %v6242_v8  ;;  %v6483_v50 = vadd.f32 %v990_v4, %v901_v54  ;;  %v4210_v8 = vld [vmem:[%s8053_s1 + $0x1660] sm:$0xff]  ;;  %v4183_v0 = vld [vmem:[%s8053_s1 + $0x1588] sm:$0xff] }
 0x143   : > { %1886 = vmatpush1.msra.mxu0 %v3976_v15  ;;  %1919 = vmatprep.mubr.f32.mxu0 %v8058_v61  ;;  %v4179_v26 = vld [vmem:[%s8053_s1 + $0x1568] sm:$0xff]  ;;  %v4062_v29 = vld [vmem:[%s8053_s1 + $0x11c0] sm:$0xff] }
 0x144   : > { %1831 = vmatmul.mubr.f32.vlgmr.msra.gmra.mxu1 %v6250_v40  ;;  %4030 = vmatmul.mubr.msk.f32.vlgmr.msra.gmra.mxu0 %vm640_vm1, %v6006_v6  ;;  %v4090_v40 = vld [vmem:[%s8053_s1 + $0x12a0] sm:$0xff]  ;;  %v4059_v15 = vld [vmem:[%s8053_s1 + $0x11a8] sm:$0xff] }
 0x145   : > { %2179 = vmatprep.subr.mxu0 %v4095_v59  ;;  %2274 = vmatprep.subr.mxu1 %v4211_v34  ;;  %v905_v7 = vpop.f32.mrf.mxu1  ;;  %v994_v60 = vpop.f32.mrf.mxu0  ;;  %v4206_v6 = vld [vmem:[%s8053_s1 + $0x1640] sm:$0xff]  ;;  %v4175_v54 = vld [vmem:[%s8053_s1 + $0x1548] sm:$0xff] }
 0x146   : > { %2180 = vmatpush1.msra.mxu0 %v4094_v16  ;;  %2275 = vmatpush1.msra.mxu1 %v4210_v8  ;;  %v6507_v37 = vadd.f32 %v994_v60, %v905_v7  ;;  %v4178_v38 = vld [vmem:[%s8053_s1 + $0x1560] sm:$0xff]  ;;  %v4055_v34 = vld [vmem:[%s8053_s1 + $0x1188] sm:$0xff] }
 0x147   : > { %2181 = vmatprep.subr.mxu0 %v4091_v35  ;;  %2276 = vmatprep.subr.mxu1 %v4207_v5  ;;  %v907_v41 = vpop.f32.mrf.mxu1  ;;  %v996_v44 = vpop.f32.mrf.mxu0  ;;  %v4058_v4 = vld [vmem:[%s8053_s1 + $0x11a0] sm:$0xff]  ;;  %v4171_v16 = vld [vmem:[%s8053_s1 + $0x1528] sm:$0xff] }
 0x148   : > { %1836 = vmatprep.mubr.f32.mxu1 %v6278_v56  ;;  %1925 = vmatprep.mubr.f32.mxu0 %v8058_v61  ;;  %v6517_v63 = vadd.f32 %v996_v44, %v907_v41  ;;  %v4202_v56 = vld [vmem:[%s8053_s1 + $0x1620] sm:$0xff]  ;;  %v4051_v5 = vld [vmem:[%s8053_s1 + $0x1168] sm:$0xff] }
 0x149   : > { %2182 = vmatpush1.msra.mxu0 %v4090_v40  ;;  %2277 = vmatpush1.msra.mxu1 %v4206_v6  ;;  %v4174_v59 = vld [vmem:[%s8053_s1 + $0x1540] sm:$0xff]  ;;  %v4167_v7 = vld [vmem:[%s8053_s1 + $0x1508] sm:$0xff]  ;;  %v6651_v6 = vld [vmem:[%s4656_s27 + $0x10] sm:$0xff] }
 0x14a   : > { %1837 = vmatmul.mubr.f32.gmra.mxu1 %v6289_v9  ;;  %4031 = vmatmul.mubr.msk.f32.gmra.mxu0 %vm640_vm1, %v6294_v10  ;;  %v4082_v9 = vld [vmem:[%s8053_s1 + $0x1260] sm:$0xff]  ;;  %v2148_v41 = vrot.slane %v6651_v6, 3  ;;  %v6655_v44 = vld [vmem:[%s4656_s27 + $0x28] sm:$0xff] }
 0x14b   : > { %2183 = vmatprep.subr.mxu0 %v4087_v18  ;;  %2278 = vmatprep.subr.mxu1 %v4203_v46  ;;  %v911_v49 = vpop.f32.mrf.mxu1  ;;  %v1000_v52 = vpop.f32.mrf.mxu0  ;;  %v4198_v10 = vld [vmem:[%s8053_s1 + $0x1600] sm:$0xff]  ;;  %v2149_v18 = vrot.slane %v6655_v44, 3  ;;  %v4047_v46 = vld [vmem:[%s8053_s1 + $0x1148] sm:$0xff] }
 0x14c   : > { %2184 = vmatpush1.msra.mxu0 %v4086_v57  ;;  %2279 = vmatpush1.msra.mxu1 %v4202_v56  ;;  %v6540_v58 = vadd.f32 %v1000_v52, %v911_v49  ;;  %v4054_v8 = vld [vmem:[%s8053_s1 + $0x1180] sm:$0xff]  ;;  %v4163_v57 = vld [vmem:[%s8053_s1 + $0x14e8] sm:$0xff]  ;;  %v4097_v52 = vld [vmem:[%s8053_s1 + $0x12d8] sm:$0xff] }
 0x14d   : > { %2185 = vmatprep.subr.mxu0 %v4083_v47  ;;  %2280 = vmatprep.subr.mxu1 %v4199_v42  ;;  %v913_v25 = vpop.f32.mrf.mxu1  ;;  %v1002_v28 = vpop.f32.mrf.mxu0  ;;  %v4170_v35 = vld [vmem:[%s8053_s1 + $0x1520] sm:$0xff]  ;;  %v4043_v42 = vld [vmem:[%s8053_s1 + $0x1128] sm:$0xff]  ;;  %v6676_v49 = vsel %vm2141_vm3, %v2148_v41, %v2149_v18 }
 0x14e   : > { %1842 = vmatprep.mubr.f32.mxu1 %v6332_v30  ;;  %1931 = vmatprep.mubr.f32.mxu0 %v8058_v61  ;;  %v6550_v19 = vadd.f32 %v1002_v28, %v913_v25  ;;  %v4194_v30 = vld [vmem:[%s8053_s1 + $0x15e0] sm:$0xff]  ;;  %v4039_v25 = vld [vmem:[%s8053_s1 + $0x1108] sm:$0xff]  ;;  %v4093_v28 = vld [vmem:[%s8053_s1 + $0x12b8] sm:$0xff] }
 0x14f   : > { %2186 = vmatpush1.msra.mxu0 %v4082_v9  ;;  %2281 = vmatpush1.msra.mxu1 %v4198_v10  ;;  %v4050_v60 = vld [vmem:[%s8053_s1 + $0x1160] sm:$0xff]  ;;  %v4096_v10 = vld [vmem:[%s8053_s1 + $0x12d0] sm:$0xff] }
 0x150   : > { %1843 = vmatmul.mubr.f32.gmra.mxu1 %v6344_v27  ;;  %4032 = vmatmul.mubr.msk.f32.gmra.mxu0 %vm640_vm1, %v6348_v33  ;;  %v4190_v27 = vld [vmem:[%s8053_s1 + $0x15c0] sm:$0xff]  ;;  %v4071_v33 = vld [vmem:[%s8053_s1 + $0x1208] sm:$0xff] }
 0x151   : > { %2187 = vmatprep.subr.mxu0 %v4079_v43  ;;  %2282 = vmatprep.subr.mxu1 %v4195_v17  ;;  %v4166_v40 = vld [vmem:[%s8053_s1 + $0x1500] sm:$0xff]  ;;  %v4092_v17 = vld [vmem:[%s8053_s1 + $0x12b0] sm:$0xff] }
 0x152   : > { %2188 = vmatpush1.msra.mxu0 %v4078_v1  ;;  %2283 = vmatpush1.msra.mxu1 %v4194_v30  ;;  %v4046_v56 = vld [vmem:[%s8053_s1 + $0x1140] sm:$0xff]  ;;  %v4035_v1 = vld [vmem:[%s8053_s1 + $0x10e8] sm:$0xff]  ;;  %v4089_v30 = vld [vmem:[%s8053_s1 + $0x1298] sm:$0xff] }
 0x153   : > { %2189 = vmatprep.subr.mxu0 %v4075_v3  ;;  %2284 = vmatprep.subr.mxu1 %v4191_v14  ;;  %v4162_v47 = vld [vmem:[%s8053_s1 + $0x14e0] sm:$0xff]  ;;  %v4088_v14 = vld [vmem:[%s8053_s1 + $0x1290] sm:$0xff] }
 0x154   : > { %1848 = vmatprep.mubr.f32.mxu1 %v6297_v13  ;;  %1937 = vmatprep.mubr.f32.mxu0 %v8058_v61  ;;  %v4186_v13 = vld [vmem:[%s8053_s1 + $0x15a0] sm:$0xff] }
 0x155   : > { %2190 = vmatpush1.msra.mxu0 %v4074_v48  ;;  %2285 = vmatpush1.msra.mxu1 %v4190_v27  ;;  %v4042_v9 = vld [vmem:[%s8053_s1 + $0x1120] sm:$0xff]  ;;  %v4159_v48 = vld [vmem:[%s8053_s1 + $0x14c8] sm:$0xff]  ;;  %v4085_v27 = vld [vmem:[%s8053_s1 + $0x1278] sm:$0xff] }
 0x156   : > { %1849 = vmatmul.mubr.f32.gmra.mxu1 %v6316_v55  ;;  %4033 = vmatmul.mubr.msk.f32.gmra.mxu0 %vm640_vm1, %v6319_v22  ;;  %v4182_v55 = vld [vmem:[%s8053_s1 + $0x1580] sm:$0xff]  ;;  %v4063_v22 = vld [vmem:[%s8053_s1 + $0x11c8] sm:$0xff] }
 0x157   : > { %2191 = vmatprep.subr.mxu0 %v4071_v33  ;;  %2286 = vmatprep.subr.mxu1 %v4187_v23  ;;  %v4038_v43 = vld [vmem:[%s8053_s1 + $0x1100] sm:$0xff]  ;;  %v4084_v23 = vld [vmem:[%s8053_s1 + $0x1270] sm:$0xff] }
 0x158   : > { %2192 = vmatpush1.msra.mxu0 %v4070_v24  ;;  %2287 = vmatpush1.msra.mxu1 %v4186_v13  ;;  %v4034_v3 = vld [vmem:[%s8053_s1 + $0x10e0] sm:$0xff]  ;;  %v4155_v24 = vld [vmem:[%s8053_s1 + $0x14a8] sm:$0xff]  ;;  %v4081_v13 = vld [vmem:[%s8053_s1 + $0x1258] sm:$0xff] }
 0x159   : > { %2193 = vmatprep.subr.mxu0 %v4067_v32  ;;  %2288 = vmatprep.subr.mxu1 %v4183_v0  ;;  %v4158_v33 = vld [vmem:[%s8053_s1 + $0x14c0] sm:$0xff]  ;;  %v4080_v0 = vld [vmem:[%s8053_s1 + $0x1250] sm:$0xff] }
 0x15a   : > { %2194 = vmatpush1.msra.mxu0 %v4066_v2  ;;  %2289 = vmatpush1.msra.mxu1 %v4182_v55  ;;  %v4154_v32 = vld [vmem:[%s8053_s1 + $0x14a0] sm:$0xff]  ;;  %v4151_v2 = vld [vmem:[%s8053_s1 + $0x1488] sm:$0xff]  ;;  %v4077_v55 = vld [vmem:[%s8053_s1 + $0x1238] sm:$0xff] }
 0x15b   : > { %2195 = vmatprep.subr.mxu0 %v4063_v22  ;;  %2290 = vmatprep.subr.mxu1 %v4179_v26  ;;  %v4150_v22 = vld [vmem:[%s8053_s1 + $0x1480] sm:$0xff]  ;;  %v4076_v26 = vld [vmem:[%s8053_s1 + $0x1230] sm:$0xff] }
 0x15c   : > { %2196 = vmatpush1.msra.mxu0 %v4062_v29  ;;  %2291 = vmatpush1.msra.mxu1 %v4178_v38  ;;  %v4147_v29 = vld [vmem:[%s8053_s1 + $0x1468] sm:$0xff]  ;;  %v4073_v38 = vld [vmem:[%s8053_s1 + $0x1218] sm:$0xff]  ;;  %v4134_v41 = vld [vmem:[%s8053_s1 + $0x1400] sm:$0xff] }
 0x15d   : > { %2197 = vmatprep.subr.mxu0 %v4059_v15  ;;  %2292 = vmatprep.subr.mxu1 %v4175_v54  ;;  %v4146_v15 = vld [vmem:[%s8053_s1 + $0x1460] sm:$0xff]  ;;  %v4072_v54 = vld [vmem:[%s8053_s1 + $0x1210] sm:$0xff] }
 0x15e   : > { %2198 = vmatpush1.msra.mxu0 %v4058_v4  ;;  %2293 = vmatpush1.msra.mxu1 %v4174_v59  ;;  %v4143_v4 = vld [vmem:[%s8053_s1 + $0x1448] sm:$0xff]  ;;  %v4069_v59 = vld [vmem:[%s8053_s1 + $0x11f8] sm:$0xff] }
 0x15f   : > { %2199 = vmatprep.subr.mxu0 %v4055_v34  ;;  %2294 = vmatprep.subr.mxu1 %v4171_v16  ;;  %v4142_v34 = vld [vmem:[%s8053_s1 + $0x1440] sm:$0xff]  ;;  %v4068_v16 = vld [vmem:[%s8053_s1 + $0x11f0] sm:$0xff] }
 0x160   : > { %2200 = vmatpush1.msra.mxu0 %v4054_v8  ;;  %2295 = vmatpush1.msra.mxu1 %v4170_v35  ;;  %v4139_v8 = vld [vmem:[%s8053_s1 + $0x1428] sm:$0xff]  ;;  %v4065_v35 = vld [vmem:[%s8053_s1 + $0x11d8] sm:$0xff] }
 0x161   : > { %2201 = vmatprep.subr.mxu0 %v4051_v5  ;;  %2296 = vmatprep.subr.mxu1 %v4167_v7  ;;  %v4138_v5 = vld [vmem:[%s8053_s1 + $0x1420] sm:$0xff]  ;;  %v4064_v7 = vld [vmem:[%s8053_s1 + $0x11d0] sm:$0xff] }
 0x162   : > { %2202 = vmatpush1.msra.mxu0 %v4050_v60  ;;  %2297 = vmatpush1.msra.mxu1 %v4166_v40  ;;  %v4135_v60 = vld [vmem:[%s8053_s1 + $0x1408] sm:$0xff]  ;;  %v4061_v40 = vld [vmem:[%s8053_s1 + $0x11b8] sm:$0xff] }
 0x163   : > { %2203 = vmatprep.subr.mxu0 %v4047_v46  ;;  %2298 = vmatprep.subr.mxu1 %v4163_v57  ;;  %v4060_v46 = vld [vmem:[%s8053_s1 + $0x11b0] sm:$0xff]  ;;  %v4131_v57 = vld [vmem:[%s8053_s1 + $0x13e8] sm:$0xff] }
 0x164   : > { %2204 = vmatpush1.msra.mxu0 %v4046_v56  ;;  %2299 = vmatpush1.msra.mxu1 %v4162_v47  ;;  %v4057_v56 = vld [vmem:[%s8053_s1 + $0x1198] sm:$0xff]  ;;  %v1168_v47 = vpop.f32.mrf.mxu1 }
 0x165   : > { %2332 = vmatprep.mubr.f32.mxu1 %v8058_v61  ;;  %2205 = vmatprep.subr.mxu0 %v4043_v42  ;;  %v4130_v42 = vld [vmem:[%s8053_s1 + $0x13e0] sm:$0xff] }
 0x166   : > { %4214 = vmatmul.mubr.msk.f32.vlgmr.msra.gmra.mxu1 %vm640_vm1, %v6676_v49  ;;  %2357 = vmatprep.subr.mxu1 %v4097_v52  ;;  %v4056_v52 = vld [vmem:[%s8053_s1 + $0x1190] sm:$0xff] }
 0x167   : > { %2206 = vmatpush1.msra.mxu0 %v4042_v9  ;;  %2358 = vmatpush1.msra.mxu1 %v4096_v10  ;;  %v4127_v10 = vld [vmem:[%s8053_s1 + $0x13c8] sm:$0xff] }
 0x168   : > { %2207 = vmatprep.subr.mxu0 %v4039_v25  ;;  %2359 = vmatprep.subr.mxu1 %v4093_v28  ;;  %v4053_v25 = vld [vmem:[%s8053_s1 + $0x1178] sm:$0xff] }
 0x169   : > { %2208 = vmatpush1.msra.mxu0 %v4038_v43  ;;  %2360 = vmatpush1.msra.mxu1 %v4092_v17  ;;  %v4126_v43 = vld [vmem:[%s8053_s1 + $0x13c0] sm:$0xff]  ;;  %v4052_v17 = vld [vmem:[%s8053_s1 + $0x1170] sm:$0xff] }
 0x16a   : > { %2209 = vmatprep.subr.mxu0 %v4035_v1  ;;  %2361 = vmatprep.subr.mxu1 %v4089_v30  ;;  %v4123_v30 = vld [vmem:[%s8053_s1 + $0x13a8] sm:$0xff] }
 0x16b   : > { %2210 = vmatpush1.msra.mxu0 %v4034_v3  ;;  %2362 = vmatpush1.msra.mxu1 %v4088_v14 }
 0x16c   : > { %2211 = vmatprep.subr.mxu0 %v4159_v48  ;;  %2363 = vmatprep.subr.mxu1 %v4085_v27  ;;  %v1170_v48 = vpop.f32.mrf.mxu1  ;;  %v4122_v27 = vld [vmem:[%s8053_s1 + $0x13a0] sm:$0xff] }
 0x16d   : > { %2212 = vmatpush2.msra.mxu0 %v4158_v33  ;;  %2364 = vmatpush1.msra.mxu1 %v4084_v23  ;;  %v4048_v33 = vld [vmem:[%s8053_s1 + $0x1150] sm:$0xff]  ;;  %v4119_v23 = vld [vmem:[%s8053_s1 + $0x1388] sm:$0xff] }
 0x16e   : > { %2213 = vmatprep.subr.mxu0 %v4155_v24  ;;  %2365 = vmatprep.subr.mxu1 %v4081_v13  ;;  %v4118_v13 = vld [vmem:[%s8053_s1 + $0x1380] sm:$0xff] }
 0x16f   : > { %2214 = vmatpush2.msra.mxu0 %v4154_v32  ;;  %2366 = vmatpush1.msra.mxu1 %v4080_v0  ;;  %v4044_v32 = vld [vmem:[%s8053_s1 + $0x1130] sm:$0xff] }
 0x170   : > { %2215 = vmatprep.subr.mxu0 %v4151_v2  ;;  %2367 = vmatprep.subr.mxu1 %v4077_v55  ;;  %v4115_v2 = vld [vmem:[%s8053_s1 + $0x1368] sm:$0xff]  ;;  %v4041_v55 = vld [vmem:[%s8053_s1 + $0x1118] sm:$0xff] }
 0x171   : > { %2216 = vmatpush2.msra.mxu0 %v4150_v22  ;;  %2368 = vmatpush1.msra.mxu1 %v4076_v26  ;;  %v4114_v26 = vld [vmem:[%s8053_s1 + $0x1360] sm:$0xff] }
 0x172   : > { %2217 = vmatprep.subr.mxu0 %v4147_v29  ;;  %2369 = vmatprep.subr.mxu1 %v4073_v38  ;;  %v4040_v29 = vld [vmem:[%s8053_s1 + $0x1110] sm:$0xff] }
 0x173   : > { %2218 = vmatpush2.msra.mxu0 %v4146_v15  ;;  %2370 = vmatpush1.msra.mxu1 %v4072_v54  ;;  %v4111_v54 = vld [vmem:[%s8053_s1 + $0x1348] sm:$0xff] }
 0x174   : > { %2219 = vmatprep.subr.mxu0 %v4143_v4  ;;  %2371 = vmatprep.subr.mxu1 %v4069_v59 }
 0x175   : > { %2220 = vmatpush2.msra.mxu0 %v4142_v34  ;;  %2372 = vmatpush1.msra.mxu1 %v4068_v16  ;;  %v4110_v34 = vld [vmem:[%s8053_s1 + $0x1340] sm:$0xff]  ;;  %v4036_v16 = vld [vmem:[%s8053_s1 + $0x10f0] sm:$0xff] }
 0x176   : > { %2221 = vmatprep.subr.mxu0 %v4139_v8  ;;  %2373 = vmatprep.subr.mxu1 %v4065_v35  ;;  %v4161_v35 = vld [vmem:[%s8053_s1 + $0x14d8] sm:$0xff] }
 0x177   : > { %2222 = vmatpush2.msra.mxu0 %v4138_v5  ;;  %2374 = vmatpush1.msra.mxu1 %v4064_v7  ;;  %v4106_v7 = vld [vmem:[%s8053_s1 + $0x1320] sm:$0xff] }
 0x178   : > { %2223 = vmatprep.subr.mxu0 %v4135_v60  ;;  %2375 = vmatprep.subr.mxu1 %v4061_v40  ;;  %v1079_v9 = vpop.f32.mrf.mxu0  ;;  %v4160_v60 = vld [vmem:[%s8053_s1 + $0x14d0] sm:$0xff]  ;;  %v6895_v40 = vld [vmem:[%s4656_s27 + $0x8] sm:$0xff] }
 0x179   : > { %2224 = vmatpush2.msra.mxu0 %v4134_v41  ;;  %2376 = vmatpush1.msra.mxu1 %v4060_v46  ;;  %v1080_v28 = vadd.f32 %v1079_v9, %v6146_v53  ;;  %v4049_v53 = vld [vmem:[%s8053_s1 + $0x1158] sm:$0xff]  ;;  %v2145_v41 = vrot.slane %v6895_v40, 3  ;;  %v6899_v46 = vld [vmem:[%s4656_s27 + $0x20] sm:$0xff] }
 0x17a   : > { %2225 = vmatprep.subr.mxu0 %v4131_v57  ;;  %2377 = vmatprep.subr.mxu1 %v4057_v56  ;;  %v1081_v1 = vpop.f32.mrf.mxu0  ;;  %v2146_v57 = vrot.slane %v6899_v46, 3 }
 0x17b   : > { %2226 = vmatpush2.msra.mxu0 %v4130_v42  ;;  %2378 = vmatpush1.msra.mxu1 %v4056_v52  ;;  %v6829_v3 = vadd.f32 %v1168_v47, %v1080_v28  ;;  %v1082_v14 = vadd.f32 %v1081_v1, %v6160_v12  ;;  %v4045_v12 = vld [vmem:[%s8053_s1 + $0x1138] sm:$0xff]  ;;  %v4103_v47 = vld [vmem:[%s8053_s1 + $0x1308] sm:$0xff]  ;;  %v6909_v52 = vld [vmem:[%s4656_s27] sm:$0xff] }
 0x17c   : > { %2227 = vmatprep.subr.mxu0 %v4127_v10  ;;  %2379 = vmatprep.subr.mxu1 %v4053_v25  ;;  %v4157_v42 = vld [vmem:[%s8053_s1 + $0x14b8] sm:$0xff]  ;;  %v2142_v9 = vrot.slane %v6909_v52, 3 }
 0x17d   : > { %2228 = vmatpush2.msra.mxu0 %v4126_v43  ;;  %2380 = vmatpush1.msra.mxu1 %v4052_v17  ;;  %v6844_v24 = vadd.f32 %v1170_v48, %v1082_v14  ;;  %v6913_v10 = vld [vmem:[%s4656_s27 + $0x18] sm:$0xff]  ;;  %v4102_v43 = vld [vmem:[%s8053_s1 + $0x1300] sm:$0xff]  ;;  %v4156_v17 = vld [vmem:[%s8053_s1 + $0x14b0] sm:$0xff] }
 0x17e   : > { %2229 = vmatprep.subr.mxu0 %v4123_v30  ;;  %2381 = vmatprep.subr.mxu1 %v4049_v53  ;;  %v1085_v0 = vpop.f32.mrf.mxu0  ;;  %v2143_v25 = vrot.slane %v6913_v10, 3  ;;  %v4099_v53 = vld [vmem:[%s8053_s1 + $0x12e8] sm:$0xff] }
 0x17f   : > { %2230 = vmatpush2.msra.mxu0 %v4122_v27  ;;  %2382 = vmatpush1.msra.mxu1 %v4048_v33  ;;  %v1086_v22 = vadd.f32 %v1085_v0, %v6244_v36  ;;  %v4037_v36 = vld [vmem:[%s8053_s1 + $0x10f8] sm:$0xff]  ;;  %v4098_v27 = vld [vmem:[%s8053_s1 + $0x12e0] sm:$0xff]  ;;  %v6936_v33 = vsel %vm2141_vm3, %v2145_v41, %v2146_v57  ;;  %v4208_v41 = vld [vmem:[%s8053_s1 + $0x1650] sm:$0xff] }
 0x180   : > { %2231 = vmatprep.subr.mxu0 %v4119_v23  ;;  %2383 = vmatprep.subr.mxu1 %v4045_v12  ;;  %v1087_v38 = vpop.f32.mrf.mxu0  ;;  %v1174_v15 = vpop.f32.mrf.mxu1  ;;  %v4152_v12 = vld [vmem:[%s8053_s1 + $0x1490] sm:$0xff] }
 0x181   : > { %2232 = vmatpush2.msra.mxu0 %v4118_v13  ;;  %2384 = vmatpush1.msra.mxu1 %v4044_v32  ;;  %v1088_v4 = vadd.f32 %v1087_v38, %v6259_v20  ;;  %v6872_v59 = vadd.f32 %v1174_v15, %v1086_v22  ;;  %v4107_v20 = vld [vmem:[%s8053_s1 + $0x1328] sm:$0xff]  ;;  %v6945_v13 = vld [vmem:[%s4656_s27 + $0x38] sm:$0xff]  ;;  %v6964_v38 = vld [vmem:[%s4656_s27 + $0x30] sm:$0xff] }
 0x182   : > { %2233 = vmatprep.subr.mxu0 %v4115_v2  ;;  %2385 = vmatprep.subr.mxu1 %v4041_v55  ;;  %v1176_v8 = vpop.f32.mrf.mxu1  ;;  %v2153_v32 = vrot.slane %v6945_v13, 3  ;;  %v4149_v2 = vld [vmem:[%s8053_s1 + $0x1478] sm:$0xff]  ;;  %v2151_v15 = vrot.slane %v6964_v38, 3 }
 0x183   : > { %2234 = vmatpush2.msra.mxu0 %v4114_v26  ;;  %2386 = vmatpush1.msra.mxu1 %v4040_v29  ;;  %v6886_v5 = vadd.f32 %v1176_v8, %v1088_v4  ;;  %v4213_v55 = vld [vmem:[%s8053_s1 + $0x1678] sm:$0xff]  ;;  %v4148_v26 = vld [vmem:[%s8053_s1 + $0x1470] sm:$0xff] }
 0x184   : > { %2235 = vmatprep.subr.mxu0 %v4111_v54  ;;  %2387 = vmatprep.subr.mxu1 %v4037_v36  ;;  %v1091_v56 = vpop.f32.mrf.mxu0  ;;  %v4212_v29 = vld [vmem:[%s8053_s1 + $0x1670] sm:$0xff]  ;;  %v6968_v54 = vld [vmem:[%s4656_s27 + $0x40] sm:$0xff] }
 0x185   : > { %2236 = vmatpush2.msra.mxu0 %v4110_v34  ;;  %2388 = vmatpush1.msra.mxu1 %v4036_v16  ;;  %v1092_v28 = vadd.f32 %v1091_v56, %v6286_v51  ;;  %v4153_v51 = vld [vmem:[%s8053_s1 + $0x1498] sm:$0xff]  ;;  %v2155_v36 = vrot.slane %v6968_v54, 3 }
 0x186   : > { %2237 = vmatprep.subr.mxu0 %v4107_v20  ;;  %2389 = vmatprep.subr.mxu1 %v4161_v35  ;;  %v1093_v1 = vpop.f32.mrf.mxu0  ;;  %v1180_v30 = vpop.f32.mrf.mxu1  ;;  %v4145_v34 = vld [vmem:[%s8053_s1 + $0x1458] sm:$0xff]  ;;  %v6980_v35 = vsel %vm2141_vm3, %v2146_v57, %v2153_v32  ;;  %v6992_v57 = vsel %vm2141_vm3, %v2143_v25, %v2151_v15 }
 0x187   : > { %2238 = vmatpush2.msra.mxu0 %v4106_v7  ;;  %2390 = vmatpush2.msra.mxu1 %v4160_v60  ;;  %v1094_v14 = vadd.f32 %v1093_v1, %v6307_v21  ;;  %v6930_v48 = vadd.f32 %v1180_v30, %v1092_v28  ;;  %v6942_v21 = vsel %vm2141_vm3, %v2142_v9, %v2143_v25  ;;  %v4209_v16 = vld [vmem:[%s8053_s1 + $0x1658] sm:$0xff]  ;;  %v4144_v60 = vld [vmem:[%s8053_s1 + $0x1450] sm:$0xff] }
 0x188   : > { %2239 = vmatprep.subr.mxu0 %v4103_v47  ;;  %2391 = vmatprep.subr.mxu1 %v4157_v42  ;;  %v1182_v23 = vpop.f32.mrf.mxu1  ;;  %v7000_v47 = vld [vmem:[%s4656_s27 + $0x50] sm:$0x3f]  ;;  %v4141_v25 = vld [vmem:[%s8053_s1 + $0x1438] sm:$0xff] }
 0x189   : > { %2240 = vmatpush2.msra.mxu0 %v4102_v43  ;;  %2392 = vmatpush2.msra.mxu1 %v4156_v17  ;;  %v6948_v0 = vadd.f32 %v1182_v23, %v1094_v14  ;;  %v7003_v42 = vrot.slane %v7000_v47, 3  ;;  %v4140_v28 = vld [vmem:[%s8053_s1 + $0x1430] sm:$0xff]  ;;  %v7022_v17 = vld [vmem:[%s4656_s27 + $0x48] sm:$0x3f]  ;;  %v7028_v30 = vld [vmem:[%s4656_s27 + $0x58] sm:$0x3f] }
 0x18a   : > { %2241 = vmatprep.subr.mxu0 %v4099_v53  ;;  %2393 = vmatprep.subr.mxu1 %v4153_v51  ;;  %v1097_v22 = vpop.f32.mrf.mxu0  ;;  %v4204_v43 = vld [vmem:[%s8053_s1 + $0x1630] sm:$0xff]  ;;  %v7025_v1 = vrot.slane %v7022_v17, 3  ;;  %v7031_v53 = vrot.slane %v7028_v30, 3  ;;  %v4137_v51 = vld [vmem:[%s8053_s1 + $0x1418] sm:$0xff] }
 0x18b   : > { %2242 = vmatpush2.msra.mxu0 %v4098_v27  ;;  %2243 = vmatprep.mubr.f32.mxu0 %v6936_v33  ;;  %v1098_v4 = vadd.f32 %v1097_v22, %v6340_v11  ;;  %v4201_v14 = vld [vmem:[%s8053_s1 + $0x1618] sm:$0xff]  ;;  %v7044_v27 = vsel %vm2141_vm3, %v2153_v32, %v7003_v42  ;;  %v4136_v23 = vld [vmem:[%s8053_s1 + $0x1410] sm:$0xff] }
 0x18c   : > { %2394 = vmatpush2.msra.mxu1 %v4152_v12  ;;  %2244 = vmatmul.mubr.f32.vlgmr.msra.gmra.mxu0 %v6942_v21  ;;  %v1099_v8 = vpop.f32.mrf.mxu0  ;;  %v1186_v20 = vpop.f32.mrf.mxu1  ;;  %v4200_v12 = vld [vmem:[%s8053_s1 + $0x1610] sm:$0xff]  ;;  %v7058_v32 = vsel %vm2141_vm3, %v2155_v36, %v7031_v53  ;;  %v4197_v22 = vld [vmem:[%s8053_s1 + $0x15f8] sm:$0xff] }
 0x18d   : > { %2395 = vmatprep.subr.mxu1 %v4149_v2  ;;  %2452 = vmatprep.subr.mxu0 %v4213_v55  ;;  %v1100_v11 = vadd.f32 %v1099_v8, %v6358_v31  ;;  %v6983_v7 = vadd.f32 %v1186_v20, %v1098_v4  ;;  %v6997_v31 = vsel %vm2141_vm3, %v2149_v18, %v2155_v36  ;;  %v4205_v18 = vld [vmem:[%s8053_s1 + $0x1638] sm:$0xff]  ;;  %v4128_v4 = vld [vmem:[%s8053_s1 + $0x13d0] sm:$0xff] }
 0x18e   : > { %2396 = vmatpush2.msra.mxu1 %v4148_v26  ;;  %2453 = vmatpush1.msra.mxu0 %v4212_v29  ;;  %v1188_v56 = vpop.f32.mrf.mxu1  ;;  %v7054_v2 = vsel %vm2141_vm3, %v2151_v15, %v7025_v1  ;;  %v4133_v55 = vld [vmem:[%s8053_s1 + $0x13f8] sm:$0xff]  ;;  %v4132_v26 = vld [vmem:[%s8053_s1 + $0x13f0] sm:$0xff] }
 0x18f   : > { %2397 = vmatprep.subr.mxu1 %v4145_v34  ;;  %2454 = vmatprep.subr.mxu0 %v4209_v16  ;;  %v7005_v9 = vadd.f32 %v1188_v56, %v1100_v11  ;;  %v4196_v29 = vld [vmem:[%s8053_s1 + $0x15f0] sm:$0xff]  ;;  %v4129_v15 = vld [vmem:[%s8053_s1 + $0x13d8] sm:$0xff] }
 0x190   : > { %2249 = vmatprep.mubr.f32.mxu0 %v6980_v35  ;;  %2338 = vmatprep.mubr.f32.mxu1 %v8058_v61  ;;  %v4193_v36 = vld [vmem:[%s8053_s1 + $0x15d8] sm:$0xff]  ;;  %v4192_v34 = vld [vmem:[%s8053_s1 + $0x15d0] sm:$0xff] }
 0x191   : > { %2398 = vmatpush2.msra.mxu1 %v4144_v60  ;;  %2455 = vmatpush1.msra.mxu0 %v4208_v41  ;;  %v4125_v11 = vld [vmem:[%s8053_s1 + $0x13b8] sm:$0xff]  ;;  %v4124_v56 = vld [vmem:[%s8053_s1 + $0x13b0] sm:$0xff] }
 0x192   : > { %2250 = vmatmul.mubr.f32.gmra.mxu0 %v6992_v57  ;;  %4215 = vmatmul.mubr.msk.f32.gmra.mxu1 %vm640_vm1, %v6997_v31  ;;  %v4189_v60 = vld [vmem:[%s8053_s1 + $0x15b8] sm:$0xff] }
 0x193   : > { %2399 = vmatprep.subr.mxu1 %v4141_v25  ;;  %2456 = vmatprep.subr.mxu0 %v4205_v18 }
 0x194   : > { %2400 = vmatpush2.msra.mxu1 %v4140_v28  ;;  %2457 = vmatpush1.msra.mxu0 %v4204_v43  ;;  %v4121_v28 = vld [vmem:[%s8053_s1 + $0x1398] sm:$0xff] }
 0x195   : > { %2401 = vmatprep.subr.mxu1 %v4137_v51  ;;  %2458 = vmatprep.subr.mxu0 %v4201_v14  ;;  %v4185_v43 = vld [vmem:[%s8053_s1 + $0x1598] sm:$0xff]  ;;  %v4184_v14 = vld [vmem:[%s8053_s1 + $0x1590] sm:$0xff] }
 0x196   : > { %2255 = vmatprep.mubr.f32.mxu0 %v7044_v27  ;;  %2344 = vmatprep.mubr.f32.mxu1 %v8058_v61 }
 0x197   : > { %2402 = vmatpush2.msra.mxu1 %v4136_v23  ;;  %2459 = vmatpush1.msra.mxu0 %v4200_v12  ;;  %v4117_v12 = vld [vmem:[%s8053_s1 + $0x1378] sm:$0xff] }
 0x198   : > { %2256 = vmatmul.mubr.f32.gmra.mxu0 %v7054_v2  ;;  %4216 = vmatmul.mubr.msk.f32.gmra.mxu1 %vm640_vm1, %v7058_v32 }
 0x199   : > { %2403 = vmatprep.subr.mxu1 %v4133_v55  ;;  %2460 = vmatprep.subr.mxu0 %v4197_v22  ;;  %v4181_v55 = vld [vmem:[%s8053_s1 + $0x1578] sm:$0xff] }
 0x19a   : > { %2404 = vmatpush2.msra.mxu1 %v4132_v26  ;;  %2461 = vmatpush1.msra.mxu0 %v4196_v29  ;;  %v1257_v16 = vpop.f32.mrf.mxu1  ;;  %v1346_v8 = vpop.f32.mrf.mxu0  ;;  %v4116_v26 = vld [vmem:[%s8053_s1 + $0x1370] sm:$0xff] }
 0x19b   : > { %2405 = vmatprep.subr.mxu1 %v4129_v15  ;;  %2462 = vmatprep.subr.mxu0 %v4193_v36  ;;  %v1258_v20 = vadd.f32 %v1257_v16, %v6381_v62  ;;  %v4188_v62 = vld [vmem:[%s8053_s1 + $0x15b0] sm:$0xff]  ;;  %v4113_v36 = vld [vmem:[%s8053_s1 + $0x1358] sm:$0xff] }
 0x19c   : > { %2261 = vmatprep.mubr.f32.mxu0 %v7003_v42  ;;  %2350 = vmatprep.mubr.f32.mxu1 %v8058_v61  ;;  %v1259_v41 = vpop.f32.mrf.mxu1  ;;  %v1348_v51 = vpop.f32.mrf.mxu0  ;;  %v4180_v29 = vld [vmem:[%s8053_s1 + $0x1570] sm:$0xff] }
 0x19d   : > { %2406 = vmatpush2.msra.mxu1 %v4128_v4  ;;  %2463 = vmatpush1.msra.mxu0 %v4192_v34  ;;  %v7104_v25 = vadd.f32 %v1346_v8, %v1258_v20  ;;  %v1260_v18 = vadd.f32 %v1259_v41, %v6397_v45  ;;  %v4120_v45 = vld [vmem:[%s8053_s1 + $0x1390] sm:$0xff]  ;;  %v4177_v4 = vld [vmem:[%s8053_s1 + $0x1558] sm:$0xff] }
 0x19e   : > { %2262 = vmatmul.mubr.f32.gmra.mxu0 %v7025_v1  ;;  %4217 = vmatmul.mubr.msk.f32.gmra.mxu1 %vm640_vm1, %v7031_v53  ;;  %v4112_v8 = vld [vmem:[%s8053_s1 + $0x1350] sm:$0xff]  ;;  %v4173_v41 = vld [vmem:[%s8053_s1 + $0x1538] sm:$0xff] }
 0x19f   : > { %2407 = vmatprep.subr.mxu1 %v4125_v11  ;;  %2464 = vmatprep.subr.mxu0 %v4189_v60  ;;  %v7122_v23 = vadd.f32 %v1348_v51, %v1260_v18  ;;  %v4109_v60 = vld [vmem:[%s8053_s1 + $0x1338] sm:$0xff] }
 0x1a0   : > { %2408 = vmatpush2.msra.mxu1 %v4124_v56  ;;  %2465 = vmatpush1.msra.mxu0 %v4188_v62  ;;  %v1263_v22 = vpop.f32.mrf.mxu1  ;;  %v4108_v62 = vld [vmem:[%s8053_s1 + $0x1330] sm:$0xff] }
 0x1a1   : > { %2409 = vmatprep.subr.mxu1 %v4121_v28  ;;  %2466 = vmatprep.subr.mxu0 %v4185_v43  ;;  %v1264_v15 = vadd.f32 %v1263_v22, %v6474_v39  ;;  %v4176_v39 = vld [vmem:[%s8053_s1 + $0x1550] sm:$0xff]  ;;  %v4105_v28 = vld [vmem:[%s8053_s1 + $0x1318] sm:$0xff] }
 0x1a2   : > { %2410 = vmatpush2.msra.mxu1 %v4120_v45  ;;  %2467 = vmatpush1.msra.mxu0 %v4184_v14  ;;  %v1265_v34 = vpop.f32.mrf.mxu1  ;;  %v1352_v16 = vpop.f32.mrf.mxu0  ;;  %v4169_v43 = vld [vmem:[%s8053_s1 + $0x1518] sm:$0xff]  ;;  %v4104_v45 = vld [vmem:[%s8053_s1 + $0x1310] sm:$0xff] }
 0x1a3   : > { %2411 = vmatprep.subr.mxu1 %v4117_v12  ;;  %2468 = vmatprep.subr.mxu0 %v4181_v55  ;;  %v1266_v20 = vadd.f32 %v1265_v34, %v6483_v50  ;;  %v7150_v11 = vadd.f32 %v1352_v16, %v1264_v15  ;;  %v4172_v50 = vld [vmem:[%s8053_s1 + $0x1530] sm:$0xff]  ;;  %v4101_v55 = vld [vmem:[%s8053_s1 + $0x12f8] sm:$0xff] }
 0x1a4   : > { %2412 = vmatpush2.msra.mxu1 %v4116_v26  ;;  %2469 = vmatpush1.msra.mxu0 %v4180_v29  ;;  %v1354_v56 = vpop.f32.mrf.mxu0  ;;  %v4168_v14 = vld [vmem:[%s8053_s1 + $0x1510] sm:$0xff]  ;;  %v4165_v22 = vld [vmem:[%s8053_s1 + $0x14f8] sm:$0xff] }
 0x1a5   : > { %2413 = vmatprep.subr.mxu1 %v4113_v36  ;;  %2470 = vmatprep.subr.mxu0 %v4177_v4  ;;  %v7164_v18 = vadd.f32 %v1354_v56, %v1266_v20  ;;  %v4100_v15 = vld [vmem:[%s8053_s1 + $0x12f0] sm:$0xff]  ;;  %v4282_v20 = vld [vmem:[%s8053_s1 + $0x1860] sm:$0xff]  ;;  %v4395_v56 = vld [vmem:[%s8053_s1 + $0x1be8] sm:$0xff] }
 0x1a6   : > { %2414 = vmatpush2.msra.mxu1 %v4112_v8  ;;  %2471 = vmatpush1.msra.mxu0 %v4176_v39  ;;  %v1269_v51 = vpop.f32.mrf.mxu1  ;;  %v4164_v4 = vld [vmem:[%s8053_s1 + $0x14f0] sm:$0xff]  ;;  %v4399_v8 = vld [vmem:[%s8053_s1 + $0x1c08] sm:$0xff] }
 0x1a7   : > { %2415 = vmatprep.subr.mxu1 %v4109_v60  ;;  %2472 = vmatprep.subr.mxu0 %v4173_v41  ;;  %v1270_v12 = vadd.f32 %v1269_v51, %v6507_v37  ;;  %v4279_v41 = vld [vmem:[%s8053_s1 + $0x1848] sm:$0xff] }
 0x1a8   : > { %2416 = vmatpush2.msra.mxu1 %v4108_v62  ;;  %2473 = vmatpush1.msra.mxu0 %v4172_v50  ;;  %v1271_v26 = vpop.f32.mrf.mxu1  ;;  %v1358_v29 = vpop.f32.mrf.mxu0 }
 0x1a9   : > { %2417 = vmatprep.subr.mxu1 %v4105_v28  ;;  %2474 = vmatprep.subr.mxu0 %v4169_v43  ;;  %v1272_v37 = vadd.f32 %v1271_v26, %v6517_v63  ;;  %v7189_v36 = vadd.f32 %v1358_v29, %v1270_v12  ;;  %v4283_v63 = vld [vmem:[%s8053_s1 + $0x1868] sm:$0xff]  ;;  %v4266_v29 = vld [vmem:[%s8053_s1 + $0x17e0] sm:$0xff] }
 0x1aa   : > { %2418 = vmatpush2.msra.mxu1 %v4104_v45  ;;  %2475 = vmatpush1.msra.mxu0 %v4168_v14  ;;  %v1360_v34 = vpop.f32.mrf.mxu0  ;;  %v4391_v45 = vld [vmem:[%s8053_s1 + $0x1bc8] sm:$0xff]  ;;  %v4274_v14 = vld [vmem:[%s8053_s1 + $0x1820] sm:$0xff] }
 0x1ab   : > { %2419 = vmatprep.subr.mxu1 %v4101_v55  ;;  %2476 = vmatprep.subr.mxu0 %v4165_v22  ;;  %v7194_v16 = vadd.f32 %v1360_v34, %v1272_v37  ;;  %v4271_v12 = vld [vmem:[%s8053_s1 + $0x1808] sm:$0xff]  ;;  %v4270_v22 = vld [vmem:[%s8053_s1 + $0x1800] sm:$0xff] }
 0x1ac   : > { %2420 = vmatpush2.msra.mxu1 %v4100_v15  ;;  %2421 = vmatprep.mubr.f32.mxu1 %v6936_v33  ;;  %v1275_v39 = vpop.f32.mrf.mxu1  ;;  %v4398_v33 = vld [vmem:[%s8053_s1 + $0x1c00] sm:$0xff]  ;;  %v4387_v55 = vld [vmem:[%s8053_s1 + $0x1ba8] sm:$0xff] }
 0x1ad   : > { %2477 = vmatpush1.msra.mxu0 %v4164_v4  ;;  %2510 = vmatprep.mubr.f32.mxu0 %v8058_v61  ;;  %v1276_v60 = vadd.f32 %v1275_v39, %v6540_v58  ;;  %v4383_v26 = vld [vmem:[%s8053_s1 + $0x1b88] sm:$0xff]  ;;  %v4262_v4 = vld [vmem:[%s8053_s1 + $0x17c0] sm:$0xff] }
 0x1ae   : > { %2422 = vmatmul.mubr.f32.vlgmr.msra.gmra.mxu1 %v6942_v21  ;;  %4218 = vmatmul.mubr.msk.f32.vlgmr.msra.gmra.mxu0 %vm640_vm1, %v6676_v49  ;;  %v1277_v62 = vpop.f32.mrf.mxu1  ;;  %v1364_v50 = vpop.f32.mrf.mxu0  ;;  %v4278_v49 = vld [vmem:[%s8053_s1 + $0x1840] sm:$0xff]  ;;  %v4263_v15 = vld [vmem:[%s8053_s1 + $0x17c8] sm:$0xff] }
 0x1af   : > { %2770 = vmatprep.subr.mxu0 %v4283_v63  ;;  %2865 = vmatprep.subr.mxu1 %v4399_v8  ;;  %v1278_v28 = vadd.f32 %v1277_v62, %v6550_v19  ;;  %v7221_v58 = vadd.f32 %v1364_v50, %v1276_v60  ;;  %v4394_v21 = vld [vmem:[%s8053_s1 + $0x1be0] sm:$0xff]  ;;  %v4275_v19 = vld [vmem:[%s8053_s1 + $0x1828] sm:$0xff] }
 0x1b0   : > { %2771 = vmatpush1.msra.mxu0 %v4282_v20  ;;  %2866 = vmatpush1.msra.mxu1 %v4398_v33  ;;  %v1366_v43 = vpop.f32.mrf.mxu0  ;;  %v4379_v37 = vld [vmem:[%s8053_s1 + $0x1b68] sm:$0xff]  ;;  %v4258_v63 = vld [vmem:[%s8053_s1 + $0x17a0] sm:$0xff] }
 0x1b1   : > { %2772 = vmatprep.subr.mxu0 %v4279_v41  ;;  %2867 = vmatprep.subr.mxu1 %v4395_v56  ;;  %v7229_v51 = vadd.f32 %v1366_v43, %v1278_v28  ;;  %v4375_v34 = vld [vmem:[%s8053_s1 + $0x1b48] sm:$0xff]  ;;  %v4254_v20 = vld [vmem:[%s8053_s1 + $0x1780] sm:$0xff] }
 0x1b2   : > { %2427 = vmatprep.mubr.f32.mxu1 %v6980_v35  ;;  %2516 = vmatprep.mubr.f32.mxu0 %v8058_v61  ;;  %v4390_v35 = vld [vmem:[%s8053_s1 + $0x1bc0] sm:$0xff]  ;;  %v4255_v8 = vld [vmem:[%s8053_s1 + $0x1788] sm:$0xff] }
 0x1b3   : > { %2773 = vmatpush1.msra.mxu0 %v4278_v49  ;;  %2868 = vmatpush1.msra.mxu1 %v4394_v21  ;;  %v4371_v39 = vld [vmem:[%s8053_s1 + $0x1b28] sm:$0xff]  ;;  %v4250_v60 = vld [vmem:[%s8053_s1 + $0x1760] sm:$0xff] }
 0x1b4   : > { %2428 = vmatmul.mubr.f32.gmra.mxu1 %v6992_v57  ;;  %4219 = vmatmul.mubr.msk.f32.gmra.mxu0 %vm640_vm1, %v6997_v31  ;;  %v4386_v57 = vld [vmem:[%s8053_s1 + $0x1ba0] sm:$0xff]  ;;  %v4267_v31 = vld [vmem:[%s8053_s1 + $0x17e8] sm:$0xff] }
 0x1b5   : > { %2774 = vmatprep.subr.mxu0 %v4275_v19  ;;  %2869 = vmatprep.subr.mxu1 %v4391_v45  ;;  %v4367_v33 = vld [vmem:[%s8053_s1 + $0x1b08] sm:$0xff]  ;;  %v4366_v41 = vld [vmem:[%s8053_s1 + $0x1b00] sm:$0xff] }
 0x1b6   : > { %2775 = vmatpush1.msra.mxu0 %v4274_v14  ;;  %2870 = vmatpush1.msra.mxu1 %v4390_v35  ;;  %v4247_v56 = vld [vmem:[%s8053_s1 + $0x1748] sm:$0xff]  ;;  %v4246_v50 = vld [vmem:[%s8053_s1 + $0x1740] sm:$0xff] }
 0x1b7   : > { %2776 = vmatprep.subr.mxu0 %v4271_v12  ;;  %2871 = vmatprep.subr.mxu1 %v4387_v55  ;;  %v4363_v62 = vld [vmem:[%s8053_s1 + $0x1ae8] sm:$0xff]  ;;  %v4362_v28 = vld [vmem:[%s8053_s1 + $0x1ae0] sm:$0xff]  ;;  %v2739_v55 = vrot.slane %v6651_v6, 4 }
 0x1b8   : > { %2433 = vmatprep.mubr.f32.mxu1 %v7044_v27  ;;  %2522 = vmatprep.mubr.f32.mxu0 %v8058_v61  ;;  %v4382_v27 = vld [vmem:[%s8053_s1 + $0x1b80] sm:$0xff]  ;;  %v4243_v49 = vld [vmem:[%s8053_s1 + $0x1728] sm:$0xff] }
 0x1b9   : > { %2777 = vmatpush1.msra.mxu0 %v4270_v22  ;;  %2872 = vmatpush1.msra.mxu1 %v4386_v57  ;;  %v4359_v21 = vld [vmem:[%s8053_s1 + $0x1ac8] sm:$0xff]  ;;  %v4242_v43 = vld [vmem:[%s8053_s1 + $0x1720] sm:$0xff]  ;;  %v2740_v22 = vrot.slane %v6655_v44, 4  ;;  %v4328_v44 = vld [vmem:[%s8053_s1 + $0x19d0] sm:$0xff] }
 0x1ba   : > { %2434 = vmatmul.mubr.f32.gmra.mxu1 %v7054_v2  ;;  %4220 = vmatmul.mubr.msk.f32.gmra.mxu0 %vm640_vm1, %v7058_v32  ;;  %v4378_v2 = vld [vmem:[%s8053_s1 + $0x1b60] sm:$0xff]  ;;  %v4259_v32 = vld [vmem:[%s8053_s1 + $0x17a8] sm:$0xff] }
 0x1bb   : > { %2778 = vmatprep.subr.mxu0 %v4267_v31  ;;  %2873 = vmatprep.subr.mxu1 %v4383_v26  ;;  %v4358_v19 = vld [vmem:[%s8053_s1 + $0x1ac0] sm:$0xff]  ;;  %v4239_v45 = vld [vmem:[%s8053_s1 + $0x1708] sm:$0xff] }
 0x1bc   : > { %2779 = vmatpush1.msra.mxu0 %v4266_v29  ;;  %2874 = vmatpush1.msra.mxu1 %v4382_v27  ;;  %v4355_v14 = vld [vmem:[%s8053_s1 + $0x1aa8] sm:$0xff]  ;;  %v4238_v35 = vld [vmem:[%s8053_s1 + $0x1700] sm:$0xff]  ;;  %v7386_v27 = vsel %vm2732_vm4, %v2739_v55, %v2740_v22  ;;  %v4257_v55 = vld [vmem:[%s8053_s1 + $0x1798] sm:$0xff] }
 0x1bd   : > { %2780 = vmatprep.subr.mxu0 %v4263_v15  ;;  %2875 = vmatprep.subr.mxu1 %v4379_v37  ;;  %v4354_v12 = vld [vmem:[%s8053_s1 + $0x1aa0] sm:$0xff]  ;;  %v4235_v57 = vld [vmem:[%s8053_s1 + $0x16e8] sm:$0xff]  ;;  %v4285_v15 = vld [vmem:[%s8053_s1 + $0x1878] sm:$0xff] }
 0x1be   : > { %2439 = vmatprep.mubr.f32.mxu1 %v7003_v42  ;;  %2528 = vmatprep.mubr.f32.mxu0 %v8058_v61  ;;  %v4374_v42 = vld [vmem:[%s8053_s1 + $0x1b40] sm:$0xff]  ;;  %v4351_v31 = vld [vmem:[%s8053_s1 + $0x1a88] sm:$0xff] }
 0x1bf   : > { %2781 = vmatpush1.msra.mxu0 %v4262_v4  ;;  %2876 = vmatpush1.msra.mxu1 %v4378_v2  ;;  %v4234_v26 = vld [vmem:[%s8053_s1 + $0x16e0] sm:$0xff]  ;;  %v4231_v29 = vld [vmem:[%s8053_s1 + $0x16c8] sm:$0xff]  ;;  %v4284_v4 = vld [vmem:[%s8053_s1 + $0x1870] sm:$0xff] }
 0x1c0   : > { %2440 = vmatmul.mubr.f32.gmra.mxu1 %v7025_v1  ;;  %4221 = vmatmul.mubr.msk.f32.gmra.mxu0 %vm640_vm1, %v7031_v53  ;;  %v4370_v1 = vld [vmem:[%s8053_s1 + $0x1b20] sm:$0xff]  ;;  %v4251_v53 = vld [vmem:[%s8053_s1 + $0x1768] sm:$0xff] }
 0x1c1   : > { %2782 = vmatprep.subr.mxu0 %v4259_v32  ;;  %2877 = vmatprep.subr.mxu1 %v4375_v34  ;;  %v4350_v6 = vld [vmem:[%s8053_s1 + $0x1a80] sm:$0xff]  ;;  %v4227_v2 = vld [vmem:[%s8053_s1 + $0x16a8] sm:$0xff]  ;;  %v4281_v32 = vld [vmem:[%s8053_s1 + $0x1858] sm:$0xff] }
 0x1c2   : > { %2783 = vmatpush1.msra.mxu0 %v4258_v63  ;;  %2878 = vmatpush1.msra.mxu1 %v4374_v42  ;;  %v4230_v37 = vld [vmem:[%s8053_s1 + $0x16c0] sm:$0xff]  ;;  %v4280_v63 = vld [vmem:[%s8053_s1 + $0x1850] sm:$0xff]  ;;  %v4223_v42 = vld [vmem:[%s8053_s1 + $0x1688] sm:$0xff] }
 0x1c3   : > { %2784 = vmatprep.subr.mxu0 %v4255_v8  ;;  %2879 = vmatprep.subr.mxu1 %v4371_v39  ;;  %v4226_v34 = vld [vmem:[%s8053_s1 + $0x16a0] sm:$0xff]  ;;  %v4277_v8 = vld [vmem:[%s8053_s1 + $0x1838] sm:$0xff] }
 0x1c4   : > { %2785 = vmatpush1.msra.mxu0 %v4254_v20  ;;  %2880 = vmatpush1.msra.mxu1 %v4370_v1  ;;  %v4222_v39 = vld [vmem:[%s8053_s1 + $0x1680] sm:$0xff]  ;;  %v4276_v20 = vld [vmem:[%s8053_s1 + $0x1830] sm:$0xff]  ;;  %v4347_v1 = vld [vmem:[%s8053_s1 + $0x1a68] sm:$0xff] }
 0x1c5   : > { %2786 = vmatprep.subr.mxu0 %v4251_v53  ;;  %2881 = vmatprep.subr.mxu1 %v4367_v33  ;;  %v4273_v53 = vld [vmem:[%s8053_s1 + $0x1818] sm:$0xff]  ;;  %v4346_v33 = vld [vmem:[%s8053_s1 + $0x1a60] sm:$0xff] }
 0x1c6   : > { %2787 = vmatpush1.msra.mxu0 %v4250_v60  ;;  %2882 = vmatpush1.msra.mxu1 %v4366_v41  ;;  %v4272_v60 = vld [vmem:[%s8053_s1 + $0x1810] sm:$0xff]  ;;  %v4343_v41 = vld [vmem:[%s8053_s1 + $0x1a48] sm:$0xff] }
 0x1c7   : > { %2788 = vmatprep.subr.mxu0 %v4247_v56  ;;  %2883 = vmatprep.subr.mxu1 %v4363_v62  ;;  %v4269_v56 = vld [vmem:[%s8053_s1 + $0x17f8] sm:$0xff]  ;;  %v4342_v62 = vld [vmem:[%s8053_s1 + $0x1a40] sm:$0xff] }
 0x1c8   : > { %2789 = vmatpush1.msra.mxu0 %v4246_v50  ;;  %2884 = vmatpush1.msra.mxu1 %v4362_v28  ;;  %v4268_v50 = vld [vmem:[%s8053_s1 + $0x17f0] sm:$0xff]  ;;  %v4339_v28 = vld [vmem:[%s8053_s1 + $0x1a28] sm:$0xff] }
 0x1c9   : > { %2790 = vmatprep.subr.mxu0 %v4243_v49  ;;  %2885 = vmatprep.subr.mxu1 %v4359_v21  ;;  %v4265_v49 = vld [vmem:[%s8053_s1 + $0x17d8] sm:$0xff]  ;;  %v4338_v21 = vld [vmem:[%s8053_s1 + $0x1a20] sm:$0xff] }
 0x1ca   : > { %2791 = vmatpush1.msra.mxu0 %v4242_v43  ;;  %2886 = vmatpush1.msra.mxu1 %v4358_v19  ;;  %v4264_v43 = vld [vmem:[%s8053_s1 + $0x17d0] sm:$0xff]  ;;  %v4335_v19 = vld [vmem:[%s8053_s1 + $0x1a08] sm:$0xff] }
 0x1cb   : > { %2792 = vmatprep.subr.mxu0 %v4239_v45  ;;  %2887 = vmatprep.subr.mxu1 %v4355_v14  ;;  %v4261_v45 = vld [vmem:[%s8053_s1 + $0x17b8] sm:$0xff]  ;;  %v4334_v14 = vld [vmem:[%s8053_s1 + $0x1a00] sm:$0xff] }
 0x1cc   : > { %2793 = vmatpush1.msra.mxu0 %v4238_v35  ;;  %2888 = vmatpush1.msra.mxu1 %v4354_v12  ;;  %v4260_v35 = vld [vmem:[%s8053_s1 + $0x17b0] sm:$0xff]  ;;  %v4331_v12 = vld [vmem:[%s8053_s1 + $0x19e8] sm:$0xff] }
 0x1cd   : > { %2794 = vmatprep.subr.mxu0 %v4235_v57  ;;  %2889 = vmatprep.subr.mxu1 %v4351_v31  ;;  %v4330_v57 = vld [vmem:[%s8053_s1 + $0x19e0] sm:$0xff]  ;;  %v4256_v31 = vld [vmem:[%s8053_s1 + $0x1790] sm:$0xff] }
 0x1ce   : > { %2795 = vmatpush1.msra.mxu0 %v4234_v26  ;;  %2890 = vmatpush1.msra.mxu1 %v4350_v6  ;;  %v4327_v26 = vld [vmem:[%s8053_s1 + $0x19c8] sm:$0xff]  ;;  %v4253_v6 = vld [vmem:[%s8053_s1 + $0x1778] sm:$0xff] }
 0x1cf   : > { %2923 = vmatprep.mubr.f32.mxu1 %v8058_v61  ;;  %2796 = vmatprep.subr.mxu0 %v4231_v29  ;;  %v4326_v29 = vld [vmem:[%s8053_s1 + $0x19c0] sm:$0xff] }
 0x1d0   : > { %4402 = vmatmul.mubr.msk.f32.vlgmr.msra.gmra.mxu1 %vm640_vm1, %v7386_v27  ;;  %2948 = vmatprep.subr.mxu1 %v4285_v15  ;;  %v4252_v15 = vld [vmem:[%s8053_s1 + $0x1770] sm:$0xff] }
 0x1d1   : > { %2797 = vmatpush1.msra.mxu0 %v4230_v37  ;;  %2949 = vmatpush1.msra.mxu1 %v4284_v4  ;;  %v4323_v37 = vld [vmem:[%s8053_s1 + $0x19a8] sm:$0xff]  ;;  %v4249_v4 = vld [vmem:[%s8053_s1 + $0x1758] sm:$0xff] }
 0x1d2   : > { %2798 = vmatprep.subr.mxu0 %v4227_v2  ;;  %2950 = vmatprep.subr.mxu1 %v4281_v32  ;;  %v1743_v2 = vpop.f32.mrf.mxu1  ;;  %v4322_v32 = vld [vmem:[%s8053_s1 + $0x19a0] sm:$0xff] }
 0x1d3   : > { %2799 = vmatpush1.msra.mxu0 %v4226_v34  ;;  %2951 = vmatpush1.msra.mxu1 %v4280_v63  ;;  %v4248_v34 = vld [vmem:[%s8053_s1 + $0x1750] sm:$0xff]  ;;  %v4319_v63 = vld [vmem:[%s8053_s1 + $0x1988] sm:$0xff] }
 0x1d4   : > { %2800 = vmatprep.subr.mxu0 %v4223_v42  ;;  %2952 = vmatprep.subr.mxu1 %v4277_v8  ;;  %v4245_v42 = vld [vmem:[%s8053_s1 + $0x1738] sm:$0xff]  ;;  %v4318_v8 = vld [vmem:[%s8053_s1 + $0x1980] sm:$0xff] }
 0x1d5   : > { %2801 = vmatpush1.msra.mxu0 %v4222_v39  ;;  %2953 = vmatpush1.msra.mxu1 %v4276_v20  ;;  %v4244_v39 = vld [vmem:[%s8053_s1 + $0x1730] sm:$0xff] }
 0x1d6   : > { %2802 = vmatprep.subr.mxu0 %v4347_v1  ;;  %2954 = vmatprep.subr.mxu1 %v4273_v53  ;;  %v4315_v1 = vld [vmem:[%s8053_s1 + $0x1968] sm:$0xff]  ;;  %v4241_v53 = vld [vmem:[%s8053_s1 + $0x1718] sm:$0xff] }
 0x1d7   : > { %2803 = vmatpush2.msra.mxu0 %v4346_v33  ;;  %2955 = vmatpush1.msra.mxu1 %v4272_v60  ;;  %v1745_v60 = vpop.f32.mrf.mxu1 }
 0x1d8   : > { %2804 = vmatprep.subr.mxu0 %v4343_v41  ;;  %2956 = vmatprep.subr.mxu1 %v4269_v56  ;;  %v4314_v41 = vld [vmem:[%s8053_s1 + $0x1960] sm:$0xff]  ;;  %v4240_v56 = vld [vmem:[%s8053_s1 + $0x1710] sm:$0xff] }
 0x1d9   : > { %2805 = vmatpush2.msra.mxu0 %v4342_v62  ;;  %2957 = vmatpush1.msra.mxu1 %v4268_v50  ;;  %v4311_v50 = vld [vmem:[%s8053_s1 + $0x1948] sm:$0xff] }
 0x1da   : > { %2806 = vmatprep.subr.mxu0 %v4339_v28  ;;  %2958 = vmatprep.subr.mxu1 %v4265_v49  ;;  %v4237_v28 = vld [vmem:[%s8053_s1 + $0x16f8] sm:$0xff] }
 0x1db   : > { %2807 = vmatpush2.msra.mxu0 %v4338_v21  ;;  %2959 = vmatpush1.msra.mxu1 %v4264_v43  ;;  %v4310_v43 = vld [vmem:[%s8053_s1 + $0x1940] sm:$0xff] }
 0x1dc   : > { %2808 = vmatprep.subr.mxu0 %v4335_v19  ;;  %2960 = vmatprep.subr.mxu1 %v4261_v45  ;;  %v4236_v19 = vld [vmem:[%s8053_s1 + $0x16f0] sm:$0xff]  ;;  %v4307_v45 = vld [vmem:[%s8053_s1 + $0x1928] sm:$0xff] }
 0x1dd   : > { %2809 = vmatpush2.msra.mxu0 %v4334_v14  ;;  %2961 = vmatpush1.msra.mxu1 %v4260_v35  ;;  %v4306_v35 = vld [vmem:[%s8053_s1 + $0x1920] sm:$0xff] }
 0x1de   : > { %2810 = vmatprep.subr.mxu0 %v4331_v12  ;;  %2962 = vmatprep.subr.mxu1 %v4257_v55  ;;  %v4232_v12 = vld [vmem:[%s8053_s1 + $0x16d0] sm:$0xff] }
 0x1df   : > { %2811 = vmatpush2.msra.mxu0 %v4330_v57  ;;  %2963 = vmatpush1.msra.mxu1 %v4256_v31  ;;  %v4303_v31 = vld [vmem:[%s8053_s1 + $0x1908] sm:$0xff] }
 0x1e0   : > { %2812 = vmatprep.subr.mxu0 %v4327_v26  ;;  %2964 = vmatprep.subr.mxu1 %v4253_v6  ;;  %v4302_v6 = vld [vmem:[%s8053_s1 + $0x1900] sm:$0xff] }
 0x1e1   : > { %2813 = vmatpush2.msra.mxu0 %v4326_v29  ;;  %2965 = vmatpush1.msra.mxu1 %v4252_v15  ;;  %v4228_v29 = vld [vmem:[%s8053_s1 + $0x16b0] sm:$0xff] }
 0x1e2   : > { %2814 = vmatprep.subr.mxu0 %v4323_v37  ;;  %2966 = vmatprep.subr.mxu1 %v4249_v4  ;;  %v1654_v20 = vpop.f32.mrf.mxu0  ;;  %v4299_v4 = vld [vmem:[%s8053_s1 + $0x18e8] sm:$0xff] }
 0x1e3   : > { %2815 = vmatpush2.msra.mxu0 %v4322_v32  ;;  %2967 = vmatpush1.msra.mxu1 %v4248_v34  ;;  %v1744_v33 = vadd.f32 %v1743_v2, %v1654_v20  ;;  %v4225_v2 = vld [vmem:[%s8053_s1 + $0x1698] sm:$0xff]  ;;  %v4294_v20 = vld [vmem:[%s8053_s1 + $0x18c0] sm:$0xff] }
 0x1e4   : > { %2816 = vmatprep.subr.mxu0 %v4319_v63  ;;  %2968 = vmatprep.subr.mxu1 %v4245_v42  ;;  %v1656_v62 = vpop.f32.mrf.mxu0  ;;  %v4298_v63 = vld [vmem:[%s8053_s1 + $0x18e0] sm:$0xff]  ;;  %v4224_v42 = vld [vmem:[%s8053_s1 + $0x1690] sm:$0xff] }
 0x1e5   : > { %2817 = vmatpush2.msra.mxu0 %v4318_v8  ;;  %2969 = vmatpush1.msra.mxu1 %v4244_v39  ;;  %v7539_v49 = vadd.f32 %v1744_v33, %v6829_v3  ;;  %v1746_v21 = vadd.f32 %v1745_v60, %v1656_v62  ;;  %v4233_v3 = vld [vmem:[%s8053_s1 + $0x16d8] sm:$0xff]  ;;  %v4295_v8 = vld [vmem:[%s8053_s1 + $0x18c8] sm:$0xff]  ;;  %v2737_v33 = vrot.slane %v6899_v46, 4  ;;  %v2733_v62 = vrot.slane %v6909_v52, 4  ;;  %v4344_v46 = vld [vmem:[%s8053_s1 + $0x1a50] sm:$0xff] }
 0x1e6   : > { %2818 = vmatprep.subr.mxu0 %v4315_v1  ;;  %2970 = vmatprep.subr.mxu1 %v4241_v53  ;;  %v4348_v1 = vld [vmem:[%s8053_s1 + $0x1a70] sm:$0xff]  ;;  %v2736_v53 = vrot.slane %v6895_v40, 4  ;;  %v4290_v40 = vld [vmem:[%s8053_s1 + $0x18a0] sm:$0xff]  ;;  %v4287_v52 = vld [vmem:[%s8053_s1 + $0x1888] sm:$0xff] }
 0x1e7   : > { %2819 = vmatpush2.msra.mxu0 %v4314_v41  ;;  %2971 = vmatpush1.msra.mxu1 %v4240_v56  ;;  %v7554_v14 = vadd.f32 %v1746_v21, %v6844_v24  ;;  %v4229_v24 = vld [vmem:[%s8053_s1 + $0x16b8] sm:$0xff] }
 0x1e8   : > { %2820 = vmatprep.subr.mxu0 %v4311_v50  ;;  %2972 = vmatprep.subr.mxu1 %v4237_v28  ;;  %v1660_v55 = vpop.f32.mrf.mxu0  ;;  %v1749_v57 = vpop.f32.mrf.mxu1  ;;  %v4345_v56 = vld [vmem:[%s8053_s1 + $0x1a58] sm:$0xff]  ;;  %v2734_v50 = vrot.slane %v6913_v10, 4 }
 0x1e9   : > { %2821 = vmatpush2.msra.mxu0 %v4310_v43  ;;  %2973 = vmatpush1.msra.mxu1 %v4236_v19  ;;  %v1750_v26 = vadd.f32 %v1749_v57, %v1660_v55  ;;  %v4341_v10 = vld [vmem:[%s8053_s1 + $0x1a38] sm:$0xff] }
 0x1ea   : > { %2822 = vmatprep.subr.mxu0 %v4307_v45  ;;  %2974 = vmatprep.subr.mxu1 %v4233_v3  ;;  %v1662_v15 = vpop.f32.mrf.mxu0  ;;  %v1751_v37 = vpop.f32.mrf.mxu1  ;;  %v4286_v3 = vld [vmem:[%s8053_s1 + $0x1880] sm:$0xff]  ;;  %v7639_v55 = vsel %vm2732_vm4, %v2733_v62, %v2734_v50  ;;  %v4320_v62 = vld [vmem:[%s8053_s1 + $0x1990] sm:$0xff] }
 0x1eb   : > { %2823 = vmatpush2.msra.mxu0 %v4306_v35  ;;  %2975 = vmatpush1.msra.mxu1 %v4232_v12  ;;  %v7581_v32 = vadd.f32 %v1750_v26, %v6872_v59  ;;  %v1752_v34 = vadd.f32 %v1751_v37, %v1662_v15  ;;  %v4349_v59 = vld [vmem:[%s8053_s1 + $0x1a78] sm:$0xff]  ;;  %v7633_v35 = vsel %vm2732_vm4, %v2736_v53, %v2737_v33  ;;  %v4340_v12 = vld [vmem:[%s8053_s1 + $0x1a30] sm:$0xff]  ;;  %v2742_v26 = vrot.slane %v6964_v38, 4 }
 0x1ec   : > { %2824 = vmatprep.subr.mxu0 %v4303_v31  ;;  %2976 = vmatprep.subr.mxu1 %v4229_v24  ;;  %v4337_v31 = vld [vmem:[%s8053_s1 + $0x1a18] sm:$0xff]  ;;  %v4332_v38 = vld [vmem:[%s8053_s1 + $0x19f0] sm:$0xff] }
 0x1ed   : > { %2825 = vmatpush2.msra.mxu0 %v4302_v6  ;;  %2977 = vmatpush1.msra.mxu1 %v4228_v29  ;;  %v7596_v39 = vadd.f32 %v1752_v34, %v6886_v5  ;;  %v4291_v5 = vld [vmem:[%s8053_s1 + $0x18a8] sm:$0xff]  ;;  %v4401_v24 = vld [vmem:[%s8053_s1 + $0x1c18] sm:$0xff]  ;;  %v2746_v6 = vrot.slane %v6968_v54, 4  ;;  %v4396_v54 = vld [vmem:[%s8053_s1 + $0x1bf0] sm:$0xff]  ;;  %v7685_v34 = vrot.slane %v7000_v47, 4 }
 0x1ee   : > { %2826 = vmatprep.subr.mxu0 %v4299_v4  ;;  %2978 = vmatprep.subr.mxu1 %v4225_v2  ;;  %v1666_v60 = vpop.f32.mrf.mxu0  ;;  %v1755_v41 = vpop.f32.mrf.mxu1  ;;  %v4333_v29 = vld [vmem:[%s8053_s1 + $0x19f8] sm:$0xff]  ;;  %v7677_v4 = vsel %vm2732_vm4, %v2734_v50, %v2742_v26  ;;  %v4392_v47 = vld [vmem:[%s8053_s1 + $0x1bd0] sm:$0xff] }
 0x1ef   : > { %2827 = vmatpush2.msra.mxu0 %v4298_v63  ;;  %2979 = vmatpush1.msra.mxu1 %v4224_v42  ;;  %v1756_v28 = vadd.f32 %v1755_v41, %v1666_v60  ;;  %v4397_v15 = vld [vmem:[%s8053_s1 + $0x1bf8] sm:$0xff]  ;;  %v7682_v2 = vsel %vm2732_vm4, %v2740_v22, %v2746_v6  ;;  %v7702_v22 = vrot.slane %v7022_v17, 4  ;;  %v4384_v50 = vld [vmem:[%s8053_s1 + $0x1b90] sm:$0xff] }
 0x1f0   : > { %2828 = vmatprep.subr.mxu0 %v4295_v8  ;;  %2980 = vmatprep.subr.mxu1 %v4349_v59  ;;  %v1668_v21 = vpop.f32.mrf.mxu0  ;;  %v1757_v43 = vpop.f32.mrf.mxu1  ;;  %v4329_v63 = vld [vmem:[%s8053_s1 + $0x19d8] sm:$0xff]  ;;  %v7705_v8 = vrot.slane %v7028_v30, 4  ;;  %v4324_v30 = vld [vmem:[%s8053_s1 + $0x19b0] sm:$0xff] }
 0x1f1   : > { %2829 = vmatpush2.msra.mxu0 %v4294_v20  ;;  %2981 = vmatpush2.msra.mxu1 %v4348_v1  ;;  %v7627_v19 = vadd.f32 %v1756_v28, %v6930_v48  ;;  %v1758_v45 = vadd.f32 %v1757_v43, %v1668_v21  ;;  %v2744_v48 = vrot.slane %v6945_v13, 4  ;;  %v4336_v13 = vld [vmem:[%s8053_s1 + $0x1a10] sm:$0xff]  ;;  %v4393_v42 = vld [vmem:[%s8053_s1 + $0x1bd8] sm:$0xff]  ;;  %v7732_v60 = vsel %vm2732_vm4, %v2742_v26, %v7702_v22 }
 0x1f2   : > { %2830 = vmatprep.subr.mxu0 %v4291_v5  ;;  %2982 = vmatprep.subr.mxu1 %v4345_v56  ;;  %v4325_v59 = vld [vmem:[%s8053_s1 + $0x19b8] sm:$0xff]  ;;  %v4388_v1 = vld [vmem:[%s8053_s1 + $0x1bb0] sm:$0xff]  ;;  %v7736_v41 = vsel %vm2732_vm4, %v2746_v6, %v7705_v8 }
 0x1f3   : > { %2831 = vmatpush2.msra.mxu0 %v4290_v40  ;;  %2983 = vmatpush2.msra.mxu1 %v4344_v46  ;;  %v7643_v57 = vadd.f32 %v1758_v45, %v6948_v0  ;;  %v4400_v0 = vld [vmem:[%s8053_s1 + $0x1c10] sm:$0xff]  ;;  %v7668_v37 = vsel %vm2732_vm4, %v2737_v33, %v2744_v48  ;;  %v4389_v20 = vld [vmem:[%s8053_s1 + $0x1bb8] sm:$0xff]  ;;  %v7718_v17 = vsel %vm2732_vm4, %v2744_v48, %v7685_v34 }
 0x1f4   : > { %2832 = vmatprep.subr.mxu0 %v4287_v52  ;;  %2984 = vmatprep.subr.mxu1 %v4341_v10  ;;  %v7726_v53 = vpop.f32.mrf.mxu0  ;;  %v7728_v33 = vpop.f32.mrf.mxu1  ;;  %v4321_v5 = vld [vmem:[%s8053_s1 + $0x1998] sm:$0xff]  ;;  %v4316_v43 = vld [vmem:[%s8053_s1 + $0x1970] sm:$0xff] }
 0x1f5   : > { %2833 = vmatpush2.msra.mxu0 %v4286_v3  ;;  %2834 = vmatprep.mubr.f32.mxu0 %v7633_v35  ;;  %v4385_v56 = vld [vmem:[%s8053_s1 + $0x1b98] sm:$0xff]  ;;  %v4380_v52 = vld [vmem:[%s8053_s1 + $0x1b70] sm:$0xff] }
 0x1f6   : > { %2985 = vmatpush2.msra.mxu1 %v4340_v12  ;;  %2835 = vmatmul.mubr.f32.vlgmr.msra.gmra.mxu0 %v7639_v55  ;;  %v4317_v28 = vld [vmem:[%s8053_s1 + $0x1978] sm:$0xff]  ;;  %v7761_v46 = vpop.f32.mrf.mxu0  ;;  %v7763_v21 = vpop.f32.mrf.mxu1 }
 0x1f7   : > { %2986 = vmatprep.subr.mxu1 %v4337_v31  ;;  %3043 = vmatprep.subr.mxu0 %v4401_v24  ;;  %v4381_v40 = vld [vmem:[%s8053_s1 + $0x1b78] sm:$0xff] }
 0x1f8   : > { %2987 = vmatpush2.msra.mxu1 %v4336_v13  ;;  %3044 = vmatpush1.msra.mxu0 %v4400_v0  ;;  %v4313_v12 = vld [vmem:[%s8053_s1 + $0x1958] sm:$0xff]  ;;  %v4312_v13 = vld [vmem:[%s8053_s1 + $0x1950] sm:$0xff] }
 0x1f9   : > { %2988 = vmatprep.subr.mxu1 %v4333_v29  ;;  %3045 = vmatprep.subr.mxu0 %v4397_v15  ;;  %v4377_v48 = vld [vmem:[%s8053_s1 + $0x1b58] sm:$0xff]  ;;  %v4376_v0 = vld [vmem:[%s8053_s1 + $0x1b50] sm:$0xff] }
 0x1fa   : > { %2840 = vmatprep.mubr.f32.mxu0 %v7668_v37  ;;  %2929 = vmatprep.mubr.f32.mxu1 %v8058_v61  ;;  %v4309_v29 = vld [vmem:[%s8053_s1 + $0x1938] sm:$0xff] }
 0x1fb   : > { %2989 = vmatpush2.msra.mxu1 %v4332_v38  ;;  %3046 = vmatpush1.msra.mxu0 %v4396_v54  ;;  %v4373_v15 = vld [vmem:[%s8053_s1 + $0x1b38] sm:$0xff]  ;;  %v4372_v38 = vld [vmem:[%s8053_s1 + $0x1b30] sm:$0xff] }
 0x1fc   : > { %2841 = vmatmul.mubr.f32.gmra.mxu0 %v7677_v4  ;;  %4403 = vmatmul.mubr.msk.f32.gmra.mxu1 %vm640_vm1, %v7682_v2 }
 0x1fd   : > { %2990 = vmatprep.subr.mxu1 %v4329_v63  ;;  %3047 = vmatprep.subr.mxu0 %v4393_v42  ;;  %v4305_v63 = vld [vmem:[%s8053_s1 + $0x1918] sm:$0xff] }
 0x1fe   : > { %2991 = vmatpush2.msra.mxu1 %v4328_v44  ;;  %3048 = vmatpush1.msra.mxu0 %v4392_v47  ;;  %v4369_v42 = vld [vmem:[%s8053_s1 + $0x1b18] sm:$0xff] }
 0x1ff   : > { %2992 = vmatprep.subr.mxu1 %v4325_v59  ;;  %3049 = vmatprep.subr.mxu0 %v4389_v20  ;;  %v4304_v59 = vld [vmem:[%s8053_s1 + $0x1910] sm:$0xff] }
 0x200   : > { %2846 = vmatprep.mubr.f32.mxu0 %v7718_v17  ;;  %2935 = vmatprep.mubr.f32.mxu1 %v8058_v61 }
 0x201   : > { %2993 = vmatpush2.msra.mxu1 %v4324_v30  ;;  %3050 = vmatpush1.msra.mxu0 %v4388_v1  ;;  %v4301_v30 = vld [vmem:[%s8053_s1 + $0x18f8] sm:$0xff] }
 0x202   : > { %2847 = vmatmul.mubr.f32.gmra.mxu0 %v7732_v60  ;;  %4404 = vmatmul.mubr.msk.f32.gmra.mxu1 %vm640_vm1, %v7736_v41  ;;  %v4365_v1 = vld [vmem:[%s8053_s1 + $0x1af8] sm:$0xff] }
 0x203   : > { %2994 = vmatprep.subr.mxu1 %v4321_v5  ;;  %3051 = vmatprep.subr.mxu0 %v4385_v56 }
 0x204   : > { %2995 = vmatpush2.msra.mxu1 %v4320_v62  ;;  %3052 = vmatpush1.msra.mxu0 %v4384_v50  ;;  %v1832_v10 = vpop.f32.mrf.mxu1  ;;  %v1921_v45 = vpop.f32.mrf.mxu0  ;;  %v4300_v62 = vld [vmem:[%s8053_s1 + $0x18f0] sm:$0xff] }
 0x205   : > { %2996 = vmatprep.subr.mxu1 %v4317_v28  ;;  %3053 = vmatprep.subr.mxu0 %v4381_v40  ;;  %v1922_v3 = vadd.f32 %v1921_v45, %v1832_v10  ;;  %v4364_v50 = vld [vmem:[%s8053_s1 + $0x1af0] sm:$0xff] }
 0x206   : > { %2852 = vmatprep.mubr.f32.mxu0 %v7685_v34  ;;  %2941 = vmatprep.mubr.f32.mxu1 %v8058_v61  ;;  %v1834_v31 = vpop.f32.mrf.mxu1  ;;  %v1923_v24 = vpop.f32.mrf.mxu0  ;;  %v4296_v10 = vld [vmem:[%s8053_s1 + $0x18d0] sm:$0xff] }
 0x207   : > { %2997 = vmatpush2.msra.mxu1 %v4316_v43  ;;  %3054 = vmatpush1.msra.mxu0 %v4380_v52  ;;  %v7786_v26 = vadd.f32 %v1922_v3, %v7104_v25  ;;  %v1924_v6 = vadd.f32 %v1923_v24, %v1834_v31  ;;  %v4308_v25 = vld [vmem:[%s8053_s1 + $0x1930] sm:$0xff]  ;;  %v4297_v43 = vld [vmem:[%s8053_s1 + $0x18d8] sm:$0xff] }
 0x208   : > { %2853 = vmatmul.mubr.f32.gmra.mxu0 %v7702_v22  ;;  %4405 = vmatmul.mubr.msk.f32.gmra.mxu1 %vm640_vm1, %v7705_v8  ;;  %v4361_v52 = vld [vmem:[%s8053_s1 + $0x1ad8] sm:$0xff]  ;;  %v4292_v24 = vld [vmem:[%s8053_s1 + $0x18b0] sm:$0xff] }
 0x209   : > { %8061 = vst [vmem:[#allocation2_spill] sm:$0xff] %v7786_v26  ;;  %2998 = vmatprep.subr.mxu1 %v4313_v12  ;;  %3055 = vmatprep.subr.mxu0 %v4377_v48  ;;  %v7804_v54 = vadd.f32 %v1924_v6, %v7122_v23  ;;  %v4368_v23 = vld [vmem:[%s8053_s1 + $0x1b10] sm:$0xff]  ;;  %v4293_v3 = vld [vmem:[%s8053_s1 + $0x18b8] sm:$0xff]  ;;  %v1762_v26 = vadd.f32 %v7728_v33, %v7726_v53 }
 0x20a   : > { %2999 = vmatpush2.msra.mxu1 %v4312_v13  ;;  %3056 = vmatpush1.msra.mxu0 %v4376_v0  ;;  %v1838_v44 = vpop.f32.mrf.mxu1  ;;  %v1927_v47 = vpop.f32.mrf.mxu0  ;;  %v4357_v12 = vld [vmem:[%s8053_s1 + $0x1ab8] sm:$0xff] }
 0x20b   : > { %8062 = vst [vmem:[#allocation3_spill] sm:$0xff] %v7804_v54  ;;  %3000 = vmatprep.subr.mxu1 %v4309_v29  ;;  %3057 = vmatprep.subr.mxu0 %v4373_v15  ;;  %v1928_v20 = vadd.f32 %v1927_v47, %v1838_v44  ;;  %v4289_v0 = vld [vmem:[%s8053_s1 + $0x1898] sm:$0xff]  ;;  %v1764_v54 = vadd.f32 %v7763_v21, %v7761_v46 }
 0x20c   : > { %3001 = vmatpush2.msra.mxu1 %v4308_v25  ;;  %3058 = vmatpush1.msra.mxu0 %v4372_v38  ;;  %v1840_v5 = vpop.f32.mrf.mxu1  ;;  %v1929_v56 = vpop.f32.mrf.mxu0  ;;  %v4353_v6 = vld [vmem:[%s8053_s1 + $0x1a98] sm:$0xff]  ;;  %v4288_v25 = vld [vmem:[%s8053_s1 + $0x1890] sm:$0xff] }
 0x20d   : > { %3002 = vmatprep.subr.mxu1 %v4305_v63  ;;  %3059 = vmatprep.subr.mxu0 %v4369_v42  ;;  %v7831_v28 = vadd.f32 %v1928_v20, %v7150_v11  ;;  %v1930_v40 = vadd.f32 %v1929_v56, %v1840_v5  ;;  %v4360_v11 = vld [vmem:[%s8053_s1 + $0x1ad0] sm:$0xff]  ;;  %v1957_v53 = vadd.f32 %v1764_v54, %v7005_v9 }
 0x20e   : > { %3003 = vmatpush2.msra.mxu1 %v4304_v59  ;;  %3060 = vmatpush1.msra.mxu0 %v4368_v23  ;;  %v4352_v42 = vld [vmem:[%s8053_s1 + $0x1a90] sm:$0xff] }
 0x20f   : > { %8063 = vst [vmem:[#allocation4_spill] sm:$0xff] %v7831_v28  ;;  %3004 = vmatprep.subr.mxu1 %v4301_v30  ;;  %3061 = vmatprep.subr.mxu0 %v4365_v1  ;;  %v7846_v45 = vadd.f32 %v1930_v40, %v7164_v18  ;;  %v4356_v18 = vld [vmem:[%s8053_s1 + $0x1ab0] sm:$0xff] }
 0x210   : > { %3005 = vmatpush2.msra.mxu1 %v4300_v62  ;;  %3062 = vmatpush1.msra.mxu0 %v4364_v50  ;;  %v1844_v48 = vpop.f32.mrf.mxu1  ;;  %v1933_v31 = vpop.f32.mrf.mxu0 }
 0x211   : > { %8064 = vst [vmem:[#allocation5_spill] sm:$0xff] %v7846_v45  ;;  %3006 = vmatprep.subr.mxu1 %v4297_v43  ;;  %3063 = vmatprep.subr.mxu0 %v4361_v52  ;;  %v1934_v13 = vadd.f32 %v1933_v31, %v1844_v48 }
 0x212   : > { %3007 = vmatpush2.msra.mxu1 %v4296_v10  ;;  %3064 = vmatpush1.msra.mxu0 %v4360_v11  ;;  %v1846_v29 = vpop.f32.mrf.mxu1  ;;  %v1935_v15 = vpop.f32.mrf.mxu0 }
 0x213   : > { %3008 = vmatprep.subr.mxu1 %v4293_v3  ;;  %3065 = vmatprep.subr.mxu0 %v4357_v12  ;;  %v7870_v38 = vadd.f32 %v1934_v13, %v7189_v36  ;;  %v1936_v63 = vadd.f32 %v1935_v15, %v1846_v29 }
 0x214   : > { %3009 = vmatpush2.msra.mxu1 %v4292_v24  ;;  %3066 = vmatpush1.msra.mxu0 %v4356_v18 }
 0x215   : > { %8065 = vst [vmem:[#allocation6_spill] sm:$0xff] %v7870_v38  ;;  %3010 = vmatprep.subr.mxu1 %v4289_v0  ;;  %3067 = vmatprep.subr.mxu0 %v4353_v6  ;;  %v7876_v44 = vadd.f32 %v1936_v63, %v7194_v16 }
 0x216   : > { %3011 = vmatpush2.msra.mxu1 %v4288_v25  ;;  %3012 = vmatprep.mubr.f32.mxu1 %v7633_v35  ;;  %v1850_v47 = vpop.f32.mrf.mxu1  ;;  %v1939_v59 = vpop.f32.mrf.mxu0 }
 0x217   : > { %8066 = vst [vmem:[#allocation7_spill] sm:$0xff] %v7876_v44  ;;  %3068 = vmatpush1.msra.mxu0 %v4352_v42  ;;  %3101 = vmatprep.mubr.f32.mxu0 %v8058_v61  ;;  %v1940_v36 = vadd.f32 %v1939_v59, %v1850_v47  ;;  %v3144_v42 = vlaneseq }
 0x218   : > { %3013 = vmatmul.mubr.f32.vlgmr.msra.gmra.mxu1 %v7639_v55  ;;  %4406 = vmatmul.mubr.msk.f32.vlgmr.msra.gmra.mxu0 %vm640_vm1, %v7386_v27  ;;  %v1852_v23 = vpop.f32.mrf.mxu1  ;;  %v1941_v20 = vpop.f32.mrf.mxu0 }
 0x219   : > { %3018 = vmatprep.mubr.f32.mxu1 %v7668_v37  ;;  %3107 = vmatprep.mubr.f32.mxu0 %v8058_v61  ;;  %v7886_v16 = vadd.f32 %v1940_v36, %v7221_v58  ;;  %v1942_v35 = vadd.f32 %v1941_v20, %v1852_v23  ;;  %v7942_v20 = vshrl.u32 %v3144_v42, 7 }
 0x21b   : > { %8067 = vst [vmem:[#allocation8_spill] sm:$0xff] %v7886_v16  ;;  %v7889_v30 = vadd.f32 %v1942_v35, %v7229_v51  ;;  %v3146_v28 = vsub.s32 0, %v7942_v20  ;;  %v3150_v42 = vsub.s32 1, %v7942_v20  ;;  %v1956_v16 = vadd.f32 %v1762_v26, %v6983_v7 }
 0x21c   : > { %3019 = vmatmul.mubr.f32.gmra.mxu1 %v7677_v4  ;;  %4407 = vmatmul.mubr.msk.f32.gmra.mxu0 %vm640_vm1, %v7682_v2 }
 0x21d   : > { %8068 = vst [vmem:[#allocation9_spill] sm:$0xff] %v7889_v30  ;;  %3024 = vmatprep.mubr.f32.mxu1 %v7718_v17  ;;  %3113 = vmatprep.mubr.f32.mxu0 %v8058_v61 }
 0x220   : > { %3025 = vmatmul.mubr.f32.gmra.mxu1 %v7732_v60  ;;  %4408 = vmatmul.mubr.msk.f32.gmra.mxu0 %vm640_vm1, %v7736_v41 }
 0x221   : > { %3030 = vmatprep.mubr.f32.mxu1 %v7685_v34  ;;  %3119 = vmatprep.mubr.f32.mxu0 %v8058_v61 }
 0x224   : > { %3031 = vmatmul.mubr.f32.gmra.mxu1 %v7702_v22  ;;  %4409 = vmatmul.mubr.msk.f32.gmra.mxu0 %vm640_vm1, %v7705_v8 }
 0x225   : > { %3266 = vmatprep.mubr.f32.mxu0 %v8058_v61  ;;  %3343 = vmatprep.mubr.f32.mxu1 %v8058_v61 }
 0x226   : > { %v7908_v51 = vpop.f32.mrf.mxu1 }
 0x228   : > { %v2336_v55 = vpop.f32.mrf.mxu1 }
 0x24c   : > { %v7906_v58 = vpop.f32.mrf.mxu0 }
 0x24e   : > { %v2247_v27 = vpop.f32.mrf.mxu0 }
 0x252   : > { %v2251_v37 = vpop.f32.mrf.mxu0  ;;  %v2340_v4 = vpop.f32.mrf.mxu1 }
 0x254   : > { %v2253_v2 = vpop.f32.mrf.mxu0  ;;  %v2342_v34 = vpop.f32.mrf.mxu1 }
 0x258   : > { %v2257_v17 = vpop.f32.mrf.mxu0  ;;  %v2346_v60 = vpop.f32.mrf.mxu1 }
 0x259   : > { %v2347_v33 = vadd.f32 %v2346_v60, %v2257_v17 }
 0x25a   : > { %v2259_v22 = vpop.f32.mrf.mxu0  ;;  %v2348_v41 = vpop.f32.mrf.mxu1 }
 0x25b   : > { %v2349_v30 = vadd.f32 %v2348_v41, %v2259_v22 }
 0x25d   : > { %v2544_v7 = vadd.f32 %v2349_v30, %v7643_v57 }
 0x25e   : > { %v2263_v1 = vpop.f32.mrf.mxu0  ;;  %v2352_v8 = vpop.f32.mrf.mxu1 }
 0x260   : > { %v2265_v5 = vpop.f32.mrf.mxu0  ;;  %v2354_v56 = vpop.f32.mrf.mxu1 }
 0x261   : > { %v2355_v44 = vadd.f32 %v2354_v56, %v2265_v5 }
 0x263   : > { %v2548_v26 = vadd.f32 %v2355_v44, %v1957_v53 }
 0x26e   : > { %v7910_v62 = vpop.f32.mrf.mxu1  ;;  %v7912_v50 = vpop.f32.mrf.mxu0 }
 0x26f   : > { %8069 = vst [vmem:[#allocation10_spill] sm:$0xff] %v7910_v62  ;;  %8070 = vst [vmem:[#allocation11_spill] sm:$0xff] %v7912_v50  ;;  %v7952_v50 = vld [vmem:[%s8054_s2] sm:$0xf]  ;;  %v2353_v62 = vadd.f32 %v2352_v8, %v2263_v1 }
 0x270   : > { %v7914_v40 = vpop.f32.mrf.mxu1  ;;  %v7916_v43 = vpop.f32.mrf.mxu0  ;;  %v3147_v46 = vrot.slane %v7952_v50, %v3146_v28  ;;  %v2335_v28 = vadd.f32 %v7908_v51, %v7906_v58 }
 0x271   : > { %8071 = vst [vmem:[#allocation12_spill] sm:$0xff] %v7914_v40  ;;  %8072 = vst [vmem:[#allocation13_spill] sm:$0xff] %v7916_v43 }
 0x272   : > { %v2535_v58 = vadd.f32 %v2335_v28, %v7539_v49  ;;  %v7972_v49 = vld [vmem:[%s8055_s3] sm:$0xff] }
 0x274   : > { %v7918_v52 = vpop.f32.mrf.mxu1  ;;  %v7920_v10 = vpop.f32.mrf.mxu0 }
 0x275   : > { %8073 = vst [vmem:[#allocation14_spill] sm:$0xff] %v7918_v52  ;;  %8074 = vst [vmem:[#allocation15_spill] sm:$0xff] %v7920_v10  ;;  %v2343_v52 = vadd.f32 %v2342_v34, %v2253_v2  ;;  %v2543_v2 = vadd.f32 %v2347_v33, %v7627_v19 }
 0x276   : > { %v7922_v11 = vpop.f32.mrf.mxu1  ;;  %v7924_v3 = vpop.f32.mrf.mxu0 }
 0x277   : > { %8075 = vst [vmem:[#allocation16_spill] sm:$0xff] %v7922_v11  ;;  %8076 = vst [vmem:[#allocation17_spill] sm:$0xff] %v7924_v3  ;;  %v3151_v3 = vrot.slane %v7952_v50, %v3150_v42  ;;  %v2337_v11 = vadd.f32 %v2336_v55, %v2247_v27  ;;  %v2540_v34 = vadd.f32 %v2343_v52, %v7596_v39 }
 0x279   : > { %v2536_v57 = vadd.f32 %v2337_v11, %v7554_v14  ;;  %v7982_v11 = vld [vmem:[%s8055_s3 + $0x8] sm:$0x1f] }
 0x27a   : > { %v7926_v12 = vpop.f32.mrf.mxu1  ;;  %v7928_v48 = vpop.f32.mrf.mxu0 }
 0x27b   : > { %8077 = vst [vmem:[#allocation18_spill] sm:$0xff] %v7926_v12  ;;  %8078 = vst [vmem:[#allocation19_spill] sm:$0xff] %v7928_v48  ;;  %v2341_v48 = vadd.f32 %v2340_v4, %v2251_v37  ;;  %v2547_v12 = vadd.f32 %v2353_v62, %v1956_v16 }
 0x27c   : > { %v7930_v31 = vpop.f32.mrf.mxu1  ;;  %v7932_v24 = vpop.f32.mrf.mxu0  ;;  %v8087_v28 = vld [vmem:[#allocation15_spill] sm:$0xff] }
 0x27d   : > { %v2527_v42 = vadd.f32 %v7932_v24, %v7930_v31  ;;  %v8084_v31 = vld [vmem:[#allocation12_spill] sm:$0xff]  ;;  %v8085_v24 = vld [vmem:[#allocation13_spill] sm:$0xff] }
 0x280   : > { %v7934_v18 = vpop.f32.mrf.mxu1  ;;  %v7936_v13 = vpop.f32.mrf.mxu0 }
 0x282   : > { %v7938_v0 = vpop.f32.mrf.mxu1  ;;  %v7940_v6 = vpop.f32.mrf.mxu0  ;;  %v8080_v33 = vld [vmem:[#allocation18_spill] sm:$0xff] }
 0x283   : > { %v2533_v53 = vadd.f32 %v7940_v6, %v7938_v0  ;;  %v2515_v0 = vadd.f32 %v8085_v24, %v8084_v31  ;;  %v8086_v6 = vld [vmem:[#allocation14_spill] sm:$0xff] }
 0x290   : > { %v2925_v29 = vpop.f32.mrf.mxu1 }
 0x292   : > { %v2927_v63 = vpop.f32.mrf.mxu1 }
 0x2b6   : > { %v2836_v15 = vpop.f32.mrf.mxu0 }
 0x2b7   : > { %v2926_v37 = vadd.f32 %v2925_v29, %v2836_v15  ;;  %v7990_v15 = vld [vmem:[%s8056_s4] sm:$0xff] }
 0x2b8   : > { %v2838_v25 = vpop.f32.mrf.mxu0 }
 0x2b9   : > { %v2928_v27 = vadd.f32 %v2927_v63, %v2838_v25  ;;  %v3126_v60 = vadd.f32 %v2926_v37, %v2535_v58 }
 0x2bb   : > { %v3127_v17 = vadd.f32 %v2928_v27, %v2536_v57  ;;  %v3164_v56 = vadd.f32 %v3147_v46, %v3126_v60  ;;  %v8094_v60 = vld [vmem:[#allocation5_spill] sm:$0xff] }
 0x2bc   : > { %v2842_v47 = vpop.f32.mrf.mxu0  ;;  %v2931_v59 = vpop.f32.mrf.mxu1 }
 0x2bd   : > { %v3165_v14 = vadd.f32 %v3151_v3, %v3127_v17 }
 0x2be   : > { %v2844_v36 = vpop.f32.mrf.mxu0  ;;  %v2933_v23 = vpop.f32.mrf.mxu1 }
 0x2bf   : > { %v2934_v9 = vadd.f32 %v2933_v23, %v2844_v36 }
 0x2c1   : > { %v3131_v44 = vadd.f32 %v2934_v9, %v2540_v34 }
 0x2c2   : > { %v2848_v35 = vpop.f32.mrf.mxu0  ;;  %v2937_v61 = vpop.f32.mrf.mxu1 }
 0x2c3   : > { %v2938_v1 = vadd.f32 %v2937_v61, %v2848_v35  ;;  %v2539_v61 = vadd.f32 %v2341_v48, %v7581_v32  ;;  %v3169_v32 = vadd.f32 %v3151_v3, %v3131_v44  ;;  %v8001_v35 = vld [vmem:[%s8056_s4 + $0x8] sm:$0x1f]  ;;  %v8091_v44 = vld [vmem:[#allocation10_spill] sm:$0xff] }
 0x2c4   : > { %v2850_v45 = vpop.f32.mrf.mxu0  ;;  %v2939_v38 = vpop.f32.mrf.mxu1 }
 0x2c5   : > { %v2940_v43 = vadd.f32 %v2939_v38, %v2850_v45  ;;  %v2932_v45 = vadd.f32 %v2931_v59, %v2842_v47  ;;  %v3134_v4 = vadd.f32 %v2938_v1, %v2543_v2  ;;  %v3158_v47 = vsub.s32 3, %v7942_v20 }
 0x2c6   : > { %v2531_v59 = vadd.f32 %v7936_v13, %v7934_v18  ;;  %v3154_v18 = vsub.s32 2, %v7942_v20  ;;  %v2519_v2 = vadd.f32 %v8087_v28, %v8086_v6 }
 0x2c7   : > { %v3135_v55 = vadd.f32 %v2940_v43, %v2544_v7  ;;  %v3130_v51 = vadd.f32 %v2932_v45, %v2539_v61  ;;  %v3172_v8 = vadd.f32 %v3147_v46, %v3134_v4  ;;  %v8088_v45 = vld [vmem:[#allocation8_spill] sm:$0xff]  ;;  %v8090_v61 = vld [vmem:[#allocation9_spill] sm:$0xff] }
 0x2c8   : > { %v2854_v21 = vpop.f32.mrf.mxu0  ;;  %v2943_v10 = vpop.f32.mrf.mxu1  ;;  %v2549_v20 = vadd.f32 %v2531_v59, %v8088_v45  ;;  %v2550_v37 = vadd.f32 %v2533_v53, %v8090_v61 }
 0x2c9   : > { %v2944_v40 = vadd.f32 %v2943_v10, %v2854_v21  ;;  %v3173_v39 = vadd.f32 %v3151_v3, %v3135_v55  ;;  %v3168_v5 = vadd.f32 %v3147_v46, %v3130_v51  ;;  %v8079_v10 = vmov 0.0   ;;  %v8089_v55 = vld [vmem:[#allocation7_spill] sm:$0xff]  ;;  %v8093_v51 = vld [vmem:[#allocation6_spill] sm:$0xff] }
 0x2ca   : > { %v2856_v22 = vpop.f32.mrf.mxu0  ;;  %v2945_v41 = vpop.f32.mrf.mxu1 }
 0x2cb   : > { %v2946_v54 = vadd.f32 %v2945_v41, %v2856_v22  ;;  %v3138_v38 = vadd.f32 %v2944_v40, %v2547_v12  ;;  %v8082_v22 = vld [vmem:[#allocation16_spill] sm:$0xff]  ;;  %v8083_v41 = vld [vmem:[#allocation17_spill] sm:$0xff] }
 0x2cc   : > { %v2521_v7 = vadd.f32 %v8083_v41, %v8082_v22 }
 0x2cd   : > { %v3139_v16 = vadd.f32 %v2946_v54, %v2548_v26  ;;  %v3176_v19 = vadd.f32 %v3147_v46, %v3138_v38  ;;  %v8081_v46 = vld [vmem:[#allocation19_spill] sm:$0xff]  ;;  %v3159_v54 = vrot.slane %v7952_v50, %v3158_v47  ;;  %v3155_v47 = vrot.slane %v7952_v50, %v3154_v18 }
 0x2ce   : > { %v2525_v21 = vadd.f32 %v8081_v46, %v8080_v33 }
 0x2cf   : > { %v3177_v30 = vadd.f32 %v3151_v3, %v3139_v16  ;;  %v2546_v16 = vadd.f32 %v2527_v42, %v8089_v55  ;;  %v8097_v42 = vld [vmem:[#allocation2_spill] sm:$0xff] }
 0x2d1   : > { %4410 = vmatprep.subr.msk.mxu0 %vm3189_vm5, %v3177_v30 }
 0x2d2   : > { %4411 = vmatpush1.msk.msra.mxu0 %vm3189_vm5, %v3176_v19 }
 0x2d3   : > { %3228 = vmatprep.subr.mxu0 %v3173_v39 }
 0x2d4   : > { %3229 = vmatpush1.msra.mxu0 %v3172_v8 }
 0x2d5   : > { %3230 = vmatprep.subr.mxu0 %v3169_v32 }
 0x2d6   : > { %3231 = vmatpush1.msra.mxu0 %v3168_v5 }
 0x2d7   : > { %3232 = vmatprep.subr.mxu0 %v3165_v14 }
 0x2d8   : > { %v3014_v62 = vpop.f32.mrf.mxu1  ;;  %v3103_v40 = vpop.f32.mrf.mxu0  ;;  %3233 = vmatpush1.msra.mxu0 %v3164_v56 }
 0x2d9   : > { %4418 = vmatprep.subr.msk.mxu0 %vm3189_vm5, %v3177_v30  ;;  %4412 = vmatmul.mubr.msk.f32.vlgmr.msra.gmra.mxu0 %vm3182_vm6, %v7972_v49  ;;  %v8092_v30 = vld [vmem:[#allocation11_spill] sm:$0xff] }
 0x2da   : > { %v3016_v43 = vpop.f32.mrf.mxu1  ;;  %v3105_v52 = vpop.f32.mrf.mxu0  ;;  %4419 = vmatpush1.msk.msra.mxu0 %vm3189_vm5, %v3176_v19  ;;  %3272 = vmatprep.mubr.f32.mxu0 %v8079_v10  ;;  %v2513_v58 = vadd.f32 %v8092_v30, %v8091_v44  ;;  %v2545_v19 = vadd.f32 %v2525_v21, %v8093_v51 }
 0x2db   : > { %3390 = vmatprep.subr.mxu0 %v3173_v39 }
 0x2dc   : > { %v3020_v3 = vpop.f32.mrf.mxu1  ;;  %v3109_v12 = vpop.f32.mrf.mxu0  ;;  %3391 = vmatpush1.msra.mxu0 %v3172_v8  ;;  %v2542_v8 = vadd.f32 %v2521_v7, %v8094_v60  ;;  %v2537_v53 = vadd.f32 %v2513_v58, %v8097_v42 }
 0x2dd   : > { %3392 = vmatprep.subr.mxu0 %v3169_v32  ;;  %4413 = vmatmul.mubr.msk.f32.gmra.mxu0 %vm3182_vm6, %v7982_v11  ;;  %v3110_v17 = vadd.f32 %v3109_v12, %v3020_v3  ;;  %v3106_v32 = vadd.f32 %v3105_v52, %v3016_v43 }
 0x2de   : > { %v3022_v48 = vpop.f32.mrf.mxu1  ;;  %v3111_v29 = vpop.f32.mrf.mxu0  ;;  %3393 = vmatpush1.msra.mxu0 %v3168_v5  ;;  %3428 = vmatprep.mubr.f32.mxu0 %v8079_v10 }
 0x2df   : > { %3394 = vmatprep.subr.mxu0 %v3165_v14  ;;  %v3112_v4 = vadd.f32 %v3111_v29, %v3022_v48  ;;  %v8096_v48 = vld [vmem:[#allocation3_spill] sm:$0xff] }
 0x2e0   : > { %v3026_v25 = vpop.f32.mrf.mxu1  ;;  %v3115_v63 = vpop.f32.mrf.mxu0  ;;  %3395 = vmatpush1.msra.mxu0 %v3164_v56  ;;  %v8095_v56 = vld [vmem:[#allocation4_spill] sm:$0xff]  ;;  %v2538_v29 = vadd.f32 %v2515_v0, %v8096_v48 }
 0x2e1   : > { %4420 = vmatmul.mubr.msk.f32.vlgmr.msra.gmra.mxu0 %vm3182_vm6, %v7990_v15  ;;  %v3116_v38 = vadd.f32 %v3115_v63, %v3026_v25  ;;  %v2541_v25 = vadd.f32 %v2519_v2, %v8095_v56  ;;  %v3104_v63 = vadd.f32 %v3103_v40, %v3014_v62 }
 0x2e2   : > { %v3028_v36 = vpop.f32.mrf.mxu1  ;;  %v3117_v23 = vpop.f32.mrf.mxu0  ;;  %3434 = vmatprep.mubr.f32.mxu0 %v8079_v10  ;;  %v3129_v12 = vadd.f32 %v3106_v32, %v2538_v29 }
 0x2e3   : > { %v3118_v26 = vadd.f32 %v3117_v23, %v3028_v36  ;;  %v3136_v59 = vadd.f32 %v3116_v38, %v2545_v19  ;;  %v3133_v36 = vadd.f32 %v3112_v4, %v2542_v8  ;;  %v3132_v33 = vadd.f32 %v3110_v17, %v2541_v25 }
 0x2e4   : > { %v3032_v13 = vpop.f32.mrf.mxu1  ;;  %v3121_v1 = vpop.f32.mrf.mxu0  ;;  %v3128_v52 = vadd.f32 %v3104_v63, %v2537_v53  ;;  %v3167_v40 = vadd.f32 %v3159_v54, %v3129_v12 }
 0x2e5   : > { %v3122_v9 = vadd.f32 %v3121_v1, %v3032_v13  ;;  %4421 = vmatmul.mubr.msk.f32.gmra.mxu0 %vm3182_vm6, %v8001_v35  ;;  %v3137_v5 = vadd.f32 %v3118_v26, %v2546_v16  ;;  %v3174_v46 = vadd.f32 %v3155_v47, %v3136_v59  ;;  %v3171_v62 = vadd.f32 %v3159_v54, %v3133_v36 }
 0x2e6   : > { %v3034_v34 = vpop.f32.mrf.mxu1  ;;  %v3123_v27 = vpop.f32.mrf.mxu0  ;;  %v3170_v50 = vadd.f32 %v3155_v47, %v3132_v33  ;;  %v3166_v21 = vadd.f32 %v3155_v47, %v3128_v52 }
 0x2e7   : > { %v3124_v57 = vadd.f32 %v3123_v27, %v3034_v34  ;;  %v3140_v39 = vadd.f32 %v3122_v9, %v2549_v20  ;;  %v3175_v43 = vadd.f32 %v3159_v54, %v3137_v5 }
 0x2e9   : > { %v3141_v14 = vadd.f32 %v3124_v57, %v2550_v37  ;;  %v3178_v3 = vadd.f32 %v3155_v47, %v3140_v39 }
 0x2eb   : > { %v3179_v23 = vadd.f32 %v3159_v54, %v3141_v14 }
 0x2ed   : > { %4414 = vmatprep.subr.msk.mxu1 %vm3189_vm5, %v3179_v23 }
 0x2ee   : > { %4415 = vmatpush1.msk.msra.mxu1 %vm3189_vm5, %v3178_v3 }
 0x2ef   : > { %3305 = vmatprep.subr.mxu1 %v3175_v43 }
 0x2f0   : > { %3306 = vmatpush1.msra.mxu1 %v3174_v46 }
 0x2f1   : > { %3307 = vmatprep.subr.mxu1 %v3171_v62 }
 0x2f2   : > { %3308 = vmatpush1.msra.mxu1 %v3170_v50 }
 0x2f3   : > { %3309 = vmatprep.subr.mxu1 %v3167_v40 }
 0x2f4   : > { %3310 = vmatpush1.msra.mxu1 %v3166_v21 }
 0x2f5   : > { %4416 = vmatmul.mubr.msk.f32.vlgmr.msra.gmra.mxu1 %vm3182_vm6, %v7972_v49  ;;  %4422 = vmatprep.subr.msk.mxu1 %vm3189_vm5, %v3179_v23 }
 0x2f6   : > { %4423 = vmatpush1.msk.msra.mxu1 %vm3189_vm5, %v3178_v3  ;;  %3349 = vmatprep.mubr.f32.mxu1 %v8079_v10 }
 0x2f7   : > { %3467 = vmatprep.subr.mxu1 %v3175_v43 }
 0x2f8   : > { %3468 = vmatpush1.msra.mxu1 %v3174_v46 }
 0x2f9   : > { %4417 = vmatmul.mubr.msk.f32.gmra.mxu1 %vm3182_vm6, %v7982_v11  ;;  %3469 = vmatprep.subr.mxu1 %v3171_v62 }
 0x2fa   : > { %3470 = vmatpush1.msra.mxu1 %v3170_v50  ;;  %3505 = vmatprep.mubr.f32.mxu1 %v8079_v10 }
 0x2fb   : > { %3471 = vmatprep.subr.mxu1 %v3167_v40 }
 0x2fc   : > { %3472 = vmatpush1.msra.mxu1 %v3166_v21 }
 0x2fd   : > { %4424 = vmatmul.mubr.msk.f32.vlgmr.msra.gmra.mxu1 %vm3182_vm6, %v7990_v15 }
 0x2fe   : > { %3511 = vmatprep.mubr.f32.mxu1 %v8079_v10 }
 0x301   : > { %4425 = vmatmul.mubr.msk.f32.gmra.mxu1 %vm3182_vm6, %v8001_v35 }
 0x399   : > { %v3268_v49 = vpop.f32.mrf.mxu0 }
 0x39b   : > { %v3270_v18 = vpop.f32.mrf.mxu0 }
 0x39d   : > { %v3274_v13 = vpop.f32.mrf.mxu0 }
 0x39f   : > { %v3276_v1 = vpop.f32.mrf.mxu0 }
 0x3a1   : > { %v3430_v22 = vpop.f32.mrf.mxu0 }
 0x3a2   : > { %v3518_v11 = vmax.f32 %v3268_v49, %v3430_v22 }
 0x3a3   : > { %v3432_v41 = vpop.f32.mrf.mxu0 }
 0x3a4   : > { %v3519_v7 = vmax.f32 %v3270_v18, %v3432_v41 }
 0x3a5   : > { %v3436_v26 = vpop.f32.mrf.mxu0 }
 0x3a6   : > { %v3522_v9 = vmax.f32 %v3274_v13, %v3436_v26  ;;  %3532 = vrot.lane.b32.xlu0 %v3519_v7, %s4493_s30 }
 0x3a7   : > { %v3438_v54 = vpop.f32.mrf.mxu0 }
 0x3a8   : > { %v3523_v31 = vmax.f32 %v3276_v1, %v3438_v54 }
 0x3aa   : > { %3538 = vrot.lane.b32.xlu1 %v3523_v31, %s4493_s30 }
 0x3b5   : > { %v3345_v15 = vpop.f32.mrf.mxu1 }
 0x3b7   : > { %v3347_v10 = vpop.f32.mrf.mxu1 }
 0x3b9   : > { %v3351_v24 = vpop.f32.mrf.mxu1 }
 0x3bb   : > { %v3353_v0 = vpop.f32.mrf.mxu1 }
 0x3bd   : > { %v3507_v35 = vpop.f32.mrf.mxu1 }
 0x3be   : > { %v3520_v6 = vmax.f32 %v3345_v15, %v3507_v35 }
 0x3bf   : > { %v3509_v28 = vpop.f32.mrf.mxu1 }
 0x3c0   : > { %v3521_v2 = vmax.f32 %v3347_v10, %v3509_v28  ;;  %3534 = vrot.lane.b32.xlu0 %v3520_v6, %s4493_s30 }
 0x3c1   : > { %v3513_v45 = vpop.f32.mrf.mxu1 }
 0x3c2   : > { %v3524_v20 = vmax.f32 %v3351_v24, %v3513_v45  ;;  %3536 = vrot.lane.b32.xlu1 %v3521_v2, %s4493_s30 }
 0x3c3   : > { %v3515_v38 = vpop.f32.mrf.mxu1 }
 0x3c4   : > { %v3525_v34 = vmax.f32 %v3353_v0, %v3515_v38  ;;  %3540 = vrot.lane.b32.xlu0 %v3524_v20, %s4493_s30 }
 0x3c6   : > { %3542 = vrot.lane.b32.xlu1 %v3525_v34, %s4493_s30 }
 0x418   : > { %v3533_v27 = vpop.permute.xlu0 %3532 }
 0x41c   : > { %v3539_v55 = vpop.permute.xlu1 %3538 }
 0x432   : > { %v3535_v16 = vpop.permute.xlu0 %3534 }
 0x433   : > { %v3545_v61 = vsel %vm3544_vm7, %v3533_v27, %v3535_v16 }
 0x434   : > { %v3553_v37 = vmax.f32 %v3518_v11, %v3545_v61  ;;  %v3537_v4 = vpop.permute.xlu1 %3536 }
 0x435   : > { %v3546_v57 = vsel %vm3544_vm7, %v3535_v16, %v3537_v4 }
 0x436   : > { %v4426_v44 = vmul.f32 -1.442695, %v3553_v37  ;;  %v3554_v30 = vmax.f32 %v3519_v7, %v3546_v57  ;;  %v3541_v58 = vpop.permute.xlu0 %3540 }
 0x437   : > { %v3547_v51 = vsel %vm3544_vm7, %v3539_v55, %v3541_v58 }
 0x438   : > { %4444 = vpow2.f32 %v4426_v44  ;;  %v4427_v19 = vmul.f32 -1.442695, %v3554_v30  ;;  %v3555_v17 = vmax.f32 %v3522_v9, %v3547_v51  ;;  %v3543_v39 = vpop.permute.xlu1 %3542 }
 0x439   : > { %v3548_v60 = vsel %vm3544_vm7, %v3541_v58, %v3543_v39 }
 0x43a   : > { %4446 = vpow2.f32 %v4427_v19  ;;  %v4428_v8 = vmul.f32 -1.442695, %v3555_v17  ;;  %v3556_v32 = vmax.f32 %v3523_v31, %v3548_v60 }
 0x43c   : > { %4448 = vpow2.f32 %v4428_v8  ;;  %v4429_v5 = vmul.f32 -1.442695, %v3556_v32 }
 0x43e   : > { %4450 = vpow2.f32 %v4429_v5 }
 0x445   : > { %v4445_v14 = vpop.eup %4444 }
 0x446   : > { %v3569_v56 = vadd.f32 1.0, %v4445_v14 }
 0x447   : > { %v4447_v25 = vpop.eup %4446 }
 0x448   : > { %4452 = vrcp.f32 %v3569_v56  ;;  %v3570_v63 = vadd.f32 1.0, %v4447_v25 }
 0x449   : > { %v4449_v47 = vpop.eup %4448 }
 0x44a   : > { %4454 = vrcp.f32 %v3570_v63  ;;  %v3571_v59 = vadd.f32 1.0, %v4449_v47 }
 0x44b   : > { %v4451_v48 = vpop.eup %4450 }
 0x44c   : > { %4456 = vrcp.f32 %v3571_v59  ;;  %v3572_v29 = vadd.f32 1.0, %v4451_v48 }
 0x44e   : > { %4458 = vrcp.f32 %v3572_v29 }
 0x455   : > { %v4453_v36 = vpop.eup %4452 }
 0x456   : > { %3581 = vst [vmem:[%s224_s6] sm:$0xff] %v4453_v36 }
 0x457   : > { %v4455_v23 = vpop.eup %4454 }
 0x458   : > { %3583 = vst.msk [vmem:[%s224_s6 + $0x8] sm:$0xff] %vm3582_vm8, %v4455_v23 }
 0x459   : > { %v4457_v42 = vpop.eup %4456 }
 0x45a   : > { %3584 = vst [vmem:[%s224_s6 + $0x10] sm:$0x1f] %v4457_v42 }
 0x45b   : > { %v4459_v53 = vpop.eup %4458 }
 0x45c   : > { %3586 = vst.msk [vmem:[%s224_s6 + $0x18] sm:$0x1f] %vm3585_vm9, %v4459_v53 }
 0x45d PF: > { %s15_s18 = sadd.s32 1, %s4490_s18  }
 0x45e   : > { %p12_p4 = scmp.ge.s32.totalorder %s15_s18, 4  }
 0x460   :  { %14 = sbr.rel (!%p12_p4) target bundleno = 1 (0x1), region = 74 }

</bundles_post_ra>
